<compile_context>
chip_gen: v7x
topology: tpu7x:2x2x1
jax: 0.10.0
libtpu: 0.0.40
codegen_flags: <defaults>
</compile_context>

<pallas_src>
import functools

import jax
import jax.numpy as jnp
from jax.experimental import pallas as pl
from jax.experimental.pallas import tpu as pltpu

EPS = 1e-5            # BatchNorm eps (PyTorch default)
NEG_SLOPE = 0.2       # LeakyReLU slope
VMEM_LIMIT = 48 * 1024 * 1024   # explicit scoped-VMEM budget (fits v5e/v6e/v7x)


def _row_tile(m, target=256):
    """Largest row-tile <= target that divides m (multiple of 8 when tiling)."""
    if m <= target:
        return m
    for t in range(target, 0, -1):
        if m % t == 0 and t % 8 == 0:
            return t
    return m


def _full_specs(shapes):
    """BlockSpecs covering the full array (grid=(1,)) - used only for tiny head."""
    return [pl.BlockSpec(s, (lambda *_, n=len(s): (0,) * n)) for s in shapes]


def _params(semantics):
    return pltpu.CompilerParams(dimension_semantics=semantics,
                                vmem_limit_bytes=VMEM_LIMIT)


# ----------------------------------------------------------------------------
# kNN: negative pairwise squared distances (Pallas) + top-k (plain JAX)
# ----------------------------------------------------------------------------
def _neg_pdist_kernel(x_ref, out_ref):
    x = x_ref[0]                                                  # (N, C)
    inner = jax.lax.dot_general(x, x, (((1,), (1,)), ((), ())),
                                preferred_element_type=jnp.float32)  # x @ x.T
    xx = x * x                                                    # single multiply
    sq_col = jnp.sum(xx, axis=1, keepdims=True)                   # (N, 1)
    sq_row = jnp.sum(xx, axis=1)[None, :]                         # (1, N)
    # matches: -xx + 2 x x^T - xx^T  of the reference knn()
    out_ref[0] = 2.0 * inner - sq_col - sq_row


def neg_pairwise_dist(x):
    B, N, C = x.shape
    return pl.pallas_call(
        _neg_pdist_kernel,
        out_shape=jax.ShapeDtypeStruct((B, N, N), jnp.float32),
        grid=(B,),
        in_specs=[pl.BlockSpec((1, N, C), lambda b: (b, 0, 0))],
        out_specs=pl.BlockSpec((1, N, N), lambda b: (b, 0, 0)),
        compiler_params=_params(("parallel",)),
    )(x)


def knn_idx(x, k):
    # TODO(synk): fuse iterative top-k into the pdist kernel; lax.top_k for now.
    return jax.lax.top_k(neg_pairwise_dist(x), k)[1]              # (B, N, k) int32


# ----------------------------------------------------------------------------
# EdgeConv block (graph-feature + 1x1 conv + BN2d + LeakyReLU + max over K)
#   kernel 1: per-point projection (tall bf16 matmul, tiled, parallel)
#   (JAX)   : neighbour gather of the Cout-wide projected rows
#   kernel 2: BN sum / sum^2 accumulation over B*N*K samples (arbitrary axis)
#   kernel 3: normalize + LeakyReLU + max over K (tiled, parallel)
# ----------------------------------------------------------------------------
def _proj_kernel(x_ref, w_ref, o_ref):
    o_ref[...] = jnp.dot(x_ref[...], w_ref[...],
                         preferred_element_type=jnp.float32)


def _proj_matmul(x2, wcat):
    M, C = x2.shape
    C2 = wcat.shape[1]
    tm = _row_tile(M, 512)
    return pl.pallas_call(
        _proj_kernel,
        out_shape=jax.ShapeDtypeStruct((M, C2), jnp.float32),
        grid=(M // tm,),
        in_specs=[pl.BlockSpec((tm, C), lambda i: (i, 0)),
                  pl.BlockSpec((C, C2), lambda i: (0, 0))],
        out_specs=pl.BlockSpec((tm, C2), lambda i: (i, 0)),
        compiler_params=_params(("parallel",)),
    )(x2.astype(jnp.bfloat16), wcat.astype(jnp.bfloat16))


def _ec_stats_kernel(g_ref, cm_ref, sums_ref):
    @pl.when(pl.program_id(0) == 0)
    def _():
        sums_ref[...] = jnp.zeros_like(sums_ref)
    h = g_ref[...] + cm_ref[...][:, None, :]                      # (tm, K, Cout) f32
    sums_ref[0:1, :] += jnp.sum(h, axis=(0, 1))[None, :]
    sums_ref[1:2, :] += jnp.sum(h * h, axis=(0, 1))[None, :]


def _ec_norm_kernel(g_ref, cm_ref, sums_ref, gamma_ref, beta_ref, out_ref, *,
                    count):
    h = g_ref[...] + cm_ref[...][:, None, :]                      # (tm, K, Cout)
    inv = 1.0 / count
    mean = sums_ref[0:1, :] * inv                                 # (1, Cout)
    var = jnp.maximum(sums_ref[1:2, :] * inv - mean * mean, 0.0)  # clamp (no NaN)
    scale = gamma_ref[...] * jax.lax.rsqrt(var + EPS)
    shift = beta_ref[...] - mean * scale
    a = h * scale[:, None, :] + shift[:, None, :]
    a = jnp.maximum(a, NEG_SLOPE * a)                             # LeakyReLU(0.2)
    out_ref[...] = jnp.max(a, axis=1)                             # max over K


def edge_conv(x, idx, w, gamma, beta):
    """x: (B,N,C), idx: (B,N,K) int32, w: (2C, Cout) -> (B, N, Cout)."""
    B, N, C = x.shape
    K = idx.shape[-1]
    Cout = w.shape[1]

    # [g - c, c] @ W = g @ W_top + c @ (W_bot - W_top)
    w_top = w[:C]
    w_cen = w[C:] - w_top
    wcat = jnp.concatenate([w_top, w_cen], axis=1)                # (C, 2*Cout)

    proj = _proj_matmul(x.reshape(B * N, C), wcat)                # (B*N, 2*Cout)
    A = proj[:, :Cout].reshape(B, N, Cout)                        # neighbour part
    cm = proj[:, Cout:]                                           # center part

    # TODO(synk): fuse this dynamic gather into the Pallas kernel (SMEM idx +
    # in-kernel jnp.take); kept in JAX for robustness.
    g = jax.vmap(lambda a, ids: a[ids])(A, idx).reshape(B * N, K, Cout)

    M = B * N
    tm = _row_tile(M, 256)

    sums = pl.pallas_call(
        _ec_stats_kernel,
        out_shape=jax.ShapeDtypeStruct((2, Cout), jnp.float32),
        grid=(M // tm,),
        in_specs=[pl.BlockSpec((tm, K, Cout), lambda i: (i, 0, 0)),
                  pl.BlockSpec((tm, Cout), lambda i: (i, 0))],
        out_specs=pl.BlockSpec((2, Cout), lambda i: (0, 0)),
        compiler_params=_params(("arbitrary",)),
    )(g, cm)

    kern = functools.partial(_ec_norm_kernel, count=float(M * K))
    out = pl.pallas_call(
        kern,
        out_shape=jax.ShapeDtypeStruct((M, Cout), jnp.float32),
        grid=(M // tm,),
        in_specs=[pl.BlockSpec((tm, K, Cout), lambda i: (i, 0, 0)),
                  pl.BlockSpec((tm, Cout), lambda i: (i, 0)),
                  pl.BlockSpec((2, Cout), lambda i: (0, 0)),
                  pl.BlockSpec((1, Cout), lambda i: (0, 0)),
                  pl.BlockSpec((1, Cout), lambda i: (0, 0))],
        out_specs=pl.BlockSpec((tm, Cout), lambda i: (i, 0)),
        compiler_params=_params(("parallel",)),
    )(g, cm, sums, gamma.reshape(1, -1), beta.reshape(1, -1))
    return out.reshape(B, N, Cout)


# ----------------------------------------------------------------------------
# conv5 (1x1 Conv1d + BN1d + LeakyReLU) + max/avg pool over N.
#   kernel 1: tiled bf16 matmul + BN sum/sum^2 accumulation
#   kernel 2: normalize + LeakyReLU + vectorized per-batch max/mean pooling
# ----------------------------------------------------------------------------
def _conv5_stats_kernel(x_ref, w_ref, h_ref, sums_ref):
    @pl.when(pl.program_id(0) == 0)
    def _():
        sums_ref[...] = jnp.zeros_like(sums_ref)
    h = jnp.dot(x_ref[...], w_ref[...], preferred_element_type=jnp.float32)
    h_ref[...] = h
    sums_ref[0:1, :] += jnp.sum(h, axis=0, keepdims=True)
    sums_ref[1:2, :] += jnp.sum(h * h, axis=0, keepdims=True)


def _conv5_pool_kernel(h_ref, sums_ref, gamma_ref, beta_ref, max_ref, mean_ref,
                       *, count, npts):
    h = h_ref[0]                                                  # (N, E)
    inv = 1.0 / count
    mean = sums_ref[0:1, :] * inv
    var = jnp.maximum(sums_ref[1:2, :] * inv - mean * mean, 0.0)
    scale = gamma_ref[...] * jax.lax.rsqrt(var + EPS)
    shift = beta_ref[...] - mean * scale
    a = h * scale + shift
    a = jnp.maximum(a, NEG_SLOPE * a)
    max_ref[0] = jnp.max(a, axis=0, keepdims=True)                # (1, E)
    mean_ref[0] = jnp.sum(a, axis=0, keepdims=True) * (1.0 / npts)


def conv5_pool(xc, w, gamma, beta):
    B, N, C = xc.shape
    E = w.shape[1]
    M = B * N
    tm = _row_tile(M, 256)

    h, sums = pl.pallas_call(
        _conv5_stats_kernel,
        out_shape=(jax.ShapeDtypeStruct((M, E), jnp.float32),
                   jax.ShapeDtypeStruct((2, E), jnp.float32)),
        grid=(M // tm,),
        in_specs=[pl.BlockSpec((tm, C), lambda i: (i, 0)),
                  pl.BlockSpec((C, E), lambda i: (0, 0))],
        out_specs=(pl.BlockSpec((tm, E), lambda i: (i, 0)),
                   pl.BlockSpec((2, E), lambda i: (0, 0))),
        compiler_params=_params(("arbitrary",)),
    )(xc.reshape(M, C).astype(jnp.bfloat16), w.astype(jnp.bfloat16))

    kern = functools.partial(_conv5_pool_kernel, count=float(M), npts=float(N))
    mx, mn = pl.pallas_call(
        kern,
        out_shape=(jax.ShapeDtypeStruct((B, 1, E), jnp.float32),
                   jax.ShapeDtypeStruct((B, 1, E), jnp.float32)),
        grid=(B,),
        in_specs=[pl.BlockSpec((1, N, E), lambda b: (b, 0, 0)),
                  pl.BlockSpec((2, E), lambda b: (0, 0)),
                  pl.BlockSpec((1, E), lambda b: (0, 0)),
                  pl.BlockSpec((1, E), lambda b: (0, 0))],
        out_specs=(pl.BlockSpec((1, 1, E), lambda b: (b, 0, 0)),
                   pl.BlockSpec((1, 1, E), lambda b: (b, 0, 0))),
        compiler_params=_params(("parallel",)),
    )(h.reshape(B, N, E), sums, gamma.reshape(1, -1), beta.reshape(1, -1))
    return mx.reshape(B, E), mn.reshape(B, E)


# ----------------------------------------------------------------------------
# MLP head: linear1+bn6+lrelu, (dropout=id), linear2+bias+bn7+lrelu, linear3+bias
# Tiny (B rows) -> single small kernel; not worth tiling (latency noise).
# ----------------------------------------------------------------------------
def _head_kernel(x_ref, w1_ref, g6_ref, b6_ref, w2_ref, bias2_ref,
                 g7_ref, b7_ref, w3_ref, bias3_ref, out_ref):
    def bn_lrelu(h, g, b):
        cnt = float(h.shape[0])
        mean = jnp.sum(h, axis=0, keepdims=True) / cnt
        var = jnp.sum((h - mean) * (h - mean), axis=0, keepdims=True) / cnt
        a = (h - mean) * (g * jax.lax.rsqrt(var + EPS)) + b
        return jnp.maximum(a, NEG_SLOPE * a)

    x = x_ref[...]                                                # (B, 2E)
    h = bn_lrelu(jnp.dot(x, w1_ref[...], preferred_element_type=jnp.float32),
                 g6_ref[...], b6_ref[...])
    # dropout p=0.0 -> identity
    h = bn_lrelu(jnp.dot(h, w2_ref[...], preferred_element_type=jnp.float32)
                 + bias2_ref[...], g7_ref[...], b7_ref[...])
    out_ref[...] = (jnp.dot(h, w3_ref[...], preferred_element_type=jnp.float32)
                    + bias3_ref[...])


def head(x, hp):
    B = x.shape[0]
    (w1, g6, b6, w2, bias2, g7, b7, w3, bias3) = hp
    out_ch = w3.shape[1]
    args = (x, w1, g6.reshape(1, -1), b6.reshape(1, -1), w2, bias2.reshape(1, -1),
            g7.reshape(1, -1), b7.reshape(1, -1), w3, bias3.reshape(1, -1))
    return pl.pallas_call(
        _head_kernel,
        out_shape=jax.ShapeDtypeStruct((B, out_ch), jnp.float32),
        grid=(1,),
        in_specs=_full_specs([a.shape for a in args]),
        out_specs=pl.BlockSpec((B, out_ch), lambda *_: (0, 0)),
        compiler_params=_params(("arbitrary",)),
    )(*args)


# ----------------------------------------------------------------------------
# Full forward + deterministic parameter initialization
# ----------------------------------------------------------------------------
def init_params(key, emb_dims=64, output_channels=40):
    def conv_block(k, cin, cout):
        kw, kg, kb = jax.random.split(k, 3)
        return (0.1 * jax.random.normal(kw, (cin, cout), jnp.float32),     # weight
                1.0 + 0.05 * jax.random.normal(kg, (cout,), jnp.float32),  # bn gamma
                0.05 * jax.random.normal(kb, (cout,), jnp.float32))        # bn beta

    ks = jax.random.split(key, 6)
    params = {
        "conv1": conv_block(ks[0], 6, 64),
        "conv2": conv_block(ks[1], 128, 64),
        "conv3": conv_block(ks[2], 128, 128),
        "conv4": conv_block(ks[3], 256, 256),
        "conv5": conv_block(ks[4], 512, emb_dims),
    }
    hk = jax.random.split(ks[5], 9)
    params["head"] = (
        0.1 * jax.random.normal(hk[0], (emb_dims * 2, 512), jnp.float32),    # linear1 (no bias)
        1.0 + 0.05 * jax.random.normal(hk[1], (512,), jnp.float32),          # bn6 gamma
        0.05 * jax.random.normal(hk[2], (512,), jnp.float32),                # bn6 beta
        0.1 * jax.random.normal(hk[3], (512, 256), jnp.float32),             # linear2 W
        0.05 * jax.random.normal(hk[4], (256,), jnp.float32),                # linear2 bias
        1.0 + 0.05 * jax.random.normal(hk[5], (256,), jnp.float32),          # bn7 gamma
        0.05 * jax.random.normal(hk[6], (256,), jnp.float32),                # bn7 beta
        0.1 * jax.random.normal(hk[7], (256, output_channels), jnp.float32), # linear3 W
        0.05 * jax.random.normal(hk[8], (output_channels,), jnp.float32),    # linear3 bias
    )
    return params


def dgcnn_forward(x, params, k=4):
    x1 = edge_conv(x, knn_idx(x, k), *params["conv1"])       # (B, N, 64)
    x2 = edge_conv(x1, knn_idx(x1, k), *params["conv2"])     # (B, N, 64)
    x3 = edge_conv(x2, knn_idx(x2, k), *params["conv3"])     # (B, N, 128)
    x4 = edge_conv(x3, knn_idx(x3, k), *params["conv4"])     # (B, N, 256)
    xc = jnp.concatenate([x1, x2, x3, x4], axis=-1)          # (B, N, 512)
    xmax, xavg = conv5_pool(xc, *params["conv5"])            # (B, E), (B, E)
    pooled = jnp.concatenate([xmax, xavg], axis=-1)          # (B, 2E)
    return head(pooled, params["head"])                      # (B, output_channels)


if __name__ == "__main__":
    key = jax.random.PRNGKey(0)
    kx, kp = jax.random.split(key)
    B, N, K_NEIGH, EMB, OUT = 2, 16, 4, 64, 40
    x = jax.random.normal(kx, (B, N, 3), jnp.float32)        # (B, N, 3) point cloud
    params = init_params(kp, emb_dims=EMB, output_channels=OUT)

    fwd = jax.jit(lambda pts: dgcnn_forward(pts, params, k=K_NEIGH))
    out = fwd(x)
    jax.block_until_ready(out)
    assert out.shape == (B, OUT) and out.dtype == jnp.float32
    print("KERNEL_OK")
</pallas_src>

<mosaic_0001>
module attributes {stable_mosaic.version = 11 : i64} {
  func.func @_proj_kernel(%arg0: i32, %arg1: memref<32x3xbf16, #tpu.memory_space<vmem>>, %arg2: memref<3x128xbf16, #tpu.memory_space<vmem>>, %arg3: memref<32x128xf32, #tpu.memory_space<vmem>>) attributes {dimension_semantics = [#tpu.dimension_semantics<parallel>], iteration_bounds = array<i64: 1>, scalar_prefetch = 0 : i64, scratch_operands = 0 : i64, tpu.core_type = #tpu.core_type<tc>, window_params = [{transform_indices = @transform_0, window_bounds = array<i64: 32, 3>}, {pipeline_mode = #tpu.pipeline_mode<synchronous>, transform_indices = @transform_1, window_bounds = array<i64: 3, 128>}, {transform_indices = @transform_2, window_bounds = array<i64: 32, 128>}]} {
    %c0 = arith.constant 0 : index
    %c0_0 = arith.constant 0 : index
    %0 = vector.load %arg1[%c0, %c0_0] : memref<32x3xbf16, #tpu.memory_space<vmem>>, vector<32x3xbf16>
    %c0_1 = arith.constant 0 : index
    %c0_2 = arith.constant 0 : index
    %1 = vector.load %arg2[%c0_1, %c0_2] : memref<3x128xbf16, #tpu.memory_space<vmem>>, vector<3x128xbf16>
    %cst = arith.constant dense<0.000000e+00> : vector<32x128xf32>
    %2 = tpu.matmul %0, %1, %cst {dimension_numbers = #tpu.dot_dimension_numbers<[1], [0], [0], [1], [0, 0, 1, 1], [], []>} : vector<32x3xbf16>, vector<3x128xbf16>, vector<32x128xf32> -> vector<32x128xf32>
    %c0_3 = arith.constant 0 : index
    %c0_4 = arith.constant 0 : index
    %3 = vector.load %arg3[%c0_3, %c0_4] : memref<32x128xf32, #tpu.memory_space<vmem>>, vector<32x128xf32>
    tpu.vector_store %arg3[%c0_3, %c0_4], %2 {strides = array<i32>} : memref<32x128xf32, #tpu.memory_space<vmem>>, vector<32x128xf32>,
    return
  }
  func.func @transform_0(%arg0: i32) -> (i32, i32) {
    %c0_i32 = arith.constant 0 : i32
    %c0_i32_0 = arith.constant 0 : i32
    return %arg0, %c0_i32 : i32, i32
  }
  func.func @transform_1(%arg0: i32) -> (i32, i32) {
    %c0_i32 = arith.constant 0 : i32
    %c0_i32_0 = arith.constant 0 : i32
    %c0_i32_1 = arith.constant 0 : i32
    return %c0_i32, %c0_i32_0 : i32, i32
  }
  func.func @transform_2(%arg0: i32) -> (i32, i32) {
    %c0_i32 = arith.constant 0 : i32
    %c0_i32_0 = arith.constant 0 : i32
    return %arg0, %c0_i32 : i32, i32
  }
}

module attributes {stable_mosaic.version = 11 : i64} {
  func.func @_neg_pdist_kernel(%arg0: i32, %arg1: memref<1x16x3xf32, #tpu.memory_space<vmem>>, %arg2: memref<1x16x16xf32, #tpu.memory_space<vmem>>) attributes {dimension_semantics = [#tpu.dimension_semantics<parallel>], iteration_bounds = array<i64: 2>, scalar_prefetch = 0 : i64, scratch_operands = 0 : i64, tpu.core_type = #tpu.core_type<tc>, window_params = [{transform_indices = @transform_0, window_bounds = array<i64: 1, 16, 3>}, {transform_indices = @transform_1, window_bounds = array<i64: 1, 16, 16>}]} {
    %c0 = arith.constant 0 : index
    %c0_0 = arith.constant 0 : index
    %c0_1 = arith.constant 0 : index
    %0 = vector.load %arg1[%c0, %c0_0, %c0_1] : memref<1x16x3xf32, #tpu.memory_space<vmem>>, vector<1x16x3xf32>
    %1 = vector.shape_cast %0 : vector<1x16x3xf32> to vector<16x3xf32>
    %cst = arith.constant dense<0.000000e+00> : vector<16x16xf32>
    %2 = tpu.matmul %1, %1, %cst {dimension_numbers = #tpu.dot_dimension_numbers<[1], [1], [0], [0], [0, 0, 1, 0], [], []>} : vector<16x3xf32>, vector<16x3xf32>, vector<16x16xf32> -> vector<16x16xf32>
    %3 = arith.mulf %1, %1 : vector<16x3xf32>
    %cst_2 = arith.constant dense<0.000000e+00> : vector<16xf32>
    %4 = vector.multi_reduction <add>, %3, %cst_2 [1] : vector<16x3xf32> to vector<16xf32>
    %5 = vector.shape_cast %4 : vector<16xf32> to vector<16x1xf32>
    %cst_3 = arith.constant dense<0.000000e+00> : vector<16xf32>
    %6 = vector.multi_reduction <add>, %3, %cst_3 [1] : vector<16x3xf32> to vector<16xf32>
    %7 = vector.shape_cast %6 : vector<16xf32> to vector<1x16xf32>
    %cst_4 = arith.constant 2.000000e+00 : f32
    %8 = vector.broadcast %cst_4 : f32 to vector<16x16xf32>
    %9 = arith.mulf %8, %2 : vector<16x16xf32>
    %10 = vector.broadcast %5 : vector<16x1xf32> to vector<16x16xf32>
    %11 = arith.subf %9, %10 : vector<16x16xf32>
    %12 = vector.broadcast %7 : vector<1x16xf32> to vector<16x16xf32>
    %13 = arith.subf %11, %12 : vector<16x16xf32>
    %c0_5 = arith.constant 0 : index
    %c0_6 = arith.constant 0 : index
    %c0_7 = arith.constant 0 : index
    %14 = vector.load %arg2[%c0_5, %c0_6, %c0_7] : memref<1x16x16xf32, #tpu.memory_space<vmem>>, vector<1x16x16xf32>
    %15 = vector.shape_cast %14 : vector<1x16x16xf32> to vector<16x16xf32>
    %16 = vector.shape_cast %13 : vector<16x16xf32> to vector<1x16x16xf32>
    tpu.vector_store %arg2[%c0_5, %c0_6, %c0_7], %16 {strides = array<i32>} : memref<1x16x16xf32, #tpu.memory_space<vmem>>, vector<1x16x16xf32>,
    return
  }
  func.func @transform_0(%arg0: i32) -> (i32, i32, i32) {
    %c0_i32 = arith.constant 0 : i32
    %c0_i32_0 = arith.constant 0 : i32
    %c0_i32_1 = arith.constant 0 : i32
    return %arg0, %c0_i32, %c0_i32_0 : i32, i32, i32
  }
  func.func @transform_1(%arg0: i32) -> (i32, i32, i32) {
    %c0_i32 = arith.constant 0 : i32
    %c0_i32_0 = arith.constant 0 : i32
    %c0_i32_1 = arith.constant 0 : i32
    return %arg0, %c0_i32, %c0_i32_0 : i32, i32, i32
  }
}

module attributes {stable_mosaic.version = 11 : i64} {
  func.func @_ec_stats_kernel(%arg0: i32, %arg1: memref<32x4x64xf32, #tpu.memory_space<vmem>>, %arg2: memref<32x64xf32, #tpu.memory_space<vmem>>, %arg3: memref<2x64xf32, #tpu.memory_space<vmem>>) attributes {dimension_semantics = [#tpu.dimension_semantics<arbitrary>], iteration_bounds = array<i64: 1>, scalar_prefetch = 0 : i64, scratch_operands = 0 : i64, tpu.core_type = #tpu.core_type<tc>, window_params = [{transform_indices = @transform_0, window_bounds = array<i64: 32, 4, 64>}, {transform_indices = @transform_1, window_bounds = array<i64: 32, 64>}, {pipeline_mode = #tpu.pipeline_mode<synchronous>, transform_indices = @transform_2, window_bounds = array<i64: 2, 64>}]} {
    %c0_i32 = arith.constant 0 : i32
    %0 = arith.cmpi eq, %arg0, %c0_i32 : i32
    %1 = arith.extui %0 : i1 to i32
    %c0_i32_0 = arith.constant 0 : i32
    %2 = arith.cmpi ne, %1, %c0_i32_0 : i32
    scf.if %2 {
      %cst_13 = arith.constant 0.000000e+00 : f32
      %19 = vector.broadcast %cst_13 : f32 to vector<2x64xf32>
      %c0_14 = arith.constant 0 : index
      %c0_15 = arith.constant 0 : index
      %20 = vector.load %arg3[%c0_14, %c0_15] : memref<2x64xf32, #tpu.memory_space<vmem>>, vector<2x64xf32>
      tpu.vector_store %arg3[%c0_14, %c0_15], %19 {strides = array<i32>} : memref<2x64xf32, #tpu.memory_space<vmem>>, vector<2x64xf32>,
    } else {
    }
    %c0 = arith.constant 0 : index
    %c0_1 = arith.constant 0 : index
    %c0_2 = arith.constant 0 : index
    %3 = vector.load %arg1[%c0, %c0_1, %c0_2] : memref<32x4x64xf32, #tpu.memory_space<vmem>>, vector<32x4x64xf32>
    %c0_3 = arith.constant 0 : index
    %c0_4 = arith.constant 0 : index
    %4 = vector.load %arg2[%c0_3, %c0_4] : memref<32x64xf32, #tpu.memory_space<vmem>>, vector<32x64xf32>
    %5 = vector.shape_cast %4 : vector<32x64xf32> to vector<32x1x64xf32>
    %6 = vector.broadcast %5 : vector<32x1x64xf32> to vector<32x4x64xf32>
    %7 = arith.addf %3, %6 : vector<32x4x64xf32>
    %c0_5 = arith.constant 0 : index
    %c0_6 = arith.constant 0 : index
    %8 = vector.load %arg3[%c0_5, %c0_6] : memref<2x64xf32, #tpu.memory_space<vmem>>, vector<1x64xf32>
    %cst = arith.constant dense<0.000000e+00> : vector<64xf32>
    %9 = vector.multi_reduction <add>, %7, %cst [0, 1] : vector<32x4x64xf32> to vector<64xf32>
    %10 = vector.shape_cast %9 : vector<64xf32> to vector<1x64xf32>
    %11 = arith.addf %8, %10 : vector<1x64xf32>
    %c0_7 = arith.constant 0 : index
    %c0_8 = arith.constant 0 : index
    %12 = vector.load %arg3[%c0_7, %c0_8] : memref<2x64xf32, #tpu.memory_space<vmem>>, vector<1x64xf32>
    tpu.vector_store %arg3[%c0_7, %c0_8], %11 {strides = array<i32>} : memref<2x64xf32, #tpu.memory_space<vmem>>, vector<1x64xf32>,
    %c1 = arith.constant 1 : index
    %c0_9 = arith.constant 0 : index
    %13 = vector.load %arg3[%c1, %c0_9] : memref<2x64xf32, #tpu.memory_space<vmem>>, vector<1x64xf32>
    %14 = arith.mulf %7, %7 : vector<32x4x64xf32>
    %cst_10 = arith.constant dense<0.000000e+00> : vector<64xf32>
    %15 = vector.multi_reduction <add>, %14, %cst_10 [0, 1] : vector<32x4x64xf32> to vector<64xf32>
    %16 = vector.shape_cast %15 : vector<64xf32> to vector<1x64xf32>
    %17 = arith.addf %13, %16 : vector<1x64xf32>
    %c1_11 = arith.constant 1 : index
    %c0_12 = arith.constant 0 : index
    %18 = vector.load %arg3[%c1_11, %c0_12] : memref<2x64xf32, #tpu.memory_space<vmem>>, vector<1x64xf32>
    tpu.vector_store %arg3[%c1_11, %c0_12], %17 {strides = array<i32>} : memref<2x64xf32, #tpu.memory_space<vmem>>, vector<1x64xf32>,
    return
  }
  func.func @transform_0(%arg0: i32) -> (i32, i32, i32) {
    %c0_i32 = arith.constant 0 : i32
    %c0_i32_0 = arith.constant 0 : i32
    %c0_i32_1 = arith.constant 0 : i32
    return %arg0, %c0_i32, %c0_i32_0 : i32, i32, i32
  }
  func.func @transform_1(%arg0: i32) -> (i32, i32) {
    %c0_i32 = arith.constant 0 : i32
    %c0_i32_0 = arith.constant 0 : i32
    return %arg0, %c0_i32 : i32, i32
  }
  func.func @transform_2(%arg0: i32) -> (i32, i32) {
    %c0_i32 = arith.constant 0 : i32
    %c0_i32_0 = arith.constant 0 : i32
    %c0_i32_1 = arith.constant 0 : i32
    return %c0_i32, %c0_i32_0 : i32, i32
  }
}

module attributes {stable_mosaic.version = 11 : i64} {
  func.func @_ec_norm_kernel(%arg0: i32, %arg1: memref<32x4x64xf32, #tpu.memory_space<vmem>>, %arg2: memref<32x64xf32, #tpu.memory_space<vmem>>, %arg3: memref<2x64xf32, #tpu.memory_space<vmem>>, %arg4: memref<1x64xf32, #tpu.memory_space<vmem>>, %arg5: memref<1x64xf32, #tpu.memory_space<vmem>>, %arg6: memref<32x64xf32, #tpu.memory_space<vmem>>) attributes {dimension_semantics = [#tpu.dimension_semantics<parallel>], iteration_bounds = array<i64: 1>, scalar_prefetch = 0 : i64, scratch_operands = 0 : i64, tpu.core_type = #tpu.core_type<tc>, window_params = [{transform_indices = @transform_0, window_bounds = array<i64: 32, 4, 64>}, {transform_indices = @transform_1, window_bounds = array<i64: 32, 64>}, {pipeline_mode = #tpu.pipeline_mode<synchronous>, transform_indices = @transform_2, window_bounds = array<i64: 2, 64>}, {pipeline_mode = #tpu.pipeline_mode<synchronous>, transform_indices = @transform_3, window_bounds = array<i64: 1, 64>}, {pipeline_mode = #tpu.pipeline_mode<synchronous>, transform_indices = @transform_4, window_bounds = array<i64: 1, 64>}, {transform_indices = @transform_5, window_bounds = array<i64: 32, 64>}]} {
    %c0 = arith.constant 0 : index
    %c0_0 = arith.constant 0 : index
    %c0_1 = arith.constant 0 : index
    %0 = vector.load %arg1[%c0, %c0_0, %c0_1] : memref<32x4x64xf32, #tpu.memory_space<vmem>>, vector<32x4x64xf32>
    %c0_2 = arith.constant 0 : index
    %c0_3 = arith.constant 0 : index
    %1 = vector.load %arg2[%c0_2, %c0_3] : memref<32x64xf32, #tpu.memory_space<vmem>>, vector<32x64xf32>
    %2 = vector.shape_cast %1 : vector<32x64xf32> to vector<32x1x64xf32>
    %3 = vector.broadcast %2 : vector<32x1x64xf32> to vector<32x4x64xf32>
    %4 = arith.addf %0, %3 : vector<32x4x64xf32>
    %c0_4 = arith.constant 0 : index
    %c0_5 = arith.constant 0 : index
    %5 = vector.load %arg3[%c0_4, %c0_5] : memref<2x64xf32, #tpu.memory_space<vmem>>, vector<1x64xf32>
    %cst = arith.constant 7.812500e-03 : f32
    %6 = vector.broadcast %cst : f32 to vector<1x64xf32>
    %7 = arith.mulf %5, %6 : vector<1x64xf32>
    %c1 = arith.constant 1 : index
    %c0_6 = arith.constant 0 : index
    %8 = vector.load %arg3[%c1, %c0_6] : memref<2x64xf32, #tpu.memory_space<vmem>>, vector<1x64xf32>
    %cst_7 = arith.constant 7.812500e-03 : f32
    %9 = vector.broadcast %cst_7 : f32 to vector<1x64xf32>
    %10 = arith.mulf %8, %9 : vector<1x64xf32>
    %11 = arith.mulf %7, %7 : vector<1x64xf32>
    %12 = arith.subf %10, %11 : vector<1x64xf32>
    %cst_8 = arith.constant 0.000000e+00 : f32
    %13 = vector.broadcast %cst_8 : f32 to vector<1x64xf32>
    %14 = arith.maximumf %12, %13 : vector<1x64xf32>
    %c0_9 = arith.constant 0 : index
    %c0_10 = arith.constant 0 : index
    %15 = vector.load %arg4[%c0_9, %c0_10] : memref<1x64xf32, #tpu.memory_space<vmem>>, vector<1x64xf32>
    %cst_11 = arith.constant 9.99999974E-6 : f32
    %16 = vector.broadcast %cst_11 : f32 to vector<1x64xf32>
    %17 = arith.addf %14, %16 : vector<1x64xf32>
    %18 = math.rsqrt %17 : vector<1x64xf32>
    %19 = arith.mulf %15, %18 : vector<1x64xf32>
    %c0_12 = arith.constant 0 : index
    %c0_13 = arith.constant 0 : index
    %20 = vector.load %arg5[%c0_12, %c0_13] : memref<1x64xf32, #tpu.memory_space<vmem>>, vector<1x64xf32>
    %21 = arith.mulf %7, %19 : vector<1x64xf32>
    %22 = arith.subf %20, %21 : vector<1x64xf32>
    %23 = vector.shape_cast %19 : vector<1x64xf32> to vector<1x1x64xf32>
    %24 = vector.broadcast %23 : vector<1x1x64xf32> to vector<32x4x64xf32>
    %25 = arith.mulf %4, %24 : vector<32x4x64xf32>
    %26 = vector.shape_cast %22 : vector<1x64xf32> to vector<1x1x64xf32>
    %27 = vector.broadcast %26 : vector<1x1x64xf32> to vector<32x4x64xf32>
    %28 = arith.addf %25, %27 : vector<32x4x64xf32>
    %cst_14 = arith.constant 2.000000e-01 : f32
    %29 = vector.broadcast %cst_14 : f32 to vector<32x4x64xf32>
    %30 = arith.mulf %29, %28 : vector<32x4x64xf32>
    %31 = arith.maximumf %28, %30 : vector<32x4x64xf32>
    %cst_15 = arith.constant dense<0xFF800000> : vector<32x64xf32>
    %32 = vector.multi_reduction <maximumf>, %31, %cst_15 [1] : vector<32x4x64xf32> to vector<32x64xf32>
    %c0_16 = arith.constant 0 : index
    %c0_17 = arith.constant 0 : index
    %33 = vector.load %arg6[%c0_16, %c0_17] : memref<32x64xf32, #tpu.memory_space<vmem>>, vector<32x64xf32>
    tpu.vector_store %arg6[%c0_16, %c0_17], %32 {strides = array<i32>} : memref<32x64xf32, #tpu.memory_space<vmem>>, vector<32x64xf32>,
    return
  }
  func.func @transform_0(%arg0: i32) -> (i32, i32, i32) {
    %c0_i32 = arith.constant 0 : i32
    %c0_i32_0 = arith.constant 0 : i32
    %c0_i32_1 = arith.constant 0 : i32
    return %arg0, %c0_i32, %c0_i32_0 : i32, i32, i32
  }
  func.func @transform_1(%arg0: i32) -> (i32, i32) {
    %c0_i32 = arith.constant 0 : i32
    %c0_i32_0 = arith.constant 0 : i32
    return %arg0, %c0_i32 : i32, i32
  }
  func.func @transform_2(%arg0: i32) -> (i32, i32) {
    %c0_i32 = arith.constant 0 : i32
    %c0_i32_0 = arith.constant 0 : i32
    %c0_i32_1 = arith.constant 0 : i32
    return %c0_i32, %c0_i32_0 : i32, i32
  }
  func.func @transform_3(%arg0: i32) -> (i32, i32) {
    %c0_i32 = arith.constant 0 : i32
    %c0_i32_0 = arith.constant 0 : i32
    %c0_i32_1 = arith.constant 0 : i32
    return %c0_i32, %c0_i32_0 : i32, i32
  }
  func.func @transform_4(%arg0: i32) -> (i32, i32) {
    %c0_i32 = arith.constant 0 : i32
    %c0_i32_0 = arith.constant 0 : i32
    %c0_i32_1 = arith.constant 0 : i32
    return %c0_i32, %c0_i32_0 : i32, i32
  }
  func.func @transform_5(%arg0: i32) -> (i32, i32) {
    %c0_i32 = arith.constant 0 : i32
    %c0_i32_0 = arith.constant 0 : i32
    return %arg0, %c0_i32 : i32, i32
  }
}

module attributes {stable_mosaic.version = 11 : i64} {
  func.func @_proj_kernel(%arg0: i32, %arg1: memref<32x64xbf16, #tpu.memory_space<vmem>>, %arg2: memref<64x128xbf16, #tpu.memory_space<vmem>>, %arg3: memref<32x128xf32, #tpu.memory_space<vmem>>) attributes {dimension_semantics = [#tpu.dimension_semantics<parallel>], iteration_bounds = array<i64: 1>, scalar_prefetch = 0 : i64, scratch_operands = 0 : i64, tpu.core_type = #tpu.core_type<tc>, window_params = [{transform_indices = @transform_0, window_bounds = array<i64: 32, 64>}, {pipeline_mode = #tpu.pipeline_mode<synchronous>, transform_indices = @transform_1, window_bounds = array<i64: 64, 128>}, {transform_indices = @transform_2, window_bounds = array<i64: 32, 128>}]} {
    %c0 = arith.constant 0 : index
    %c0_0 = arith.constant 0 : index
    %0 = vector.load %arg1[%c0, %c0_0] : memref<32x64xbf16, #tpu.memory_space<vmem>>, vector<32x64xbf16>
    %c0_1 = arith.constant 0 : index
    %c0_2 = arith.constant 0 : index
    %1 = vector.load %arg2[%c0_1, %c0_2] : memref<64x128xbf16, #tpu.memory_space<vmem>>, vector<64x128xbf16>
    %cst = arith.constant dense<0.000000e+00> : vector<32x128xf32>
    %2 = tpu.matmul %0, %1, %cst {dimension_numbers = #tpu.dot_dimension_numbers<[1], [0], [0], [1], [0, 0, 1, 1], [], []>} : vector<32x64xbf16>, vector<64x128xbf16>, vector<32x128xf32> -> vector<32x128xf32>
    %c0_3 = arith.constant 0 : index
    %c0_4 = arith.constant 0 : index
    %3 = vector.load %arg3[%c0_3, %c0_4] : memref<32x128xf32, #tpu.memory_space<vmem>>, vector<32x128xf32>
    tpu.vector_store %arg3[%c0_3, %c0_4], %2 {strides = array<i32>} : memref<32x128xf32, #tpu.memory_space<vmem>>, vector<32x128xf32>,
    return
  }
  func.func @transform_0(%arg0: i32) -> (i32, i32) {
    %c0_i32 = arith.constant 0 : i32
    %c0_i32_0 = arith.constant 0 : i32
    return %arg0, %c0_i32 : i32, i32
  }
  func.func @transform_1(%arg0: i32) -> (i32, i32) {
    %c0_i32 = arith.constant 0 : i32
    %c0_i32_0 = arith.constant 0 : i32
    %c0_i32_1 = arith.constant 0 : i32
    return %c0_i32, %c0_i32_0 : i32, i32
  }
  func.func @transform_2(%arg0: i32) -> (i32, i32) {
    %c0_i32 = arith.constant 0 : i32
    %c0_i32_0 = arith.constant 0 : i32
    return %arg0, %c0_i32 : i32, i32
  }
}

module attributes {stable_mosaic.version = 11 : i64} {
  func.func @_neg_pdist_kernel(%arg0: i32, %arg1: memref<1x16x64xf32, #tpu.memory_space<vmem>>, %arg2: memref<1x16x16xf32, #tpu.memory_space<vmem>>) attributes {dimension_semantics = [#tpu.dimension_semantics<parallel>], iteration_bounds = array<i64: 2>, scalar_prefetch = 0 : i64, scratch_operands = 0 : i64, tpu.core_type = #tpu.core_type<tc>, window_params = [{transform_indices = @transform_0, window_bounds = array<i64: 1, 16, 64>}, {transform_indices = @transform_1, window_bounds = array<i64: 1, 16, 16>}]} {
    %c0 = arith.constant 0 : index
    %c0_0 = arith.constant 0 : index
    %c0_1 = arith.constant 0 : index
    %0 = vector.load %arg1[%c0, %c0_0, %c0_1] : memref<1x16x64xf32, #tpu.memory_space<vmem>>, vector<1x16x64xf32>
    %1 = vector.shape_cast %0 : vector<1x16x64xf32> to vector<16x64xf32>
    %cst = arith.constant dense<0.000000e+00> : vector<16x16xf32>
    %2 = tpu.matmul %1, %1, %cst {dimension_numbers = #tpu.dot_dimension_numbers<[1], [1], [0], [0], [0, 0, 1, 0], [], []>} : vector<16x64xf32>, vector<16x64xf32>, vector<16x16xf32> -> vector<16x16xf32>
    %3 = arith.mulf %1, %1 : vector<16x64xf32>
    %cst_2 = arith.constant dense<0.000000e+00> : vector<16xf32>
    %4 = vector.multi_reduction <add>, %3, %cst_2 [1] : vector<16x64xf32> to vector<16xf32>
    %5 = vector.shape_cast %4 : vector<16xf32> to vector<16x1xf32>
    %cst_3 = arith.constant dense<0.000000e+00> : vector<16xf32>
    %6 = vector.multi_reduction <add>, %3, %cst_3 [1] : vector<16x64xf32> to vector<16xf32>
    %7 = vector.shape_cast %6 : vector<16xf32> to vector<1x16xf32>
    %cst_4 = arith.constant 2.000000e+00 : f32
    %8 = vector.broadcast %cst_4 : f32 to vector<16x16xf32>
    %9 = arith.mulf %8, %2 : vector<16x16xf32>
    %10 = vector.broadcast %5 : vector<16x1xf32> to vector<16x16xf32>
    %11 = arith.subf %9, %10 : vector<16x16xf32>
    %12 = vector.broadcast %7 : vector<1x16xf32> to vector<16x16xf32>
    %13 = arith.subf %11, %12 : vector<16x16xf32>
    %c0_5 = arith.constant 0 : index
    %c0_6 = arith.constant 0 : index
    %c0_7 = arith.constant 0 : index
    %14 = vector.load %arg2[%c0_5, %c0_6, %c0_7] : memref<1x16x16xf32, #tpu.memory_space<vmem>>, vector<1x16x16xf32>
    %15 = vector.shape_cast %14 : vector<1x16x16xf32> to vector<16x16xf32>
    %16 = vector.shape_cast %13 : vector<16x16xf32> to vector<1x16x16xf32>
    tpu.vector_store %arg2[%c0_5, %c0_6, %c0_7], %16 {strides = array<i32>} : memref<1x16x16xf32, #tpu.memory_space<vmem>>, vector<1x16x16xf32>,
    return
  }
  func.func @transform_0(%arg0: i32) -> (i32, i32, i32) {
    %c0_i32 = arith.constant 0 : i32
    %c0_i32_0 = arith.constant 0 : i32
    %c0_i32_1 = arith.constant 0 : i32
    return %arg0, %c0_i32, %c0_i32_0 : i32, i32, i32
  }
  func.func @transform_1(%arg0: i32) -> (i32, i32, i32) {
    %c0_i32 = arith.constant 0 : i32
    %c0_i32_0 = arith.constant 0 : i32
    %c0_i32_1 = arith.constant 0 : i32
    return %arg0, %c0_i32, %c0_i32_0 : i32, i32, i32
  }
}

module attributes {stable_mosaic.version = 11 : i64} {
  func.func @_proj_kernel(%arg0: i32, %arg1: memref<32x64xbf16, #tpu.memory_space<vmem>>, %arg2: memref<64x256xbf16, #tpu.memory_space<vmem>>, %arg3: memref<32x256xf32, #tpu.memory_space<vmem>>) attributes {dimension_semantics = [#tpu.dimension_semantics<parallel>], iteration_bounds = array<i64: 1>, scalar_prefetch = 0 : i64, scratch_operands = 0 : i64, tpu.core_type = #tpu.core_type<tc>, window_params = [{transform_indices = @transform_0, window_bounds = array<i64: 32, 64>}, {pipeline_mode = #tpu.pipeline_mode<synchronous>, transform_indices = @transform_1, window_bounds = array<i64: 64, 256>}, {transform_indices = @transform_2, window_bounds = array<i64: 32, 256>}]} {
    %c0 = arith.constant 0 : index
    %c0_0 = arith.constant 0 : index
    %0 = vector.load %arg1[%c0, %c0_0] : memref<32x64xbf16, #tpu.memory_space<vmem>>, vector<32x64xbf16>
    %c0_1 = arith.constant 0 : index
    %c0_2 = arith.constant 0 : index
    %1 = vector.load %arg2[%c0_1, %c0_2] : memref<64x256xbf16, #tpu.memory_space<vmem>>, vector<64x256xbf16>
    %cst = arith.constant dense<0.000000e+00> : vector<32x256xf32>
    %2 = tpu.matmul %0, %1, %cst {dimension_numbers = #tpu.dot_dimension_numbers<[1], [0], [0], [1], [0, 0, 1, 1], [], []>} : vector<32x64xbf16>, vector<64x256xbf16>, vector<32x256xf32> -> vector<32x256xf32>
    %c0_3 = arith.constant 0 : index
    %c0_4 = arith.constant 0 : index
    %3 = vector.load %arg3[%c0_3, %c0_4] : memref<32x256xf32, #tpu.memory_space<vmem>>, vector<32x256xf32>
    tpu.vector_store %arg3[%c0_3, %c0_4], %2 {strides = array<i32>} : memref<32x256xf32, #tpu.memory_space<vmem>>, vector<32x256xf32>,
    return
  }
  func.func @transform_0(%arg0: i32) -> (i32, i32) {
    %c0_i32 = arith.constant 0 : i32
    %c0_i32_0 = arith.constant 0 : i32
    return %arg0, %c0_i32 : i32, i32
  }
  func.func @transform_1(%arg0: i32) -> (i32, i32) {
    %c0_i32 = arith.constant 0 : i32
    %c0_i32_0 = arith.constant 0 : i32
    %c0_i32_1 = arith.constant 0 : i32
    return %c0_i32, %c0_i32_0 : i32, i32
  }
  func.func @transform_2(%arg0: i32) -> (i32, i32) {
    %c0_i32 = arith.constant 0 : i32
    %c0_i32_0 = arith.constant 0 : i32
    return %arg0, %c0_i32 : i32, i32
  }
}

module attributes {stable_mosaic.version = 11 : i64} {
  func.func @_ec_stats_kernel(%arg0: i32, %arg1: memref<32x4x128xf32, #tpu.memory_space<vmem>>, %arg2: memref<32x128xf32, #tpu.memory_space<vmem>>, %arg3: memref<2x128xf32, #tpu.memory_space<vmem>>) attributes {dimension_semantics = [#tpu.dimension_semantics<arbitrary>], iteration_bounds = array<i64: 1>, scalar_prefetch = 0 : i64, scratch_operands = 0 : i64, tpu.core_type = #tpu.core_type<tc>, window_params = [{transform_indices = @transform_0, window_bounds = array<i64: 32, 4, 128>}, {transform_indices = @transform_1, window_bounds = array<i64: 32, 128>}, {pipeline_mode = #tpu.pipeline_mode<synchronous>, transform_indices = @transform_2, window_bounds = array<i64: 2, 128>}]} {
    %c0_i32 = arith.constant 0 : i32
    %0 = arith.cmpi eq, %arg0, %c0_i32 : i32
    %1 = arith.extui %0 : i1 to i32
    %c0_i32_0 = arith.constant 0 : i32
    %2 = arith.cmpi ne, %1, %c0_i32_0 : i32
    scf.if %2 {
      %cst_13 = arith.constant 0.000000e+00 : f32
      %19 = vector.broadcast %cst_13 : f32 to vector<2x128xf32>
      %c0_14 = arith.constant 0 : index
      %c0_15 = arith.constant 0 : index
      %20 = vector.load %arg3[%c0_14, %c0_15] : memref<2x128xf32, #tpu.memory_space<vmem>>, vector<2x128xf32>
      tpu.vector_store %arg3[%c0_14, %c0_15], %19 {strides = array<i32>} : memref<2x128xf32, #tpu.memory_space<vmem>>, vector<2x128xf32>,
    } else {
    }
    %c0 = arith.constant 0 : index
    %c0_1 = arith.constant 0 : index
    %c0_2 = arith.constant 0 : index
    %3 = vector.load %arg1[%c0, %c0_1, %c0_2] : memref<32x4x128xf32, #tpu.memory_space<vmem>>, vector<32x4x128xf32>
    %c0_3 = arith.constant 0 : index
    %c0_4 = arith.constant 0 : index
    %4 = vector.load %arg2[%c0_3, %c0_4] : memref<32x128xf32, #tpu.memory_space<vmem>>, vector<32x128xf32>
    %5 = vector.shape_cast %4 : vector<32x128xf32> to vector<32x1x128xf32>
    %6 = vector.broadcast %5 : vector<32x1x128xf32> to vector<32x4x128xf32>
    %7 = arith.addf %3, %6 : vector<32x4x128xf32>
    %c0_5 = arith.constant 0 : index
    %c0_6 = arith.constant 0 : index
    %8 = vector.load %arg3[%c0_5, %c0_6] : memref<2x128xf32, #tpu.memory_space<vmem>>, vector<1x128xf32>
    %cst = arith.constant dense<0.000000e+00> : vector<128xf32>
    %9 = vector.multi_reduction <add>, %7, %cst [0, 1] : vector<32x4x128xf32> to vector<128xf32>
    %10 = vector.shape_cast %9 : vector<128xf32> to vector<1x128xf32>
    %11 = arith.addf %8, %10 : vector<1x128xf32>
    %c0_7 = arith.constant 0 : index
    %c0_8 = arith.constant 0 : index
    %12 = vector.load %arg3[%c0_7, %c0_8] : memref<2x128xf32, #tpu.memory_space<vmem>>, vector<1x128xf32>
    tpu.vector_store %arg3[%c0_7, %c0_8], %11 {strides = array<i32>} : memref<2x128xf32, #tpu.memory_space<vmem>>, vector<1x128xf32>,
    %c1 = arith.constant 1 : index
    %c0_9 = arith.constant 0 : index
    %13 = vector.load %arg3[%c1, %c0_9] : memref<2x128xf32, #tpu.memory_space<vmem>>, vector<1x128xf32>
    %14 = arith.mulf %7, %7 : vector<32x4x128xf32>
    %cst_10 = arith.constant dense<0.000000e+00> : vector<128xf32>
    %15 = vector.multi_reduction <add>, %14, %cst_10 [0, 1] : vector<32x4x128xf32> to vector<128xf32>
    %16 = vector.shape_cast %15 : vector<128xf32> to vector<1x128xf32>
    %17 = arith.addf %13, %16 : vector<1x128xf32>
    %c1_11 = arith.constant 1 : index
    %c0_12 = arith.constant 0 : index
    %18 = vector.load %arg3[%c1_11, %c0_12] : memref<2x128xf32, #tpu.memory_space<vmem>>, vector<1x128xf32>
    tpu.vector_store %arg3[%c1_11, %c0_12], %17 {strides = array<i32>} : memref<2x128xf32, #tpu.memory_space<vmem>>, vector<1x128xf32>,
    return
  }
  func.func @transform_0(%arg0: i32) -> (i32, i32, i32) {
    %c0_i32 = arith.constant 0 : i32
    %c0_i32_0 = arith.constant 0 : i32
    %c0_i32_1 = arith.constant 0 : i32
    return %arg0, %c0_i32, %c0_i32_0 : i32, i32, i32
  }
  func.func @transform_1(%arg0: i32) -> (i32, i32) {
    %c0_i32 = arith.constant 0 : i32
    %c0_i32_0 = arith.constant 0 : i32
    return %arg0, %c0_i32 : i32, i32
  }
  func.func @transform_2(%arg0: i32) -> (i32, i32) {
    %c0_i32 = arith.constant 0 : i32
    %c0_i32_0 = arith.constant 0 : i32
    %c0_i32_1 = arith.constant 0 : i32
    return %c0_i32, %c0_i32_0 : i32, i32
  }
}

module attributes {stable_mosaic.version = 11 : i64} {
  func.func @_neg_pdist_kernel(%arg0: i32, %arg1: memref<1x16x128xf32, #tpu.memory_space<vmem>>, %arg2: memref<1x16x16xf32, #tpu.memory_space<vmem>>) attributes {dimension_semantics = [#tpu.dimension_semantics<parallel>], iteration_bounds = array<i64: 2>, scalar_prefetch = 0 : i64, scratch_operands = 0 : i64, tpu.core_type = #tpu.core_type<tc>, window_params = [{transform_indices = @transform_0, window_bounds = array<i64: 1, 16, 128>}, {transform_indices = @transform_1, window_bounds = array<i64: 1, 16, 16>}]} {
    %c0 = arith.constant 0 : index
    %c0_0 = arith.constant 0 : index
    %c0_1 = arith.constant 0 : index
    %0 = vector.load %arg1[%c0, %c0_0, %c0_1] : memref<1x16x128xf32, #tpu.memory_space<vmem>>, vector<1x16x128xf32>
    %1 = vector.shape_cast %0 : vector<1x16x128xf32> to vector<16x128xf32>
    %cst = arith.constant dense<0.000000e+00> : vector<16x16xf32>
    %2 = tpu.matmul %1, %1, %cst {dimension_numbers = #tpu.dot_dimension_numbers<[1], [1], [0], [0], [0, 0, 1, 0], [], []>} : vector<16x128xf32>, vector<16x128xf32>, vector<16x16xf32> -> vector<16x16xf32>
    %3 = arith.mulf %1, %1 : vector<16x128xf32>
    %cst_2 = arith.constant dense<0.000000e+00> : vector<16xf32>
    %4 = vector.multi_reduction <add>, %3, %cst_2 [1] : vector<16x128xf32> to vector<16xf32>
    %5 = vector.shape_cast %4 : vector<16xf32> to vector<16x1xf32>
    %cst_3 = arith.constant dense<0.000000e+00> : vector<16xf32>
    %6 = vector.multi_reduction <add>, %3, %cst_3 [1] : vector<16x128xf32> to vector<16xf32>
    %7 = vector.shape_cast %6 : vector<16xf32> to vector<1x16xf32>
    %cst_4 = arith.constant 2.000000e+00 : f32
    %8 = vector.broadcast %cst_4 : f32 to vector<16x16xf32>
    %9 = arith.mulf %8, %2 : vector<16x16xf32>
    %10 = vector.broadcast %5 : vector<16x1xf32> to vector<16x16xf32>
    %11 = arith.subf %9, %10 : vector<16x16xf32>
    %12 = vector.broadcast %7 : vector<1x16xf32> to vector<16x16xf32>
    %13 = arith.subf %11, %12 : vector<16x16xf32>
    %c0_5 = arith.constant 0 : index
    %c0_6 = arith.constant 0 : index
    %c0_7 = arith.constant 0 : index
    %14 = vector.load %arg2[%c0_5, %c0_6, %c0_7] : memref<1x16x16xf32, #tpu.memory_space<vmem>>, vector<1x16x16xf32>
    %15 = vector.shape_cast %14 : vector<1x16x16xf32> to vector<16x16xf32>
    %16 = vector.shape_cast %13 : vector<16x16xf32> to vector<1x16x16xf32>
    tpu.vector_store %arg2[%c0_5, %c0_6, %c0_7], %16 {strides = array<i32>} : memref<1x16x16xf32, #tpu.memory_space<vmem>>, vector<1x16x16xf32>,
    return
  }
  func.func @transform_0(%arg0: i32) -> (i32, i32, i32) {
    %c0_i32 = arith.constant 0 : i32
    %c0_i32_0 = arith.constant 0 : i32
    %c0_i32_1 = arith.constant 0 : i32
    return %arg0, %c0_i32, %c0_i32_0 : i32, i32, i32
  }
  func.func @transform_1(%arg0: i32) -> (i32, i32, i32) {
    %c0_i32 = arith.constant 0 : i32
    %c0_i32_0 = arith.constant 0 : i32
    %c0_i32_1 = arith.constant 0 : i32
    return %arg0, %c0_i32, %c0_i32_0 : i32, i32, i32
  }
}

module attributes {stable_mosaic.version = 11 : i64} {
  func.func @_ec_norm_kernel(%arg0: i32, %arg1: memref<32x4x128xf32, #tpu.memory_space<vmem>>, %arg2: memref<32x128xf32, #tpu.memory_space<vmem>>, %arg3: memref<2x128xf32, #tpu.memory_space<vmem>>, %arg4: memref<1x128xf32, #tpu.memory_space<vmem>>, %arg5: memref<1x128xf32, #tpu.memory_space<vmem>>, %arg6: memref<32x128xf32, #tpu.memory_space<vmem>>) attributes {dimension_semantics = [#tpu.dimension_semantics<parallel>], iteration_bounds = array<i64: 1>, scalar_prefetch = 0 : i64, scratch_operands = 0 : i64, tpu.core_type = #tpu.core_type<tc>, window_params = [{transform_indices = @transform_0, window_bounds = array<i64: 32, 4, 128>}, {transform_indices = @transform_1, window_bounds = array<i64: 32, 128>}, {pipeline_mode = #tpu.pipeline_mode<synchronous>, transform_indices = @transform_2, window_bounds = array<i64: 2, 128>}, {pipeline_mode = #tpu.pipeline_mode<synchronous>, transform_indices = @transform_3, window_bounds = array<i64: 1, 128>}, {pipeline_mode = #tpu.pipeline_mode<synchronous>, transform_indices = @transform_4, window_bounds = array<i64: 1, 128>}, {transform_indices = @transform_5, window_bounds = array<i64: 32, 128>}]} {
    %c0 = arith.constant 0 : index
    %c0_0 = arith.constant 0 : index
    %c0_1 = arith.constant 0 : index
    %0 = vector.load %arg1[%c0, %c0_0, %c0_1] : memref<32x4x128xf32, #tpu.memory_space<vmem>>, vector<32x4x128xf32>
    %c0_2 = arith.constant 0 : index
    %c0_3 = arith.constant 0 : index
    %1 = vector.load %arg2[%c0_2, %c0_3] : memref<32x128xf32, #tpu.memory_space<vmem>>, vector<32x128xf32>
    %2 = vector.shape_cast %1 : vector<32x128xf32> to vector<32x1x128xf32>
    %3 = vector.broadcast %2 : vector<32x1x128xf32> to vector<32x4x128xf32>
    %4 = arith.addf %0, %3 : vector<32x4x128xf32>
    %c0_4 = arith.constant 0 : index
    %c0_5 = arith.constant 0 : index
    %5 = vector.load %arg3[%c0_4, %c0_5] : memref<2x128xf32, #tpu.memory_space<vmem>>, vector<1x128xf32>
    %cst = arith.constant 7.812500e-03 : f32
    %6 = vector.broadcast %cst : f32 to vector<1x128xf32>
    %7 = arith.mulf %5, %6 : vector<1x128xf32>
    %c1 = arith.constant 1 : index
    %c0_6 = arith.constant 0 : index
    %8 = vector.load %arg3[%c1, %c0_6] : memref<2x128xf32, #tpu.memory_space<vmem>>, vector<1x128xf32>
    %cst_7 = arith.constant 7.812500e-03 : f32
    %9 = vector.broadcast %cst_7 : f32 to vector<1x128xf32>
    %10 = arith.mulf %8, %9 : vector<1x128xf32>
    %11 = arith.mulf %7, %7 : vector<1x128xf32>
    %12 = arith.subf %10, %11 : vector<1x128xf32>
    %cst_8 = arith.constant 0.000000e+00 : f32
    %13 = vector.broadcast %cst_8 : f32 to vector<1x128xf32>
    %14 = arith.maximumf %12, %13 : vector<1x128xf32>
    %c0_9 = arith.constant 0 : index
    %c0_10 = arith.constant 0 : index
    %15 = vector.load %arg4[%c0_9, %c0_10] : memref<1x128xf32, #tpu.memory_space<vmem>>, vector<1x128xf32>
    %cst_11 = arith.constant 9.99999974E-6 : f32
    %16 = vector.broadcast %cst_11 : f32 to vector<1x128xf32>
    %17 = arith.addf %14, %16 : vector<1x128xf32>
    %18 = math.rsqrt %17 : vector<1x128xf32>
    %19 = arith.mulf %15, %18 : vector<1x128xf32>
    %c0_12 = arith.constant 0 : index
    %c0_13 = arith.constant 0 : index
    %20 = vector.load %arg5[%c0_12, %c0_13] : memref<1x128xf32, #tpu.memory_space<vmem>>, vector<1x128xf32>
    %21 = arith.mulf %7, %19 : vector<1x128xf32>
    %22 = arith.subf %20, %21 : vector<1x128xf32>
    %23 = vector.shape_cast %19 : vector<1x128xf32> to vector<1x1x128xf32>
    %24 = vector.broadcast %23 : vector<1x1x128xf32> to vector<32x4x128xf32>
    %25 = arith.mulf %4, %24 : vector<32x4x128xf32>
    %26 = vector.shape_cast %22 : vector<1x128xf32> to vector<1x1x128xf32>
    %27 = vector.broadcast %26 : vector<1x1x128xf32> to vector<32x4x128xf32>
    %28 = arith.addf %25, %27 : vector<32x4x128xf32>
    %cst_14 = arith.constant 2.000000e-01 : f32
    %29 = vector.broadcast %cst_14 : f32 to vector<32x4x128xf32>
    %30 = arith.mulf %29, %28 : vector<32x4x128xf32>
    %31 = arith.maximumf %28, %30 : vector<32x4x128xf32>
    %cst_15 = arith.constant dense<0xFF800000> : vector<32x128xf32>
    %32 = vector.multi_reduction <maximumf>, %31, %cst_15 [1] : vector<32x4x128xf32> to vector<32x128xf32>
    %c0_16 = arith.constant 0 : index
    %c0_17 = arith.constant 0 : index
    %33 = vector.load %arg6[%c0_16, %c0_17] : memref<32x128xf32, #tpu.memory_space<vmem>>, vector<32x128xf32>
    tpu.vector_store %arg6[%c0_16, %c0_17], %32 {strides = array<i32>} : memref<32x128xf32, #tpu.memory_space<vmem>>, vector<32x128xf32>,
    return
  }
  func.func @transform_0(%arg0: i32) -> (i32, i32, i32) {
    %c0_i32 = arith.constant 0 : i32
    %c0_i32_0 = arith.constant 0 : i32
    %c0_i32_1 = arith.constant 0 : i32
    return %arg0, %c0_i32, %c0_i32_0 : i32, i32, i32
  }
  func.func @transform_1(%arg0: i32) -> (i32, i32) {
    %c0_i32 = arith.constant 0 : i32
    %c0_i32_0 = arith.constant 0 : i32
    return %arg0, %c0_i32 : i32, i32
  }
  func.func @transform_2(%arg0: i32) -> (i32, i32) {
    %c0_i32 = arith.constant 0 : i32
    %c0_i32_0 = arith.constant 0 : i32
    %c0_i32_1 = arith.constant 0 : i32
    return %c0_i32, %c0_i32_0 : i32, i32
  }
  func.func @transform_3(%arg0: i32) -> (i32, i32) {
    %c0_i32 = arith.constant 0 : i32
    %c0_i32_0 = arith.constant 0 : i32
    %c0_i32_1 = arith.constant 0 : i32
    return %c0_i32, %c0_i32_0 : i32, i32
  }
  func.func @transform_4(%arg0: i32) -> (i32, i32) {
    %c0_i32 = arith.constant 0 : i32
    %c0_i32_0 = arith.constant 0 : i32
    %c0_i32_1 = arith.constant 0 : i32
    return %c0_i32, %c0_i32_0 : i32, i32
  }
  func.func @transform_5(%arg0: i32) -> (i32, i32) {
    %c0_i32 = arith.constant 0 : i32
    %c0_i32_0 = arith.constant 0 : i32
    return %arg0, %c0_i32 : i32, i32
  }
}

module attributes {stable_mosaic.version = 11 : i64} {
  func.func @_proj_kernel(%arg0: i32, %arg1: memref<32x128xbf16, #tpu.memory_space<vmem>>, %arg2: memref<128x512xbf16, #tpu.memory_space<vmem>>, %arg3: memref<32x512xf32, #tpu.memory_space<vmem>>) attributes {dimension_semantics = [#tpu.dimension_semantics<parallel>], iteration_bounds = array<i64: 1>, scalar_prefetch = 0 : i64, scratch_operands = 0 : i64, tpu.core_type = #tpu.core_type<tc>, window_params = [{transform_indices = @transform_0, window_bounds = array<i64: 32, 128>}, {pipeline_mode = #tpu.pipeline_mode<synchronous>, transform_indices = @transform_1, window_bounds = array<i64: 128, 512>}, {transform_indices = @transform_2, window_bounds = array<i64: 32, 512>}]} {
    %c0 = arith.constant 0 : index
    %c0_0 = arith.constant 0 : index
    %0 = vector.load %arg1[%c0, %c0_0] : memref<32x128xbf16, #tpu.memory_space<vmem>>, vector<32x128xbf16>
    %c0_1 = arith.constant 0 : index
    %c0_2 = arith.constant 0 : index
    %1 = vector.load %arg2[%c0_1, %c0_2] : memref<128x512xbf16, #tpu.memory_space<vmem>>, vector<128x512xbf16>
    %cst = arith.constant dense<0.000000e+00> : vector<32x512xf32>
    %2 = tpu.matmul %0, %1, %cst {dimension_numbers = #tpu.dot_dimension_numbers<[1], [0], [0], [1], [0, 0, 1, 1], [], []>} : vector<32x128xbf16>, vector<128x512xbf16>, vector<32x512xf32> -> vector<32x512xf32>
    %c0_3 = arith.constant 0 : index
    %c0_4 = arith.constant 0 : index
    %3 = vector.load %arg3[%c0_3, %c0_4] : memref<32x512xf32, #tpu.memory_space<vmem>>, vector<32x512xf32>
    tpu.vector_store %arg3[%c0_3, %c0_4], %2 {strides = array<i32>} : memref<32x512xf32, #tpu.memory_space<vmem>>, vector<32x512xf32>,
    return
  }
  func.func @transform_0(%arg0: i32) -> (i32, i32) {
    %c0_i32 = arith.constant 0 : i32
    %c0_i32_0 = arith.constant 0 : i32
    return %arg0, %c0_i32 : i32, i32
  }
  func.func @transform_1(%arg0: i32) -> (i32, i32) {
    %c0_i32 = arith.constant 0 : i32
    %c0_i32_0 = arith.constant 0 : i32
    %c0_i32_1 = arith.constant 0 : i32
    return %c0_i32, %c0_i32_0 : i32, i32
  }
  func.func @transform_2(%arg0: i32) -> (i32, i32) {
    %c0_i32 = arith.constant 0 : i32
    %c0_i32_0 = arith.constant 0 : i32
    return %arg0, %c0_i32 : i32, i32
  }
}

module attributes {stable_mosaic.version = 11 : i64} {
  func.func @_ec_stats_kernel(%arg0: i32, %arg1: memref<32x4x256xf32, #tpu.memory_space<vmem>>, %arg2: memref<32x256xf32, #tpu.memory_space<vmem>>, %arg3: memref<2x256xf32, #tpu.memory_space<vmem>>) attributes {dimension_semantics = [#tpu.dimension_semantics<arbitrary>], iteration_bounds = array<i64: 1>, scalar_prefetch = 0 : i64, scratch_operands = 0 : i64, tpu.core_type = #tpu.core_type<tc>, window_params = [{transform_indices = @transform_0, window_bounds = array<i64: 32, 4, 256>}, {transform_indices = @transform_1, window_bounds = array<i64: 32, 256>}, {pipeline_mode = #tpu.pipeline_mode<synchronous>, transform_indices = @transform_2, window_bounds = array<i64: 2, 256>}]} {
    %c0_i32 = arith.constant 0 : i32
    %0 = arith.cmpi eq, %arg0, %c0_i32 : i32
    %1 = arith.extui %0 : i1 to i32
    %c0_i32_0 = arith.constant 0 : i32
    %2 = arith.cmpi ne, %1, %c0_i32_0 : i32
    scf.if %2 {
      %cst_13 = arith.constant 0.000000e+00 : f32
      %19 = vector.broadcast %cst_13 : f32 to vector<2x256xf32>
      %c0_14 = arith.constant 0 : index
      %c0_15 = arith.constant 0 : index
      %20 = vector.load %arg3[%c0_14, %c0_15] : memref<2x256xf32, #tpu.memory_space<vmem>>, vector<2x256xf32>
      tpu.vector_store %arg3[%c0_14, %c0_15], %19 {strides = array<i32>} : memref<2x256xf32, #tpu.memory_space<vmem>>, vector<2x256xf32>,
    } else {
    }
    %c0 = arith.constant 0 : index
    %c0_1 = arith.constant 0 : index
    %c0_2 = arith.constant 0 : index
    %3 = vector.load %arg1[%c0, %c0_1, %c0_2] : memref<32x4x256xf32, #tpu.memory_space<vmem>>, vector<32x4x256xf32>
    %c0_3 = arith.constant 0 : index
    %c0_4 = arith.constant 0 : index
    %4 = vector.load %arg2[%c0_3, %c0_4] : memref<32x256xf32, #tpu.memory_space<vmem>>, vector<32x256xf32>
    %5 = vector.shape_cast %4 : vector<32x256xf32> to vector<32x1x256xf32>
    %6 = vector.broadcast %5 : vector<32x1x256xf32> to vector<32x4x256xf32>
    %7 = arith.addf %3, %6 : vector<32x4x256xf32>
    %c0_5 = arith.constant 0 : index
    %c0_6 = arith.constant 0 : index
    %8 = vector.load %arg3[%c0_5, %c0_6] : memref<2x256xf32, #tpu.memory_space<vmem>>, vector<1x256xf32>
    %cst = arith.constant dense<0.000000e+00> : vector<256xf32>
    %9 = vector.multi_reduction <add>, %7, %cst [0, 1] : vector<32x4x256xf32> to vector<256xf32>
    %10 = vector.shape_cast %9 : vector<256xf32> to vector<1x256xf32>
    %11 = arith.addf %8, %10 : vector<1x256xf32>
    %c0_7 = arith.constant 0 : index
    %c0_8 = arith.constant 0 : index
    %12 = vector.load %arg3[%c0_7, %c0_8] : memref<2x256xf32, #tpu.memory_space<vmem>>, vector<1x256xf32>
    tpu.vector_store %arg3[%c0_7, %c0_8], %11 {strides = array<i32>} : memref<2x256xf32, #tpu.memory_space<vmem>>, vector<1x256xf32>,
    %c1 = arith.constant 1 : index
    %c0_9 = arith.constant 0 : index
    %13 = vector.load %arg3[%c1, %c0_9] : memref<2x256xf32, #tpu.memory_space<vmem>>, vector<1x256xf32>
    %14 = arith.mulf %7, %7 : vector<32x4x256xf32>
    %cst_10 = arith.constant dense<0.000000e+00> : vector<256xf32>
    %15 = vector.multi_reduction <add>, %14, %cst_10 [0, 1] : vector<32x4x256xf32> to vector<256xf32>
    %16 = vector.shape_cast %15 : vector<256xf32> to vector<1x256xf32>
    %17 = arith.addf %13, %16 : vector<1x256xf32>
    %c1_11 = arith.constant 1 : index
    %c0_12 = arith.constant 0 : index
    %18 = vector.load %arg3[%c1_11, %c0_12] : memref<2x256xf32, #tpu.memory_space<vmem>>, vector<1x256xf32>
    tpu.vector_store %arg3[%c1_11, %c0_12], %17 {strides = array<i32>} : memref<2x256xf32, #tpu.memory_space<vmem>>, vector<1x256xf32>,
    return
  }
  func.func @transform_0(%arg0: i32) -> (i32, i32, i32) {
    %c0_i32 = arith.constant 0 : i32
    %c0_i32_0 = arith.constant 0 : i32
    %c0_i32_1 = arith.constant 0 : i32
    return %arg0, %c0_i32, %c0_i32_0 : i32, i32, i32
  }
  func.func @transform_1(%arg0: i32) -> (i32, i32) {
    %c0_i32 = arith.constant 0 : i32
    %c0_i32_0 = arith.constant 0 : i32
    return %arg0, %c0_i32 : i32, i32
  }
  func.func @transform_2(%arg0: i32) -> (i32, i32) {
    %c0_i32 = arith.constant 0 : i32
    %c0_i32_0 = arith.constant 0 : i32
    %c0_i32_1 = arith.constant 0 : i32
    return %c0_i32, %c0_i32_0 : i32, i32
  }
}

module attributes {stable_mosaic.version = 11 : i64} {
  func.func @_ec_norm_kernel(%arg0: i32, %arg1: memref<32x4x256xf32, #tpu.memory_space<vmem>>, %arg2: memref<32x256xf32, #tpu.memory_space<vmem>>, %arg3: memref<2x256xf32, #tpu.memory_space<vmem>>, %arg4: memref<1x256xf32, #tpu.memory_space<vmem>>, %arg5: memref<1x256xf32, #tpu.memory_space<vmem>>, %arg6: memref<32x256xf32, #tpu.memory_space<vmem>>) attributes {dimension_semantics = [#tpu.dimension_semantics<parallel>], iteration_bounds = array<i64: 1>, scalar_prefetch = 0 : i64, scratch_operands = 0 : i64, tpu.core_type = #tpu.core_type<tc>, window_params = [{transform_indices = @transform_0, window_bounds = array<i64: 32, 4, 256>}, {transform_indices = @transform_1, window_bounds = array<i64: 32, 256>}, {pipeline_mode = #tpu.pipeline_mode<synchronous>, transform_indices = @transform_2, window_bounds = array<i64: 2, 256>}, {pipeline_mode = #tpu.pipeline_mode<synchronous>, transform_indices = @transform_3, window_bounds = array<i64: 1, 256>}, {pipeline_mode = #tpu.pipeline_mode<synchronous>, transform_indices = @transform_4, window_bounds = array<i64: 1, 256>}, {transform_indices = @transform_5, window_bounds = array<i64: 32, 256>}]} {
    %c0 = arith.constant 0 : index
    %c0_0 = arith.constant 0 : index
    %c0_1 = arith.constant 0 : index
    %0 = vector.load %arg1[%c0, %c0_0, %c0_1] : memref<32x4x256xf32, #tpu.memory_space<vmem>>, vector<32x4x256xf32>
    %c0_2 = arith.constant 0 : index
    %c0_3 = arith.constant 0 : index
    %1 = vector.load %arg2[%c0_2, %c0_3] : memref<32x256xf32, #tpu.memory_space<vmem>>, vector<32x256xf32>
    %2 = vector.shape_cast %1 : vector<32x256xf32> to vector<32x1x256xf32>
    %3 = vector.broadcast %2 : vector<32x1x256xf32> to vector<32x4x256xf32>
    %4 = arith.addf %0, %3 : vector<32x4x256xf32>
    %c0_4 = arith.constant 0 : index
    %c0_5 = arith.constant 0 : index
    %5 = vector.load %arg3[%c0_4, %c0_5] : memref<2x256xf32, #tpu.memory_space<vmem>>, vector<1x256xf32>
    %cst = arith.constant 7.812500e-03 : f32
    %6 = vector.broadcast %cst : f32 to vector<1x256xf32>
    %7 = arith.mulf %5, %6 : vector<1x256xf32>
    %c1 = arith.constant 1 : index
    %c0_6 = arith.constant 0 : index
    %8 = vector.load %arg3[%c1, %c0_6] : memref<2x256xf32, #tpu.memory_space<vmem>>, vector<1x256xf32>
    %cst_7 = arith.constant 7.812500e-03 : f32
    %9 = vector.broadcast %cst_7 : f32 to vector<1x256xf32>
    %10 = arith.mulf %8, %9 : vector<1x256xf32>
    %11 = arith.mulf %7, %7 : vector<1x256xf32>
    %12 = arith.subf %10, %11 : vector<1x256xf32>
    %cst_8 = arith.constant 0.000000e+00 : f32
    %13 = vector.broadcast %cst_8 : f32 to vector<1x256xf32>
    %14 = arith.maximumf %12, %13 : vector<1x256xf32>
    %c0_9 = arith.constant 0 : index
    %c0_10 = arith.constant 0 : index
    %15 = vector.load %arg4[%c0_9, %c0_10] : memref<1x256xf32, #tpu.memory_space<vmem>>, vector<1x256xf32>
    %cst_11 = arith.constant 9.99999974E-6 : f32
    %16 = vector.broadcast %cst_11 : f32 to vector<1x256xf32>
    %17 = arith.addf %14, %16 : vector<1x256xf32>
    %18 = math.rsqrt %17 : vector<1x256xf32>
    %19 = arith.mulf %15, %18 : vector<1x256xf32>
    %c0_12 = arith.constant 0 : index
    %c0_13 = arith.constant 0 : index
    %20 = vector.load %arg5[%c0_12, %c0_13] : memref<1x256xf32, #tpu.memory_space<vmem>>, vector<1x256xf32>
    %21 = arith.mulf %7, %19 : vector<1x256xf32>
    %22 = arith.subf %20, %21 : vector<1x256xf32>
    %23 = vector.shape_cast %19 : vector<1x256xf32> to vector<1x1x256xf32>
    %24 = vector.broadcast %23 : vector<1x1x256xf32> to vector<32x4x256xf32>
    %25 = arith.mulf %4, %24 : vector<32x4x256xf32>
    %26 = vector.shape_cast %22 : vector<1x256xf32> to vector<1x1x256xf32>
    %27 = vector.broadcast %26 : vector<1x1x256xf32> to vector<32x4x256xf32>
    %28 = arith.addf %25, %27 : vector<32x4x256xf32>
    %cst_14 = arith.constant 2.000000e-01 : f32
    %29 = vector.broadcast %cst_14 : f32 to vector<32x4x256xf32>
    %30 = arith.mulf %29, %28 : vector<32x4x256xf32>
    %31 = arith.maximumf %28, %30 : vector<32x4x256xf32>
    %cst_15 = arith.constant dense<0xFF800000> : vector<32x256xf32>
    %32 = vector.multi_reduction <maximumf>, %31, %cst_15 [1] : vector<32x4x256xf32> to vector<32x256xf32>
    %c0_16 = arith.constant 0 : index
    %c0_17 = arith.constant 0 : index
    %33 = vector.load %arg6[%c0_16, %c0_17] : memref<32x256xf32, #tpu.memory_space<vmem>>, vector<32x256xf32>
    tpu.vector_store %arg6[%c0_16, %c0_17], %32 {strides = array<i32>} : memref<32x256xf32, #tpu.memory_space<vmem>>, vector<32x256xf32>,
    return
  }
  func.func @transform_0(%arg0: i32) -> (i32, i32, i32) {
    %c0_i32 = arith.constant 0 : i32
    %c0_i32_0 = arith.constant 0 : i32
    %c0_i32_1 = arith.constant 0 : i32
    return %arg0, %c0_i32, %c0_i32_0 : i32, i32, i32
  }
  func.func @transform_1(%arg0: i32) -> (i32, i32) {
    %c0_i32 = arith.constant 0 : i32
    %c0_i32_0 = arith.constant 0 : i32
    return %arg0, %c0_i32 : i32, i32
  }
  func.func @transform_2(%arg0: i32) -> (i32, i32) {
    %c0_i32 = arith.constant 0 : i32
    %c0_i32_0 = arith.constant 0 : i32
    %c0_i32_1 = arith.constant 0 : i32
    return %c0_i32, %c0_i32_0 : i32, i32
  }
  func.func @transform_3(%arg0: i32) -> (i32, i32) {
    %c0_i32 = arith.constant 0 : i32
    %c0_i32_0 = arith.constant 0 : i32
    %c0_i32_1 = arith.constant 0 : i32
    return %c0_i32, %c0_i32_0 : i32, i32
  }
  func.func @transform_4(%arg0: i32) -> (i32, i32) {
    %c0_i32 = arith.constant 0 : i32
    %c0_i32_0 = arith.constant 0 : i32
    %c0_i32_1 = arith.constant 0 : i32
    return %c0_i32, %c0_i32_0 : i32, i32
  }
  func.func @transform_5(%arg0: i32) -> (i32, i32) {
    %c0_i32 = arith.constant 0 : i32
    %c0_i32_0 = arith.constant 0 : i32
    return %arg0, %c0_i32 : i32, i32
  }
}

module attributes {stable_mosaic.version = 11 : i64} {
  func.func @_conv5_stats_kernel(%arg0: i32, %arg1: memref<32x512xbf16, #tpu.memory_space<vmem>>, %arg2: memref<512x64xbf16, #tpu.memory_space<vmem>>, %arg3: memref<32x64xf32, #tpu.memory_space<vmem>>, %arg4: memref<2x64xf32, #tpu.memory_space<vmem>>) attributes {dimension_semantics = [#tpu.dimension_semantics<arbitrary>], iteration_bounds = array<i64: 1>, scalar_prefetch = 0 : i64, scratch_operands = 0 : i64, tpu.core_type = #tpu.core_type<tc>, window_params = [{transform_indices = @transform_0, window_bounds = array<i64: 32, 512>}, {pipeline_mode = #tpu.pipeline_mode<synchronous>, transform_indices = @transform_1, window_bounds = array<i64: 512, 64>}, {transform_indices = @transform_2, window_bounds = array<i64: 32, 64>}, {pipeline_mode = #tpu.pipeline_mode<synchronous>, transform_indices = @transform_3, window_bounds = array<i64: 2, 64>}]} {
    %c0_i32 = arith.constant 0 : i32
    %0 = arith.cmpi eq, %arg0, %c0_i32 : i32
    %1 = arith.extui %0 : i1 to i32
    %c0_i32_0 = arith.constant 0 : i32
    %2 = arith.cmpi ne, %1, %c0_i32_0 : i32
    scf.if %2 {
      %cst_15 = arith.constant 0.000000e+00 : f32
      %18 = vector.broadcast %cst_15 : f32 to vector<2x64xf32>
      %c0_16 = arith.constant 0 : index
      %c0_17 = arith.constant 0 : index
      %19 = vector.load %arg4[%c0_16, %c0_17] : memref<2x64xf32, #tpu.memory_space<vmem>>, vector<2x64xf32>
      tpu.vector_store %arg4[%c0_16, %c0_17], %18 {strides = array<i32>} : memref<2x64xf32, #tpu.memory_space<vmem>>, vector<2x64xf32>,
    } else {
    }
    %c0 = arith.constant 0 : index
    %c0_1 = arith.constant 0 : index
    %3 = vector.load %arg1[%c0, %c0_1] : memref<32x512xbf16, #tpu.memory_space<vmem>>, vector<32x512xbf16>
    %c0_2 = arith.constant 0 : index
    %c0_3 = arith.constant 0 : index
    %4 = vector.load %arg2[%c0_2, %c0_3] : memref<512x64xbf16, #tpu.memory_space<vmem>>, vector<512x64xbf16>
    %cst = arith.constant dense<0.000000e+00> : vector<32x64xf32>
    %5 = tpu.matmul %3, %4, %cst {dimension_numbers = #tpu.dot_dimension_numbers<[1], [0], [0], [1], [0, 0, 1, 1], [], []>} : vector<32x512xbf16>, vector<512x64xbf16>, vector<32x64xf32> -> vector<32x64xf32>
    %c0_4 = arith.constant 0 : index
    %c0_5 = arith.constant 0 : index
    %6 = vector.load %arg3[%c0_4, %c0_5] : memref<32x64xf32, #tpu.memory_space<vmem>>, vector<32x64xf32>
    tpu.vector_store %arg3[%c0_4, %c0_5], %5 {strides = array<i32>} : memref<32x64xf32, #tpu.memory_space<vmem>>, vector<32x64xf32>,
    %c0_6 = arith.constant 0 : index
    %c0_7 = arith.constant 0 : index
    %7 = vector.load %arg4[%c0_6, %c0_7] : memref<2x64xf32, #tpu.memory_space<vmem>>, vector<1x64xf32>
    %cst_8 = arith.constant dense<0.000000e+00> : vector<64xf32>
    %8 = vector.multi_reduction <add>, %5, %cst_8 [0] : vector<32x64xf32> to vector<64xf32>
    %9 = vector.shape_cast %8 : vector<64xf32> to vector<1x64xf32>
    %10 = arith.addf %7, %9 : vector<1x64xf32>
    %c0_9 = arith.constant 0 : index
    %c0_10 = arith.constant 0 : index
    %11 = vector.load %arg4[%c0_9, %c0_10] : memref<2x64xf32, #tpu.memory_space<vmem>>, vector<1x64xf32>
    tpu.vector_store %arg4[%c0_9, %c0_10], %10 {strides = array<i32>} : memref<2x64xf32, #tpu.memory_space<vmem>>, vector<1x64xf32>,
    %c1 = arith.constant 1 : index
    %c0_11 = arith.constant 0 : index
    %12 = vector.load %arg4[%c1, %c0_11] : memref<2x64xf32, #tpu.memory_space<vmem>>, vector<1x64xf32>
    %13 = arith.mulf %5, %5 : vector<32x64xf32>
    %cst_12 = arith.constant dense<0.000000e+00> : vector<64xf32>
    %14 = vector.multi_reduction <add>, %13, %cst_12 [0] : vector<32x64xf32> to vector<64xf32>
    %15 = vector.shape_cast %14 : vector<64xf32> to vector<1x64xf32>
    %16 = arith.addf %12, %15 : vector<1x64xf32>
    %c1_13 = arith.constant 1 : index
    %c0_14 = arith.constant 0 : index
    %17 = vector.load %arg4[%c1_13, %c0_14] : memref<2x64xf32, #tpu.memory_space<vmem>>, vector<1x64xf32>
    tpu.vector_store %arg4[%c1_13, %c0_14], %16 {strides = array<i32>} : memref<2x64xf32, #tpu.memory_space<vmem>>, vector<1x64xf32>,
    return
  }
  func.func @transform_0(%arg0: i32) -> (i32, i32) {
    %c0_i32 = arith.constant 0 : i32
    %c0_i32_0 = arith.constant 0 : i32
    return %arg0, %c0_i32 : i32, i32
  }
  func.func @transform_1(%arg0: i32) -> (i32, i32) {
    %c0_i32 = arith.constant 0 : i32
    %c0_i32_0 = arith.constant 0 : i32
    %c0_i32_1 = arith.constant 0 : i32
    return %c0_i32, %c0_i32_0 : i32, i32
  }
  func.func @transform_2(%arg0: i32) -> (i32, i32) {
    %c0_i32 = arith.constant 0 : i32
    %c0_i32_0 = arith.constant 0 : i32
    return %arg0, %c0_i32 : i32, i32
  }
  func.func @transform_3(%arg0: i32) -> (i32, i32) {
    %c0_i32 = arith.constant 0 : i32
    %c0_i32_0 = arith.constant 0 : i32
    %c0_i32_1 = arith.constant 0 : i32
    return %c0_i32, %c0_i32_0 : i32, i32
  }
}

module attributes {stable_mosaic.version = 11 : i64} {
  func.func @_conv5_pool_kernel(%arg0: i32, %arg1: memref<1x16x64xf32, #tpu.memory_space<vmem>>, %arg2: memref<2x64xf32, #tpu.memory_space<vmem>>, %arg3: memref<1x64xf32, #tpu.memory_space<vmem>>, %arg4: memref<1x64xf32, #tpu.memory_space<vmem>>, %arg5: memref<1x1x64xf32, #tpu.memory_space<vmem>>, %arg6: memref<1x1x64xf32, #tpu.memory_space<vmem>>) attributes {dimension_semantics = [#tpu.dimension_semantics<parallel>], iteration_bounds = array<i64: 2>, scalar_prefetch = 0 : i64, scratch_operands = 0 : i64, tpu.core_type = #tpu.core_type<tc>, window_params = [{transform_indices = @transform_0, window_bounds = array<i64: 1, 16, 64>}, {pipeline_mode = #tpu.pipeline_mode<synchronous>, transform_indices = @transform_1, window_bounds = array<i64: 2, 64>}, {pipeline_mode = #tpu.pipeline_mode<synchronous>, transform_indices = @transform_2, window_bounds = array<i64: 1, 64>}, {pipeline_mode = #tpu.pipeline_mode<synchronous>, transform_indices = @transform_3, window_bounds = array<i64: 1, 64>}, {transform_indices = @transform_4, window_bounds = array<i64: 1, 1, 64>}, {transform_indices = @transform_5, window_bounds = array<i64: 1, 1, 64>}]} {
    %c0 = arith.constant 0 : index
    %c0_0 = arith.constant 0 : index
    %c0_1 = arith.constant 0 : index
    %0 = vector.load %arg1[%c0, %c0_0, %c0_1] : memref<1x16x64xf32, #tpu.memory_space<vmem>>, vector<1x16x64xf32>
    %1 = vector.shape_cast %0 : vector<1x16x64xf32> to vector<16x64xf32>
    %c0_2 = arith.constant 0 : index
    %c0_3 = arith.constant 0 : index
    %2 = vector.load %arg2[%c0_2, %c0_3] : memref<2x64xf32, #tpu.memory_space<vmem>>, vector<1x64xf32>
    %cst = arith.constant 3.125000e-02 : f32
    %3 = vector.broadcast %cst : f32 to vector<1x64xf32>
    %4 = arith.mulf %2, %3 : vector<1x64xf32>
    %c1 = arith.constant 1 : index
    %c0_4 = arith.constant 0 : index
    %5 = vector.load %arg2[%c1, %c0_4] : memref<2x64xf32, #tpu.memory_space<vmem>>, vector<1x64xf32>
    %cst_5 = arith.constant 3.125000e-02 : f32
    %6 = vector.broadcast %cst_5 : f32 to vector<1x64xf32>
    %7 = arith.mulf %5, %6 : vector<1x64xf32>
    %8 = arith.mulf %4, %4 : vector<1x64xf32>
    %9 = arith.subf %7, %8 : vector<1x64xf32>
    %cst_6 = arith.constant 0.000000e+00 : f32
    %10 = vector.broadcast %cst_6 : f32 to vector<1x64xf32>
    %11 = arith.maximumf %9, %10 : vector<1x64xf32>
    %c0_7 = arith.constant 0 : index
    %c0_8 = arith.constant 0 : index
    %12 = vector.load %arg3[%c0_7, %c0_8] : memref<1x64xf32, #tpu.memory_space<vmem>>, vector<1x64xf32>
    %cst_9 = arith.constant 9.99999974E-6 : f32
    %13 = vector.broadcast %cst_9 : f32 to vector<1x64xf32>
    %14 = arith.addf %11, %13 : vector<1x64xf32>
    %15 = math.rsqrt %14 : vector<1x64xf32>
    %16 = arith.mulf %12, %15 : vector<1x64xf32>
    %c0_10 = arith.constant 0 : index
    %c0_11 = arith.constant 0 : index
    %17 = vector.load %arg4[%c0_10, %c0_11] : memref<1x64xf32, #tpu.memory_space<vmem>>, vector<1x64xf32>
    %18 = arith.mulf %4, %16 : vector<1x64xf32>
    %19 = arith.subf %17, %18 : vector<1x64xf32>
    %20 = vector.broadcast %16 : vector<1x64xf32> to vector<16x64xf32>
    %21 = arith.mulf %1, %20 : vector<16x64xf32>
    %22 = vector.broadcast %19 : vector<1x64xf32> to vector<16x64xf32>
    %23 = arith.addf %21, %22 : vector<16x64xf32>
    %cst_12 = arith.constant 2.000000e-01 : f32
    %24 = vector.broadcast %cst_12 : f32 to vector<16x64xf32>
    %25 = arith.mulf %24, %23 : vector<16x64xf32>
    %26 = arith.maximumf %23, %25 : vector<16x64xf32>
    %cst_13 = arith.constant dense<0xFF800000> : vector<64xf32>
    %27 = vector.multi_reduction <maximumf>, %26, %cst_13 [0] : vector<16x64xf32> to vector<64xf32>
    %28 = vector.shape_cast %27 : vector<64xf32> to vector<1x64xf32>
    %c0_14 = arith.constant 0 : index
    %c0_15 = arith.constant 0 : index
    %c0_16 = arith.constant 0 : index
    %29 = vector.load %arg5[%c0_14, %c0_15, %c0_16] : memref<1x1x64xf32, #tpu.memory_space<vmem>>, vector<1x1x64xf32>
    %30 = vector.shape_cast %29 : vector<1x1x64xf32> to vector<1x64xf32>
    %31 = vector.shape_cast %28 : vector<1x64xf32> to vector<1x1x64xf32>
    tpu.vector_store %arg5[%c0_14, %c0_15, %c0_16], %31 {strides = array<i32>} : memref<1x1x64xf32, #tpu.memory_space<vmem>>, vector<1x1x64xf32>,
    %cst_17 = arith.constant dense<0.000000e+00> : vector<64xf32>
    %32 = vector.multi_reduction <add>, %26, %cst_17 [0] : vector<16x64xf32> to vector<64xf32>
    %33 = vector.shape_cast %32 : vector<64xf32> to vector<1x64xf32>
    %cst_18 = arith.constant 6.250000e-02 : f32
    %34 = vector.broadcast %cst_18 : f32 to vector<1x64xf32>
    %35 = arith.mulf %33, %34 : vector<1x64xf32>
    %c0_19 = arith.constant 0 : index
    %c0_20 = arith.constant 0 : index
    %c0_21 = arith.constant 0 : index
    %36 = vector.load %arg6[%c0_19, %c0_20, %c0_21] : memref<1x1x64xf32, #tpu.memory_space<vmem>>, vector<1x1x64xf32>
    %37 = vector.shape_cast %36 : vector<1x1x64xf32> to vector<1x64xf32>
    %38 = vector.shape_cast %35 : vector<1x64xf32> to vector<1x1x64xf32>
    tpu.vector_store %arg6[%c0_19, %c0_20, %c0_21], %38 {strides = array<i32>} : memref<1x1x64xf32, #tpu.memory_space<vmem>>, vector<1x1x64xf32>,
    return
  }
  func.func @transform_0(%arg0: i32) -> (i32, i32, i32) {
    %c0_i32 = arith.constant 0 : i32
    %c0_i32_0 = arith.constant 0 : i32
    %c0_i32_1 = arith.constant 0 : i32
    return %arg0, %c0_i32, %c0_i32_0 : i32, i32, i32
  }
  func.func @transform_1(%arg0: i32) -> (i32, i32) {
    %c0_i32 = arith.constant 0 : i32
    %c0_i32_0 = arith.constant 0 : i32
    %c0_i32_1 = arith.constant 0 : i32
    return %c0_i32, %c0_i32_0 : i32, i32
  }
  func.func @transform_2(%arg0: i32) -> (i32, i32) {
    %c0_i32 = arith.constant 0 : i32
    %c0_i32_0 = arith.constant 0 : i32
    %c0_i32_1 = arith.constant 0 : i32
    return %c0_i32, %c0_i32_0 : i32, i32
  }
  func.func @transform_3(%arg0: i32) -> (i32, i32) {
    %c0_i32 = arith.constant 0 : i32
    %c0_i32_0 = arith.constant 0 : i32
    %c0_i32_1 = arith.constant 0 : i32
    return %c0_i32, %c0_i32_0 : i32, i32
  }
  func.func @transform_4(%arg0: i32) -> (i32, i32, i32) {
    %c0_i32 = arith.constant 0 : i32
    %c0_i32_0 = arith.constant 0 : i32
    %c0_i32_1 = arith.constant 0 : i32
    return %arg0, %c0_i32, %c0_i32_0 : i32, i32, i32
  }
  func.func @transform_5(%arg0: i32) -> (i32, i32, i32) {
    %c0_i32 = arith.constant 0 : i32
    %c0_i32_0 = arith.constant 0 : i32
    %c0_i32_1 = arith.constant 0 : i32
    return %arg0, %c0_i32, %c0_i32_0 : i32, i32, i32
  }
}

module attributes {stable_mosaic.version = 11 : i64} {
  func.func @_head_kernel(%arg0: i32, %arg1: memref<2x128xf32, #tpu.memory_space<vmem>>, %arg2: memref<128x512xf32, #tpu.memory_space<vmem>>, %arg3: memref<1x512xf32, #tpu.memory_space<vmem>>, %arg4: memref<1x512xf32, #tpu.memory_space<vmem>>, %arg5: memref<512x256xf32, #tpu.memory_space<vmem>>, %arg6: memref<1x256xf32, #tpu.memory_space<vmem>>, %arg7: memref<1x256xf32, #tpu.memory_space<vmem>>, %arg8: memref<1x256xf32, #tpu.memory_space<vmem>>, %arg9: memref<256x40xf32, #tpu.memory_space<vmem>>, %arg10: memref<1x40xf32, #tpu.memory_space<vmem>>, %arg11: memref<2x40xf32, #tpu.memory_space<vmem>>) attributes {dimension_semantics = [#tpu.dimension_semantics<arbitrary>], iteration_bounds = array<i64: 1>, scalar_prefetch = 0 : i64, scratch_operands = 0 : i64, tpu.core_type = #tpu.core_type<tc>, window_params = [{pipeline_mode = #tpu.pipeline_mode<synchronous>, transform_indices = @transform_0, window_bounds = array<i64: 2, 128>}, {pipeline_mode = #tpu.pipeline_mode<synchronous>, transform_indices = @transform_1, window_bounds = array<i64: 128, 512>}, {pipeline_mode = #tpu.pipeline_mode<synchronous>, transform_indices = @transform_2, window_bounds = array<i64: 1, 512>}, {pipeline_mode = #tpu.pipeline_mode<synchronous>, transform_indices = @transform_3, window_bounds = array<i64: 1, 512>}, {pipeline_mode = #tpu.pipeline_mode<synchronous>, transform_indices = @transform_4, window_bounds = array<i64: 512, 256>}, {pipeline_mode = #tpu.pipeline_mode<synchronous>, transform_indices = @transform_5, window_bounds = array<i64: 1, 256>}, {pipeline_mode = #tpu.pipeline_mode<synchronous>, transform_indices = @transform_6, window_bounds = array<i64: 1, 256>}, {pipeline_mode = #tpu.pipeline_mode<synchronous>, transform_indices = @transform_7, window_bounds = array<i64: 1, 256>}, {pipeline_mode = #tpu.pipeline_mode<synchronous>, transform_indices = @transform_8, window_bounds = array<i64: 256, 40>}, {pipeline_mode = #tpu.pipeline_mode<synchronous>, transform_indices = @transform_9, window_bounds = array<i64: 1, 40>}, {pipeline_mode = #tpu.pipeline_mode<synchronous>, transform_indices = @transform_10, window_bounds = array<i64: 2, 40>}]} {
    %c0 = arith.constant 0 : index
    %c0_0 = arith.constant 0 : index
    %0 = vector.load %arg1[%c0, %c0_0] : memref<2x128xf32, #tpu.memory_space<vmem>>, vector<2x128xf32>
    %c0_1 = arith.constant 0 : index
    %c0_2 = arith.constant 0 : index
    %1 = vector.load %arg2[%c0_1, %c0_2] : memref<128x512xf32, #tpu.memory_space<vmem>>, vector<128x512xf32>
    %cst = arith.constant dense<0.000000e+00> : vector<2x512xf32>
    %2 = tpu.matmul %0, %1, %cst {dimension_numbers = #tpu.dot_dimension_numbers<[1], [0], [0], [1], [0, 0, 1, 1], [], []>} : vector<2x128xf32>, vector<128x512xf32>, vector<2x512xf32> -> vector<2x512xf32>
    %c0_3 = arith.constant 0 : index
    %c0_4 = arith.constant 0 : index
    %3 = vector.load %arg3[%c0_3, %c0_4] : memref<1x512xf32, #tpu.memory_space<vmem>>, vector<1x512xf32>
    %c0_5 = arith.constant 0 : index
    %c0_6 = arith.constant 0 : index
    %4 = vector.load %arg4[%c0_5, %c0_6] : memref<1x512xf32, #tpu.memory_space<vmem>>, vector<1x512xf32>
    %cst_7 = arith.constant dense<0.000000e+00> : vector<512xf32>
    %5 = vector.multi_reduction <add>, %2, %cst_7 [0] : vector<2x512xf32> to vector<512xf32>
    %6 = vector.shape_cast %5 : vector<512xf32> to vector<1x512xf32>
    %cst_8 = arith.constant 2.000000e+00 : f32
    %7 = vector.broadcast %cst_8 : f32 to vector<1x512xf32>
    %8 = arith.divf %6, %7 : vector<1x512xf32>
    %9 = vector.broadcast %8 : vector<1x512xf32> to vector<2x512xf32>
    %10 = arith.subf %2, %9 : vector<2x512xf32>
    %11 = vector.broadcast %8 : vector<1x512xf32> to vector<2x512xf32>
    %12 = arith.subf %2, %11 : vector<2x512xf32>
    %13 = arith.mulf %10, %12 : vector<2x512xf32>
    %cst_9 = arith.constant dense<0.000000e+00> : vector<512xf32>
    %14 = vector.multi_reduction <add>, %13, %cst_9 [0] : vector<2x512xf32> to vector<512xf32>
    %15 = vector.shape_cast %14 : vector<512xf32> to vector<1x512xf32>
    %cst_10 = arith.constant 2.000000e+00 : f32
    %16 = vector.broadcast %cst_10 : f32 to vector<1x512xf32>
    %17 = arith.divf %15, %16 : vector<1x512xf32>
    %18 = vector.broadcast %8 : vector<1x512xf32> to vector<2x512xf32>
    %19 = arith.subf %2, %18 : vector<2x512xf32>
    %cst_11 = arith.constant 9.99999974E-6 : f32
    %20 = vector.broadcast %cst_11 : f32 to vector<1x512xf32>
    %21 = arith.addf %17, %20 : vector<1x512xf32>
    %22 = math.rsqrt %21 : vector<1x512xf32>
    %23 = arith.mulf %3, %22 : vector<1x512xf32>
    %24 = vector.broadcast %23 : vector<1x512xf32> to vector<2x512xf32>
    %25 = arith.mulf %19, %24 : vector<2x512xf32>
    %26 = vector.broadcast %4 : vector<1x512xf32> to vector<2x512xf32>
    %27 = arith.addf %25, %26 : vector<2x512xf32>
    %cst_12 = arith.constant 2.000000e-01 : f32
    %28 = vector.broadcast %cst_12 : f32 to vector<2x512xf32>
    %29 = arith.mulf %28, %27 : vector<2x512xf32>
    %30 = arith.maximumf %27, %29 : vector<2x512xf32>
    %c0_13 = arith.constant 0 : index
    %c0_14 = arith.constant 0 : index
    %31 = vector.load %arg5[%c0_13, %c0_14] : memref<512x256xf32, #tpu.memory_space<vmem>>, vector<512x256xf32>
    %cst_15 = arith.constant dense<0.000000e+00> : vector<2x256xf32>
    %32 = tpu.matmul %30, %31, %cst_15 {dimension_numbers = #tpu.dot_dimension_numbers<[1], [0], [0], [1], [0, 0, 1, 1], [], []>} : vector<2x512xf32>, vector<512x256xf32>, vector<2x256xf32> -> vector<2x256xf32>
    %c0_16 = arith.constant 0 : index
    %c0_17 = arith.constant 0 : index
    %33 = vector.load %arg6[%c0_16, %c0_17] : memref<1x256xf32, #tpu.memory_space<vmem>>, vector<1x256xf32>
    %34 = vector.broadcast %33 : vector<1x256xf32> to vector<2x256xf32>
    %35 = arith.addf %32, %34 : vector<2x256xf32>
    %c0_18 = arith.constant 0 : index
    %c0_19 = arith.constant 0 : index
    %36 = vector.load %arg7[%c0_18, %c0_19] : memref<1x256xf32, #tpu.memory_space<vmem>>, vector<1x256xf32>
    %c0_20 = arith.constant 0 : index
    %c0_21 = arith.constant 0 : index
    %37 = vector.load %arg8[%c0_20, %c0_21] : memref<1x256xf32, #tpu.memory_space<vmem>>, vector<1x256xf32>
    %cst_22 = arith.constant dense<0.000000e+00> : vector<256xf32>
    %38 = vector.multi_reduction <add>, %35, %cst_22 [0] : vector<2x256xf32> to vector<256xf32>
    %39 = vector.shape_cast %38 : vector<256xf32> to vector<1x256xf32>
    %cst_23 = arith.constant 2.000000e+00 : f32
    %40 = vector.broadcast %cst_23 : f32 to vector<1x256xf32>
    %41 = arith.divf %39, %40 : vector<1x256xf32>
    %42 = vector.broadcast %41 : vector<1x256xf32> to vector<2x256xf32>
    %43 = arith.subf %35, %42 : vector<2x256xf32>
    %44 = vector.broadcast %41 : vector<1x256xf32> to vector<2x256xf32>
    %45 = arith.subf %35, %44 : vector<2x256xf32>
    %46 = arith.mulf %43, %45 : vector<2x256xf32>
    %cst_24 = arith.constant dense<0.000000e+00> : vector<256xf32>
    %47 = vector.multi_reduction <add>, %46, %cst_24 [0] : vector<2x256xf32> to vector<256xf32>
    %48 = vector.shape_cast %47 : vector<256xf32> to vector<1x256xf32>
    %cst_25 = arith.constant 2.000000e+00 : f32
    %49 = vector.broadcast %cst_25 : f32 to vector<1x256xf32>
    %50 = arith.divf %48, %49 : vector<1x256xf32>
    %51 = vector.broadcast %41 : vector<1x256xf32> to vector<2x256xf32>
    %52 = arith.subf %35, %51 : vector<2x256xf32>
    %cst_26 = arith.constant 9.99999974E-6 : f32
    %53 = vector.broadcast %cst_26 : f32 to vector<1x256xf32>
    %54 = arith.addf %50, %53 : vector<1x256xf32>
    %55 = math.rsqrt %54 : vector<1x256xf32>
    %56 = arith.mulf %36, %55 : vector<1x256xf32>
    %57 = vector.broadcast %56 : vector<1x256xf32> to vector<2x256xf32>
    %58 = arith.mulf %52, %57 : vector<2x256xf32>
    %59 = vector.broadcast %37 : vector<1x256xf32> to vector<2x256xf32>
    %60 = arith.addf %58, %59 : vector<2x256xf32>
    %cst_27 = arith.constant 2.000000e-01 : f32
    %61 = vector.broadcast %cst_27 : f32 to vector<2x256xf32>
    %62 = arith.mulf %61, %60 : vector<2x256xf32>
    %63 = arith.maximumf %60, %62 : vector<2x256xf32>
    %c0_28 = arith.constant 0 : index
    %c0_29 = arith.constant 0 : index
    %64 = vector.load %arg9[%c0_28, %c0_29] : memref<256x40xf32, #tpu.memory_space<vmem>>, vector<256x40xf32>
    %cst_30 = arith.constant dense<0.000000e+00> : vector<2x40xf32>
    %65 = tpu.matmul %63, %64, %cst_30 {dimension_numbers = #tpu.dot_dimension_numbers<[1], [0], [0], [1], [0, 0, 1, 1], [], []>} : vector<2x256xf32>, vector<256x40xf32>, vector<2x40xf32> -> vector<2x40xf32>
    %c0_31 = arith.constant 0 : index
    %c0_32 = arith.constant 0 : index
    %66 = vector.load %arg10[%c0_31, %c0_32] : memref<1x40xf32, #tpu.memory_space<vmem>>, vector<1x40xf32>
    %67 = vector.broadcast %66 : vector<1x40xf32> to vector<2x40xf32>
    %68 = arith.addf %65, %67 : vector<2x40xf32>
    %c0_33 = arith.constant 0 : index
    %c0_34 = arith.constant 0 : index
    %69 = vector.load %arg11[%c0_33, %c0_34] : memref<2x40xf32, #tpu.memory_space<vmem>>, vector<2x40xf32>
    tpu.vector_store %arg11[%c0_33, %c0_34], %68 {strides = array<i32>} : memref<2x40xf32, #tpu.memory_space<vmem>>, vector<2x40xf32>,
    return
  }
  func.func @transform_0(%arg0: i32) -> (i32, i32) {
    %c0_i32 = arith.constant 0 : i32
    %c0_i32_0 = arith.constant 0 : i32
    %c0_i32_1 = arith.constant 0 : i32
    return %c0_i32, %c0_i32_0 : i32, i32
  }
  func.func @transform_1(%arg0: i32) -> (i32, i32) {
    %c0_i32 = arith.constant 0 : i32
    %c0_i32_0 = arith.constant 0 : i32
    %c0_i32_1 = arith.constant 0 : i32
    return %c0_i32, %c0_i32_0 : i32, i32
  }
  func.func @transform_2(%arg0: i32) -> (i32, i32) {
    %c0_i32 = arith.constant 0 : i32
    %c0_i32_0 = arith.constant 0 : i32
    %c0_i32_1 = arith.constant 0 : i32
    return %c0_i32, %c0_i32_0 : i32, i32
  }
  func.func @transform_3(%arg0: i32) -> (i32, i32) {
    %c0_i32 = arith.constant 0 : i32
    %c0_i32_0 = arith.constant 0 : i32
    %c0_i32_1 = arith.constant 0 : i32
    return %c0_i32, %c0_i32_0 : i32, i32
  }
  func.func @transform_4(%arg0: i32) -> (i32, i32) {
    %c0_i32 = arith.constant 0 : i32
    %c0_i32_0 = arith.constant 0 : i32
    %c0_i32_1 = arith.constant 0 : i32
    return %c0_i32, %c0_i32_0 : i32, i32
  }
  func.func @transform_5(%arg0: i32) -> (i32, i32) {
    %c0_i32 = arith.constant 0 : i32
    %c0_i32_0 = arith.constant 0 : i32
    %c0_i32_1 = arith.constant 0 : i32
    return %c0_i32, %c0_i32_0 : i32, i32
  }
  func.func @transform_6(%arg0: i32) -> (i32, i32) {
    %c0_i32 = arith.constant 0 : i32
    %c0_i32_0 = arith.constant 0 : i32
    %c0_i32_1 = arith.constant 0 : i32
    return %c0_i32, %c0_i32_0 : i32, i32
  }
  func.func @transform_7(%arg0: i32) -> (i32, i32) {
    %c0_i32 = arith.constant 0 : i32
    %c0_i32_0 = arith.constant 0 : i32
    %c0_i32_1 = arith.constant 0 : i32
    return %c0_i32, %c0_i32_0 : i32, i32
  }
  func.func @transform_8(%arg0: i32) -> (i32, i32) {
    %c0_i32 = arith.constant 0 : i32
    %c0_i32_0 = arith.constant 0 : i32
    %c0_i32_1 = arith.constant 0 : i32
    return %c0_i32, %c0_i32_0 : i32, i32
  }
  func.func @transform_9(%arg0: i32) -> (i32, i32) {
    %c0_i32 = arith.constant 0 : i32
    %c0_i32_0 = arith.constant 0 : i32
    %c0_i32_1 = arith.constant 0 : i32
    return %c0_i32, %c0_i32_0 : i32, i32
  }
  func.func @transform_10(%arg0: i32) -> (i32, i32) {
    %c0_i32 = arith.constant 0 : i32
    %c0_i32_0 = arith.constant 0 : i32
    %c0_i32_1 = arith.constant 0 : i32
    return %c0_i32, %c0_i32_0 : i32, i32
  }
}

</mosaic_0001>

<bundles_post_ra>
// kernel: _lambda_.20
= control target key start
LH: loop header
LB: loop body
LE: loop exit
PB: predicated region body
PF: predicated region fallthrough
CT: control target
= control target key end

     0   :  { %vm34_vm0 = vcmask 1040384   ;;  %vm35_vm1 = vcmask 1041408   ;;  %vm27_vm2 = vcmask 23552   ;;  %v114_v1 = vmov 65535   ;;  %s151_s1 = inlined_call_operand.vmem [shape: bf16[3,128], index: 1, kind: input, shape index: {}]   ;;  %s152_s0 = inlined_call_operand.vmem [shape: bf16[32,3], index: 0, kind: input, shape index: {}]   ;;  %s153_s2 = inlined_call_operand.vmem [shape: f32[32,128], index: 2, kind: output, shape index: {}]  }
   0x1   :  { %v16_v0 = vld [vmem:[%s151_s1] sm:$0x3]  ;;  %v36_v2 = vsel %vm34_vm0, 4294967295, %v114_v1  ;;  %v113_v6 = vld [vmem:[%s152_s0 + $0x8] sm:$0xff]  }
   0x2   :  { %v112_v3 = vld [vmem:[%s152_s0] sm:$0xff]   ;;  %v37_v4 = vsel %vm35_vm1, %v36_v2, 0 }
   0x3   :  { %v39_v5 = vand.u32 %v37_v4, %v16_v0  ;;  %107 = vmatprep.mubr.msk.bf16.mxu0 %vm27_vm2, %v112_v3 }
   0x5   :  { %105 = vmatprep.subr.bf16.mxu0 %v39_v5 }
   0x6   :  { %106 = vmatpush3.bf16.msra.mxu0 %v39_v5 }
   0x9   :  { %108 = vmatmul.mubr.msk.bf16.vlgmr.msra.gmra.mrb[0].mxu0 %vm27_vm2, %v113_v6 }
  0xdc   :  { %v109_v7 = vpop.f32.mrb[0].mxu0 }
  0xdd   :  { %92 = vst [vmem:[%s153_s2 + $0x10] sm:$0xff] %v109_v7  ;;  %v75_v8 = vpop.f32.mrb[1].mxu0 }
  0xde   :  { %90 = vst [vmem:[%s153_s2] sm:$0xff] %v75_v8  ;;  %v110_v9 = vpop.f32.mrb[2].mxu0 }
  0xdf   :  { %93 = vst [vmem:[%s153_s2 + $0x18] sm:$0xff] %v110_v9  ;;  %v78_v10 = vpop.f32.mrb[3].mxu0 }
  0xe0   :  { %91 = vst [vmem:[%s153_s2 + $0x8] sm:$0xff] %v78_v10 }

// kernel: _lambda_.19
= control target key start
LH: loop header
LB: loop body
LE: loop exit
PB: predicated region body
PF: predicated region fallthrough
CT: control target
= control target key end

     0   :  { %s361_s6 = smov 0   ;;  %s391_s0 = inlined_call_operand.vmem [shape: f32[2,16,3], index: 0, kind: input, shape index: {}]   ;;  %s392_s1 = inlined_call_operand.vmem [shape: f32[2,16,16], index: 1, kind: output, shape index: {}]  }
   0x1 LB: > { %s301_s7 = sadd.s32 4294967295, %s349_s6   ;;  %p305_p0 = scmp.ge.s32.totalorder %s349_s6, 1  ;;  %s349_s6 = sphi %s361_s6, %s11_s6  }
   0x2   : > { %p87_p1 = scmp.lt.s32.totalorder %s349_s6, 3 }
   0x4   : > { %p88_p2 = pnand %p305_p0, %p87_p1 }
   0x5   : > { %p107_p3 = scmp.lt.s32.totalorder (!%p88_p2), %s301_s7, 1  ;;  %vm119_vm0 = vcmask (!%p88_p2), 23552   ;;  %v215_v7 = vlaneseq (!%p88_p2)  ;;  %vm226_vm2 = vcmask (!%p88_p2), 130112   ;;  %vm243_vm3 = vcmask (!%p88_p2), 130048  }
   0x6   : > { %91 = sbr.rel (%p88_p2) target bundleno = 247 (0xf7), region = 24  ;;  %vm330_vm1 = vmpackc.low (!%p88_p2), %vm119_vm0, %vm119_vm0 }
   0x7   : > { %v216_v8 = vand.u32 (!%p88_p2), 127, %v215_v7  ;;  %v218_v10 = vshrl.u32 (!%p88_p2), %v215_v7, 7 }
   0x9   : > { %v221_v11 = vadd.s32 (!%p88_p2), 4294967288, %v216_v8  ;;  %v219_v12 = vsub.s32 (!%p88_p2), %v216_v8, %v218_v10 }
   0xb   : > { %v224_v13 = vsub.s32 (!%p88_p2), %v221_v11, %v218_v10 }
   0xd   : > { %s394_s7 = smov (!%p107_p3, %s301_s7), 1 }
   0xe   : > { %s316_s8 = sshll.u32 %s394_s7, 4 }
   0xf   : > { %s111_s11 = scalar_lea.vmem %s391_s0, %s316_s8  ;;  %s116_s14 = scalar_lea.vmem %s392_s1, %s316_s8 }
  0x10   : > { %v117_v0 = vld [vmem:[%s111_s11] sm:$0xff]  ;;  %v118_v1 = vld [vmem:[%s111_s11 + $0x8] sm:$0xff] }
  0x11   : > { %v329_v2 = vpack.c.bf16 %v118_v1, %v117_v0  ;;  %326 = vmatprep.mubr.msk.f32.mxu0 %vm119_vm0, %v117_v0  ;;  %v201_v3 = vmul.f32 %v117_v0, %v117_v0  ;;  %v202_v4 = vmul.f32 %v118_v1, %v118_v1 }
  0x13   : > { %331 = vmatprep.subr.msk.bf16.mxu0 %vm330_vm1, %v329_v2  ;;  %v203_v5 = vsel %vm119_vm0, %v201_v3, 0.0  ;;  %v206_v6 = vsel %vm119_vm0, %v202_v4, 0.0 }
  0x14   : > { %334 = vmatpush3.bf16.xpose.msk.msra.mxu0 %vm330_vm1, %v329_v2  ;;  %204 = vadd.xlane.f32.xlu0 %v203_v5 }
  0x18   : > { %207 = vadd.xlane.f32.xlu0 %v206_v6 }
  0x1b   : > { %327 = vmatmul.mubr.msk.f32.vlgmr.msra.gmra.mrb[0].mxu0 %vm119_vm0, %v118_v1 }
  0xa1   : > { %v205_v9 = vpop.xlane.xlu0 %204 }
  0xa2   : > { %v220_v15 = vrot.slane %v205_v9, %v219_v12 }
  0xa5   : > { %v208_v14 = vpop.xlane.xlu0 %207 }
  0xa6   : > { %v225_v16 = vrot.slane %v208_v14, %v224_v13 }
  0xa8   : > { %v227_v22 = vsel %vm226_vm2, %v225_v16, %v220_v15 }
  0xee   : > { %v328_v17 = vpop.f32.mrb[0].mxu0 }
  0xef   : > { %v210_v18 = vmul.f32 2.0, %v328_v17  ;;  %v192_v19 = vpop.f32.mrb[1].mxu0 }
  0xf0   : > { %v209_v20 = vmul.f32 2.0, %v192_v19 }
  0xf1   : > { %v212_v21 = vsub.f32 %v210_v18, %v208_v14 }
  0xf2   : > { %v211_v23 = vsub.f32 %v209_v20, %v205_v9 }
  0xf3   : > { %v242_v24 = vsub.f32 %v212_v21, %v227_v22 }
  0xf4   : > { %v241_v25 = vsub.f32 %v211_v23, %v227_v22 }
  0xf5   : > { %245 = vst.msk [vmem:[%s116_s14 + $0x8] sm:$0xff] %vm243_vm3, %v242_v24 }
  0xf6   : > { %244 = vst.msk [vmem:[%s116_s14] sm:$0xff] %vm243_vm3, %v241_v25 }
  0xf7 PF: > { %s11_s6 = sadd.s32 1, %s349_s6  }
  0xf8   : > { %p8_p4 = scmp.ge.s32.totalorder %s11_s6, 4  }
  0xfa   :  { %10 = sbr.rel (!%p8_p4) target bundleno = 1 (0x1), region = 54 }

// kernel: _lambda_.21
= control target key start
LH: loop header
LB: loop body
LE: loop exit
PB: predicated region body
PF: predicated region fallthrough
CT: control target
= control target key end

     0   :  { %vm15_vm0 = vcmask 517120   ;;  %v633_v0 = vmov 0.0   ;;  %v634_v1 = vmov 1966171168   ;;  %v61_v3 = vlaneseq  ;;  %s1047_s2 = inlined_call_operand.vmem [shape: f32[2,64], index: 2, kind: output, shape index: {}]   ;;  %s1048_s1 = inlined_call_operand.vmem [shape: f32[32,64], index: 1, kind: input, shape index: {}]   ;;  %s1049_s0 = inlined_call_operand.vmem [shape: f32[32,4,64], index: 0, kind: input, shape index: {}]  }
   0x1   :  { %16 = vst.msk [vmem:[%s1047_s2] sm:$0x3] %vm15_vm0, %v633_v0  ;;  %v59_v2 = vunpack.c.l.s4 %v634_v1  ;;  %v49_v7 = vld [vmem:[%s1048_s1] sm:$0xff]  ;;  %v50_v17 = vld [vmem:[%s1048_s1 + $0x8] sm:$0xff]  ;;  %vm446_vm1 = vcmask 519168   ;;  %v51_v46 = vld [vmem:[%s1048_s1 + $0x10] sm:$0xff] }
   0x2   :  { %v62_v5 = vshrl.u32 %v61_v3, 7  ;;  %v57_v9 = vcombine.high %v49_v7, %v49_v7  ;;  %v17_v23 = vld [vmem:[%s1049_s0] sm:$0xf]  ;;  %v18_v24 = vld [vmem:[%s1049_s0 + $0x4] sm:$0xf]  ;;  %v106_v37 = vcombine.high %v50_v17, %v50_v17  ;;  %v155_v53 = vcombine.high %v51_v46, %v51_v46  ;;  %v52_v60 = vld [vmem:[%s1048_s1 + $0x18] sm:$0xff] }
   0x3   :  { %v60_v4 = vunpack.c.0.s8 %v59_v2  ;;  %v19_v25 = vld [vmem:[%s1049_s0 + $0x8] sm:$0xf]  ;;  %v20_v29 = vld [vmem:[%s1049_s0 + $0xc] sm:$0xf]  ;;  %v21_v35 = vld [vmem:[%s1049_s0 + $0x10] sm:$0xf]  ;;  %v204_v63 = vcombine.high %v52_v60, %v52_v60 }
   0x4   :  { %v662_v15 = vsub.s32 0, %v62_v5  ;;  %v22_v44 = vld [vmem:[%s1049_s0 + $0x14] sm:$0xf]  ;;  %v23_v51 = vld [vmem:[%s1049_s0 + $0x18] sm:$0xf]  ;;  %vm517_vm2 = vcmask 516096  }
   0x5   :  { %v653_v6 = vsub.s32 %v60_v4, %v62_v5  ;;  %v24_v59 = vld [vmem:[%s1049_s0 + $0x1c] sm:$0xf]  ;;  %v25_v3 = vld [vmem:[%s1049_s0 + $0x20] sm:$0xf] }
   0x7   :  { %v64_v8 = vrot.slane %v49_v7, %v653_v6  ;;  %v71_v12 = vrot.slane %v57_v9, %v653_v6  ;;  %v113_v27 = vrot.slane %v50_v17, %v653_v6  ;;  %v120_v52 = vrot.slane %v106_v37, %v653_v6 }
   0x8   :  { %v162_v7 = vrot.slane %v51_v46, %v653_v6  ;;  %v169_v9 = vrot.slane %v155_v53, %v653_v6 }
   0x9   :  { %v72_v10 = vcombine.high %v64_v8, %v64_v8  ;;  %v80_v11 = vrot.slane %v64_v8, %v653_v6  ;;  %v73_v16 = vcombine.high %v71_v12, %v71_v12  ;;  %v87_v19 = vrot.slane %v71_v12, %v653_v6 }
   0xa   :  { %v121_v38 = vcombine.high %v113_v27, %v113_v27  ;;  %v129_v47 = vrot.slane %v113_v27, %v653_v6  ;;  %v122_v4 = vcombine.high %v120_v52, %v120_v52  ;;  %v28_v27 = vld [vmem:[%s1049_s0 + $0x2c] sm:$0xf]  ;;  %v791_v46 = vrot.slane %v169_v9, %v653_v6 }
   0xb   :  { %v94_v13 = vrot.slane %v72_v10, %v653_v6  ;;  %v102_v14 = vcombine.high %v80_v11, %v80_v11  ;;  %v256_v20 = vrot.slane %v80_v11, %v662_v15  ;;  %v101_v26 = vrot.slane %v73_v16, %v653_v6 }
   0xc   :  { %v103_v30 = vcombine.high %v87_v19, %v87_v19  ;;  %v272_v31 = vrot.slane %v87_v19, %v662_v15  ;;  %v143_v55 = vrot.slane %v121_v38, %v653_v6  ;;  %v151_v61 = vcombine.high %v129_v47, %v129_v47 }
   0xd   :  { %v104_v18 = vcombine.high %v94_v13, %v94_v13  ;;  %v260_v21 = vrot.slane %v94_v13, %v662_v15  ;;  %v264_v22 = vrot.slane %v102_v14, %v662_v15  ;;  %v687_v32 = vadd.f32 %v256_v20, %v17_v23  ;;  %v26_v13 = vld [vmem:[%s1049_s0 + $0x24] sm:$0xf] }
   0xe   :  { %v105_v36 = vcombine.high %v101_v26, %v101_v26  ;;  %v276_v39 = vrot.slane %v101_v26, %v662_v15  ;;  %v280_v48 = vrot.slane %v103_v30, %v662_v15  ;;  %v713_v49 = vadd.f32 %v272_v31, %v21_v35 }
   0xf   :  { %v268_v28 = vrot.slane %v104_v18, %v662_v15  ;;  %v689_v33 = vadd.f32 %v260_v21, %v18_v24  ;;  %v691_v34 = vadd.f32 %v264_v22, %v19_v25  ;;  %v447_v41 = vsel %vm446_vm1, %v687_v32, 0.0  ;;  %v27_v18 = vld [vmem:[%s1049_s0 + $0x28] sm:$0xf] }
  0x10   :  { %v284_v56 = vrot.slane %v105_v36, %v662_v15  ;;  %v723_v57 = vadd.f32 %v276_v39, %v22_v44  ;;  %v454_v58 = vsel %vm446_vm1, %v713_v49, 0.0  ;;  %v288_v0 = vrot.slane %v129_v47, %v662_v15  ;;  %v29_v39 = vld [vmem:[%s1049_s0 + $0x30] sm:$0xf] }
  0x11   :  { %v697_v40 = vadd.f32 %v268_v28, %v20_v29  ;;  %v448_v42 = vsel %vm446_vm1, %v689_v33, 0.0  ;;  %v450_v43 = vsel %vm446_vm1, %v691_v34, 0.0  ;;  %v734_v1 = vadd.f32 %v280_v48, %v23_v51 }
  0x12   :  { %v449_v45 = vadd.f32 %v448_v42, %v447_v41  ;;  %v456_v2 = vsel %vm446_vm1, %v723_v57, 0.0  ;;  %v153_v5 = vcombine.high %v143_v55, %v143_v55  ;;  %v292_v10 = vrot.slane %v143_v55, %v662_v15 }
  0x13   :  { %v452_v50 = vsel %vm446_vm1, %v697_v40, 0.0  ;;  %v744_v11 = vadd.f32 %v284_v56, %v24_v59  ;;  %v458_v12 = vsel %vm446_vm1, %v734_v1, 0.0  ;;  %v136_v14 = vrot.slane %v120_v52, %v653_v6 }
  0x14   :  { %v451_v54 = vadd.f32 %v450_v43, %v449_v45  ;;  %v296_v16 = vrot.slane %v151_v61, %v662_v15  ;;  %v757_v19 = vrot.slane %v52_v60, %v653_v6  ;;  %v760_v20 = vrot.slane %v204_v63, %v653_v6  ;;  %v31_v60 = vld [vmem:[%s1049_s0 + $0x38] sm:$0xf] }
  0x15   :  { %v762_v21 = vadd.f32 %v288_v0, %v25_v3  ;;  %v460_v22 = vsel %vm446_vm1, %v744_v11, 0.0  ;;  %v150_v23 = vrot.slane %v122_v4, %v653_v6  ;;  %v152_v24 = vcombine.high %v136_v14, %v136_v14 }
  0x16   :  { %v453_v62 = vadd.f32 %v452_v50, %v451_v54  ;;  %v300_v25 = vrot.slane %v153_v5, %v662_v15  ;;  %v170_v28 = vcombine.high %v162_v7, %v162_v7  ;;  %v171_v29 = vcombine.high %v169_v9, %v169_v9  ;;  %v32_v5 = vld [vmem:[%s1049_s0 + $0x3c] sm:$0xf] }
  0x17   :  { %v771_v30 = vadd.f32 %v292_v10, %v26_v13  ;;  %v462_v31 = vsel %vm446_vm1, %v762_v21, 0.0  ;;  %v154_v35 = vcombine.high %v150_v23, %v150_v23  ;;  %v304_v36 = vrot.slane %v136_v14, %v662_v15 }
  0x18   :  { %v455_v8 = vadd.f32 %v454_v58, %v453_v62  ;;  %v776_v37 = vadd.f32 %v296_v16, %v27_v18  ;;  %v520_v42 = vmul.f32 %v687_v32, %v687_v32  ;;  %v521_v43 = vmul.f32 %v689_v33, %v689_v33  ;;  %v33_v16 = vld [vmem:[%s1049_s0 + $0x40] sm:$0xf] }
  0x19   :  { %v464_v41 = vsel %vm446_vm1, %v771_v30, 0.0  ;;  %v522_v44 = vmul.f32 %v691_v34, %v691_v34  ;;  %v178_v45 = vrot.slane %v162_v7, %v653_v6  ;;  %v793_v47 = vadd.f32 %v300_v25, %v28_v27  ;;  %v30_v34 = vld [vmem:[%s1049_s0 + $0x34] sm:$0xf]  ;;  %v34_v27 = vld [vmem:[%s1049_s0 + $0x44] sm:$0xf] }
  0x1a   :  { %v457_v17 = vadd.f32 %v456_v2, %v455_v8  ;;  %v192_v50 = vrot.slane %v170_v28, %v653_v6  ;;  %v308_v51 = vrot.slane %v150_v23, %v662_v15  ;;  %v466_v32 = vsel %vm446_vm1, %v776_v37, 0.0 }
  0x1b   :  { %v523_v33 = vmul.f32 %v697_v40, %v697_v40  ;;  %v312_v52 = vrot.slane %v152_v24, %v662_v15  ;;  %v805_v53 = vadd.f32 %v304_v36, %v29_v39  ;;  %v468_v55 = vsel %vm446_vm1, %v793_v47, 0.0 }
  0x1c   :  { %v459_v26 = vadd.f32 %v458_v12, %v457_v17  ;;  %v524_v56 = vmul.f32 %v713_v49, %v713_v49  ;;  %v552_v58 = vsel %vm446_vm1, %v520_v42, 0.0  ;;  %v553_v59 = vsel %vm446_vm1, %v521_v43, 0.0 }
  0x1d   :  { %v555_v40 = vsel %vm446_vm1, %v522_v44, 0.0  ;;  %v818_v61 = vrot.slane %v171_v29, %v653_v6  ;;  %v316_v62 = vrot.slane %v154_v35, %v662_v15  ;;  %v554_v0 = vadd.f32 %v553_v59, %v552_v58  ;;  %v37_v59 = vld [vmem:[%s1049_s0 + $0x50] sm:$0xf] }
  0x1e   :  { %v461_v38 = vadd.f32 %v460_v22, %v459_v26  ;;  %v821_v2 = vadd.f32 %v308_v51, %v30_v34  ;;  %v470_v49 = vsel %vm446_vm1, %v805_v53, 0.0  ;;  %v525_v3 = vmul.f32 %v723_v57, %v723_v57 }
  0x1f   :  { %v557_v4 = vsel %vm446_vm1, %v523_v33, 0.0  ;;  %v200_v7 = vcombine.high %v178_v45, %v178_v45  ;;  %v320_v8 = vrot.slane %v178_v45, %v662_v15  ;;  %v556_v10 = vadd.f32 %v555_v40, %v554_v0 }
  0x20   :  { %v463_v48 = vadd.f32 %v462_v31, %v461_v38  ;;  %v832_v12 = vadd.f32 %v312_v52, %v31_v60  ;;  %v472_v13 = vsel %vm446_vm1, %v821_v2, 0.0  ;;  %v526_v14 = vmul.f32 %v734_v1, %v734_v1 }
  0x21   :  { %v559_v57 = vsel %vm446_vm1, %v524_v56, 0.0  ;;  %v202_v17 = vcombine.high %v192_v50, %v192_v50  ;;  %v324_v18 = vrot.slane %v192_v50, %v662_v15  ;;  %v558_v23 = vadd.f32 %v557_v4, %v556_v10 }
  0x22   :  { %v465_v54 = vadd.f32 %v464_v41, %v463_v48  ;;  %v843_v24 = vadd.f32 %v316_v62, %v32_v5  ;;  %v474_v25 = vsel %vm446_vm1, %v832_v12, 0.0  ;;  %v527_v26 = vmul.f32 %v744_v11, %v744_v11  ;;  %v35_v41 = vld [vmem:[%s1049_s0 + $0x48] sm:$0xf] }
  0x23   :  { %v561_v1 = vsel %vm446_vm1, %v525_v3, 0.0  ;;  %v219_v28 = vcombine.high %v757_v19, %v757_v19  ;;  %v328_v29 = vrot.slane %v200_v7, %v662_v15  ;;  %v560_v35 = vadd.f32 %v559_v57, %v558_v23  ;;  %v38_v3 = vld [vmem:[%s1049_s0 + $0x54] sm:$0xf]  ;;  %v40_v23 = vld [vmem:[%s1049_s0 + $0x5c] sm:$0xf] }
  0x24   :  { %v467_v63 = vadd.f32 %v466_v32, %v465_v54  ;;  %v856_v36 = vadd.f32 %v320_v8, %v33_v16  ;;  %v476_v38 = vsel %vm446_vm1, %v843_v24, 0.0  ;;  %v528_v11 = vmul.f32 %v762_v21, %v762_v21  ;;  %v36_v32 = vld [vmem:[%s1049_s0 + $0x4c] sm:$0xf] }
  0x25   :  { %v563_v39 = vsel %vm446_vm1, %v526_v14, 0.0  ;;  %v220_v42 = vcombine.high %v760_v20, %v760_v20  ;;  %v332_v43 = vrot.slane %v202_v17, %v662_v15  ;;  %v562_v45 = vadd.f32 %v561_v1, %v560_v35  ;;  %v41_v35 = vld [vmem:[%s1049_s0 + $0x60] sm:$0xf] }
  0x26   :  { %v469_v9 = vadd.f32 %v468_v55, %v467_v63  ;;  %v869_v48 = vadd.f32 %v324_v18, %v34_v27  ;;  %v478_v50 = vsel %vm446_vm1, %v856_v36, 0.0  ;;  %v529_v21 = vmul.f32 %v771_v30, %v771_v30 }
  0x27   :  { %v565_v51 = vsel %vm446_vm1, %v527_v26, 0.0  ;;  %v201_v33 = vcombine.high %v791_v46, %v791_v46  ;;  %v336_v34 = vrot.slane %v791_v46, %v662_v15  ;;  %v564_v54 = vadd.f32 %v563_v39, %v562_v45 }
  0x28   :  { %v471_v22 = vadd.f32 %v470_v49, %v469_v9  ;;  %v883_v55 = vadd.f32 %v328_v29, %v35_v41  ;;  %v480_v56 = vsel %vm446_vm1, %v869_v48, 0.0  ;;  %v530_v30 = vmul.f32 %v776_v37, %v776_v37 }
  0x29   :  { %v567_v58 = vsel %vm446_vm1, %v528_v11, 0.0  ;;  %v203_v40 = vcombine.high %v818_v61, %v818_v61  ;;  %v340_v46 = vrot.slane %v818_v61, %v662_v15  ;;  %v566_v62 = vadd.f32 %v565_v51, %v564_v54 }
  0x2a   :  { %v473_v31 = vadd.f32 %v472_v13, %v471_v22  ;;  %v897_v63 = vadd.f32 %v332_v43, %v36_v32  ;;  %v482_v0 = vsel %vm446_vm1, %v883_v55, 0.0  ;;  %v531_v37 = vmul.f32 %v793_v47, %v793_v47  ;;  %v39_v13 = vld [vmem:[%s1049_s0 + $0x58] sm:$0xf] }
  0x2b   :  { %v569_v49 = vsel %vm446_vm1, %v529_v21, 0.0  ;;  %v227_v4 = vrot.slane %v757_v19, %v653_v6  ;;  %v344_v61 = vrot.slane %v201_v33, %v662_v15  ;;  %v568_v7 = vadd.f32 %v567_v58, %v566_v62 }
  0x2c   :  { %v475_v44 = vadd.f32 %v474_v25, %v473_v31  ;;  %v910_v8 = vadd.f32 %v336_v34, %v37_v59  ;;  %v484_v9 = vsel %vm446_vm1, %v897_v63, 0.0  ;;  %v532_v47 = vmul.f32 %v805_v53, %v805_v53 }
  0x2d   :  { %v571_v10 = vsel %vm446_vm1, %v530_v30, 0.0  ;;  %v241_v19 = vrot.slane %v219_v28, %v653_v6  ;;  %v348_v14 = vrot.slane %v203_v40, %v662_v15  ;;  %v570_v16 = vadd.f32 %v569_v49, %v568_v7 }
  0x2e   :  { %v477_v52 = vadd.f32 %v476_v38, %v475_v44  ;;  %v922_v17 = vadd.f32 %v340_v46, %v38_v3  ;;  %v486_v18 = vsel %vm446_vm1, %v910_v8, 0.0  ;;  %v533_v53 = vmul.f32 %v821_v2, %v821_v2 }
  0x2f   :  { %v573_v22 = vsel %vm446_vm1, %v531_v37, 0.0  ;;  %v249_v25 = vcombine.high %v227_v4, %v227_v4  ;;  %v352_v26 = vrot.slane %v227_v4, %v662_v15  ;;  %v572_v27 = vadd.f32 %v571_v10, %v570_v16 }
  0x30   :  { %v479_v60 = vadd.f32 %v478_v50, %v477_v52  ;;  %v933_v28 = vadd.f32 %v344_v61, %v39_v13  ;;  %v488_v29 = vsel %vm446_vm1, %v922_v17, 0.0  ;;  %v534_v31 = vmul.f32 %v832_v12, %v832_v12  ;;  %v42_v50 = vld [vmem:[%s1049_s0 + $0x64] sm:$0xf] }
  0x31   :  { %v575_v2 = vsel %vm446_vm1, %v532_v47, 0.0  ;;  %v251_v38 = vcombine.high %v241_v19, %v241_v19  ;;  %v356_v11 = vrot.slane %v241_v19, %v662_v15  ;;  %v574_v41 = vadd.f32 %v573_v22, %v572_v27 }
  0x32   :  { %v481_v5 = vadd.f32 %v480_v56, %v479_v60  ;;  %v944_v43 = vadd.f32 %v348_v14, %v40_v23  ;;  %v490_v44 = vsel %vm446_vm1, %v933_v28, 0.0  ;;  %v535_v45 = vmul.f32 %v843_v24, %v843_v24  ;;  %v43_v56 = vld [vmem:[%s1049_s0 + $0x68] sm:$0xf] }
  0x33   :  { %v577_v12 = vsel %vm446_vm1, %v533_v53, 0.0  ;;  %v234_v21 = vrot.slane %v760_v20, %v653_v6  ;;  %v360_v51 = vrot.slane %v249_v25, %v662_v15  ;;  %v576_v33 = vadd.f32 %v575_v2, %v574_v41 }
  0x34   :  { %v483_v57 = vadd.f32 %v482_v0, %v481_v5  ;;  %v957_v34 = vadd.f32 %v352_v26, %v41_v35  ;;  %v492_v52 = vsel %vm446_vm1, %v944_v43, 0.0  ;;  %v536_v24 = vmul.f32 %v856_v36, %v856_v36  ;;  %v44_v0 = vld [vmem:[%s1049_s0 + $0x6c] sm:$0xf] }
  0x35   :  { %v579_v54 = vsel %vm446_vm1, %v534_v31, 0.0  ;;  %v248_v30 = vrot.slane %v220_v42, %v653_v6  ;;  %v364_v58 = vrot.slane %v251_v38, %v662_v15  ;;  %v578_v40 = vadd.f32 %v577_v12, %v576_v33 }
  0x36   :  { %v485_v1 = vadd.f32 %v484_v9, %v483_v57  ;;  %v438_v46 = vadd.f32 %v356_v11, %v42_v50  ;;  %v494_v60 = vsel %vm446_vm1, %v957_v34, 0.0  ;;  %v537_v36 = vmul.f32 %v869_v48, %v869_v48  ;;  %v45_v48 = vld [vmem:[%s1049_s0 + $0x70] sm:$0xf] }
  0x37   :  { %v581_v62 = vsel %vm446_vm1, %v535_v45, 0.0  ;;  %v250_v37 = vcombine.high %v234_v21, %v234_v21  ;;  %v368_v6 = vrot.slane %v234_v21, %v662_v15  ;;  %v580_v42 = vadd.f32 %v579_v54, %v578_v40 }
  0x38   :  { %v487_v39 = vadd.f32 %v486_v18, %v485_v1  ;;  %v439_v49 = vadd.f32 %v360_v51, %v43_v56  ;;  %v496_v3 = vsel %vm446_vm1, %v438_v46, 0.0  ;;  %v538_v4 = vmul.f32 %v883_v55, %v883_v55  ;;  %v46_v55 = vld [vmem:[%s1049_s0 + $0x74] sm:$0xf] }
  0x39   :  { %v583_v61 = vsel %vm446_vm1, %v536_v24, 0.0  ;;  %v252_v5 = vcombine.high %v248_v30, %v248_v30  ;;  %v372_v7 = vrot.slane %v248_v30, %v662_v15  ;;  %v582_v47 = vadd.f32 %v581_v62, %v580_v42 }
  0x3a   :  { %v489_v32 = vadd.f32 %v488_v29, %v487_v39  ;;  %v440_v10 = vadd.f32 %v364_v58, %v44_v0  ;;  %v498_v13 = vsel %vm446_vm1, %v439_v49, 0.0  ;;  %v539_v19 = vmul.f32 %v897_v63, %v897_v63  ;;  %v47_v63 = vld [vmem:[%s1049_s0 + $0x78] sm:$0xf] }
  0x3b   :  { %v585_v14 = vsel %vm446_vm1, %v537_v36, 0.0  ;;  %v376_v57 = vrot.slane %v250_v37, %v662_v15  ;;  %v584_v18 = vadd.f32 %v583_v61, %v582_v47  ;;  %v441_v53 = vadd.f32 %v368_v6, %v45_v48 }
  0x3c   :  { %v491_v59 = vadd.f32 %v490_v44, %v489_v32  ;;  %v500_v22 = vsel %vm446_vm1, %v440_v10, 0.0  ;;  %v540_v23 = vmul.f32 %v910_v8, %v910_v8  ;;  %v587_v25 = vsel %vm446_vm1, %v538_v4, 0.0  ;;  %v48_v8 = vld [vmem:[%s1049_s0 + $0x7c] sm:$0xf] }
  0x3d   :  { %v380_v26 = vrot.slane %v252_v5, %v662_v15  ;;  %v586_v27 = vadd.f32 %v585_v14, %v584_v18  ;;  %v442_v29 = vadd.f32 %v372_v7, %v46_v55  ;;  %v502_v31 = vsel %vm446_vm1, %v441_v53, 0.0 }
  0x3e   :  { %v493_v20 = vadd.f32 %v492_v52, %v491_v59  ;;  %v541_v2 = vmul.f32 %v922_v17, %v922_v17  ;;  %v589_v35 = vsel %vm446_vm1, %v539_v19, 0.0  ;;  %v443_v39 = vadd.f32 %v376_v57, %v47_v63 }
  0x3f   :  { %v588_v11 = vadd.f32 %v587_v25, %v586_v27  ;;  %v504_v41 = vsel %vm446_vm1, %v442_v29, 0.0  ;;  %v542_v15 = vmul.f32 %v933_v28, %v933_v28  ;;  %v591_v44 = vsel %vm446_vm1, %v540_v23, 0.0 }
  0x40   :  { %v495_v9 = vadd.f32 %v494_v60, %v493_v20  ;;  %v444_v50 = vadd.f32 %v380_v26, %v48_v8  ;;  %v506_v17 = vsel %vm446_vm1, %v443_v39, 0.0  ;;  %v543_v21 = vmul.f32 %v944_v43, %v944_v43 }
  0x41   :  { %v590_v12 = vadd.f32 %v589_v35, %v588_v11  ;;  %v593_v51 = vsel %vm446_vm1, %v541_v2, 0.0  ;;  %v544_v24 = vmul.f32 %v957_v34, %v957_v34  ;;  %v595_v28 = vsel %vm446_vm1, %v542_v15, 0.0 }
  0x42   :  { %v497_v16 = vadd.f32 %v496_v3, %v495_v9  ;;  %v508_v52 = vsel %vm446_vm1, %v444_v50, 0.0  ;;  %v545_v30 = vmul.f32 %v438_v46, %v438_v46  ;;  %v597_v58 = vsel %vm446_vm1, %v543_v21, 0.0 }
  0x43   :  { %v592_v33 = vadd.f32 %v591_v44, %v590_v12  ;;  %v546_v60 = vmul.f32 %v439_v49, %v439_v49  ;;  %v599_v43 = vsel %vm446_vm1, %v544_v24, 0.0  ;;  %v547_v0 = vmul.f32 %v440_v10, %v440_v10  ;;  %v445_v10 = vld [vmem:[%s1047_s2] sm:$0x1] }
  0x44   :  { %v499_v1 = vadd.f32 %v498_v13, %v497_v16  ;;  %v601_v37 = vsel %vm446_vm1, %v545_v30, 0.0  ;;  %v548_v34 = vmul.f32 %v441_v53, %v441_v53  ;;  %v549_v46 = vmul.f32 %v442_v29, %v442_v29  ;;  %v519_v29 = vld [vmem:[%s1047_s2 + $0x1] sm:$0x1] }
  0x45   :  { %v594_v56 = vadd.f32 %v593_v51, %v592_v33  ;;  %v603_v42 = vsel %vm446_vm1, %v546_v60, 0.0  ;;  %v605_v61 = vsel %vm446_vm1, %v547_v0, 0.0  ;;  %v550_v49 = vmul.f32 %v443_v39, %v443_v39 }
  0x46   :  { %v501_v38 = vadd.f32 %v500_v22, %v499_v1  ;;  %v607_v7 = vsel %vm446_vm1, %v548_v34, 0.0  ;;  %v551_v13 = vmul.f32 %v444_v50, %v444_v50  ;;  %v609_v19 = vsel %vm446_vm1, %v549_v46, 0.0 }
  0x47   :  { %v596_v40 = vadd.f32 %v595_v28, %v594_v56  ;;  %v611_v57 = vsel %vm446_vm1, %v550_v49, 0.0 }
  0x48   :  { %v503_v45 = vadd.f32 %v502_v31, %v501_v38  ;;  %v613_v53 = vsel %vm446_vm1, %v551_v13, 0.0 }
  0x49   :  { %v598_v62 = vadd.f32 %v597_v58, %v596_v40 }
  0x4a   :  { %v505_v32 = vadd.f32 %v504_v41, %v503_v45 }
  0x4b   :  { %v600_v20 = vadd.f32 %v599_v43, %v598_v62 }
  0x4c   :  { %v507_v54 = vadd.f32 %v506_v17, %v505_v32 }
  0x4d   :  { %v602_v4 = vadd.f32 %v601_v37, %v600_v20 }
  0x4e   :  { %v509_v59 = vadd.f32 %v508_v52, %v507_v54 }
  0x4f   :  { %v604_v5 = vadd.f32 %v603_v42, %v602_v4 }
  0x50   :  { %v510_v36 = vrot.slane %v509_v59, 4 }
  0x51   :  { %v606_v47 = vadd.f32 %v605_v61, %v604_v5 }
  0x52   :  { %v511_v6 = vadd.f32 %v510_v36, %v509_v59 }
  0x53   :  { %v608_v55 = vadd.f32 %v607_v7, %v606_v47 }
  0x54   :  { %v512_v3 = vrot.slane %v511_v6, 2 }
  0x55   :  { %v610_v18 = vadd.f32 %v609_v19, %v608_v55 }
  0x56   :  { %v513_v48 = vadd.f32 %v512_v3, %v511_v6 }
  0x57   :  { %v612_v22 = vadd.f32 %v611_v57, %v610_v18 }
  0x58   :  { %v514_v9 = vrot.slane %v513_v48, 1 }
  0x59   :  { %v614_v23 = vadd.f32 %v613_v53, %v612_v22 }
  0x5a   :  { %v515_v14 = vadd.f32 %v514_v9, %v513_v48 }
  0x5b   :  { %v615_v25 = vrot.slane %v614_v23, 4 }
  0x5c   :  { %v516_v16 = vadd.f32 %v515_v14, %v445_v10 }
  0x5d   :  { %v616_v63 = vadd.f32 %v615_v25, %v614_v23 }
  0x5e   :  { %518 = vst.msk [vmem:[%s1047_s2] sm:$0x1] %vm517_vm2, %v516_v16 }
  0x5f   :  { %v617_v26 = vrot.slane %v616_v63, 2 }
  0x61   :  { %v618_v1 = vadd.f32 %v617_v26, %v616_v63 }
  0x63   :  { %v619_v27 = vrot.slane %v618_v1, 1 }
  0x65   :  { %v620_v31 = vadd.f32 %v619_v27, %v618_v1 }
  0x67   :  { %v621_v2 = vadd.f32 %v620_v31, %v519_v29 }
  0x69   :  { %622 = vst.msk [vmem:[%s1047_s2 + $0x1] sm:$0x1] %vm517_vm2, %v621_v2 }

// kernel: _lambda_.22
= control target key start
LH: loop header
LB: loop body
LE: loop exit
PB: predicated region body
PF: predicated region fallthrough
CT: control target
= control target key end

     0   :  { %v914_v0 = vmov 1966171168   ;;  %v64_v2 = vlaneseq  ;;  %vm602_vm0 = vcmask 519168   ;;  %vm859_vm1 = vcmask 1041409   ;;  %s1636_s1 = inlined_call_operand.vmem [shape: f32[32,64], index: 1, kind: input, shape index: {}]   ;;  %s1637_s2 = inlined_call_operand.vmem [shape: f32[2,64], index: 2, kind: input, shape index: {}]   ;;  %s1638_s0 = inlined_call_operand.vmem [shape: f32[32,4,64], index: 0, kind: input, shape index: {}]   ;;  %s1639_s3 = inlined_call_operand.vmem [shape: f32[1,64], index: 3, kind: input, shape index: {}]   ;;  %s1640_s4 = inlined_call_operand.vmem [shape: f32[1,64], index: 4, kind: input, shape index: {}]   ;;  %s1641_s5 = inlined_call_operand.vmem [shape: f32[32,64], index: 5, kind: output, shape index: {}]  }
   0x1   :  { %v62_v1 = vunpack.c.l.s4 %v914_v0  ;;  %v52_v5 = vld [vmem:[%s1636_s1] sm:$0xff]  ;;  %v53_v8 = vld [vmem:[%s1636_s1 + $0x8] sm:$0xff]  ;;  %v54_v9 = vld [vmem:[%s1636_s1 + $0x10] sm:$0xff]  ;;  %vm861_vm2 = vcmask 1042434   ;;  %vm863_vm3 = vcmask 1043459   ;;  %vm865_vm4 = vcmask 1044484  }
   0x2   :  { %v65_v4 = vshrl.u32 %v64_v2, 7  ;;  %v60_v6 = vcombine.high %v52_v5, %v52_v5  ;;  %v109_v10 = vcombine.high %v53_v8, %v53_v8  ;;  %v158_v11 = vcombine.high %v54_v9, %v54_v9  ;;  %v55_v12 = vld [vmem:[%s1636_s1 + $0x18] sm:$0xff]  ;;  %v448_v18 = vld [vmem:[%s1637_s2] sm:$0x1]  ;;  %v450_v23 = vld [vmem:[%s1637_s2 + $0x1] sm:$0x1] }
   0x3   :  { %v63_v3 = vunpack.c.0.s8 %v62_v1  ;;  %v207_v15 = vcombine.high %v55_v12, %v55_v12  ;;  %v965_v27 = vmul.f32 0.0078125, %v448_v18  ;;  %v451_v34 = vmul.f32 0.0078125, %v450_v23  ;;  %v20_v18 = vld [vmem:[%s1638_s0] sm:$0xf] }
   0x4   :  { %v969_v33 = vsub.s32 0, %v65_v4  ;;  %vm867_vm5 = vcmask 1045509   ;;  %vm869_vm6 = vcmask 1046534   ;;  %vm871_vm7 = vcmask 1047559  }
   0x5   :  { %v66_v7 = vsub.s32 %v63_v3, %v65_v4  ;;  %v452_v42 = vmul.f32 %v965_v27, %v965_v27  ;;  %vm898_vm8 = vcmask 523264  }
   0x7   :  { %v67_v13 = vrot.slane %v52_v5, %v66_v7  ;;  %v74_v14 = vrot.slane %v60_v6, %v66_v7  ;;  %v116_v16 = vrot.slane %v53_v8, %v66_v7  ;;  %v123_v17 = vrot.slane %v109_v10, %v66_v7 }
   0x8   :  { %v165_v19 = vrot.slane %v54_v9, %v66_v7  ;;  %v172_v20 = vrot.slane %v158_v11, %v66_v7  ;;  %v214_v25 = vrot.slane %v55_v12, %v66_v7  ;;  %v221_v26 = vrot.slane %v207_v15, %v66_v7 }
   0x9   :  { %v75_v21 = vcombine.high %v67_v13, %v67_v13  ;;  %v76_v22 = vcombine.high %v74_v14, %v74_v14  ;;  %v963_v24 = vrot.slane %v67_v13, %v66_v7  ;;  %v967_v28 = vrot.slane %v74_v14, %v66_v7 }
   0xa   :  { %v124_v29 = vcombine.high %v116_v16, %v116_v16  ;;  %v125_v30 = vcombine.high %v123_v17, %v123_v17  ;;  %v173_v31 = vcombine.high %v165_v19, %v165_v19  ;;  %v174_v32 = vcombine.high %v172_v20, %v172_v20 }
   0xb   :  { %v971_v35 = vrot.slane %v75_v21, %v66_v7  ;;  %v973_v36 = vrot.slane %v76_v22, %v66_v7  ;;  %v975_v37 = vrot.slane %v116_v16, %v66_v7  ;;  %v977_v38 = vrot.slane %v123_v17, %v66_v7 }
   0xc   :  { %v105_v39 = vcombine.high %v963_v24, %v963_v24  ;;  %v222_v40 = vcombine.high %v214_v25, %v214_v25  ;;  %v223_v41 = vcombine.high %v221_v26, %v221_v26  ;;  %v106_v43 = vcombine.high %v967_v28, %v967_v28 }
   0xd   :  { %v985_v44 = vrot.slane %v124_v29, %v66_v7  ;;  %v987_v45 = vrot.slane %v125_v30, %v66_v7  ;;  %v989_v46 = vrot.slane %v165_v19, %v66_v7  ;;  %v991_v47 = vrot.slane %v172_v20, %v66_v7  ;;  %v21_v19 = vld [vmem:[%s1638_s0 + $0x4] sm:$0xf]  ;;  %v22_v20 = vld [vmem:[%s1638_s0 + $0x8] sm:$0xf] }
   0xe   :  { %v993_v48 = vrot.slane %v173_v31, %v66_v7  ;;  %v995_v49 = vrot.slane %v174_v32, %v66_v7  ;;  %v453_v50 = vsub.f32 %v451_v34, %v452_v42  ;;  %v154_v51 = vcombine.high %v975_v37, %v975_v37  ;;  %v26_v34 = vld [vmem:[%s1638_s0 + $0x18] sm:$0xf]  ;;  %v30_v42 = vld [vmem:[%s1638_s0 + $0x28] sm:$0xf] }
   0xf   :  { %v155_v52 = vcombine.high %v977_v38, %v977_v38  ;;  %v1001_v53 = vrot.slane %v214_v25, %v66_v7  ;;  %v1003_v54 = vrot.slane %v221_v26, %v66_v7  ;;  %v107_v55 = vcombine.high %v971_v35, %v971_v35  ;;  %v23_v25 = vld [vmem:[%s1638_s0 + $0xc] sm:$0xf]  ;;  %v24_v26 = vld [vmem:[%s1638_s0 + $0x10] sm:$0xf] }
  0x10   :  { %v1007_v56 = vrot.slane %v222_v40, %v66_v7  ;;  %v1009_v57 = vrot.slane %v223_v41, %v66_v7  ;;  %v454_v58 = vmax.f32 %v453_v50, 0.0  ;;  %v108_v59 = vcombine.high %v973_v36, %v973_v36  ;;  %v29_v41 = vld [vmem:[%s1638_s0 + $0x24] sm:$0xf]  ;;  %v34_v50 = vld [vmem:[%s1638_s0 + $0x38] sm:$0xf] }
  0x11   :  { %v156_v60 = vcombine.high %v985_v44, %v985_v44  ;;  %v157_v61 = vcombine.high %v987_v45, %v987_v45  ;;  %v203_v62 = vcombine.high %v989_v46, %v989_v46  ;;  %v204_v63 = vcombine.high %v991_v47, %v991_v47 }
  0x12   :  { %v205_v0 = vcombine.high %v993_v48, %v993_v48  ;;  %v206_v1 = vcombine.high %v995_v49, %v995_v49  ;;  %v456_v2 = vadd.f32 1e-05, %v454_v58  ;;  %v252_v3 = vcombine.high %v1001_v53, %v1001_v53  ;;  %v36_v58 = vld [vmem:[%s1638_s0 + $0x40] sm:$0xf] }
  0x13   :  { %v253_v4 = vcombine.high %v1003_v54, %v1003_v54  ;;  %v259_v5 = vrot.slane %v963_v24, %v969_v33  ;;  %v263_v6 = vrot.slane %v971_v35, %v969_v33  ;;  %v254_v7 = vcombine.high %v1007_v56, %v1007_v56  ;;  %v27_v35 = vld [vmem:[%s1638_s0 + $0x1c] sm:$0xf] }
  0x14   :  { %v255_v8 = vcombine.high %v1009_v57, %v1009_v57  ;;  %v267_v9 = vrot.slane %v105_v39, %v969_v33  ;;  %912 = vrsqrt.f32 %v456_v2  ;;  %v271_v10 = vrot.slane %v107_v55, %v969_v33 }
  0x15   :  { %v275_v11 = vrot.slane %v967_v28, %v969_v33  ;;  %v279_v12 = vrot.slane %v973_v36, %v969_v33  ;;  %v283_v13 = vrot.slane %v106_v43, %v969_v33  ;;  %v287_v14 = vrot.slane %v108_v59, %v969_v33  ;;  %v25_v28 = vld [vmem:[%s1638_s0 + $0x14] sm:$0xf]  ;;  %v28_v36 = vld [vmem:[%s1638_s0 + $0x20] sm:$0xf]  ;;  %v31_v43 = vld [vmem:[%s1638_s0 + $0x2c] sm:$0xf] }
  0x16   :  { %v291_v15 = vrot.slane %v975_v37, %v969_v33  ;;  %v295_v16 = vrot.slane %v985_v44, %v969_v33  ;;  %v299_v17 = vrot.slane %v154_v51, %v969_v33  ;;  %v303_v21 = vrot.slane %v156_v60, %v969_v33 }
  0x17   :  { %v307_v22 = vrot.slane %v977_v38, %v969_v33  ;;  %v311_v23 = vrot.slane %v987_v45, %v969_v33  ;;  %v1065_v24 = vrot.slane %v155_v52, %v969_v33  ;;  %v319_v29 = vrot.slane %v157_v61, %v969_v33 }
  0x18   :  { %v323_v30 = vrot.slane %v989_v46, %v969_v33  ;;  %v327_v31 = vrot.slane %v993_v48, %v969_v33  ;;  %v1082_v32 = vrot.slane %v203_v62, %v969_v33  ;;  %v335_v37 = vrot.slane %v205_v0, %v969_v33  ;;  %v32_v48 = vld [vmem:[%s1638_s0 + $0x30] sm:$0xf]  ;;  %v39_v0 = vld [vmem:[%s1638_s0 + $0x4c] sm:$0xf] }
  0x19   :  { %v339_v38 = vrot.slane %v991_v47, %v969_v33  ;;  %v343_v39 = vrot.slane %v995_v49, %v969_v33  ;;  %v347_v40 = vrot.slane %v204_v63, %v969_v33  ;;  %v351_v44 = vrot.slane %v206_v1, %v969_v33  ;;  %v33_v49 = vld [vmem:[%s1638_s0 + $0x34] sm:$0xf]  ;;  %v38_v63 = vld [vmem:[%s1638_s0 + $0x48] sm:$0xf] }
  0x1a   :  { %v355_v45 = vrot.slane %v1001_v53, %v969_v33  ;;  %v359_v46 = vrot.slane %v1007_v56, %v969_v33  ;;  %v363_v47 = vrot.slane %v252_v3, %v969_v33  ;;  %v367_v51 = vrot.slane %v254_v7, %v969_v33  ;;  %v35_v56 = vld [vmem:[%s1638_s0 + $0x3c] sm:$0xf]  ;;  %v41_v7 = vld [vmem:[%s1638_s0 + $0x54] sm:$0xf] }
  0x1b   :  { %v371_v52 = vrot.slane %v1003_v54, %v969_v33  ;;  %v375_v53 = vrot.slane %v1009_v57, %v969_v33  ;;  %v379_v55 = vrot.slane %v253_v4, %v969_v33  ;;  %v383_v59 = vrot.slane %v255_v8, %v969_v33  ;;  %v455_v54 = vld [vmem:[%s1639_s3] sm:$0x1]  ;;  %v37_v57 = vld [vmem:[%s1638_s0 + $0x44] sm:$0xf]  ;;  %v42_v8 = vld [vmem:[%s1638_s0 + $0x58] sm:$0xf] }
  0x1c   :  { %v416_v60 = vadd.f32 %v259_v5, %v20_v18  ;;  %v417_v61 = vadd.f32 %v263_v6, %v21_v19  ;;  %v418_v62 = vadd.f32 %v267_v9, %v22_v20  ;;  %v419_v1 = vadd.f32 %v271_v10, %v23_v25  ;;  %v40_v6 = vld [vmem:[%s1638_s0 + $0x50] sm:$0xf] }
  0x1d   :  { %v420_v2 = vadd.f32 %v275_v11, %v24_v26  ;;  %v421_v3 = vadd.f32 %v279_v12, %v25_v28  ;;  %v422_v4 = vadd.f32 %v283_v13, %v26_v34  ;;  %v423_v9 = vadd.f32 %v287_v14, %v27_v35  ;;  %v43_v11 = vld [vmem:[%s1638_s0 + $0x5c] sm:$0xf]  ;;  %v44_v12 = vld [vmem:[%s1638_s0 + $0x60] sm:$0xf]  ;;  %v45_v13 = vld [vmem:[%s1638_s0 + $0x64] sm:$0xf] }
  0x1e   :  { %v913_v5 = vpop.eup %912  ;;  %v424_v18 = vadd.f32 %v291_v15, %v28_v36  ;;  %v425_v19 = vadd.f32 %v295_v16, %v29_v41  ;;  %v426_v10 = vadd.f32 %v299_v17, %v30_v42  ;;  %v427_v20 = vadd.f32 %v303_v21, %v31_v43  ;;  %v46_v14 = vld [vmem:[%s1638_s0 + $0x68] sm:$0xf]  ;;  %v47_v15 = vld [vmem:[%s1638_s0 + $0x6c] sm:$0xf]  ;;  %v48_v16 = vld [vmem:[%s1638_s0 + $0x70] sm:$0xf] }
  0x1f   :  { %v428_v25 = vadd.f32 %v307_v22, %v32_v48  ;;  %v429_v26 = vadd.f32 %v311_v23, %v33_v49  ;;  %v458_v28 = vmul.f32 %v913_v5, %v455_v54  ;;  %v430_v17 = vadd.f32 %v1065_v24, %v34_v50  ;;  %v49_v22 = vld [vmem:[%s1638_s0 + $0x74] sm:$0xf]  ;;  %v50_v23 = vld [vmem:[%s1638_s0 + $0x78] sm:$0xf]  ;;  %v51_v36 = vld [vmem:[%s1638_s0 + $0x7c] sm:$0xf] }
  0x20   :  { %v431_v34 = vadd.f32 %v319_v29, %v35_v56  ;;  %v432_v35 = vadd.f32 %v323_v30, %v36_v58  ;;  %v433_v21 = vadd.f32 %v327_v31, %v37_v57  ;;  %v434_v41 = vadd.f32 %v1082_v32, %v38_v63  ;;  %v459_v49 = vld [vmem:[%s1640_s4] sm:$0x1] }
  0x21   :  { %v435_v42 = vadd.f32 %v335_v37, %v39_v0  ;;  %v460_v24 = vmul.f32 %v458_v28, %v965_v27  ;;  %v466_v29 = vrot.slane %v458_v28, %v969_v33  ;;  %v436_v30 = vadd.f32 %v339_v38, %v40_v6 }
  0x22   :  { %v437_v31 = vadd.f32 %v343_v39, %v41_v7  ;;  %v438_v43 = vadd.f32 %v347_v40, %v42_v8  ;;  %v439_v48 = vadd.f32 %v351_v44, %v43_v11  ;;  %v440_v50 = vadd.f32 %v355_v45, %v44_v12 }
  0x23   :  { %v441_v56 = vadd.f32 %v359_v46, %v45_v13  ;;  %v442_v58 = vadd.f32 %v363_v47, %v46_v14  ;;  %v443_v54 = vadd.f32 %v367_v51, %v47_v15  ;;  %v444_v57 = vadd.f32 %v371_v52, %v48_v16 }
  0x24   :  { %v445_v5 = vadd.f32 %v375_v53, %v49_v22  ;;  %v446_v32 = vadd.f32 %v379_v55, %v50_v23  ;;  %v447_v37 = vadd.f32 %v383_v59, %v51_v36  ;;  %v461_v63 = vsub.f32 %v459_v49, %v460_v24 }
  0x25   :  { %v468_v27 = vmul.f32 %v466_v29, %v416_v60  ;;  %v469_v0 = vmul.f32 %v466_v29, %v417_v61  ;;  %v470_v28 = vmul.f32 %v466_v29, %v418_v62  ;;  %v471_v38 = vmul.f32 %v466_v29, %v419_v1 }
  0x26   :  { %v472_v39 = vmul.f32 %v466_v29, %v420_v2  ;;  %v473_v40 = vmul.f32 %v466_v29, %v421_v3  ;;  %v474_v44 = vmul.f32 %v466_v29, %v422_v4  ;;  %v475_v6 = vmul.f32 %v466_v29, %v423_v9 }
  0x27   :  { %v476_v7 = vmul.f32 %v466_v29, %v424_v18  ;;  %v477_v8 = vmul.f32 %v466_v29, %v425_v19  ;;  %v478_v11 = vmul.f32 %v466_v29, %v426_v10  ;;  %v479_v45 = vmul.f32 %v466_v29, %v427_v20 }
  0x28   :  { %v480_v46 = vmul.f32 %v466_v29, %v428_v25  ;;  %v481_v47 = vmul.f32 %v466_v29, %v429_v26  ;;  %v482_v51 = vmul.f32 %v466_v29, %v430_v17  ;;  %v483_v52 = vmul.f32 %v466_v29, %v431_v34 }
  0x29   :  { %v484_v53 = vmul.f32 %v466_v29, %v432_v35  ;;  %v485_v55 = vmul.f32 %v466_v29, %v433_v21  ;;  %v486_v59 = vmul.f32 %v466_v29, %v434_v41  ;;  %v487_v12 = vmul.f32 %v466_v29, %v435_v42 }
  0x2a   :  { %v488_v60 = vmul.f32 %v466_v29, %v436_v30  ;;  %v489_v61 = vmul.f32 %v466_v29, %v437_v31  ;;  %v490_v62 = vmul.f32 %v466_v29, %v438_v43  ;;  %v491_v1 = vmul.f32 %v466_v29, %v439_v48 }
  0x2b   :  { %v492_v2 = vmul.f32 %v466_v29, %v440_v50  ;;  %v493_v3 = vmul.f32 %v466_v29, %v441_v56  ;;  %v504_v4 = vrot.slane %v461_v63, %v969_v33  ;;  %v494_v9 = vmul.f32 %v466_v29, %v442_v58 }
  0x2c   :  { %v495_v18 = vmul.f32 %v466_v29, %v443_v54  ;;  %v496_v19 = vmul.f32 %v466_v29, %v444_v57  ;;  %v497_v10 = vmul.f32 %v466_v29, %v445_v5  ;;  %v498_v13 = vmul.f32 %v466_v29, %v446_v32 }
  0x2d   :  { %v499_v20 = vmul.f32 %v466_v29, %v447_v37  ;;  %v1192_v25 = vadd.f32 %v504_v4, %v468_v27  ;;  %v1194_v26 = vadd.f32 %v504_v4, %v469_v0  ;;  %v1196_v14 = vadd.f32 %v504_v4, %v470_v28 }
  0x2e   :  { %v1198_v15 = vadd.f32 %v504_v4, %v471_v38  ;;  %v1200_v16 = vadd.f32 %v504_v4, %v472_v39  ;;  %v1202_v17 = vadd.f32 %v504_v4, %v473_v40  ;;  %v1204_v34 = vadd.f32 %v504_v4, %v474_v44 }
  0x2f   :  { %v1206_v33 = vadd.f32 %v504_v4, %v475_v6  ;;  %v1208_v35 = vadd.f32 %v504_v4, %v476_v7  ;;  %v1210_v21 = vadd.f32 %v504_v4, %v477_v8  ;;  %v1212_v22 = vadd.f32 %v504_v4, %v478_v11 }
  0x30   :  { %v1214_v23 = vadd.f32 %v504_v4, %v479_v45  ;;  %v1216_v36 = vadd.f32 %v504_v4, %v480_v46  ;;  %v1218_v41 = vadd.f32 %v504_v4, %v481_v47  ;;  %v1220_v42 = vadd.f32 %v504_v4, %v482_v51 }
  0x31   :  { %v1222_v24 = vadd.f32 %v504_v4, %v483_v52  ;;  %v1224_v29 = vadd.f32 %v504_v4, %v484_v53  ;;  %v1226_v30 = vadd.f32 %v504_v4, %v485_v55  ;;  %v1228_v31 = vadd.f32 %v504_v4, %v486_v59 }
  0x32   :  { %v1230_v43 = vadd.f32 %v504_v4, %v487_v12  ;;  %v1232_v48 = vadd.f32 %v504_v4, %v488_v60  ;;  %v1234_v49 = vadd.f32 %v504_v4, %v489_v61  ;;  %v1236_v50 = vadd.f32 %v504_v4, %v490_v62 }
  0x33   :  { %v1238_v56 = vadd.f32 %v504_v4, %v491_v1  ;;  %v1240_v58 = vadd.f32 %v504_v4, %v492_v2  ;;  %v1242_v54 = vadd.f32 %v504_v4, %v493_v3  ;;  %v1244_v57 = vadd.f32 %v504_v4, %v494_v9 }
  0x34   :  { %v1246_v5 = vadd.f32 %v504_v4, %v495_v18  ;;  %v1248_v32 = vadd.f32 %v504_v4, %v496_v19  ;;  %v1250_v37 = vadd.f32 %v504_v4, %v497_v10  ;;  %v1252_v63 = vadd.f32 %v504_v4, %v498_v13 }
  0x35   :  { %1658 = vst [vmem:[#allocation2_spill] sm:$0xff] %v1240_v58  ;;  %1659 = vst [vmem:[#allocation3_spill] sm:$0xff] %v1242_v54  ;;  %v1255_v27 = vmul.f32 0.2, %v1192_v25  ;;  %v1258_v0 = vmul.f32 0.2, %v1194_v26  ;;  %v1263_v38 = vadd.f32 %v504_v4, %v499_v20 }
  0x36   :  { %1660 = vst [vmem:[#allocation4_spill] sm:$0xff] %v1244_v57  ;;  %1661 = vst [vmem:[#allocation5_spill] sm:$0xff] %v1246_v5  ;;  %v1261_v28 = vmul.f32 0.2, %v1196_v14  ;;  %v1266_v39 = vmul.f32 0.2, %v1198_v15 }
  0x37   :  { %1662 = vst [vmem:[#allocation6_spill] sm:$0xff] %v1248_v32  ;;  %1663 = vst [vmem:[#allocation7_spill] sm:$0xff] %v1250_v37  ;;  %v1269_v40 = vmul.f32 0.2, %v1200_v16  ;;  %v1272_v44 = vmul.f32 0.2, %v1202_v17  ;;  %v570_v11 = vmax.f32 %v1192_v25, %v1255_v27  ;;  %v571_v51 = vmax.f32 %v1194_v26, %v1258_v0 }
  0x38   :  { %1664 = vst [vmem:[#allocation8_spill] sm:$0xff] %v1252_v63  ;;  %1665 = vst [vmem:[#allocation9_spill] sm:$0xff] %v1263_v38  ;;  %v1275_v6 = vmul.f32 0.2, %v1204_v34  ;;  %v1278_v7 = vmul.f32 0.2, %v1206_v33  ;;  %v572_v59 = vmax.f32 %v1196_v14, %v1261_v28  ;;  %v573_v62 = vmax.f32 %v1198_v15, %v1266_v39 }
  0x39   :  { %v1281_v8 = vmul.f32 0.2, %v1208_v35  ;;  %v1286_v45 = vmul.f32 0.2, %v1210_v21  ;;  %v1289_v46 = vmul.f32 0.2, %v1212_v22  ;;  %v574_v4 = vmax.f32 %v1200_v16, %v1269_v40 }
  0x3a   :  { %v1292_v47 = vmul.f32 0.2, %v1214_v23  ;;  %v1297_v52 = vmul.f32 0.2, %v1216_v36  ;;  %v1300_v53 = vmul.f32 0.2, %v1218_v41  ;;  %v575_v10 = vmax.f32 %v1202_v17, %v1272_v44 }
  0x3b   :  { %v1303_v55 = vmul.f32 0.2, %v1220_v42  ;;  %v1308_v12 = vmul.f32 0.2, %v1222_v24  ;;  %v1311_v60 = vmul.f32 0.2, %v1224_v29  ;;  %v576_v26 = vmax.f32 %v1204_v34, %v1275_v6 }
  0x3c   :  { %v1314_v61 = vmul.f32 0.2, %v1226_v30  ;;  %v1319_v1 = vmul.f32 0.2, %v1228_v31  ;;  %v1322_v2 = vmul.f32 0.2, %v1230_v43  ;;  %v577_v17 = vmax.f32 %v1206_v33, %v1278_v7 }
  0x3d   :  { %v1325_v3 = vmul.f32 0.2, %v1232_v48  ;;  %v1330_v9 = vmul.f32 0.2, %v1234_v49  ;;  %v1333_v18 = vmul.f32 0.2, %v1236_v50 }
  0x3e   :  { %v1336_v19 = vmul.f32 0.2, %v1238_v56  ;;  %v1341_v13 = vmul.f32 0.2, %v1240_v58  ;;  %v1344_v20 = vmul.f32 0.2, %v1242_v54 }
  0x3f   :  { %v1347_v25 = vmul.f32 0.2, %v1244_v57  ;;  %v1352_v14 = vmul.f32 0.2, %v1246_v5  ;;  %v1355_v15 = vmul.f32 0.2, %v1248_v32 }
  0x40   :  { %1666 = vst [vmem:[#allocation10_spill] sm:$0xff] %v1341_v13  ;;  %1667 = vst [vmem:[#allocation11_spill] sm:$0xff] %v1344_v20  ;;  %v1358_v16 = vmul.f32 0.2, %v1250_v37  ;;  %v1363_v27 = vmul.f32 0.2, %v1252_v63 }
  0x41   :  { %1668 = vst [vmem:[#allocation12_spill] sm:$0xff] %v1347_v25  ;;  %1669 = vst [vmem:[#allocation13_spill] sm:$0xff] %v1352_v14  ;;  %v1366_v0 = vmul.f32 0.2, %v1263_v38  ;;  %v603_v40 = vsel %vm602_vm0, %v570_v11, -inf  ;;  %v610_v34 = vsel %vm602_vm0, %v571_v51, -inf }
  0x42   :  { %1670 = vst [vmem:[#allocation14_spill] sm:$0xff] %v1355_v15  ;;  %1671 = vst [vmem:[#allocation15_spill] sm:$0xff] %v1358_v16  ;;  %v604_v33 = vrot.slane %v603_v40, 4  ;;  %v611_v25 = vrot.slane %v610_v34, 4  ;;  %v617_v44 = vsel %vm602_vm0, %v572_v59, -inf  ;;  %v624_v14 = vsel %vm602_vm0, %v573_v62, -inf }
  0x43   :  { %1672 = vst [vmem:[#allocation16_spill] sm:$0xff] %v1363_v27  ;;  %1673 = vst [vmem:[#allocation17_spill] sm:$0xff] %v1366_v0  ;;  %v618_v6 = vrot.slane %v617_v44, 4  ;;  %v625_v15 = vrot.slane %v624_v14, 4  ;;  %v631_v7 = vsel %vm602_vm0, %v574_v4, -inf  ;;  %v638_v16 = vsel %vm602_vm0, %v575_v10, -inf }
  0x44   :  { %v605_v28 = vmax.f32 %v603_v40, %v604_v33  ;;  %v612_v27 = vmax.f32 %v610_v34, %v611_v25  ;;  %v632_v63 = vrot.slane %v631_v7, 4  ;;  %v639_v39 = vrot.slane %v638_v16, 4 }
  0x45   :  { %v619_v0 = vmax.f32 %v617_v44, %v618_v6  ;;  %v626_v11 = vmax.f32 %v624_v14, %v625_v15  ;;  %v645_v51 = vsel %vm602_vm0, %v576_v26, -inf  ;;  %v652_v38 = vsel %vm602_vm0, %v577_v17, -inf }
  0x46   :  { %v606_v37 = vrot.slane %v605_v28, 2  ;;  %v613_v59 = vrot.slane %v612_v27, 2  ;;  %v633_v32 = vmax.f32 %v631_v7, %v632_v63  ;;  %v640_v62 = vmax.f32 %v638_v16, %v639_v39 }
  0x47   :  { %v620_v5 = vrot.slane %v619_v0, 2  ;;  %v627_v57 = vrot.slane %v626_v11, 2  ;;  %v646_v20 = vrot.slane %v645_v51, 4  ;;  %v653_v4 = vrot.slane %v652_v38, 4 }
  0x48   :  { %v607_v54 = vmax.f32 %v605_v28, %v606_v37  ;;  %v614_v10 = vmax.f32 %v612_v27, %v613_v59  ;;  %v634_v40 = vrot.slane %v633_v32, 2  ;;  %v641_v25 = vrot.slane %v640_v62, 2 }
  0x49   :  { %v621_v34 = vmax.f32 %v619_v0, %v620_v5  ;;  %v628_v33 = vmax.f32 %v626_v11, %v627_v57  ;;  %v647_v44 = vmax.f32 %v645_v51, %v646_v20  ;;  %v654_v14 = vmax.f32 %v652_v38, %v653_v4 }
  0x4a   :  { %v608_v15 = vrot.slane %v607_v54, 1  ;;  %v615_v26 = vrot.slane %v614_v10, 1  ;;  %v635_v6 = vmax.f32 %v633_v32, %v634_v40  ;;  %v642_v17 = vmax.f32 %v640_v62, %v641_v25 }
  0x4b   :  { %v622_v13 = vrot.slane %v621_v34, 1  ;;  %v629_v58 = vrot.slane %v628_v33, 1  ;;  %v648_v63 = vrot.slane %v647_v44, 2  ;;  %v655_v16 = vrot.slane %v654_v14, 2 }
  0x4c   :  { %v1424_v39 = vmax.f32 %v607_v54, %v608_v15  ;;  %v1426_v7 = vmax.f32 %v614_v10, %v615_v26  ;;  %v636_v37 = vrot.slane %v635_v6, 1  ;;  %v643_v27 = vrot.slane %v642_v17, 1 }
  0x4d   :  { %v1428_v28 = vmax.f32 %v621_v34, %v622_v13  ;;  %v1430_v5 = vmax.f32 %v628_v33, %v629_v58  ;;  %v649_v57 = vmax.f32 %v647_v44, %v648_v63  ;;  %v656_v38 = vmax.f32 %v654_v14, %v655_v16 }
  0x4e   :  { %v1432_v20 = vmax.f32 %v635_v6, %v636_v37  ;;  %v1434_v32 = vmax.f32 %v642_v17, %v643_v27  ;;  %v1674_v0 = vmax.f32 %v1208_v35, %v1281_v8  ;;  %v1675_v11 = vmax.f32 %v1210_v21, %v1286_v45 }
  0x4f   :  { %v650_v13 = vrot.slane %v649_v57, 1  ;;  %v657_v59 = vrot.slane %v656_v38, 1  ;;  %v1676_v4 = vmax.f32 %v1212_v22, %v1289_v46  ;;  %v1677_v40 = vmax.f32 %v1214_v23, %v1292_v47 }
  0x50   :  { %v659_v54 = vsel %vm602_vm0, %v1674_v0, -inf  ;;  %v666_v51 = vsel %vm602_vm0, %v1675_v11, -inf  ;;  %v1678_v8 = vmax.f32 %v1216_v36, %v1297_v52  ;;  %v1679_v45 = vmax.f32 %v1218_v41, %v1300_v53 }
  0x51   :  { %v660_v58 = vrot.slane %v659_v54, 4  ;;  %v667_v62 = vrot.slane %v666_v51, 4  ;;  %v673_v10 = vsel %vm602_vm0, %v1676_v4, -inf  ;;  %v680_v35 = vsel %vm602_vm0, %v1677_v40, -inf }
  0x52   :  { %v687_v21 = vsel %vm602_vm0, %v1678_v8, -inf  ;;  %v694_v25 = vsel %vm602_vm0, %v1679_v45, -inf  ;;  %v1460_v34 = vmax.f32 %v649_v57, %v650_v13  ;;  %v1462_v22 = vmax.f32 %v656_v38, %v657_v59 }
  0x53   :  { %v661_v46 = vmax.f32 %v659_v54, %v660_v58  ;;  %v668_v33 = vmax.f32 %v666_v51, %v667_v62  ;;  %v674_v44 = vrot.slane %v673_v10, 4  ;;  %v681_v23 = vrot.slane %v680_v35, 4 }
  0x54   :  { %v688_v47 = vrot.slane %v687_v21, 4  ;;  %v695_v14 = vrot.slane %v694_v25, 4  ;;  %v1680_v36 = vmax.f32 %v1220_v42, %v1303_v55  ;;  %v1681_v41 = vmax.f32 %v1222_v24, %v1308_v12 }
  0x55   :  { %v662_v15 = vrot.slane %v661_v46, 2  ;;  %v669_v26 = vrot.slane %v668_v33, 2  ;;  %v675_v6 = vmax.f32 %v673_v10, %v674_v44  ;;  %v682_v17 = vmax.f32 %v680_v35, %v681_v23 }
  0x56   :  { %v701_v52 = vsel %vm602_vm0, %v1680_v36, -inf  ;;  %v708_v53 = vsel %vm602_vm0, %v1681_v41, -inf  ;;  %v689_v63 = vmax.f32 %v687_v21, %v688_v47  ;;  %v696_v16 = vmax.f32 %v694_v25, %v695_v14 }
  0x57   :  { %v663_v37 = vmax.f32 %v661_v46, %v662_v15  ;;  %v670_v27 = vmax.f32 %v668_v33, %v669_v26  ;;  %v702_v57 = vrot.slane %v701_v52, 4  ;;  %v709_v38 = vrot.slane %v708_v53, 4 }
  0x58   :  { %v676_v0 = vrot.slane %v675_v6, 2  ;;  %v683_v54 = vrot.slane %v682_v17, 2  ;;  %v690_v11 = vrot.slane %v689_v63, 2  ;;  %v697_v51 = vrot.slane %v696_v16, 2 }
  0x59   :  { %v664_v42 = vrot.slane %v663_v37, 1  ;;  %v671_v55 = vrot.slane %v670_v27, 1  ;;  %v703_v13 = vmax.f32 %v701_v52, %v702_v57  ;;  %v710_v59 = vmax.f32 %v708_v53, %v709_v38 }
  0x5a   :  { %v677_v58 = vmax.f32 %v675_v6, %v676_v0  ;;  %v684_v24 = vmax.f32 %v682_v17, %v683_v54  ;;  %v691_v12 = vmax.f32 %v689_v63, %v690_v11  ;;  %v698_v62 = vmax.f32 %v696_v16, %v697_v51 }
  0x5b   :  { %v1472_v4 = vmax.f32 %v663_v37, %v664_v42  ;;  %v1474_v10 = vmax.f32 %v670_v27, %v671_v55  ;;  %v704_v40 = vrot.slane %v703_v13, 2  ;;  %v711_v35 = vrot.slane %v710_v59, 2 }
  0x5c   :  { %v678_v8 = vrot.slane %v677_v58, 1  ;;  %v685_v21 = vrot.slane %v684_v24, 1  ;;  %v692_v45 = vrot.slane %v691_v12, 1  ;;  %v699_v25 = vrot.slane %v698_v62, 1 }
  0x5d   :  { %v705_v46 = vmax.f32 %v703_v13, %v704_v40  ;;  %v712_v33 = vmax.f32 %v710_v59, %v711_v35  ;;  %v1682_v44 = vmax.f32 %v1224_v29, %v1311_v60  ;;  %v1683_v47 = vmax.f32 %v1226_v30, %v1314_v61 }
  0x5e   :  { %v1484_v15 = vmax.f32 %v677_v58, %v678_v8  ;;  %v1486_v26 = vmax.f32 %v684_v24, %v685_v21  ;;  %v1488_v36 = vmax.f32 %v691_v12, %v692_v45  ;;  %v1490_v52 = vmax.f32 %v698_v62, %v699_v25 }
  0x5f   :  { %v715_v23 = vsel %vm602_vm0, %v1682_v44, -inf  ;;  %v722_v14 = vsel %vm602_vm0, %v1683_v47, -inf  ;;  %v706_v41 = vrot.slane %v705_v46, 1  ;;  %v713_v53 = vrot.slane %v712_v33, 1 }
  0x60   :  { %v716_v6 = vrot.slane %v715_v23, 4  ;;  %v723_v17 = vrot.slane %v722_v14, 4  ;;  %v1684_v29 = vmax.f32 %v1228_v31, %v1319_v1  ;;  %v1685_v30 = vmax.f32 %v1230_v43, %v1322_v2 }
  0x61   :  { %v1686_v63 = vmax.f32 %v1232_v48, %v1325_v3  ;;  %v1687_v37 = vmax.f32 %v1234_v49, %v1330_v9  ;;  %v1508_v57 = vmax.f32 %v705_v46, %v706_v41  ;;  %v1510_v31 = vmax.f32 %v712_v33, %v713_v53 }
  0x62   :  { %v729_v60 = vsel %vm602_vm0, %v1684_v29, -inf  ;;  %v736_v61 = vsel %vm602_vm0, %v1685_v30, -inf  ;;  %v717_v1 = vmax.f32 %v715_v23, %v716_v6  ;;  %v724_v38 = vmax.f32 %v722_v14, %v723_v17  ;;  %v1690_v30 = vld [vmem:[#allocation2_spill] sm:$0xff] }
  0x63   :  { %v743_v16 = vsel %vm602_vm0, %v1686_v63, -inf  ;;  %v750_v27 = vsel %vm602_vm0, %v1687_v37, -inf  ;;  %v730_v0 = vrot.slane %v729_v60, 4  ;;  %v737_v43 = vrot.slane %v736_v61, 4  ;;  %v1693_v37 = vld [vmem:[#allocation3_spill] sm:$0xff] }
  0x64   :  { %v744_v2 = vrot.slane %v743_v16, 4  ;;  %v751_v54 = vrot.slane %v750_v27, 4  ;;  %v718_v11 = vrot.slane %v717_v1, 2  ;;  %v725_v51 = vrot.slane %v724_v38, 2 }
  0x65   :  { %v1688_v48 = vmax.f32 %v1236_v50, %v1333_v18  ;;  %v1689_v49 = vmax.f32 %v1238_v56, %v1336_v19  ;;  %v731_v42 = vmax.f32 %v729_v60, %v730_v0  ;;  %v738_v55 = vmax.f32 %v736_v61, %v737_v43  ;;  %v1691_v61 = vld [vmem:[#allocation10_spill] sm:$0xff] }
  0x66   :  { %v745_v13 = vmax.f32 %v743_v16, %v744_v2  ;;  %v752_v59 = vmax.f32 %v750_v27, %v751_v54  ;;  %v719_v58 = vmax.f32 %v717_v1, %v718_v11  ;;  %v726_v24 = vmax.f32 %v724_v38, %v725_v51  ;;  %v1694_v27 = vld [vmem:[#allocation11_spill] sm:$0xff] }
  0x67   :  { %v757_v3 = vsel %vm602_vm0, %v1688_v48, -inf  ;;  %v764_v9 = vsel %vm602_vm0, %v1689_v49, -inf  ;;  %v732_v40 = vrot.slane %v731_v42, 2  ;;  %v739_v35 = vrot.slane %v738_v55, 2  ;;  %v1696_v49 = vld [vmem:[#allocation4_spill] sm:$0xff] }
  0x68   :  { %v758_v12 = vrot.slane %v757_v3, 4  ;;  %v765_v62 = vrot.slane %v764_v9, 4  ;;  %v746_v8 = vrot.slane %v745_v13, 2  ;;  %v753_v21 = vrot.slane %v752_v59, 2 }
  0x69   :  { %v720_v50 = vrot.slane %v719_v58, 1  ;;  %v727_v18 = vrot.slane %v726_v24, 1  ;;  %v733_v46 = vmax.f32 %v731_v42, %v732_v40  ;;  %v740_v56 = vmax.f32 %v738_v55, %v739_v35 }
  0x6a   :  { %v759_v45 = vmax.f32 %v757_v3, %v758_v12  ;;  %v766_v25 = vmax.f32 %v764_v9, %v765_v62  ;;  %v747_v19 = vmax.f32 %v745_v13, %v746_v8  ;;  %v754_v33 = vmax.f32 %v752_v59, %v753_v21  ;;  %v1697_v9 = vld [vmem:[#allocation12_spill] sm:$0xff]  ;;  %v1699_v13 = vld [vmem:[#allocation5_spill] sm:$0xff]  ;;  %v1702_v12 = vld [vmem:[#allocation6_spill] sm:$0xff] }
  0x6b   :  { %v1520_v44 = vmax.f32 %v719_v58, %v720_v50  ;;  %v1522_v23 = vmax.f32 %v726_v24, %v727_v18  ;;  %v734_v41 = vrot.slane %v733_v46, 1  ;;  %v741_v53 = vrot.slane %v740_v56, 1  ;;  %v1700_v59 = vld [vmem:[#allocation13_spill] sm:$0xff]  ;;  %v1703_v62 = vld [vmem:[#allocation14_spill] sm:$0xff]  ;;  %v1705_v8 = vld [vmem:[#allocation7_spill] sm:$0xff] }
  0x6c   :  { %v760_v47 = vrot.slane %v759_v45, 2  ;;  %v767_v14 = vrot.slane %v766_v25, 2  ;;  %v748_v6 = vrot.slane %v747_v19, 1  ;;  %v755_v17 = vrot.slane %v754_v33, 1  ;;  %v1706_v21 = vld [vmem:[#allocation15_spill] sm:$0xff] }
  0x6d   :  { %v1692_v63 = vmax.f32 %v1690_v30, %v1691_v61  ;;  %v1695_v1 = vmax.f32 %v1693_v37, %v1694_v27  ;;  %v1532_v0 = vmax.f32 %v733_v46, %v734_v41  ;;  %v1534_v43 = vmax.f32 %v740_v56, %v741_v53  ;;  %v1712_v37 = vld [vmem:[#allocation17_spill] sm:$0xff] }
  0x6e   :  { %v761_v29 = vmax.f32 %v759_v45, %v760_v47  ;;  %v768_v60 = vmax.f32 %v766_v25, %v767_v14  ;;  %v1536_v2 = vmax.f32 %v747_v19, %v748_v6  ;;  %v1538_v54 = vmax.f32 %v754_v33, %v755_v17  ;;  %v1708_v6 = vld [vmem:[#allocation8_spill] sm:$0xff] }
  0x6f   :  { %v771_v16 = vsel %vm602_vm0, %v1692_v63, -inf  ;;  %v778_v38 = vsel %vm602_vm0, %v1695_v1, -inf  ;;  %v1698_v42 = vmax.f32 %v1696_v49, %v1697_v9  ;;  %v1701_v58 = vmax.f32 %v1699_v13, %v1700_v59  ;;  %v1709_v17 = vld [vmem:[#allocation16_spill] sm:$0xff]  ;;  %v1711_v63 = vld [vmem:[#allocation9_spill] sm:$0xff] }
  0x70   :  { %v762_v11 = vrot.slane %v761_v29, 1  ;;  %v769_v51 = vrot.slane %v768_v60, 1  ;;  %v772_v48 = vrot.slane %v771_v16, 4  ;;  %v779_v3 = vrot.slane %v778_v38, 4 }
  0x71   :  { %v785_v55 = vsel %vm602_vm0, %v1698_v42, -inf  ;;  %v792_v24 = vsel %vm602_vm0, %v1701_v58, -inf  ;;  %v1704_v40 = vmax.f32 %v1702_v12, %v1703_v62  ;;  %v1707_v50 = vmax.f32 %v1705_v8, %v1706_v21 }
  0x72   :  { %v1556_v45 = vmax.f32 %v761_v29, %v762_v11  ;;  %v1558_v25 = vmax.f32 %v768_v60, %v769_v51  ;;  %v773_v46 = vmax.f32 %v771_v16, %v772_v48  ;;  %v780_v56 = vmax.f32 %v778_v38, %v779_v3 }
  0x73   :  { %v799_v35 = vsel %vm602_vm0, %v1704_v40, -inf  ;;  %v806_v18 = vsel %vm602_vm0, %v1707_v50, -inf  ;;  %v786_v19 = vrot.slane %v785_v55, 4  ;;  %v793_v33 = vrot.slane %v792_v24, 4 }
  0x74   :  { %v800_v47 = vrot.slane %v799_v35, 4  ;;  %v807_v14 = vrot.slane %v806_v18, 4  ;;  %v774_v41 = vrot.slane %v773_v46, 2  ;;  %v781_v53 = vrot.slane %v780_v56, 2 }
  0x75   :  { %v1710_v30 = vmax.f32 %v1708_v6, %v1709_v17  ;;  %v1713_v29 = vmax.f32 %v1711_v63, %v1712_v37  ;;  %v787_v16 = vmax.f32 %v785_v55, %v786_v19  ;;  %v794_v27 = vmax.f32 %v792_v24, %v793_v33 }
  0x76   :  { %v801_v1 = vmax.f32 %v799_v35, %v800_v47  ;;  %v808_v38 = vmax.f32 %v806_v18, %v807_v14  ;;  %v775_v11 = vmax.f32 %v773_v46, %v774_v41  ;;  %v782_v51 = vmax.f32 %v780_v56, %v781_v53 }
  0x77   :  { %v813_v61 = vsel %vm602_vm0, %v1710_v30, -inf  ;;  %v820_v60 = vsel %vm602_vm0, %v1713_v29, -inf  ;;  %v788_v49 = vrot.slane %v787_v16, 2  ;;  %v795_v9 = vrot.slane %v794_v27, 2 }
  0x78   :  { %v814_v48 = vrot.slane %v813_v61, 4  ;;  %v821_v3 = vrot.slane %v820_v60, 4  ;;  %v802_v42 = vrot.slane %v801_v1, 2  ;;  %v809_v13 = vrot.slane %v808_v38, 2 }
  0x79   :  { %v776_v59 = vrot.slane %v775_v11, 1  ;;  %v783_v58 = vrot.slane %v782_v51, 1  ;;  %v789_v55 = vmax.f32 %v787_v16, %v788_v49  ;;  %v796_v24 = vmax.f32 %v794_v27, %v795_v9 }
  0x7a   :  { %v815_v12 = vmax.f32 %v813_v61, %v814_v48  ;;  %v822_v62 = vmax.f32 %v820_v60, %v821_v3  ;;  %v803_v40 = vmax.f32 %v801_v1, %v802_v42  ;;  %v810_v35 = vmax.f32 %v808_v38, %v809_v13 }
  0x7b   :  { %v777_v8 = vmax.f32 %v775_v11, %v776_v59  ;;  %v784_v21 = vmax.f32 %v782_v51, %v783_v58  ;;  %v790_v46 = vrot.slane %v789_v55, 1  ;;  %v797_v56 = vrot.slane %v796_v24, 1 }
  0x7c   :  { %v816_v50 = vrot.slane %v815_v12, 2  ;;  %v823_v18 = vrot.slane %v822_v62, 2  ;;  %v804_v19 = vrot.slane %v803_v40, 1  ;;  %v811_v33 = vrot.slane %v810_v35, 1 }
  0x7d   :  { %v860_v41 = vsel %vm859_vm1, %v1426_v7, %v1424_v39  ;;  %v873_v53 = vsel %vm859_vm1, %v1474_v10, %v1472_v4  ;;  %v791_v6 = vmax.f32 %v789_v55, %v790_v46  ;;  %v798_v17 = vmax.f32 %v796_v24, %v797_v56 }
  0x7e   :  { %v817_v47 = vmax.f32 %v815_v12, %v816_v50  ;;  %v824_v14 = vmax.f32 %v822_v62, %v823_v18  ;;  %v805_v30 = vmax.f32 %v803_v40, %v804_v19  ;;  %v812_v61 = vmax.f32 %v810_v35, %v811_v33 }
  0x7f   :  { %v862_v29 = vsel %vm861_vm2, %v1428_v28, %v860_v41  ;;  %v874_v60 = vsel %vm861_vm2, %v1484_v15, %v873_v53  ;;  %v880_v7 = vsel %vm859_vm1, %v1522_v23, %v1520_v44  ;;  %v887_v4 = vsel %vm859_vm1, %v784_v21, %v777_v8 }
  0x80   :  { %v818_v63 = vrot.slane %v817_v47, 1  ;;  %v825_v37 = vrot.slane %v824_v14, 1  ;;  %v864_v16 = vsel %vm863_vm3, %v1430_v5, %v862_v29  ;;  %v875_v39 = vsel %vm863_vm3, %v1486_v26, %v874_v60 }
  0x81   :  { %v866_v28 = vsel %vm865_vm4, %v1432_v20, %v864_v16  ;;  %v876_v15 = vsel %vm865_vm4, %v1488_v36, %v875_v39  ;;  %v881_v1 = vsel %vm861_vm2, %v1532_v0, %v880_v7  ;;  %v888_v44 = vsel %vm861_vm2, %v791_v6, %v887_v4 }
  0x82   :  { %v819_v10 = vmax.f32 %v817_v47, %v818_v63  ;;  %v826_v27 = vmax.f32 %v824_v14, %v825_v37  ;;  %v868_v5 = vsel %vm867_vm5, %v1434_v32, %v866_v28  ;;  %v877_v26 = vsel %vm867_vm5, %v1490_v52, %v876_v15 }
  0x83   :  { %v870_v23 = vsel %vm869_vm6, %v1460_v34, %v868_v5  ;;  %v878_v20 = vsel %vm869_vm6, %v1508_v57, %v877_v26  ;;  %v882_v36 = vsel %vm863_vm3, %v1534_v43, %v881_v1  ;;  %v889_v38 = vsel %vm863_vm3, %v798_v17, %v888_v44 }
  0x84   :  { %v872_v32 = vsel %vm871_vm7, %v1462_v22, %v870_v23  ;;  %v879_v52 = vsel %vm871_vm7, %v1510_v31, %v878_v20  ;;  %v883_v0 = vsel %vm865_vm4, %v1536_v2, %v882_v36  ;;  %v890_v11 = vsel %vm865_vm4, %v805_v30, %v889_v38 }
  0x85   :  { %v884_v34 = vsel %vm867_vm5, %v1538_v54, %v883_v0  ;;  %v891_v57 = vsel %vm867_vm5, %v812_v61, %v890_v11  ;;  %899 = vst.msk [vmem:[%s1641_s5] sm:$0xff] %vm898_vm8, %v872_v32  ;;  %900 = vst.msk [vmem:[%s1641_s5 + $0x8] sm:$0xff] %vm898_vm8, %v879_v52 }
  0x86   :  { %v885_v22 = vsel %vm869_vm6, %v1556_v45, %v884_v34  ;;  %v892_v31 = vsel %vm869_vm6, %v819_v10, %v891_v57 }
  0x87   :  { %v886_v43 = vsel %vm871_vm7, %v1558_v25, %v885_v22  ;;  %v893_v2 = vsel %vm871_vm7, %v826_v27, %v892_v31 }
  0x88   :  { %901 = vst.msk [vmem:[%s1641_s5 + $0x10] sm:$0xff] %vm898_vm8, %v886_v43  ;;  %902 = vst.msk [vmem:[%s1641_s5 + $0x18] sm:$0xff] %vm898_vm8, %v893_v2 }

// kernel: _lambda_.24
= control target key start
LH: loop header
LB: loop body
LE: loop exit
PB: predicated region body
PF: predicated region fallthrough
CT: control target
= control target key end

     0   :  { %vm58_vm0 = vcmask 523264   ;;  %s199_s1 = inlined_call_operand.vmem [shape: bf16[64,128], index: 1, kind: input, shape index: {}]   ;;  %s200_s0 = inlined_call_operand.vmem [shape: bf16[32,64], index: 0, kind: input, shape index: {}]   ;;  %s201_s2 = inlined_call_operand.vmem [shape: f32[32,128], index: 2, kind: output, shape index: {}]  }
   0x1   :  { %v148_v0 = vld [vmem:[%s199_s1] sm:$0xff]   ;;  %v149_v1 = vld [vmem:[%s199_s1 + $0x8] sm:$0xff]   ;;  %v150_v2 = vld [vmem:[%s199_s1 + $0x10] sm:$0xff]  }
   0x2   :  { %136 = vmatprep.subr.bf16.mxu0 %v148_v0  ;;  %v152_v3 = vld [vmem:[%s200_s0] sm:$0xff]   ;;  %v151_v4 = vld [vmem:[%s199_s1 + $0x18] sm:$0xff]   ;;  %v153_v5 = vld [vmem:[%s200_s0 + $0x8] sm:$0xff]  }
   0x3   :  { %137 = vmatpush3.bf16.msra.mxu0 %v148_v0  ;;  %144 = vmatprep.mubr.msk.bf16.mxu0 %vm58_vm0, %v152_v3 }
   0x4   :  { %138 = vmatprep.subr.bf16.mxu0 %v149_v1 }
   0x7   :  { %139 = vmatpush3.bf16.msra.mxu0 %v149_v1 }
   0x8   :  { %140 = vmatprep.subr.bf16.mxu0 %v150_v2 }
   0xb   :  { %141 = vmatpush3.bf16.msra.mxu0 %v150_v2 }
   0xc   :  { %142 = vmatprep.subr.bf16.mxu0 %v151_v4 }
   0xf   :  { %143 = vmatpush3.bf16.msra.mxu0 %v151_v4 }
  0x12   :  { %145 = vmatmul.mubr.msk.bf16.vlgmr.msra.gmra.mrb[0].mxu0 %vm58_vm0, %v153_v5 }
  0xe5   :  { %v146_v6 = vpop.f32.mrb[0].mxu0 }
  0xe6   :  { %116 = vst [vmem:[%s201_s2 + $0x10] sm:$0xff] %v146_v6  ;;  %v99_v7 = vpop.f32.mrb[1].mxu0 }
  0xe7   :  { %114 = vst [vmem:[%s201_s2] sm:$0xff] %v99_v7  ;;  %v147_v8 = vpop.f32.mrb[2].mxu0 }
  0xe8   :  { %117 = vst [vmem:[%s201_s2 + $0x18] sm:$0xff] %v147_v8  ;;  %v102_v9 = vpop.f32.mrb[3].mxu0 }
  0xe9   :  { %115 = vst [vmem:[%s201_s2 + $0x8] sm:$0xff] %v102_v9 }

// kernel: _lambda_.23
= control target key start
LH: loop header
LB: loop body
LE: loop exit
PB: predicated region body
PF: predicated region fallthrough
CT: control target
= control target key end

     0   :  { %s361_s6 = smov 0   ;;  %s391_s0 = inlined_call_operand.vmem [shape: f32[2,16,64], index: 0, kind: input, shape index: {}]   ;;  %s392_s1 = inlined_call_operand.vmem [shape: f32[2,16,16], index: 1, kind: output, shape index: {}]  }
   0x1 LB: > { %s301_s7 = sadd.s32 4294967295, %s349_s6   ;;  %p305_p0 = scmp.ge.s32.totalorder %s349_s6, 1  ;;  %s349_s6 = sphi %s361_s6, %s11_s6  }
   0x2   : > { %p87_p1 = scmp.lt.s32.totalorder %s349_s6, 3 }
   0x4   : > { %p88_p2 = pnand %p305_p0, %p87_p1 }
   0x5   : > { %p107_p3 = scmp.lt.s32.totalorder (!%p88_p2), %s301_s7, 1  ;;  %vm119_vm0 = vcmask (!%p88_p2), 523264   ;;  %v215_v7 = vlaneseq (!%p88_p2)  ;;  %vm226_vm2 = vcmask (!%p88_p2), 130112   ;;  %vm243_vm3 = vcmask (!%p88_p2), 130048  }
   0x6   : > { %91 = sbr.rel (%p88_p2) target bundleno = 247 (0xf7), region = 24  ;;  %vm330_vm1 = vmpackc.low (!%p88_p2), %vm119_vm0, %vm119_vm0 }
   0x7   : > { %v216_v8 = vand.u32 (!%p88_p2), 127, %v215_v7  ;;  %v218_v10 = vshrl.u32 (!%p88_p2), %v215_v7, 7 }
   0x9   : > { %v221_v11 = vadd.s32 (!%p88_p2), 4294967288, %v216_v8  ;;  %v219_v12 = vsub.s32 (!%p88_p2), %v216_v8, %v218_v10 }
   0xb   : > { %v224_v13 = vsub.s32 (!%p88_p2), %v221_v11, %v218_v10 }
   0xd   : > { %s394_s7 = smov (!%p107_p3, %s301_s7), 1 }
   0xe   : > { %s316_s8 = sshll.u32 %s394_s7, 4 }
   0xf   : > { %s111_s11 = scalar_lea.vmem %s391_s0, %s316_s8  ;;  %s116_s14 = scalar_lea.vmem %s392_s1, %s316_s8 }
  0x10   : > { %v117_v0 = vld [vmem:[%s111_s11] sm:$0xff]  ;;  %v118_v1 = vld [vmem:[%s111_s11 + $0x8] sm:$0xff] }
  0x11   : > { %v329_v2 = vpack.c.bf16 %v118_v1, %v117_v0  ;;  %326 = vmatprep.mubr.msk.f32.mxu0 %vm119_vm0, %v117_v0  ;;  %v201_v3 = vmul.f32 %v117_v0, %v117_v0  ;;  %v202_v4 = vmul.f32 %v118_v1, %v118_v1 }
  0x13   : > { %331 = vmatprep.subr.msk.bf16.mxu0 %vm330_vm1, %v329_v2  ;;  %v203_v5 = vsel %vm119_vm0, %v201_v3, 0.0  ;;  %v206_v6 = vsel %vm119_vm0, %v202_v4, 0.0 }
  0x14   : > { %334 = vmatpush3.bf16.xpose.msk.msra.mxu0 %vm330_vm1, %v329_v2  ;;  %204 = vadd.xlane.f32.xlu0 %v203_v5 }
  0x18   : > { %207 = vadd.xlane.f32.xlu0 %v206_v6 }
  0x1b   : > { %327 = vmatmul.mubr.msk.f32.vlgmr.msra.gmra.mrb[0].mxu0 %vm119_vm0, %v118_v1 }
  0xa1   : > { %v205_v9 = vpop.xlane.xlu0 %204 }
  0xa2   : > { %v220_v15 = vrot.slane %v205_v9, %v219_v12 }
  0xa5   : > { %v208_v14 = vpop.xlane.xlu0 %207 }
  0xa6   : > { %v225_v16 = vrot.slane %v208_v14, %v224_v13 }
  0xa8   : > { %v227_v22 = vsel %vm226_vm2, %v225_v16, %v220_v15 }
  0xee   : > { %v328_v17 = vpop.f32.mrb[0].mxu0 }
  0xef   : > { %v210_v18 = vmul.f32 2.0, %v328_v17  ;;  %v192_v19 = vpop.f32.mrb[1].mxu0 }
  0xf0   : > { %v209_v20 = vmul.f32 2.0, %v192_v19 }
  0xf1   : > { %v212_v21 = vsub.f32 %v210_v18, %v208_v14 }
  0xf2   : > { %v211_v23 = vsub.f32 %v209_v20, %v205_v9 }
  0xf3   : > { %v242_v24 = vsub.f32 %v212_v21, %v227_v22 }
  0xf4   : > { %v241_v25 = vsub.f32 %v211_v23, %v227_v22 }
  0xf5   : > { %245 = vst.msk [vmem:[%s116_s14 + $0x8] sm:$0xff] %vm243_vm3, %v242_v24 }
  0xf6   : > { %244 = vst.msk [vmem:[%s116_s14] sm:$0xff] %vm243_vm3, %v241_v25 }
  0xf7 PF: > { %s11_s6 = sadd.s32 1, %s349_s6  }
  0xf8   : > { %p8_p4 = scmp.ge.s32.totalorder %s11_s6, 4  }
  0xfa   :  { %10 = sbr.rel (!%p8_p4) target bundleno = 1 (0x1), region = 54 }

// kernel: _lambda_.28
= control target key start
LH: loop header
LB: loop body
LE: loop exit
PB: predicated region body
PF: predicated region fallthrough
CT: control target
= control target key end

     0   :  { %v181_v1 = vmov 0   ;;  %vm74_vm0 = vcmask 523264   ;;  %s251_s1 = inlined_call_operand.vmem [shape: bf16[64,256], index: 1, kind: input, shape index: {}]   ;;  %s252_s0 = inlined_call_operand.vmem [shape: bf16[32,64], index: 0, kind: input, shape index: {}]   ;;  %s253_s2 = inlined_call_operand.vmem [shape: f32[32,256], index: 2, kind: output, shape index: {}]  }
   0x1   :  { %v167_v0 = vld [vmem:[%s251_s1 + $0x4] ss:$8 sps:$4 sm:$0xff]   ;;  %113 = vmatprep.mubr.bf16.mxu0 %v181_v1  ;;  %123 = vmatprep.mubr.bf16.mxu1 %v181_v1  ;;  %v169_v2 = vld [vmem:[%s251_s1] ss:$8 sps:$4 sm:$0xff]   ;;  %v170_v3 = vld [vmem:[%s251_s1 + $0x14] ss:$8 sps:$4 sm:$0xff]  }
   0x2   :  { %81 = vmatprep.subr.bf16.mxu0 %v167_v0  ;;  %158 = vmatprep.subr.bf16.mxu1 %v167_v0  ;;  %v172_v4 = vld [vmem:[%s251_s1 + $0x10] ss:$8 sps:$4 sm:$0xff]   ;;  %v173_v5 = vld [vmem:[%s251_s1 + $0x24] ss:$8 sps:$4 sm:$0xff]   ;;  %v175_v6 = vld [vmem:[%s251_s1 + $0x20] ss:$8 sps:$4 sm:$0xff]  }
   0x3   :  { %82 = vmatpush1.bf16.msra.mxu0 %v169_v2  ;;  %162 = vmatpush1.bf16.msra.mxu1 %v169_v2  ;;  %v176_v7 = vld [vmem:[%s251_s1 + $0x34] ss:$8 sps:$4 sm:$0xff]   ;;  %v178_v8 = vld [vmem:[%s251_s1 + $0x30] ss:$8 sps:$4 sm:$0xff]   ;;  %v179_v9 = vld [vmem:[%s252_s0] sm:$0xff]  }
   0x4   :  { %83 = vmatprep.subr.bf16.mxu0 %v170_v3  ;;  %159 = vmatprep.subr.bf16.mxu1 %v170_v3  ;;  %v180_v10 = vld [vmem:[%s252_s0 + $0x8] sm:$0xff]  }
   0x7   :  { %84 = vmatpush1.bf16.msra.mxu0 %v172_v4  ;;  %163 = vmatpush1.bf16.msra.mxu1 %v172_v4 }
   0x8   :  { %85 = vmatprep.subr.bf16.mxu0 %v173_v5  ;;  %160 = vmatprep.subr.bf16.mxu1 %v173_v5 }
   0xb   :  { %86 = vmatpush1.bf16.msra.mxu0 %v175_v6  ;;  %164 = vmatpush1.bf16.msra.mxu1 %v175_v6 }
   0xc   :  { %87 = vmatprep.subr.bf16.mxu0 %v176_v7  ;;  %161 = vmatprep.subr.bf16.mxu1 %v176_v7 }
   0xf   :  { %88 = vmatpush1.bf16.msra.mxu0 %v178_v8  ;;  %165 = vmatpush1.bf16.msra.mxu1 %v178_v8 }
  0x12   :  { %156 = vmatmul.mubr.msk.bf16.vlgmr.msra.gmra.mrb[0].mxu0 %vm74_vm0, %v179_v9  ;;  %157 = vmatmul.mubr.msk.bf16.vlgmr.msra.gmra.mrb[0].mxu1 %vm74_vm0, %v180_v10 }
  0xe5   :  { %v115_v11 = vpop.f32.mrb[0].mxu0  ;;  %v125_v12 = vpop.f32.mrb[0].mxu1 }
  0xe6   :  { %134 = vst [vmem:[%s253_s2] sm:$0xff] %v115_v11  ;;  %138 = vst [vmem:[%s253_s2 + $0x20] sm:$0xff] %v125_v12  ;;  %v117_v13 = vpop.f32.mrb[1].mxu0  ;;  %v127_v14 = vpop.f32.mrb[1].mxu1 }
  0xe7   :  { %135 = vst [vmem:[%s253_s2 + $0x8] sm:$0xff] %v117_v13  ;;  %139 = vst [vmem:[%s253_s2 + $0x28] sm:$0xff] %v127_v14  ;;  %v119_v15 = vpop.f32.mrb[2].mxu0  ;;  %v129_v16 = vpop.f32.mrb[2].mxu1 }
  0xe8   :  { %136 = vst [vmem:[%s253_s2 + $0x10] sm:$0xff] %v119_v15  ;;  %140 = vst [vmem:[%s253_s2 + $0x30] sm:$0xff] %v129_v16  ;;  %v121_v17 = vpop.f32.mrb[3].mxu0  ;;  %v131_v18 = vpop.f32.mrb[3].mxu1 }
  0xe9   :  { %137 = vst [vmem:[%s253_s2 + $0x18] sm:$0xff] %v121_v17  ;;  %141 = vst [vmem:[%s253_s2 + $0x38] sm:$0xff] %v131_v18 }

// kernel: _lambda_.29
= control target key start
LH: loop header
LB: loop body
LE: loop exit
PB: predicated region body
PF: predicated region fallthrough
CT: control target
= control target key end

     0   :  { %v631_v0 = vmov 0.0   ;;  %v632_v1 = vmov 1966171168   ;;  %v60_v3 = vlaneseq  ;;  %vm445_vm0 = vcmask 1043456   ;;  %s1043_s2 = inlined_call_operand.vmem [shape: f32[2,128], index: 2, kind: output, shape index: {}]   ;;  %s1044_s1 = inlined_call_operand.vmem [shape: f32[32,128], index: 1, kind: input, shape index: {}]   ;;  %s1045_s0 = inlined_call_operand.vmem [shape: f32[32,4,128], index: 0, kind: input, shape index: {}]  }
   0x1   :  { %15 = vst [vmem:[%s1043_s2] sm:$0x3] %v631_v0  ;;  %v58_v2 = vunpack.c.l.s4 %v632_v1  ;;  %v48_v7 = vld [vmem:[%s1044_s1] sm:$0xff]  ;;  %v49_v17 = vld [vmem:[%s1044_s1 + $0x8] sm:$0xff]  ;;  %v20_v35 = vld [vmem:[%s1045_s0 + $0x10] sm:$0xf] }
   0x2   :  { %v61_v5 = vshrl.u32 %v60_v3, 7  ;;  %v56_v9 = vcombine.high %v48_v7, %v48_v7  ;;  %v16_v23 = vld [vmem:[%s1045_s0] sm:$0xf]  ;;  %v17_v24 = vld [vmem:[%s1045_s0 + $0x4] sm:$0xf]  ;;  %v105_v37 = vcombine.high %v49_v17, %v49_v17  ;;  %v50_v46 = vld [vmem:[%s1044_s1 + $0x10] sm:$0xff] }
   0x3   :  { %v59_v4 = vunpack.c.0.s8 %v58_v2  ;;  %v18_v25 = vld [vmem:[%s1045_s0 + $0x8] sm:$0xf]  ;;  %v19_v29 = vld [vmem:[%s1045_s0 + $0xc] sm:$0xf]  ;;  %v21_v44 = vld [vmem:[%s1045_s0 + $0x14] sm:$0xf]  ;;  %v154_v53 = vcombine.high %v50_v46, %v50_v46 }
   0x4   :  { %v660_v15 = vsub.s32 0, %v61_v5  ;;  %v22_v51 = vld [vmem:[%s1045_s0 + $0x18] sm:$0xf]  ;;  %v23_v59 = vld [vmem:[%s1045_s0 + $0x1c] sm:$0xf] }
   0x5   :  { %v651_v6 = vsub.s32 %v59_v4, %v61_v5  ;;  %v51_v60 = vld [vmem:[%s1044_s1 + $0x18] sm:$0xff]  ;;  %v24_v3 = vld [vmem:[%s1045_s0 + $0x20] sm:$0xf] }
   0x6   :  { %v203_v63 = vcombine.high %v51_v60, %v51_v60 }
   0x7   :  { %v63_v8 = vrot.slane %v48_v7, %v651_v6  ;;  %v70_v12 = vrot.slane %v56_v9, %v651_v6  ;;  %v112_v27 = vrot.slane %v49_v17, %v651_v6  ;;  %v119_v52 = vrot.slane %v105_v37, %v651_v6 }
   0x8   :  { %v161_v7 = vrot.slane %v50_v46, %v651_v6  ;;  %v168_v9 = vrot.slane %v154_v53, %v651_v6 }
   0x9   :  { %v71_v10 = vcombine.high %v63_v8, %v63_v8  ;;  %v79_v11 = vrot.slane %v63_v8, %v651_v6  ;;  %v72_v16 = vcombine.high %v70_v12, %v70_v12  ;;  %v86_v19 = vrot.slane %v70_v12, %v651_v6 }
   0xa   :  { %v120_v38 = vcombine.high %v112_v27, %v112_v27  ;;  %v128_v47 = vrot.slane %v112_v27, %v651_v6  ;;  %v121_v4 = vcombine.high %v119_v52, %v119_v52  ;;  %v27_v27 = vld [vmem:[%s1045_s0 + $0x2c] sm:$0xf]  ;;  %v789_v46 = vrot.slane %v168_v9, %v651_v6 }
   0xb   :  { %v93_v13 = vrot.slane %v71_v10, %v651_v6  ;;  %v101_v14 = vcombine.high %v79_v11, %v79_v11  ;;  %v255_v20 = vrot.slane %v79_v11, %v660_v15  ;;  %v100_v26 = vrot.slane %v72_v16, %v651_v6 }
   0xc   :  { %v102_v30 = vcombine.high %v86_v19, %v86_v19  ;;  %v271_v31 = vrot.slane %v86_v19, %v660_v15  ;;  %v142_v55 = vrot.slane %v120_v38, %v651_v6  ;;  %v150_v61 = vcombine.high %v128_v47, %v128_v47 }
   0xd   :  { %v103_v18 = vcombine.high %v93_v13, %v93_v13  ;;  %v259_v21 = vrot.slane %v93_v13, %v660_v15  ;;  %v263_v22 = vrot.slane %v101_v14, %v660_v15  ;;  %v685_v32 = vadd.f32 %v255_v20, %v16_v23  ;;  %v25_v13 = vld [vmem:[%s1045_s0 + $0x24] sm:$0xf] }
   0xe   :  { %v104_v36 = vcombine.high %v100_v26, %v100_v26  ;;  %v275_v39 = vrot.slane %v100_v26, %v660_v15  ;;  %v279_v48 = vrot.slane %v102_v30, %v660_v15  ;;  %v711_v49 = vadd.f32 %v271_v31, %v20_v35 }
   0xf   :  { %v267_v28 = vrot.slane %v103_v18, %v660_v15  ;;  %v687_v33 = vadd.f32 %v259_v21, %v17_v24  ;;  %v689_v34 = vadd.f32 %v263_v22, %v18_v25  ;;  %v446_v41 = vsel %vm445_vm0, %v685_v32, 0.0  ;;  %v26_v18 = vld [vmem:[%s1045_s0 + $0x28] sm:$0xf] }
  0x10   :  { %v283_v56 = vrot.slane %v104_v36, %v660_v15  ;;  %v721_v57 = vadd.f32 %v275_v39, %v21_v44  ;;  %v453_v58 = vsel %vm445_vm0, %v711_v49, 0.0  ;;  %v287_v0 = vrot.slane %v128_v47, %v660_v15  ;;  %v28_v39 = vld [vmem:[%s1045_s0 + $0x30] sm:$0xf] }
  0x11   :  { %v695_v40 = vadd.f32 %v267_v28, %v19_v29  ;;  %v447_v42 = vsel %vm445_vm0, %v687_v33, 0.0  ;;  %v449_v43 = vsel %vm445_vm0, %v689_v34, 0.0  ;;  %v732_v1 = vadd.f32 %v279_v48, %v22_v51 }
  0x12   :  { %v448_v45 = vadd.f32 %v447_v42, %v446_v41  ;;  %v455_v2 = vsel %vm445_vm0, %v721_v57, 0.0  ;;  %v152_v5 = vcombine.high %v142_v55, %v142_v55  ;;  %v291_v10 = vrot.slane %v142_v55, %v660_v15 }
  0x13   :  { %v451_v50 = vsel %vm445_vm0, %v695_v40, 0.0  ;;  %v742_v11 = vadd.f32 %v283_v56, %v23_v59  ;;  %v457_v12 = vsel %vm445_vm0, %v732_v1, 0.0  ;;  %v135_v14 = vrot.slane %v119_v52, %v651_v6 }
  0x14   :  { %v450_v54 = vadd.f32 %v449_v43, %v448_v45  ;;  %v295_v16 = vrot.slane %v150_v61, %v660_v15  ;;  %v755_v19 = vrot.slane %v51_v60, %v651_v6  ;;  %v758_v20 = vrot.slane %v203_v63, %v651_v6  ;;  %v30_v60 = vld [vmem:[%s1045_s0 + $0x38] sm:$0xf] }
  0x15   :  { %v760_v21 = vadd.f32 %v287_v0, %v24_v3  ;;  %v459_v22 = vsel %vm445_vm0, %v742_v11, 0.0  ;;  %v149_v23 = vrot.slane %v121_v4, %v651_v6  ;;  %v151_v24 = vcombine.high %v135_v14, %v135_v14 }
  0x16   :  { %v452_v62 = vadd.f32 %v451_v50, %v450_v54  ;;  %v299_v25 = vrot.slane %v152_v5, %v660_v15  ;;  %v169_v28 = vcombine.high %v161_v7, %v161_v7  ;;  %v170_v29 = vcombine.high %v168_v9, %v168_v9  ;;  %v31_v5 = vld [vmem:[%s1045_s0 + $0x3c] sm:$0xf] }
  0x17   :  { %v769_v30 = vadd.f32 %v291_v10, %v25_v13  ;;  %v461_v31 = vsel %vm445_vm0, %v760_v21, 0.0  ;;  %v153_v35 = vcombine.high %v149_v23, %v149_v23  ;;  %v303_v36 = vrot.slane %v135_v14, %v660_v15 }
  0x18   :  { %v454_v8 = vadd.f32 %v453_v58, %v452_v62  ;;  %v774_v37 = vadd.f32 %v295_v16, %v26_v18  ;;  %v518_v42 = vmul.f32 %v685_v32, %v685_v32  ;;  %v519_v43 = vmul.f32 %v687_v33, %v687_v33  ;;  %v32_v16 = vld [vmem:[%s1045_s0 + $0x40] sm:$0xf] }
  0x19   :  { %v463_v41 = vsel %vm445_vm0, %v769_v30, 0.0  ;;  %v520_v44 = vmul.f32 %v689_v34, %v689_v34  ;;  %v177_v45 = vrot.slane %v161_v7, %v651_v6  ;;  %v791_v47 = vadd.f32 %v299_v25, %v27_v27  ;;  %v29_v34 = vld [vmem:[%s1045_s0 + $0x34] sm:$0xf]  ;;  %v33_v27 = vld [vmem:[%s1045_s0 + $0x44] sm:$0xf] }
  0x1a   :  { %v456_v17 = vadd.f32 %v455_v2, %v454_v8  ;;  %v191_v50 = vrot.slane %v169_v28, %v651_v6  ;;  %v307_v51 = vrot.slane %v149_v23, %v660_v15  ;;  %v465_v32 = vsel %vm445_vm0, %v774_v37, 0.0 }
  0x1b   :  { %v521_v33 = vmul.f32 %v695_v40, %v695_v40  ;;  %v311_v52 = vrot.slane %v151_v24, %v660_v15  ;;  %v803_v53 = vadd.f32 %v303_v36, %v28_v39  ;;  %v467_v55 = vsel %vm445_vm0, %v791_v47, 0.0 }
  0x1c   :  { %v458_v26 = vadd.f32 %v457_v12, %v456_v17  ;;  %v522_v56 = vmul.f32 %v711_v49, %v711_v49  ;;  %v550_v58 = vsel %vm445_vm0, %v518_v42, 0.0  ;;  %v551_v59 = vsel %vm445_vm0, %v519_v43, 0.0 }
  0x1d   :  { %v553_v40 = vsel %vm445_vm0, %v520_v44, 0.0  ;;  %v816_v61 = vrot.slane %v170_v29, %v651_v6  ;;  %v315_v62 = vrot.slane %v153_v35, %v660_v15  ;;  %v552_v0 = vadd.f32 %v551_v59, %v550_v58  ;;  %v36_v59 = vld [vmem:[%s1045_s0 + $0x50] sm:$0xf] }
  0x1e   :  { %v460_v38 = vadd.f32 %v459_v22, %v458_v26  ;;  %v819_v2 = vadd.f32 %v307_v51, %v29_v34  ;;  %v469_v49 = vsel %vm445_vm0, %v803_v53, 0.0  ;;  %v523_v3 = vmul.f32 %v721_v57, %v721_v57 }
  0x1f   :  { %v555_v4 = vsel %vm445_vm0, %v521_v33, 0.0  ;;  %v199_v7 = vcombine.high %v177_v45, %v177_v45  ;;  %v319_v8 = vrot.slane %v177_v45, %v660_v15  ;;  %v554_v10 = vadd.f32 %v553_v40, %v552_v0 }
  0x20   :  { %v462_v48 = vadd.f32 %v461_v31, %v460_v38  ;;  %v830_v12 = vadd.f32 %v311_v52, %v30_v60  ;;  %v471_v13 = vsel %vm445_vm0, %v819_v2, 0.0  ;;  %v524_v14 = vmul.f32 %v732_v1, %v732_v1 }
  0x21   :  { %v557_v57 = vsel %vm445_vm0, %v522_v56, 0.0  ;;  %v201_v17 = vcombine.high %v191_v50, %v191_v50  ;;  %v323_v18 = vrot.slane %v191_v50, %v660_v15  ;;  %v556_v23 = vadd.f32 %v555_v4, %v554_v10 }
  0x22   :  { %v464_v54 = vadd.f32 %v463_v41, %v462_v48  ;;  %v841_v24 = vadd.f32 %v315_v62, %v31_v5  ;;  %v473_v25 = vsel %vm445_vm0, %v830_v12, 0.0  ;;  %v525_v26 = vmul.f32 %v742_v11, %v742_v11  ;;  %v34_v41 = vld [vmem:[%s1045_s0 + $0x48] sm:$0xf] }
  0x23   :  { %v559_v1 = vsel %vm445_vm0, %v523_v3, 0.0  ;;  %v218_v28 = vcombine.high %v755_v19, %v755_v19  ;;  %v327_v29 = vrot.slane %v199_v7, %v660_v15  ;;  %v558_v35 = vadd.f32 %v557_v57, %v556_v23  ;;  %v37_v3 = vld [vmem:[%s1045_s0 + $0x54] sm:$0xf]  ;;  %v39_v23 = vld [vmem:[%s1045_s0 + $0x5c] sm:$0xf] }
  0x24   :  { %v466_v63 = vadd.f32 %v465_v32, %v464_v54  ;;  %v854_v36 = vadd.f32 %v319_v8, %v32_v16  ;;  %v475_v38 = vsel %vm445_vm0, %v841_v24, 0.0  ;;  %v526_v11 = vmul.f32 %v760_v21, %v760_v21  ;;  %v35_v32 = vld [vmem:[%s1045_s0 + $0x4c] sm:$0xf] }
  0x25   :  { %v561_v39 = vsel %vm445_vm0, %v524_v14, 0.0  ;;  %v219_v42 = vcombine.high %v758_v20, %v758_v20  ;;  %v331_v43 = vrot.slane %v201_v17, %v660_v15  ;;  %v560_v45 = vadd.f32 %v559_v1, %v558_v35  ;;  %v40_v35 = vld [vmem:[%s1045_s0 + $0x60] sm:$0xf] }
  0x26   :  { %v468_v9 = vadd.f32 %v467_v55, %v466_v63  ;;  %v867_v48 = vadd.f32 %v323_v18, %v33_v27  ;;  %v477_v50 = vsel %vm445_vm0, %v854_v36, 0.0  ;;  %v527_v21 = vmul.f32 %v769_v30, %v769_v30 }
  0x27   :  { %v563_v51 = vsel %vm445_vm0, %v525_v26, 0.0  ;;  %v200_v33 = vcombine.high %v789_v46, %v789_v46  ;;  %v335_v34 = vrot.slane %v789_v46, %v660_v15  ;;  %v562_v54 = vadd.f32 %v561_v39, %v560_v45 }
  0x28   :  { %v470_v22 = vadd.f32 %v469_v49, %v468_v9  ;;  %v881_v55 = vadd.f32 %v327_v29, %v34_v41  ;;  %v479_v56 = vsel %vm445_vm0, %v867_v48, 0.0  ;;  %v528_v30 = vmul.f32 %v774_v37, %v774_v37 }
  0x29   :  { %v565_v58 = vsel %vm445_vm0, %v526_v11, 0.0  ;;  %v202_v40 = vcombine.high %v816_v61, %v816_v61  ;;  %v339_v46 = vrot.slane %v816_v61, %v660_v15  ;;  %v564_v62 = vadd.f32 %v563_v51, %v562_v54 }
  0x2a   :  { %v472_v31 = vadd.f32 %v471_v13, %v470_v22  ;;  %v895_v63 = vadd.f32 %v331_v43, %v35_v32  ;;  %v481_v0 = vsel %vm445_vm0, %v881_v55, 0.0  ;;  %v529_v37 = vmul.f32 %v791_v47, %v791_v47  ;;  %v38_v13 = vld [vmem:[%s1045_s0 + $0x58] sm:$0xf] }
  0x2b   :  { %v567_v49 = vsel %vm445_vm0, %v527_v21, 0.0  ;;  %v226_v4 = vrot.slane %v755_v19, %v651_v6  ;;  %v343_v61 = vrot.slane %v200_v33, %v660_v15  ;;  %v566_v7 = vadd.f32 %v565_v58, %v564_v62 }
  0x2c   :  { %v474_v44 = vadd.f32 %v473_v25, %v472_v31  ;;  %v908_v8 = vadd.f32 %v335_v34, %v36_v59  ;;  %v483_v9 = vsel %vm445_vm0, %v895_v63, 0.0  ;;  %v530_v47 = vmul.f32 %v803_v53, %v803_v53 }
  0x2d   :  { %v569_v10 = vsel %vm445_vm0, %v528_v30, 0.0  ;;  %v240_v19 = vrot.slane %v218_v28, %v651_v6  ;;  %v347_v14 = vrot.slane %v202_v40, %v660_v15  ;;  %v568_v16 = vadd.f32 %v567_v49, %v566_v7 }
  0x2e   :  { %v476_v52 = vadd.f32 %v475_v38, %v474_v44  ;;  %v920_v17 = vadd.f32 %v339_v46, %v37_v3  ;;  %v485_v18 = vsel %vm445_vm0, %v908_v8, 0.0  ;;  %v531_v53 = vmul.f32 %v819_v2, %v819_v2 }
  0x2f   :  { %v571_v22 = vsel %vm445_vm0, %v529_v37, 0.0  ;;  %v248_v25 = vcombine.high %v226_v4, %v226_v4  ;;  %v351_v26 = vrot.slane %v226_v4, %v660_v15  ;;  %v570_v27 = vadd.f32 %v569_v10, %v568_v16 }
  0x30   :  { %v478_v60 = vadd.f32 %v477_v50, %v476_v52  ;;  %v931_v28 = vadd.f32 %v343_v61, %v38_v13  ;;  %v487_v29 = vsel %vm445_vm0, %v920_v17, 0.0  ;;  %v532_v31 = vmul.f32 %v830_v12, %v830_v12  ;;  %v41_v50 = vld [vmem:[%s1045_s0 + $0x64] sm:$0xf] }
  0x31   :  { %v573_v2 = vsel %vm445_vm0, %v530_v47, 0.0  ;;  %v250_v38 = vcombine.high %v240_v19, %v240_v19  ;;  %v355_v11 = vrot.slane %v240_v19, %v660_v15  ;;  %v572_v41 = vadd.f32 %v571_v22, %v570_v27 }
  0x32   :  { %v480_v5 = vadd.f32 %v479_v56, %v478_v60  ;;  %v942_v43 = vadd.f32 %v347_v14, %v39_v23  ;;  %v489_v44 = vsel %vm445_vm0, %v931_v28, 0.0  ;;  %v533_v45 = vmul.f32 %v841_v24, %v841_v24  ;;  %v42_v56 = vld [vmem:[%s1045_s0 + $0x68] sm:$0xf] }
  0x33   :  { %v575_v12 = vsel %vm445_vm0, %v531_v53, 0.0  ;;  %v233_v21 = vrot.slane %v758_v20, %v651_v6  ;;  %v359_v51 = vrot.slane %v248_v25, %v660_v15  ;;  %v574_v33 = vadd.f32 %v573_v2, %v572_v41 }
  0x34   :  { %v482_v57 = vadd.f32 %v481_v0, %v480_v5  ;;  %v955_v34 = vadd.f32 %v351_v26, %v40_v35  ;;  %v491_v52 = vsel %vm445_vm0, %v942_v43, 0.0  ;;  %v534_v24 = vmul.f32 %v854_v36, %v854_v36  ;;  %v43_v0 = vld [vmem:[%s1045_s0 + $0x6c] sm:$0xf] }
  0x35   :  { %v577_v54 = vsel %vm445_vm0, %v532_v31, 0.0  ;;  %v247_v30 = vrot.slane %v219_v42, %v651_v6  ;;  %v363_v58 = vrot.slane %v250_v38, %v660_v15  ;;  %v576_v40 = vadd.f32 %v575_v12, %v574_v33 }
  0x36   :  { %v484_v1 = vadd.f32 %v483_v9, %v482_v57  ;;  %v437_v46 = vadd.f32 %v355_v11, %v41_v50  ;;  %v493_v60 = vsel %vm445_vm0, %v955_v34, 0.0  ;;  %v535_v36 = vmul.f32 %v867_v48, %v867_v48  ;;  %v44_v48 = vld [vmem:[%s1045_s0 + $0x70] sm:$0xf] }
  0x37   :  { %v579_v62 = vsel %vm445_vm0, %v533_v45, 0.0  ;;  %v249_v37 = vcombine.high %v233_v21, %v233_v21  ;;  %v367_v6 = vrot.slane %v233_v21, %v660_v15  ;;  %v578_v42 = vadd.f32 %v577_v54, %v576_v40 }
  0x38   :  { %v486_v39 = vadd.f32 %v485_v18, %v484_v1  ;;  %v438_v49 = vadd.f32 %v359_v51, %v42_v56  ;;  %v495_v3 = vsel %vm445_vm0, %v437_v46, 0.0  ;;  %v536_v4 = vmul.f32 %v881_v55, %v881_v55  ;;  %v45_v55 = vld [vmem:[%s1045_s0 + $0x74] sm:$0xf] }
  0x39   :  { %v581_v61 = vsel %vm445_vm0, %v534_v24, 0.0  ;;  %v251_v5 = vcombine.high %v247_v30, %v247_v30  ;;  %v371_v7 = vrot.slane %v247_v30, %v660_v15  ;;  %v580_v47 = vadd.f32 %v579_v62, %v578_v42 }
  0x3a   :  { %v488_v32 = vadd.f32 %v487_v29, %v486_v39  ;;  %v439_v10 = vadd.f32 %v363_v58, %v43_v0  ;;  %v497_v13 = vsel %vm445_vm0, %v438_v49, 0.0  ;;  %v537_v19 = vmul.f32 %v895_v63, %v895_v63  ;;  %v46_v63 = vld [vmem:[%s1045_s0 + $0x78] sm:$0xf] }
  0x3b   :  { %v583_v14 = vsel %vm445_vm0, %v535_v36, 0.0  ;;  %v375_v57 = vrot.slane %v249_v37, %v660_v15  ;;  %v582_v18 = vadd.f32 %v581_v61, %v580_v47  ;;  %v440_v53 = vadd.f32 %v367_v6, %v44_v48 }
  0x3c   :  { %v490_v59 = vadd.f32 %v489_v44, %v488_v32  ;;  %v499_v22 = vsel %vm445_vm0, %v439_v10, 0.0  ;;  %v538_v23 = vmul.f32 %v908_v8, %v908_v8  ;;  %v585_v25 = vsel %vm445_vm0, %v536_v4, 0.0  ;;  %v47_v8 = vld [vmem:[%s1045_s0 + $0x7c] sm:$0xf] }
  0x3d   :  { %v379_v26 = vrot.slane %v251_v5, %v660_v15  ;;  %v584_v27 = vadd.f32 %v583_v14, %v582_v18  ;;  %v441_v29 = vadd.f32 %v371_v7, %v45_v55  ;;  %v501_v31 = vsel %vm445_vm0, %v440_v53, 0.0 }
  0x3e   :  { %v492_v20 = vadd.f32 %v491_v52, %v490_v59  ;;  %v539_v2 = vmul.f32 %v920_v17, %v920_v17  ;;  %v587_v35 = vsel %vm445_vm0, %v537_v19, 0.0  ;;  %v442_v39 = vadd.f32 %v375_v57, %v46_v63 }
  0x3f   :  { %v586_v11 = vadd.f32 %v585_v25, %v584_v27  ;;  %v503_v41 = vsel %vm445_vm0, %v441_v29, 0.0  ;;  %v540_v15 = vmul.f32 %v931_v28, %v931_v28  ;;  %v589_v44 = vsel %vm445_vm0, %v538_v23, 0.0 }
  0x40   :  { %v494_v9 = vadd.f32 %v493_v60, %v492_v20  ;;  %v443_v50 = vadd.f32 %v379_v26, %v47_v8  ;;  %v505_v17 = vsel %vm445_vm0, %v442_v39, 0.0  ;;  %v541_v21 = vmul.f32 %v942_v43, %v942_v43 }
  0x41   :  { %v588_v12 = vadd.f32 %v587_v35, %v586_v11  ;;  %v591_v51 = vsel %vm445_vm0, %v539_v2, 0.0  ;;  %v542_v24 = vmul.f32 %v955_v34, %v955_v34  ;;  %v593_v28 = vsel %vm445_vm0, %v540_v15, 0.0 }
  0x42   :  { %v496_v16 = vadd.f32 %v495_v3, %v494_v9  ;;  %v507_v52 = vsel %vm445_vm0, %v443_v50, 0.0  ;;  %v543_v30 = vmul.f32 %v437_v46, %v437_v46  ;;  %v595_v58 = vsel %vm445_vm0, %v541_v21, 0.0 }
  0x43   :  { %v590_v33 = vadd.f32 %v589_v44, %v588_v12  ;;  %v544_v60 = vmul.f32 %v438_v49, %v438_v49  ;;  %v597_v43 = vsel %vm445_vm0, %v542_v24, 0.0  ;;  %v545_v0 = vmul.f32 %v439_v10, %v439_v10  ;;  %v444_v10 = vld [vmem:[%s1043_s2] sm:$0x1] }
  0x44   :  { %v498_v1 = vadd.f32 %v497_v13, %v496_v16  ;;  %v599_v37 = vsel %vm445_vm0, %v543_v30, 0.0  ;;  %v546_v34 = vmul.f32 %v440_v53, %v440_v53  ;;  %v547_v46 = vmul.f32 %v441_v29, %v441_v29  ;;  %v517_v29 = vld [vmem:[%s1043_s2 + $0x1] sm:$0x1] }
  0x45   :  { %v592_v56 = vadd.f32 %v591_v51, %v590_v33  ;;  %v601_v42 = vsel %vm445_vm0, %v544_v60, 0.0  ;;  %v603_v61 = vsel %vm445_vm0, %v545_v0, 0.0  ;;  %v548_v49 = vmul.f32 %v442_v39, %v442_v39 }
  0x46   :  { %v500_v38 = vadd.f32 %v499_v22, %v498_v1  ;;  %v605_v7 = vsel %vm445_vm0, %v546_v34, 0.0  ;;  %v549_v13 = vmul.f32 %v443_v50, %v443_v50  ;;  %v607_v19 = vsel %vm445_vm0, %v547_v46, 0.0 }
  0x47   :  { %v594_v40 = vadd.f32 %v593_v28, %v592_v56  ;;  %v609_v57 = vsel %vm445_vm0, %v548_v49, 0.0 }
  0x48   :  { %v502_v45 = vadd.f32 %v501_v31, %v500_v38  ;;  %v611_v53 = vsel %vm445_vm0, %v549_v13, 0.0 }
  0x49   :  { %v596_v62 = vadd.f32 %v595_v58, %v594_v40 }
  0x4a   :  { %v504_v32 = vadd.f32 %v503_v41, %v502_v45 }
  0x4b   :  { %v598_v20 = vadd.f32 %v597_v43, %v596_v62 }
  0x4c   :  { %v506_v54 = vadd.f32 %v505_v17, %v504_v32 }
  0x4d   :  { %v600_v4 = vadd.f32 %v599_v37, %v598_v20 }
  0x4e   :  { %v508_v59 = vadd.f32 %v507_v52, %v506_v54 }
  0x4f   :  { %v602_v5 = vadd.f32 %v601_v42, %v600_v4 }
  0x50   :  { %v509_v36 = vrot.slane %v508_v59, 4 }
  0x51   :  { %v604_v47 = vadd.f32 %v603_v61, %v602_v5 }
  0x52   :  { %v510_v6 = vadd.f32 %v509_v36, %v508_v59 }
  0x53   :  { %v606_v55 = vadd.f32 %v605_v7, %v604_v47 }
  0x54   :  { %v511_v3 = vrot.slane %v510_v6, 2 }
  0x55   :  { %v608_v18 = vadd.f32 %v607_v19, %v606_v55 }
  0x56   :  { %v512_v48 = vadd.f32 %v511_v3, %v510_v6 }
  0x57   :  { %v610_v22 = vadd.f32 %v609_v57, %v608_v18 }
  0x58   :  { %v513_v9 = vrot.slane %v512_v48, 1 }
  0x59   :  { %v612_v23 = vadd.f32 %v611_v53, %v610_v22 }
  0x5a   :  { %v514_v14 = vadd.f32 %v513_v9, %v512_v48 }
  0x5b   :  { %v613_v25 = vrot.slane %v612_v23, 4 }
  0x5c   :  { %v515_v16 = vadd.f32 %v514_v14, %v444_v10 }
  0x5d   :  { %v614_v63 = vadd.f32 %v613_v25, %v612_v23 }
  0x5e   :  { %516 = vst [vmem:[%s1043_s2] sm:$0x1] %v515_v16 }
  0x5f   :  { %v615_v26 = vrot.slane %v614_v63, 2 }
  0x61   :  { %v616_v1 = vadd.f32 %v615_v26, %v614_v63 }
  0x63   :  { %v617_v27 = vrot.slane %v616_v1, 1 }
  0x65   :  { %v618_v31 = vadd.f32 %v617_v27, %v616_v1 }
  0x67   :  { %v619_v2 = vadd.f32 %v618_v31, %v517_v29 }
  0x69   :  { %620 = vst [vmem:[%s1043_s2 + $0x1] sm:$0x1] %v619_v2 }

// kernel: _lambda_.31
= control target key start
LH: loop header
LB: loop body
LE: loop exit
PB: predicated region body
PF: predicated region fallthrough
CT: control target
= control target key end

     0   :  { %s346_s6 = smov 0   ;;  %s370_s0 = inlined_call_operand.vmem [shape: f32[2,16,128], index: 0, kind: input, shape index: {}]   ;;  %s371_s1 = inlined_call_operand.vmem [shape: f32[2,16,16], index: 1, kind: output, shape index: {}]  }
   0x1 LB: > { %s292_s7 = sadd.s32 4294967295, %s334_s6   ;;  %p296_p0 = scmp.ge.s32.totalorder %s334_s6, 1  ;;  %s334_s6 = sphi %s346_s6, %s11_s6  }
   0x2   : > { %p87_p1 = scmp.lt.s32.totalorder %s334_s6, 3 }
   0x4   : > { %p88_p2 = pnand %p296_p0, %p87_p1 }
   0x5   : > { %p107_p3 = scmp.lt.s32.totalorder (!%p88_p2), %s292_s7, 1  ;;  %v206_v5 = vlaneseq (!%p88_p2)  ;;  %vm217_vm0 = vcmask (!%p88_p2), 130112   ;;  %vm234_vm1 = vcmask (!%p88_p2), 130048  }
   0x6   : > { %91 = sbr.rel (%p88_p2) target bundleno = 247 (0xf7), region = 24 }
   0x7   : > { %v207_v6 = vand.u32 (!%p88_p2), 127, %v206_v5  ;;  %v209_v8 = vshrl.u32 (!%p88_p2), %v206_v5, 7 }
   0x9   : > { %v212_v9 = vadd.s32 (!%p88_p2), 4294967288, %v207_v6  ;;  %v210_v10 = vsub.s32 (!%p88_p2), %v207_v6, %v209_v8 }
   0xb   : > { %v215_v11 = vsub.s32 (!%p88_p2), %v212_v9, %v209_v8 }
   0xd   : > { %s373_s7 = smov (!%p107_p3, %s292_s7), 1 }
   0xe   : > { %s303_s8 = sshll.u32 %s373_s7, 4 }
   0xf   : > { %s111_s11 = scalar_lea.vmem %s370_s0, %s303_s8  ;;  %s116_s14 = scalar_lea.vmem %s371_s1, %s303_s8 }
  0x10   : > { %v117_v0 = vld [vmem:[%s111_s11] sm:$0xff]  ;;  %v118_v1 = vld [vmem:[%s111_s11 + $0x8] sm:$0xff] }
  0x11   : > { %v316_v2 = vpack.c.bf16 %v118_v1, %v117_v0  ;;  %313 = vmatprep.mubr.f32.mxu0 %v117_v0  ;;  %v194_v3 = vmul.f32 %v117_v0, %v117_v0  ;;  %v195_v4 = vmul.f32 %v118_v1, %v118_v1 }
  0x13   : > { %317 = vmatprep.subr.bf16.mxu0 %v316_v2  ;;  %196 = vadd.xlane.f32.xlu0 %v194_v3 }
  0x14   : > { %319 = vmatpush3.bf16.xpose.msra.mxu0 %v316_v2 }
  0x17   : > { %198 = vadd.xlane.f32.xlu0 %v195_v4 }
  0x1b   : > { %314 = vmatmul.mubr.f32.vlgmr.msra.gmra.mrb[0].mxu0 %v118_v1 }
  0xa0   : > { %v197_v7 = vpop.xlane.xlu0 %196 }
  0xa1   : > { %v211_v13 = vrot.slane %v197_v7, %v210_v10 }
  0xa4   : > { %v199_v12 = vpop.xlane.xlu0 %198 }
  0xa5   : > { %v216_v14 = vrot.slane %v199_v12, %v215_v11 }
  0xa7   : > { %v218_v20 = vsel %vm217_vm0, %v216_v14, %v211_v13 }
  0xee   : > { %v315_v15 = vpop.f32.mrb[0].mxu0 }
  0xef   : > { %v201_v16 = vmul.f32 2.0, %v315_v15  ;;  %v185_v17 = vpop.f32.mrb[1].mxu0 }
  0xf0   : > { %v200_v18 = vmul.f32 2.0, %v185_v17 }
  0xf1   : > { %v203_v19 = vsub.f32 %v201_v16, %v199_v12 }
  0xf2   : > { %v202_v21 = vsub.f32 %v200_v18, %v197_v7 }
  0xf3   : > { %v233_v22 = vsub.f32 %v203_v19, %v218_v20 }
  0xf4   : > { %v232_v23 = vsub.f32 %v202_v21, %v218_v20 }
  0xf5   : > { %236 = vst.msk [vmem:[%s116_s14 + $0x8] sm:$0xff] %vm234_vm1, %v233_v22 }
  0xf6   : > { %235 = vst.msk [vmem:[%s116_s14] sm:$0xff] %vm234_vm1, %v232_v23 }
  0xf7 PF: > { %s11_s6 = sadd.s32 1, %s334_s6  }
  0xf8   : > { %p8_p4 = scmp.ge.s32.totalorder %s11_s6, 4  }
  0xfa   :  { %10 = sbr.rel (!%p8_p4) target bundleno = 1 (0x1), region = 54 }

// kernel: _lambda_.30
= control target key start
LH: loop header
LB: loop body
LE: loop exit
PB: predicated region body
PF: predicated region fallthrough
CT: control target
= control target key end

     0   :  { %v913_v0 = vmov 1966171168   ;;  %v64_v2 = vlaneseq  ;;  %vm602_vm0 = vcmask 1043456   ;;  %vm859_vm1 = vcmask 1041409   ;;  %s1631_s1 = inlined_call_operand.vmem [shape: f32[32,128], index: 1, kind: input, shape index: {}]   ;;  %s1632_s2 = inlined_call_operand.vmem [shape: f32[2,128], index: 2, kind: input, shape index: {}]   ;;  %s1633_s0 = inlined_call_operand.vmem [shape: f32[32,4,128], index: 0, kind: input, shape index: {}]   ;;  %s1634_s3 = inlined_call_operand.vmem [shape: f32[1,128], index: 3, kind: input, shape index: {}]   ;;  %s1635_s4 = inlined_call_operand.vmem [shape: f32[1,128], index: 4, kind: input, shape index: {}]   ;;  %s1636_s5 = inlined_call_operand.vmem [shape: f32[32,128], index: 5, kind: output, shape index: {}]  }
   0x1   :  { %v62_v1 = vunpack.c.l.s4 %v913_v0  ;;  %v52_v5 = vld [vmem:[%s1631_s1] sm:$0xff]  ;;  %v53_v8 = vld [vmem:[%s1631_s1 + $0x8] sm:$0xff]  ;;  %v54_v9 = vld [vmem:[%s1631_s1 + $0x10] sm:$0xff]  ;;  %vm861_vm2 = vcmask 1042434   ;;  %vm863_vm3 = vcmask 1043459   ;;  %vm865_vm4 = vcmask 1044484  }
   0x2   :  { %v65_v4 = vshrl.u32 %v64_v2, 7  ;;  %v60_v6 = vcombine.high %v52_v5, %v52_v5  ;;  %v109_v10 = vcombine.high %v53_v8, %v53_v8  ;;  %v158_v11 = vcombine.high %v54_v9, %v54_v9  ;;  %v55_v12 = vld [vmem:[%s1631_s1 + $0x18] sm:$0xff]  ;;  %v448_v18 = vld [vmem:[%s1632_s2] sm:$0x1]  ;;  %v450_v23 = vld [vmem:[%s1632_s2 + $0x1] sm:$0x1] }
   0x3   :  { %v63_v3 = vunpack.c.0.s8 %v62_v1  ;;  %v207_v15 = vcombine.high %v55_v12, %v55_v12  ;;  %v964_v27 = vmul.f32 0.0078125, %v448_v18  ;;  %v451_v34 = vmul.f32 0.0078125, %v450_v23  ;;  %v20_v18 = vld [vmem:[%s1633_s0] sm:$0xf] }
   0x4   :  { %v968_v33 = vsub.s32 0, %v65_v4  ;;  %vm867_vm5 = vcmask 1045509   ;;  %vm869_vm6 = vcmask 1046534   ;;  %vm871_vm7 = vcmask 1047559  }
   0x5   :  { %v66_v7 = vsub.s32 %v63_v3, %v65_v4  ;;  %v452_v42 = vmul.f32 %v964_v27, %v964_v27 }
   0x7   :  { %v67_v13 = vrot.slane %v52_v5, %v66_v7  ;;  %v74_v14 = vrot.slane %v60_v6, %v66_v7  ;;  %v116_v16 = vrot.slane %v53_v8, %v66_v7  ;;  %v123_v17 = vrot.slane %v109_v10, %v66_v7 }
   0x8   :  { %v165_v19 = vrot.slane %v54_v9, %v66_v7  ;;  %v172_v20 = vrot.slane %v158_v11, %v66_v7  ;;  %v214_v25 = vrot.slane %v55_v12, %v66_v7  ;;  %v221_v26 = vrot.slane %v207_v15, %v66_v7 }
   0x9   :  { %v75_v21 = vcombine.high %v67_v13, %v67_v13  ;;  %v76_v22 = vcombine.high %v74_v14, %v74_v14  ;;  %v962_v24 = vrot.slane %v67_v13, %v66_v7  ;;  %v966_v28 = vrot.slane %v74_v14, %v66_v7 }
   0xa   :  { %v124_v29 = vcombine.high %v116_v16, %v116_v16  ;;  %v125_v30 = vcombine.high %v123_v17, %v123_v17  ;;  %v173_v31 = vcombine.high %v165_v19, %v165_v19  ;;  %v174_v32 = vcombine.high %v172_v20, %v172_v20 }
   0xb   :  { %v970_v35 = vrot.slane %v75_v21, %v66_v7  ;;  %v972_v36 = vrot.slane %v76_v22, %v66_v7  ;;  %v974_v37 = vrot.slane %v116_v16, %v66_v7  ;;  %v976_v38 = vrot.slane %v123_v17, %v66_v7 }
   0xc   :  { %v105_v39 = vcombine.high %v962_v24, %v962_v24  ;;  %v222_v40 = vcombine.high %v214_v25, %v214_v25  ;;  %v223_v41 = vcombine.high %v221_v26, %v221_v26  ;;  %v106_v43 = vcombine.high %v966_v28, %v966_v28 }
   0xd   :  { %v984_v44 = vrot.slane %v124_v29, %v66_v7  ;;  %v986_v45 = vrot.slane %v125_v30, %v66_v7  ;;  %v988_v46 = vrot.slane %v165_v19, %v66_v7  ;;  %v990_v47 = vrot.slane %v172_v20, %v66_v7  ;;  %v21_v19 = vld [vmem:[%s1633_s0 + $0x4] sm:$0xf]  ;;  %v22_v20 = vld [vmem:[%s1633_s0 + $0x8] sm:$0xf] }
   0xe   :  { %v992_v48 = vrot.slane %v173_v31, %v66_v7  ;;  %v994_v49 = vrot.slane %v174_v32, %v66_v7  ;;  %v453_v50 = vsub.f32 %v451_v34, %v452_v42  ;;  %v154_v51 = vcombine.high %v974_v37, %v974_v37  ;;  %v26_v34 = vld [vmem:[%s1633_s0 + $0x18] sm:$0xf]  ;;  %v30_v42 = vld [vmem:[%s1633_s0 + $0x28] sm:$0xf] }
   0xf   :  { %v155_v52 = vcombine.high %v976_v38, %v976_v38  ;;  %v1000_v53 = vrot.slane %v214_v25, %v66_v7  ;;  %v1002_v54 = vrot.slane %v221_v26, %v66_v7  ;;  %v107_v55 = vcombine.high %v970_v35, %v970_v35  ;;  %v23_v25 = vld [vmem:[%s1633_s0 + $0xc] sm:$0xf]  ;;  %v24_v26 = vld [vmem:[%s1633_s0 + $0x10] sm:$0xf] }
  0x10   :  { %v1006_v56 = vrot.slane %v222_v40, %v66_v7  ;;  %v1008_v57 = vrot.slane %v223_v41, %v66_v7  ;;  %v454_v58 = vmax.f32 %v453_v50, 0.0  ;;  %v108_v59 = vcombine.high %v972_v36, %v972_v36  ;;  %v29_v41 = vld [vmem:[%s1633_s0 + $0x24] sm:$0xf]  ;;  %v34_v50 = vld [vmem:[%s1633_s0 + $0x38] sm:$0xf] }
  0x11   :  { %v156_v60 = vcombine.high %v984_v44, %v984_v44  ;;  %v157_v61 = vcombine.high %v986_v45, %v986_v45  ;;  %v203_v62 = vcombine.high %v988_v46, %v988_v46  ;;  %v204_v63 = vcombine.high %v990_v47, %v990_v47 }
  0x12   :  { %v205_v0 = vcombine.high %v992_v48, %v992_v48  ;;  %v206_v1 = vcombine.high %v994_v49, %v994_v49  ;;  %v456_v2 = vadd.f32 1e-05, %v454_v58  ;;  %v252_v3 = vcombine.high %v1000_v53, %v1000_v53  ;;  %v36_v58 = vld [vmem:[%s1633_s0 + $0x40] sm:$0xf] }
  0x13   :  { %v253_v4 = vcombine.high %v1002_v54, %v1002_v54  ;;  %v259_v5 = vrot.slane %v962_v24, %v968_v33  ;;  %v263_v6 = vrot.slane %v970_v35, %v968_v33  ;;  %v254_v7 = vcombine.high %v1006_v56, %v1006_v56  ;;  %v27_v35 = vld [vmem:[%s1633_s0 + $0x1c] sm:$0xf] }
  0x14   :  { %v255_v8 = vcombine.high %v1008_v57, %v1008_v57  ;;  %v267_v9 = vrot.slane %v105_v39, %v968_v33  ;;  %911 = vrsqrt.f32 %v456_v2  ;;  %v271_v10 = vrot.slane %v107_v55, %v968_v33 }
  0x15   :  { %v275_v11 = vrot.slane %v966_v28, %v968_v33  ;;  %v279_v12 = vrot.slane %v972_v36, %v968_v33  ;;  %v283_v13 = vrot.slane %v106_v43, %v968_v33  ;;  %v287_v14 = vrot.slane %v108_v59, %v968_v33  ;;  %v25_v28 = vld [vmem:[%s1633_s0 + $0x14] sm:$0xf]  ;;  %v28_v36 = vld [vmem:[%s1633_s0 + $0x20] sm:$0xf]  ;;  %v31_v43 = vld [vmem:[%s1633_s0 + $0x2c] sm:$0xf] }
  0x16   :  { %v291_v15 = vrot.slane %v974_v37, %v968_v33  ;;  %v295_v16 = vrot.slane %v984_v44, %v968_v33  ;;  %v299_v17 = vrot.slane %v154_v51, %v968_v33  ;;  %v303_v21 = vrot.slane %v156_v60, %v968_v33 }
  0x17   :  { %v307_v22 = vrot.slane %v976_v38, %v968_v33  ;;  %v311_v23 = vrot.slane %v986_v45, %v968_v33  ;;  %v1064_v24 = vrot.slane %v155_v52, %v968_v33  ;;  %v319_v29 = vrot.slane %v157_v61, %v968_v33 }
  0x18   :  { %v323_v30 = vrot.slane %v988_v46, %v968_v33  ;;  %v327_v31 = vrot.slane %v992_v48, %v968_v33  ;;  %v1081_v32 = vrot.slane %v203_v62, %v968_v33  ;;  %v335_v37 = vrot.slane %v205_v0, %v968_v33  ;;  %v32_v48 = vld [vmem:[%s1633_s0 + $0x30] sm:$0xf]  ;;  %v39_v0 = vld [vmem:[%s1633_s0 + $0x4c] sm:$0xf] }
  0x19   :  { %v339_v38 = vrot.slane %v990_v47, %v968_v33  ;;  %v343_v39 = vrot.slane %v994_v49, %v968_v33  ;;  %v347_v40 = vrot.slane %v204_v63, %v968_v33  ;;  %v351_v44 = vrot.slane %v206_v1, %v968_v33  ;;  %v33_v49 = vld [vmem:[%s1633_s0 + $0x34] sm:$0xf]  ;;  %v38_v63 = vld [vmem:[%s1633_s0 + $0x48] sm:$0xf] }
  0x1a   :  { %v355_v45 = vrot.slane %v1000_v53, %v968_v33  ;;  %v359_v46 = vrot.slane %v1006_v56, %v968_v33  ;;  %v363_v47 = vrot.slane %v252_v3, %v968_v33  ;;  %v367_v51 = vrot.slane %v254_v7, %v968_v33  ;;  %v35_v56 = vld [vmem:[%s1633_s0 + $0x3c] sm:$0xf]  ;;  %v41_v7 = vld [vmem:[%s1633_s0 + $0x54] sm:$0xf] }
  0x1b   :  { %v371_v52 = vrot.slane %v1002_v54, %v968_v33  ;;  %v375_v53 = vrot.slane %v1008_v57, %v968_v33  ;;  %v379_v55 = vrot.slane %v253_v4, %v968_v33  ;;  %v383_v59 = vrot.slane %v255_v8, %v968_v33  ;;  %v455_v54 = vld [vmem:[%s1634_s3] sm:$0x1]  ;;  %v37_v57 = vld [vmem:[%s1633_s0 + $0x44] sm:$0xf]  ;;  %v42_v8 = vld [vmem:[%s1633_s0 + $0x58] sm:$0xf] }
  0x1c   :  { %v416_v60 = vadd.f32 %v259_v5, %v20_v18  ;;  %v417_v61 = vadd.f32 %v263_v6, %v21_v19  ;;  %v418_v62 = vadd.f32 %v267_v9, %v22_v20  ;;  %v419_v1 = vadd.f32 %v271_v10, %v23_v25  ;;  %v40_v6 = vld [vmem:[%s1633_s0 + $0x50] sm:$0xf] }
  0x1d   :  { %v420_v2 = vadd.f32 %v275_v11, %v24_v26  ;;  %v421_v3 = vadd.f32 %v279_v12, %v25_v28  ;;  %v422_v4 = vadd.f32 %v283_v13, %v26_v34  ;;  %v423_v9 = vadd.f32 %v287_v14, %v27_v35  ;;  %v43_v11 = vld [vmem:[%s1633_s0 + $0x5c] sm:$0xf]  ;;  %v44_v12 = vld [vmem:[%s1633_s0 + $0x60] sm:$0xf]  ;;  %v45_v13 = vld [vmem:[%s1633_s0 + $0x64] sm:$0xf] }
  0x1e   :  { %v912_v5 = vpop.eup %911  ;;  %v424_v18 = vadd.f32 %v291_v15, %v28_v36  ;;  %v425_v19 = vadd.f32 %v295_v16, %v29_v41  ;;  %v426_v10 = vadd.f32 %v299_v17, %v30_v42  ;;  %v427_v20 = vadd.f32 %v303_v21, %v31_v43  ;;  %v46_v14 = vld [vmem:[%s1633_s0 + $0x68] sm:$0xf]  ;;  %v47_v15 = vld [vmem:[%s1633_s0 + $0x6c] sm:$0xf]  ;;  %v48_v16 = vld [vmem:[%s1633_s0 + $0x70] sm:$0xf] }
  0x1f   :  { %v428_v25 = vadd.f32 %v307_v22, %v32_v48  ;;  %v429_v26 = vadd.f32 %v311_v23, %v33_v49  ;;  %v458_v28 = vmul.f32 %v912_v5, %v455_v54  ;;  %v430_v17 = vadd.f32 %v1064_v24, %v34_v50  ;;  %v49_v22 = vld [vmem:[%s1633_s0 + $0x74] sm:$0xf]  ;;  %v50_v23 = vld [vmem:[%s1633_s0 + $0x78] sm:$0xf]  ;;  %v51_v36 = vld [vmem:[%s1633_s0 + $0x7c] sm:$0xf] }
  0x20   :  { %v431_v34 = vadd.f32 %v319_v29, %v35_v56  ;;  %v432_v35 = vadd.f32 %v323_v30, %v36_v58  ;;  %v433_v21 = vadd.f32 %v327_v31, %v37_v57  ;;  %v434_v41 = vadd.f32 %v1081_v32, %v38_v63  ;;  %v459_v49 = vld [vmem:[%s1635_s4] sm:$0x1] }
  0x21   :  { %v435_v42 = vadd.f32 %v335_v37, %v39_v0  ;;  %v460_v24 = vmul.f32 %v458_v28, %v964_v27  ;;  %v466_v29 = vrot.slane %v458_v28, %v968_v33  ;;  %v436_v30 = vadd.f32 %v339_v38, %v40_v6 }
  0x22   :  { %v437_v31 = vadd.f32 %v343_v39, %v41_v7  ;;  %v438_v43 = vadd.f32 %v347_v40, %v42_v8  ;;  %v439_v48 = vadd.f32 %v351_v44, %v43_v11  ;;  %v440_v50 = vadd.f32 %v355_v45, %v44_v12 }
  0x23   :  { %v441_v56 = vadd.f32 %v359_v46, %v45_v13  ;;  %v442_v58 = vadd.f32 %v363_v47, %v46_v14  ;;  %v443_v54 = vadd.f32 %v367_v51, %v47_v15  ;;  %v444_v57 = vadd.f32 %v371_v52, %v48_v16 }
  0x24   :  { %v445_v5 = vadd.f32 %v375_v53, %v49_v22  ;;  %v446_v32 = vadd.f32 %v379_v55, %v50_v23  ;;  %v447_v37 = vadd.f32 %v383_v59, %v51_v36  ;;  %v461_v63 = vsub.f32 %v459_v49, %v460_v24 }
  0x25   :  { %v468_v27 = vmul.f32 %v466_v29, %v416_v60  ;;  %v469_v0 = vmul.f32 %v466_v29, %v417_v61  ;;  %v470_v28 = vmul.f32 %v466_v29, %v418_v62  ;;  %v471_v38 = vmul.f32 %v466_v29, %v419_v1 }
  0x26   :  { %v472_v39 = vmul.f32 %v466_v29, %v420_v2  ;;  %v473_v40 = vmul.f32 %v466_v29, %v421_v3  ;;  %v474_v44 = vmul.f32 %v466_v29, %v422_v4  ;;  %v475_v6 = vmul.f32 %v466_v29, %v423_v9 }
  0x27   :  { %v476_v7 = vmul.f32 %v466_v29, %v424_v18  ;;  %v477_v8 = vmul.f32 %v466_v29, %v425_v19  ;;  %v478_v11 = vmul.f32 %v466_v29, %v426_v10  ;;  %v479_v45 = vmul.f32 %v466_v29, %v427_v20 }
  0x28   :  { %v480_v46 = vmul.f32 %v466_v29, %v428_v25  ;;  %v481_v47 = vmul.f32 %v466_v29, %v429_v26  ;;  %v482_v51 = vmul.f32 %v466_v29, %v430_v17  ;;  %v483_v52 = vmul.f32 %v466_v29, %v431_v34 }
  0x29   :  { %v484_v53 = vmul.f32 %v466_v29, %v432_v35  ;;  %v485_v55 = vmul.f32 %v466_v29, %v433_v21  ;;  %v486_v59 = vmul.f32 %v466_v29, %v434_v41  ;;  %v487_v12 = vmul.f32 %v466_v29, %v435_v42 }
  0x2a   :  { %v488_v60 = vmul.f32 %v466_v29, %v436_v30  ;;  %v489_v61 = vmul.f32 %v466_v29, %v437_v31  ;;  %v490_v62 = vmul.f32 %v466_v29, %v438_v43  ;;  %v491_v1 = vmul.f32 %v466_v29, %v439_v48 }
  0x2b   :  { %v492_v2 = vmul.f32 %v466_v29, %v440_v50  ;;  %v493_v3 = vmul.f32 %v466_v29, %v441_v56  ;;  %v504_v4 = vrot.slane %v461_v63, %v968_v33  ;;  %v494_v9 = vmul.f32 %v466_v29, %v442_v58 }
  0x2c   :  { %v495_v18 = vmul.f32 %v466_v29, %v443_v54  ;;  %v496_v19 = vmul.f32 %v466_v29, %v444_v57  ;;  %v497_v10 = vmul.f32 %v466_v29, %v445_v5  ;;  %v498_v13 = vmul.f32 %v466_v29, %v446_v32 }
  0x2d   :  { %v499_v20 = vmul.f32 %v466_v29, %v447_v37  ;;  %v1191_v25 = vadd.f32 %v504_v4, %v468_v27  ;;  %v1193_v26 = vadd.f32 %v504_v4, %v469_v0  ;;  %v1195_v14 = vadd.f32 %v504_v4, %v470_v28 }
  0x2e   :  { %v1197_v15 = vadd.f32 %v504_v4, %v471_v38  ;;  %v1199_v16 = vadd.f32 %v504_v4, %v472_v39  ;;  %v1201_v17 = vadd.f32 %v504_v4, %v473_v40  ;;  %v1203_v34 = vadd.f32 %v504_v4, %v474_v44 }
  0x2f   :  { %v1205_v33 = vadd.f32 %v504_v4, %v475_v6  ;;  %v1207_v35 = vadd.f32 %v504_v4, %v476_v7  ;;  %v1209_v21 = vadd.f32 %v504_v4, %v477_v8  ;;  %v1211_v22 = vadd.f32 %v504_v4, %v478_v11 }
  0x30   :  { %v1213_v23 = vadd.f32 %v504_v4, %v479_v45  ;;  %v1215_v36 = vadd.f32 %v504_v4, %v480_v46  ;;  %v1217_v41 = vadd.f32 %v504_v4, %v481_v47  ;;  %v1219_v42 = vadd.f32 %v504_v4, %v482_v51 }
  0x31   :  { %v1221_v24 = vadd.f32 %v504_v4, %v483_v52  ;;  %v1223_v29 = vadd.f32 %v504_v4, %v484_v53  ;;  %v1225_v30 = vadd.f32 %v504_v4, %v485_v55  ;;  %v1227_v31 = vadd.f32 %v504_v4, %v486_v59 }
  0x32   :  { %v1229_v43 = vadd.f32 %v504_v4, %v487_v12  ;;  %v1231_v48 = vadd.f32 %v504_v4, %v488_v60  ;;  %v1233_v49 = vadd.f32 %v504_v4, %v489_v61  ;;  %v1235_v50 = vadd.f32 %v504_v4, %v490_v62 }
  0x33   :  { %v1237_v56 = vadd.f32 %v504_v4, %v491_v1  ;;  %v1239_v58 = vadd.f32 %v504_v4, %v492_v2  ;;  %v1241_v54 = vadd.f32 %v504_v4, %v493_v3  ;;  %v1243_v57 = vadd.f32 %v504_v4, %v494_v9 }
  0x34   :  { %v1245_v5 = vadd.f32 %v504_v4, %v495_v18  ;;  %v1247_v32 = vadd.f32 %v504_v4, %v496_v19  ;;  %v1249_v37 = vadd.f32 %v504_v4, %v497_v10  ;;  %v1251_v63 = vadd.f32 %v504_v4, %v498_v13 }
  0x35   :  { %1653 = vst [vmem:[#allocation2_spill] sm:$0xff] %v1239_v58  ;;  %1654 = vst [vmem:[#allocation3_spill] sm:$0xff] %v1241_v54  ;;  %v1254_v27 = vmul.f32 0.2, %v1191_v25  ;;  %v1257_v0 = vmul.f32 0.2, %v1193_v26  ;;  %v1262_v38 = vadd.f32 %v504_v4, %v499_v20 }
  0x36   :  { %1655 = vst [vmem:[#allocation4_spill] sm:$0xff] %v1243_v57  ;;  %1656 = vst [vmem:[#allocation5_spill] sm:$0xff] %v1245_v5  ;;  %v1260_v28 = vmul.f32 0.2, %v1195_v14  ;;  %v1265_v39 = vmul.f32 0.2, %v1197_v15 }
  0x37   :  { %1657 = vst [vmem:[#allocation6_spill] sm:$0xff] %v1247_v32  ;;  %1658 = vst [vmem:[#allocation7_spill] sm:$0xff] %v1249_v37  ;;  %v1268_v40 = vmul.f32 0.2, %v1199_v16  ;;  %v1271_v44 = vmul.f32 0.2, %v1201_v17  ;;  %v570_v11 = vmax.f32 %v1191_v25, %v1254_v27  ;;  %v571_v51 = vmax.f32 %v1193_v26, %v1257_v0 }
  0x38   :  { %1659 = vst [vmem:[#allocation8_spill] sm:$0xff] %v1251_v63  ;;  %1660 = vst [vmem:[#allocation9_spill] sm:$0xff] %v1262_v38  ;;  %v1274_v6 = vmul.f32 0.2, %v1203_v34  ;;  %v1277_v7 = vmul.f32 0.2, %v1205_v33  ;;  %v572_v59 = vmax.f32 %v1195_v14, %v1260_v28  ;;  %v573_v62 = vmax.f32 %v1197_v15, %v1265_v39 }
  0x39   :  { %v1280_v8 = vmul.f32 0.2, %v1207_v35  ;;  %v1285_v45 = vmul.f32 0.2, %v1209_v21  ;;  %v1288_v46 = vmul.f32 0.2, %v1211_v22  ;;  %v574_v4 = vmax.f32 %v1199_v16, %v1268_v40 }
  0x3a   :  { %v1291_v47 = vmul.f32 0.2, %v1213_v23  ;;  %v1296_v52 = vmul.f32 0.2, %v1215_v36  ;;  %v1299_v53 = vmul.f32 0.2, %v1217_v41  ;;  %v575_v10 = vmax.f32 %v1201_v17, %v1271_v44 }
  0x3b   :  { %v1302_v55 = vmul.f32 0.2, %v1219_v42  ;;  %v1307_v12 = vmul.f32 0.2, %v1221_v24  ;;  %v1310_v60 = vmul.f32 0.2, %v1223_v29  ;;  %v576_v26 = vmax.f32 %v1203_v34, %v1274_v6 }
  0x3c   :  { %v1313_v61 = vmul.f32 0.2, %v1225_v30  ;;  %v1318_v1 = vmul.f32 0.2, %v1227_v31  ;;  %v1321_v2 = vmul.f32 0.2, %v1229_v43  ;;  %v577_v17 = vmax.f32 %v1205_v33, %v1277_v7 }
  0x3d   :  { %v1324_v3 = vmul.f32 0.2, %v1231_v48  ;;  %v1329_v9 = vmul.f32 0.2, %v1233_v49  ;;  %v1332_v18 = vmul.f32 0.2, %v1235_v50 }
  0x3e   :  { %v1335_v19 = vmul.f32 0.2, %v1237_v56  ;;  %v1340_v13 = vmul.f32 0.2, %v1239_v58  ;;  %v1343_v20 = vmul.f32 0.2, %v1241_v54 }
  0x3f   :  { %v1346_v25 = vmul.f32 0.2, %v1243_v57  ;;  %v1351_v14 = vmul.f32 0.2, %v1245_v5  ;;  %v1354_v15 = vmul.f32 0.2, %v1247_v32 }
  0x40   :  { %1661 = vst [vmem:[#allocation10_spill] sm:$0xff] %v1340_v13  ;;  %1662 = vst [vmem:[#allocation11_spill] sm:$0xff] %v1343_v20  ;;  %v1357_v16 = vmul.f32 0.2, %v1249_v37  ;;  %v1362_v27 = vmul.f32 0.2, %v1251_v63 }
  0x41   :  { %1663 = vst [vmem:[#allocation12_spill] sm:$0xff] %v1346_v25  ;;  %1664 = vst [vmem:[#allocation13_spill] sm:$0xff] %v1351_v14  ;;  %v1365_v0 = vmul.f32 0.2, %v1262_v38  ;;  %v603_v40 = vsel %vm602_vm0, %v570_v11, -inf  ;;  %v610_v34 = vsel %vm602_vm0, %v571_v51, -inf }
  0x42   :  { %1665 = vst [vmem:[#allocation14_spill] sm:$0xff] %v1354_v15  ;;  %1666 = vst [vmem:[#allocation15_spill] sm:$0xff] %v1357_v16  ;;  %v604_v33 = vrot.slane %v603_v40, 4  ;;  %v611_v25 = vrot.slane %v610_v34, 4  ;;  %v617_v44 = vsel %vm602_vm0, %v572_v59, -inf  ;;  %v624_v14 = vsel %vm602_vm0, %v573_v62, -inf }
  0x43   :  { %1667 = vst [vmem:[#allocation16_spill] sm:$0xff] %v1362_v27  ;;  %1668 = vst [vmem:[#allocation17_spill] sm:$0xff] %v1365_v0  ;;  %v618_v6 = vrot.slane %v617_v44, 4  ;;  %v625_v15 = vrot.slane %v624_v14, 4  ;;  %v631_v7 = vsel %vm602_vm0, %v574_v4, -inf  ;;  %v638_v16 = vsel %vm602_vm0, %v575_v10, -inf }
  0x44   :  { %v605_v28 = vmax.f32 %v603_v40, %v604_v33  ;;  %v612_v27 = vmax.f32 %v610_v34, %v611_v25  ;;  %v632_v63 = vrot.slane %v631_v7, 4  ;;  %v639_v39 = vrot.slane %v638_v16, 4 }
  0x45   :  { %v619_v0 = vmax.f32 %v617_v44, %v618_v6  ;;  %v626_v11 = vmax.f32 %v624_v14, %v625_v15  ;;  %v645_v51 = vsel %vm602_vm0, %v576_v26, -inf  ;;  %v652_v38 = vsel %vm602_vm0, %v577_v17, -inf }
  0x46   :  { %v606_v37 = vrot.slane %v605_v28, 2  ;;  %v613_v59 = vrot.slane %v612_v27, 2  ;;  %v633_v32 = vmax.f32 %v631_v7, %v632_v63  ;;  %v640_v62 = vmax.f32 %v638_v16, %v639_v39 }
  0x47   :  { %v620_v5 = vrot.slane %v619_v0, 2  ;;  %v627_v57 = vrot.slane %v626_v11, 2  ;;  %v646_v20 = vrot.slane %v645_v51, 4  ;;  %v653_v4 = vrot.slane %v652_v38, 4 }
  0x48   :  { %v607_v54 = vmax.f32 %v605_v28, %v606_v37  ;;  %v614_v10 = vmax.f32 %v612_v27, %v613_v59  ;;  %v634_v40 = vrot.slane %v633_v32, 2  ;;  %v641_v25 = vrot.slane %v640_v62, 2 }
  0x49   :  { %v621_v34 = vmax.f32 %v619_v0, %v620_v5  ;;  %v628_v33 = vmax.f32 %v626_v11, %v627_v57  ;;  %v647_v44 = vmax.f32 %v645_v51, %v646_v20  ;;  %v654_v14 = vmax.f32 %v652_v38, %v653_v4 }
  0x4a   :  { %v608_v15 = vrot.slane %v607_v54, 1  ;;  %v615_v26 = vrot.slane %v614_v10, 1  ;;  %v635_v6 = vmax.f32 %v633_v32, %v634_v40  ;;  %v642_v17 = vmax.f32 %v640_v62, %v641_v25 }
  0x4b   :  { %v622_v13 = vrot.slane %v621_v34, 1  ;;  %v629_v58 = vrot.slane %v628_v33, 1  ;;  %v648_v63 = vrot.slane %v647_v44, 2  ;;  %v655_v16 = vrot.slane %v654_v14, 2 }
  0x4c   :  { %v1423_v39 = vmax.f32 %v607_v54, %v608_v15  ;;  %v1425_v7 = vmax.f32 %v614_v10, %v615_v26  ;;  %v636_v37 = vrot.slane %v635_v6, 1  ;;  %v643_v27 = vrot.slane %v642_v17, 1 }
  0x4d   :  { %v1427_v28 = vmax.f32 %v621_v34, %v622_v13  ;;  %v1429_v5 = vmax.f32 %v628_v33, %v629_v58  ;;  %v649_v57 = vmax.f32 %v647_v44, %v648_v63  ;;  %v656_v38 = vmax.f32 %v654_v14, %v655_v16 }
  0x4e   :  { %v1431_v20 = vmax.f32 %v635_v6, %v636_v37  ;;  %v1433_v32 = vmax.f32 %v642_v17, %v643_v27  ;;  %v1669_v0 = vmax.f32 %v1207_v35, %v1280_v8  ;;  %v1670_v11 = vmax.f32 %v1209_v21, %v1285_v45 }
  0x4f   :  { %v650_v13 = vrot.slane %v649_v57, 1  ;;  %v657_v59 = vrot.slane %v656_v38, 1  ;;  %v1671_v4 = vmax.f32 %v1211_v22, %v1288_v46  ;;  %v1672_v40 = vmax.f32 %v1213_v23, %v1291_v47 }
  0x50   :  { %v659_v54 = vsel %vm602_vm0, %v1669_v0, -inf  ;;  %v666_v51 = vsel %vm602_vm0, %v1670_v11, -inf  ;;  %v1673_v8 = vmax.f32 %v1215_v36, %v1296_v52  ;;  %v1674_v45 = vmax.f32 %v1217_v41, %v1299_v53 }
  0x51   :  { %v660_v58 = vrot.slane %v659_v54, 4  ;;  %v667_v62 = vrot.slane %v666_v51, 4  ;;  %v673_v10 = vsel %vm602_vm0, %v1671_v4, -inf  ;;  %v680_v35 = vsel %vm602_vm0, %v1672_v40, -inf }
  0x52   :  { %v687_v21 = vsel %vm602_vm0, %v1673_v8, -inf  ;;  %v694_v25 = vsel %vm602_vm0, %v1674_v45, -inf  ;;  %v1459_v34 = vmax.f32 %v649_v57, %v650_v13  ;;  %v1461_v22 = vmax.f32 %v656_v38, %v657_v59 }
  0x53   :  { %v661_v46 = vmax.f32 %v659_v54, %v660_v58  ;;  %v668_v33 = vmax.f32 %v666_v51, %v667_v62  ;;  %v674_v44 = vrot.slane %v673_v10, 4  ;;  %v681_v23 = vrot.slane %v680_v35, 4 }
  0x54   :  { %v688_v47 = vrot.slane %v687_v21, 4  ;;  %v695_v14 = vrot.slane %v694_v25, 4  ;;  %v1675_v36 = vmax.f32 %v1219_v42, %v1302_v55  ;;  %v1676_v41 = vmax.f32 %v1221_v24, %v1307_v12 }
  0x55   :  { %v662_v15 = vrot.slane %v661_v46, 2  ;;  %v669_v26 = vrot.slane %v668_v33, 2  ;;  %v675_v6 = vmax.f32 %v673_v10, %v674_v44  ;;  %v682_v17 = vmax.f32 %v680_v35, %v681_v23 }
  0x56   :  { %v701_v52 = vsel %vm602_vm0, %v1675_v36, -inf  ;;  %v708_v53 = vsel %vm602_vm0, %v1676_v41, -inf  ;;  %v689_v63 = vmax.f32 %v687_v21, %v688_v47  ;;  %v696_v16 = vmax.f32 %v694_v25, %v695_v14 }
  0x57   :  { %v663_v37 = vmax.f32 %v661_v46, %v662_v15  ;;  %v670_v27 = vmax.f32 %v668_v33, %v669_v26  ;;  %v702_v57 = vrot.slane %v701_v52, 4  ;;  %v709_v38 = vrot.slane %v708_v53, 4 }
  0x58   :  { %v676_v0 = vrot.slane %v675_v6, 2  ;;  %v683_v54 = vrot.slane %v682_v17, 2  ;;  %v690_v11 = vrot.slane %v689_v63, 2  ;;  %v697_v51 = vrot.slane %v696_v16, 2 }
  0x59   :  { %v664_v42 = vrot.slane %v663_v37, 1  ;;  %v671_v55 = vrot.slane %v670_v27, 1  ;;  %v703_v13 = vmax.f32 %v701_v52, %v702_v57  ;;  %v710_v59 = vmax.f32 %v708_v53, %v709_v38 }
  0x5a   :  { %v677_v58 = vmax.f32 %v675_v6, %v676_v0  ;;  %v684_v24 = vmax.f32 %v682_v17, %v683_v54  ;;  %v691_v12 = vmax.f32 %v689_v63, %v690_v11  ;;  %v698_v62 = vmax.f32 %v696_v16, %v697_v51 }
  0x5b   :  { %v1471_v4 = vmax.f32 %v663_v37, %v664_v42  ;;  %v1473_v10 = vmax.f32 %v670_v27, %v671_v55  ;;  %v704_v40 = vrot.slane %v703_v13, 2  ;;  %v711_v35 = vrot.slane %v710_v59, 2 }
  0x5c   :  { %v678_v8 = vrot.slane %v677_v58, 1  ;;  %v685_v21 = vrot.slane %v684_v24, 1  ;;  %v692_v45 = vrot.slane %v691_v12, 1  ;;  %v699_v25 = vrot.slane %v698_v62, 1 }
  0x5d   :  { %v705_v46 = vmax.f32 %v703_v13, %v704_v40  ;;  %v712_v33 = vmax.f32 %v710_v59, %v711_v35  ;;  %v1677_v44 = vmax.f32 %v1223_v29, %v1310_v60  ;;  %v1678_v47 = vmax.f32 %v1225_v30, %v1313_v61 }
  0x5e   :  { %v1483_v15 = vmax.f32 %v677_v58, %v678_v8  ;;  %v1485_v26 = vmax.f32 %v684_v24, %v685_v21  ;;  %v1487_v36 = vmax.f32 %v691_v12, %v692_v45  ;;  %v1489_v52 = vmax.f32 %v698_v62, %v699_v25 }
  0x5f   :  { %v715_v23 = vsel %vm602_vm0, %v1677_v44, -inf  ;;  %v722_v14 = vsel %vm602_vm0, %v1678_v47, -inf  ;;  %v706_v41 = vrot.slane %v705_v46, 1  ;;  %v713_v53 = vrot.slane %v712_v33, 1 }
  0x60   :  { %v716_v6 = vrot.slane %v715_v23, 4  ;;  %v723_v17 = vrot.slane %v722_v14, 4  ;;  %v1679_v29 = vmax.f32 %v1227_v31, %v1318_v1  ;;  %v1680_v30 = vmax.f32 %v1229_v43, %v1321_v2 }
  0x61   :  { %v1681_v63 = vmax.f32 %v1231_v48, %v1324_v3  ;;  %v1682_v37 = vmax.f32 %v1233_v49, %v1329_v9  ;;  %v1507_v57 = vmax.f32 %v705_v46, %v706_v41  ;;  %v1509_v31 = vmax.f32 %v712_v33, %v713_v53 }
  0x62   :  { %v729_v60 = vsel %vm602_vm0, %v1679_v29, -inf  ;;  %v736_v61 = vsel %vm602_vm0, %v1680_v30, -inf  ;;  %v717_v1 = vmax.f32 %v715_v23, %v716_v6  ;;  %v724_v38 = vmax.f32 %v722_v14, %v723_v17  ;;  %v1685_v30 = vld [vmem:[#allocation2_spill] sm:$0xff] }
  0x63   :  { %v743_v16 = vsel %vm602_vm0, %v1681_v63, -inf  ;;  %v750_v27 = vsel %vm602_vm0, %v1682_v37, -inf  ;;  %v730_v0 = vrot.slane %v729_v60, 4  ;;  %v737_v43 = vrot.slane %v736_v61, 4  ;;  %v1688_v37 = vld [vmem:[#allocation3_spill] sm:$0xff] }
  0x64   :  { %v744_v2 = vrot.slane %v743_v16, 4  ;;  %v751_v54 = vrot.slane %v750_v27, 4  ;;  %v718_v11 = vrot.slane %v717_v1, 2  ;;  %v725_v51 = vrot.slane %v724_v38, 2 }
  0x65   :  { %v1683_v48 = vmax.f32 %v1235_v50, %v1332_v18  ;;  %v1684_v49 = vmax.f32 %v1237_v56, %v1335_v19  ;;  %v731_v42 = vmax.f32 %v729_v60, %v730_v0  ;;  %v738_v55 = vmax.f32 %v736_v61, %v737_v43  ;;  %v1686_v61 = vld [vmem:[#allocation10_spill] sm:$0xff] }
  0x66   :  { %v745_v13 = vmax.f32 %v743_v16, %v744_v2  ;;  %v752_v59 = vmax.f32 %v750_v27, %v751_v54  ;;  %v719_v58 = vmax.f32 %v717_v1, %v718_v11  ;;  %v726_v24 = vmax.f32 %v724_v38, %v725_v51  ;;  %v1689_v27 = vld [vmem:[#allocation11_spill] sm:$0xff] }
  0x67   :  { %v757_v3 = vsel %vm602_vm0, %v1683_v48, -inf  ;;  %v764_v9 = vsel %vm602_vm0, %v1684_v49, -inf  ;;  %v732_v40 = vrot.slane %v731_v42, 2  ;;  %v739_v35 = vrot.slane %v738_v55, 2  ;;  %v1691_v49 = vld [vmem:[#allocation4_spill] sm:$0xff] }
  0x68   :  { %v758_v12 = vrot.slane %v757_v3, 4  ;;  %v765_v62 = vrot.slane %v764_v9, 4  ;;  %v746_v8 = vrot.slane %v745_v13, 2  ;;  %v753_v21 = vrot.slane %v752_v59, 2 }
  0x69   :  { %v720_v50 = vrot.slane %v719_v58, 1  ;;  %v727_v18 = vrot.slane %v726_v24, 1  ;;  %v733_v46 = vmax.f32 %v731_v42, %v732_v40  ;;  %v740_v56 = vmax.f32 %v738_v55, %v739_v35 }
  0x6a   :  { %v759_v45 = vmax.f32 %v757_v3, %v758_v12  ;;  %v766_v25 = vmax.f32 %v764_v9, %v765_v62  ;;  %v747_v19 = vmax.f32 %v745_v13, %v746_v8  ;;  %v754_v33 = vmax.f32 %v752_v59, %v753_v21  ;;  %v1692_v9 = vld [vmem:[#allocation12_spill] sm:$0xff]  ;;  %v1694_v13 = vld [vmem:[#allocation5_spill] sm:$0xff]  ;;  %v1697_v12 = vld [vmem:[#allocation6_spill] sm:$0xff] }
  0x6b   :  { %v1519_v44 = vmax.f32 %v719_v58, %v720_v50  ;;  %v1521_v23 = vmax.f32 %v726_v24, %v727_v18  ;;  %v734_v41 = vrot.slane %v733_v46, 1  ;;  %v741_v53 = vrot.slane %v740_v56, 1  ;;  %v1695_v59 = vld [vmem:[#allocation13_spill] sm:$0xff]  ;;  %v1698_v62 = vld [vmem:[#allocation14_spill] sm:$0xff]  ;;  %v1700_v8 = vld [vmem:[#allocation7_spill] sm:$0xff] }
  0x6c   :  { %v760_v47 = vrot.slane %v759_v45, 2  ;;  %v767_v14 = vrot.slane %v766_v25, 2  ;;  %v748_v6 = vrot.slane %v747_v19, 1  ;;  %v755_v17 = vrot.slane %v754_v33, 1  ;;  %v1701_v21 = vld [vmem:[#allocation15_spill] sm:$0xff] }
  0x6d   :  { %v1687_v63 = vmax.f32 %v1685_v30, %v1686_v61  ;;  %v1690_v1 = vmax.f32 %v1688_v37, %v1689_v27  ;;  %v1531_v0 = vmax.f32 %v733_v46, %v734_v41  ;;  %v1533_v43 = vmax.f32 %v740_v56, %v741_v53  ;;  %v1707_v37 = vld [vmem:[#allocation17_spill] sm:$0xff] }
  0x6e   :  { %v761_v29 = vmax.f32 %v759_v45, %v760_v47  ;;  %v768_v60 = vmax.f32 %v766_v25, %v767_v14  ;;  %v1535_v2 = vmax.f32 %v747_v19, %v748_v6  ;;  %v1537_v54 = vmax.f32 %v754_v33, %v755_v17  ;;  %v1703_v6 = vld [vmem:[#allocation8_spill] sm:$0xff] }
  0x6f   :  { %v771_v16 = vsel %vm602_vm0, %v1687_v63, -inf  ;;  %v778_v38 = vsel %vm602_vm0, %v1690_v1, -inf  ;;  %v1693_v42 = vmax.f32 %v1691_v49, %v1692_v9  ;;  %v1696_v58 = vmax.f32 %v1694_v13, %v1695_v59  ;;  %v1704_v17 = vld [vmem:[#allocation16_spill] sm:$0xff]  ;;  %v1706_v63 = vld [vmem:[#allocation9_spill] sm:$0xff] }
  0x70   :  { %v762_v11 = vrot.slane %v761_v29, 1  ;;  %v769_v51 = vrot.slane %v768_v60, 1  ;;  %v772_v48 = vrot.slane %v771_v16, 4  ;;  %v779_v3 = vrot.slane %v778_v38, 4 }
  0x71   :  { %v785_v55 = vsel %vm602_vm0, %v1693_v42, -inf  ;;  %v792_v24 = vsel %vm602_vm0, %v1696_v58, -inf  ;;  %v1699_v40 = vmax.f32 %v1697_v12, %v1698_v62  ;;  %v1702_v50 = vmax.f32 %v1700_v8, %v1701_v21 }
  0x72   :  { %v1555_v45 = vmax.f32 %v761_v29, %v762_v11  ;;  %v1557_v25 = vmax.f32 %v768_v60, %v769_v51  ;;  %v773_v46 = vmax.f32 %v771_v16, %v772_v48  ;;  %v780_v56 = vmax.f32 %v778_v38, %v779_v3 }
  0x73   :  { %v799_v35 = vsel %vm602_vm0, %v1699_v40, -inf  ;;  %v806_v18 = vsel %vm602_vm0, %v1702_v50, -inf  ;;  %v786_v19 = vrot.slane %v785_v55, 4  ;;  %v793_v33 = vrot.slane %v792_v24, 4 }
  0x74   :  { %v800_v47 = vrot.slane %v799_v35, 4  ;;  %v807_v14 = vrot.slane %v806_v18, 4  ;;  %v774_v41 = vrot.slane %v773_v46, 2  ;;  %v781_v53 = vrot.slane %v780_v56, 2 }
  0x75   :  { %v1705_v30 = vmax.f32 %v1703_v6, %v1704_v17  ;;  %v1708_v29 = vmax.f32 %v1706_v63, %v1707_v37  ;;  %v787_v16 = vmax.f32 %v785_v55, %v786_v19  ;;  %v794_v27 = vmax.f32 %v792_v24, %v793_v33 }
  0x76   :  { %v801_v1 = vmax.f32 %v799_v35, %v800_v47  ;;  %v808_v38 = vmax.f32 %v806_v18, %v807_v14  ;;  %v775_v11 = vmax.f32 %v773_v46, %v774_v41  ;;  %v782_v51 = vmax.f32 %v780_v56, %v781_v53 }
  0x77   :  { %v813_v61 = vsel %vm602_vm0, %v1705_v30, -inf  ;;  %v820_v60 = vsel %vm602_vm0, %v1708_v29, -inf  ;;  %v788_v49 = vrot.slane %v787_v16, 2  ;;  %v795_v9 = vrot.slane %v794_v27, 2 }
  0x78   :  { %v814_v48 = vrot.slane %v813_v61, 4  ;;  %v821_v3 = vrot.slane %v820_v60, 4  ;;  %v802_v42 = vrot.slane %v801_v1, 2  ;;  %v809_v13 = vrot.slane %v808_v38, 2 }
  0x79   :  { %v776_v59 = vrot.slane %v775_v11, 1  ;;  %v783_v58 = vrot.slane %v782_v51, 1  ;;  %v789_v55 = vmax.f32 %v787_v16, %v788_v49  ;;  %v796_v24 = vmax.f32 %v794_v27, %v795_v9 }
  0x7a   :  { %v815_v12 = vmax.f32 %v813_v61, %v814_v48  ;;  %v822_v62 = vmax.f32 %v820_v60, %v821_v3  ;;  %v803_v40 = vmax.f32 %v801_v1, %v802_v42  ;;  %v810_v35 = vmax.f32 %v808_v38, %v809_v13 }
  0x7b   :  { %v777_v8 = vmax.f32 %v775_v11, %v776_v59  ;;  %v784_v21 = vmax.f32 %v782_v51, %v783_v58  ;;  %v790_v46 = vrot.slane %v789_v55, 1  ;;  %v797_v56 = vrot.slane %v796_v24, 1 }
  0x7c   :  { %v816_v50 = vrot.slane %v815_v12, 2  ;;  %v823_v18 = vrot.slane %v822_v62, 2  ;;  %v804_v19 = vrot.slane %v803_v40, 1  ;;  %v811_v33 = vrot.slane %v810_v35, 1 }
  0x7d   :  { %v860_v41 = vsel %vm859_vm1, %v1425_v7, %v1423_v39  ;;  %v873_v53 = vsel %vm859_vm1, %v1473_v10, %v1471_v4  ;;  %v791_v6 = vmax.f32 %v789_v55, %v790_v46  ;;  %v798_v17 = vmax.f32 %v796_v24, %v797_v56 }
  0x7e   :  { %v817_v47 = vmax.f32 %v815_v12, %v816_v50  ;;  %v824_v14 = vmax.f32 %v822_v62, %v823_v18  ;;  %v805_v30 = vmax.f32 %v803_v40, %v804_v19  ;;  %v812_v61 = vmax.f32 %v810_v35, %v811_v33 }
  0x7f   :  { %v862_v29 = vsel %vm861_vm2, %v1427_v28, %v860_v41  ;;  %v874_v60 = vsel %vm861_vm2, %v1483_v15, %v873_v53  ;;  %v880_v7 = vsel %vm859_vm1, %v1521_v23, %v1519_v44  ;;  %v887_v4 = vsel %vm859_vm1, %v784_v21, %v777_v8 }
  0x80   :  { %v818_v63 = vrot.slane %v817_v47, 1  ;;  %v825_v37 = vrot.slane %v824_v14, 1  ;;  %v864_v16 = vsel %vm863_vm3, %v1429_v5, %v862_v29  ;;  %v875_v39 = vsel %vm863_vm3, %v1485_v26, %v874_v60 }
  0x81   :  { %v866_v28 = vsel %vm865_vm4, %v1431_v20, %v864_v16  ;;  %v876_v15 = vsel %vm865_vm4, %v1487_v36, %v875_v39  ;;  %v881_v1 = vsel %vm861_vm2, %v1531_v0, %v880_v7  ;;  %v888_v44 = vsel %vm861_vm2, %v791_v6, %v887_v4 }
  0x82   :  { %v819_v10 = vmax.f32 %v817_v47, %v818_v63  ;;  %v826_v27 = vmax.f32 %v824_v14, %v825_v37  ;;  %v868_v5 = vsel %vm867_vm5, %v1433_v32, %v866_v28  ;;  %v877_v26 = vsel %vm867_vm5, %v1489_v52, %v876_v15 }
  0x83   :  { %v870_v23 = vsel %vm869_vm6, %v1459_v34, %v868_v5  ;;  %v878_v20 = vsel %vm869_vm6, %v1507_v57, %v877_v26  ;;  %v882_v36 = vsel %vm863_vm3, %v1533_v43, %v881_v1  ;;  %v889_v38 = vsel %vm863_vm3, %v798_v17, %v888_v44 }
  0x84   :  { %v872_v32 = vsel %vm871_vm7, %v1461_v22, %v870_v23  ;;  %v879_v52 = vsel %vm871_vm7, %v1509_v31, %v878_v20  ;;  %v883_v0 = vsel %vm865_vm4, %v1535_v2, %v882_v36  ;;  %v890_v11 = vsel %vm865_vm4, %v805_v30, %v889_v38 }
  0x85   :  { %v884_v34 = vsel %vm867_vm5, %v1537_v54, %v883_v0  ;;  %v891_v57 = vsel %vm867_vm5, %v812_v61, %v890_v11  ;;  %898 = vst [vmem:[%s1636_s5] sm:$0xff] %v872_v32  ;;  %899 = vst [vmem:[%s1636_s5 + $0x8] sm:$0xff] %v879_v52 }
  0x86   :  { %v885_v22 = vsel %vm869_vm6, %v1555_v45, %v884_v34  ;;  %v892_v31 = vsel %vm869_vm6, %v819_v10, %v891_v57 }
  0x87   :  { %v886_v43 = vsel %vm871_vm7, %v1557_v25, %v885_v22  ;;  %v893_v2 = vsel %vm871_vm7, %v826_v27, %v892_v31 }
  0x88   :  { %900 = vst [vmem:[%s1636_s5 + $0x10] sm:$0xff] %v886_v43  ;;  %901 = vst [vmem:[%s1636_s5 + $0x18] sm:$0xff] %v893_v2 }

// kernel: _lambda_.32
= control target key start
LH: loop header
LB: loop body
LE: loop exit
PB: predicated region body
PF: predicated region fallthrough
CT: control target
= control target key end

     0   :  { %v431_v1 = vmov 0   ;;  %s601_s1 = inlined_call_operand.vmem [shape: bf16[128,512], index: 1, kind: input, shape index: {}]   ;;  %s602_s0 = inlined_call_operand.vmem [shape: bf16[32,128], index: 0, kind: input, shape index: {}]   ;;  %s603_s2 = inlined_call_operand.vmem [shape: f32[32,512], index: 2, kind: output, shape index: {}]  }
   0x1   :  { %v381_v0 = vld [vmem:[%s601_s1 + $0x4] ss:$16 sps:$4 sm:$0xff]   ;;  %252 = vmatprep.mubr.bf16.mxu0 %v431_v1  ;;  %305 = vmatprep.mubr.bf16.mxu1 %v431_v1  ;;  %v383_v2 = vld [vmem:[%s601_s1 + $0xc] ss:$16 sps:$4 sm:$0xff]   ;;  %v385_v3 = vld [vmem:[%s601_s1] ss:$16 sps:$4 sm:$0xff]  }
   0x2   :  { %220 = vmatprep.subr.bf16.mxu0 %v381_v0  ;;  %v386_v4 = vld [vmem:[%s601_s1 + $0x8] ss:$16 sps:$4 sm:$0xff]   ;;  %273 = vmatprep.subr.bf16.mxu1 %v383_v2  ;;  %v387_v5 = vld [vmem:[%s601_s1 + $0x24] ss:$16 sps:$4 sm:$0xff]   ;;  %v389_v6 = vld [vmem:[%s601_s1 + $0x2c] ss:$16 sps:$4 sm:$0xff]  }
   0x3   :  { %221 = vmatpush1.bf16.msra.mxu0 %v385_v3  ;;  %274 = vmatpush1.bf16.msra.mxu1 %v386_v4  ;;  %v391_v7 = vld [vmem:[%s601_s1 + $0x20] ss:$16 sps:$4 sm:$0xff]   ;;  %v392_v8 = vld [vmem:[%s601_s1 + $0x28] ss:$16 sps:$4 sm:$0xff]   ;;  %v393_v9 = vld [vmem:[%s601_s1 + $0x44] ss:$16 sps:$4 sm:$0xff]  }
   0x4   :  { %222 = vmatprep.subr.bf16.mxu0 %v387_v5  ;;  %275 = vmatprep.subr.bf16.mxu1 %v389_v6  ;;  %v395_v10 = vld [vmem:[%s601_s1 + $0x4c] ss:$16 sps:$4 sm:$0xff]   ;;  %v397_v11 = vld [vmem:[%s601_s1 + $0x40] ss:$16 sps:$4 sm:$0xff]   ;;  %v398_v12 = vld [vmem:[%s601_s1 + $0x48] ss:$16 sps:$4 sm:$0xff]  }
   0x5   :  { %v399_v13 = vld [vmem:[%s601_s1 + $0x64] ss:$16 sps:$4 sm:$0xff]   ;;  %v401_v14 = vld [vmem:[%s601_s1 + $0x6c] ss:$16 sps:$4 sm:$0xff]   ;;  %v403_v15 = vld [vmem:[%s601_s1 + $0x60] ss:$16 sps:$4 sm:$0xff]  }
   0x6   :  { %v404_v16 = vld [vmem:[%s601_s1 + $0x68] ss:$16 sps:$4 sm:$0xff]   ;;  %v405_v17 = vld [vmem:[%s601_s1 + $0x84] ss:$16 sps:$4 sm:$0xff]   ;;  %v407_v18 = vld [vmem:[%s601_s1 + $0x8c] ss:$16 sps:$4 sm:$0xff]  }
   0x7   :  { %223 = vmatpush1.bf16.msra.mxu0 %v391_v7  ;;  %276 = vmatpush1.bf16.msra.mxu1 %v392_v8  ;;  %v409_v19 = vld [vmem:[%s601_s1 + $0x80] ss:$16 sps:$4 sm:$0xff]   ;;  %v410_v20 = vld [vmem:[%s601_s1 + $0x88] ss:$16 sps:$4 sm:$0xff]   ;;  %v411_v21 = vld [vmem:[%s601_s1 + $0xa4] ss:$16 sps:$4 sm:$0xff]  }
   0x8   :  { %224 = vmatprep.subr.bf16.mxu0 %v393_v9  ;;  %277 = vmatprep.subr.bf16.mxu1 %v395_v10  ;;  %v413_v22 = vld [vmem:[%s601_s1 + $0xac] ss:$16 sps:$4 sm:$0xff]   ;;  %v415_v23 = vld [vmem:[%s601_s1 + $0xa0] ss:$16 sps:$4 sm:$0xff]   ;;  %v416_v24 = vld [vmem:[%s601_s1 + $0xa8] ss:$16 sps:$4 sm:$0xff]  }
   0x9   :  { %v417_v25 = vld [vmem:[%s601_s1 + $0xc4] ss:$16 sps:$4 sm:$0xff]   ;;  %v419_v26 = vld [vmem:[%s601_s1 + $0xcc] ss:$16 sps:$4 sm:$0xff]   ;;  %v421_v27 = vld [vmem:[%s601_s1 + $0xc0] ss:$16 sps:$4 sm:$0xff]  }
   0xa   :  { %v422_v28 = vld [vmem:[%s601_s1 + $0xc8] ss:$16 sps:$4 sm:$0xff]   ;;  %v423_v29 = vld [vmem:[%s601_s1 + $0xe4] ss:$16 sps:$4 sm:$0xff]   ;;  %v425_v30 = vld [vmem:[%s601_s1 + $0xec] ss:$16 sps:$4 sm:$0xff]  }
   0xb   :  { %225 = vmatpush1.bf16.msra.mxu0 %v397_v11  ;;  %278 = vmatpush1.bf16.msra.mxu1 %v398_v12  ;;  %v427_v31 = vld [vmem:[%s601_s1 + $0xe0] ss:$16 sps:$4 sm:$0xff]   ;;  %v428_v32 = vld [vmem:[%s601_s1 + $0xe8] ss:$16 sps:$4 sm:$0xff]  }
   0xc   :  { %226 = vmatprep.subr.bf16.mxu0 %v399_v13  ;;  %279 = vmatprep.subr.bf16.mxu1 %v401_v14  ;;  %v429_v33 = vld [vmem:[%s602_s0] sm:$0xff]   ;;  %v430_v34 = vld [vmem:[%s602_s0 + $0x8] sm:$0xff]  }
   0xf   :  { %227 = vmatpush1.bf16.msra.mxu0 %v403_v15  ;;  %280 = vmatpush1.bf16.msra.mxu1 %v404_v16 }
  0x10   :  { %228 = vmatprep.subr.bf16.mxu0 %v405_v17  ;;  %281 = vmatprep.subr.bf16.mxu1 %v407_v18 }
  0x13   :  { %229 = vmatpush1.bf16.msra.mxu0 %v409_v19  ;;  %282 = vmatpush1.bf16.msra.mxu1 %v410_v20 }
  0x14   :  { %230 = vmatprep.subr.bf16.mxu0 %v411_v21  ;;  %283 = vmatprep.subr.bf16.mxu1 %v413_v22 }
  0x17   :  { %231 = vmatpush1.bf16.msra.mxu0 %v415_v23  ;;  %284 = vmatpush1.bf16.msra.mxu1 %v416_v24 }
  0x18   :  { %232 = vmatprep.subr.bf16.mxu0 %v417_v25  ;;  %285 = vmatprep.subr.bf16.mxu1 %v419_v26 }
  0x1b   :  { %233 = vmatpush1.bf16.msra.mxu0 %v421_v27  ;;  %286 = vmatpush1.bf16.msra.mxu1 %v422_v28 }
  0x1c   :  { %234 = vmatprep.subr.bf16.mxu0 %v423_v29  ;;  %287 = vmatprep.subr.bf16.mxu1 %v425_v30 }
  0x1f   :  { %235 = vmatpush1.bf16.msra.mxu0 %v427_v31  ;;  %288 = vmatpush1.bf16.msra.mxu1 %v428_v32 }
  0x22   :  { %253 = vmatmul.mubr.bf16.vlgmr.msra.gmra.mrb[0].mxu0 %v429_v33  ;;  %306 = vmatmul.mubr.bf16.vlgmr.msra.gmra.mrb[0].mxu1 %v429_v33 }
  0x23   :  { %262 = vmatprep.mubr.bf16.mxu0 %v431_v1  ;;  %315 = vmatprep.mubr.bf16.mxu1 %v431_v1 }
  0x2a   :  { %263 = vmatmul.mubr.bf16.gmra.mrb[4].mxu0 %v430_v34  ;;  %316 = vmatmul.mubr.bf16.gmra.mrb[4].mxu1 %v430_v34 }
  0xf5   :  { %v254_v35 = vpop.f32.mrb[0].mxu0  ;;  %v307_v36 = vpop.f32.mrb[0].mxu1 }
  0xf6   :  { %326 = vst [vmem:[%s603_s2] sm:$0xff] %v254_v35  ;;  %328 = vst [vmem:[%s603_s2 + $0x10] sm:$0xff] %v307_v36  ;;  %v256_v37 = vpop.f32.mrb[1].mxu0  ;;  %v309_v38 = vpop.f32.mrb[1].mxu1 }
  0xf7   :  { %327 = vst [vmem:[%s603_s2 + $0x8] sm:$0xff] %v256_v37  ;;  %329 = vst [vmem:[%s603_s2 + $0x18] sm:$0xff] %v309_v38  ;;  %v258_v39 = vpop.f32.mrb[2].mxu0  ;;  %v311_v40 = vpop.f32.mrb[2].mxu1 }
  0xf8   :  { %330 = vst [vmem:[%s603_s2 + $0x20] sm:$0xff] %v258_v39  ;;  %332 = vst [vmem:[%s603_s2 + $0x30] sm:$0xff] %v311_v40  ;;  %v260_v41 = vpop.f32.mrb[3].mxu0  ;;  %v313_v42 = vpop.f32.mrb[3].mxu1 }
  0xf9   :  { %331 = vst [vmem:[%s603_s2 + $0x28] sm:$0xff] %v260_v41  ;;  %333 = vst [vmem:[%s603_s2 + $0x38] sm:$0xff] %v313_v42 }
  0xfd   :  { %v264_v43 = vpop.f32.mrb[4].mxu0  ;;  %v317_v44 = vpop.f32.mrb[4].mxu1 }
  0xfe   :  { %334 = vst [vmem:[%s603_s2 + $0x40] sm:$0xff] %v264_v43  ;;  %336 = vst [vmem:[%s603_s2 + $0x50] sm:$0xff] %v317_v44  ;;  %v266_v45 = vpop.f32.mrb[5].mxu0  ;;  %v319_v46 = vpop.f32.mrb[5].mxu1 }
  0xff   :  { %335 = vst [vmem:[%s603_s2 + $0x48] sm:$0xff] %v266_v45  ;;  %337 = vst [vmem:[%s603_s2 + $0x58] sm:$0xff] %v319_v46  ;;  %v268_v47 = vpop.f32.mrb[6].mxu0  ;;  %v321_v48 = vpop.f32.mrb[6].mxu1 }
 0x100   :  { %338 = vst [vmem:[%s603_s2 + $0x60] sm:$0xff] %v268_v47  ;;  %340 = vst [vmem:[%s603_s2 + $0x70] sm:$0xff] %v321_v48  ;;  %v270_v49 = vpop.f32.mrb[7].mxu0  ;;  %v323_v50 = vpop.f32.mrb[7].mxu1 }
 0x101   :  { %339 = vst [vmem:[%s603_s2 + $0x68] sm:$0xff] %v270_v49  ;;  %341 = vst [vmem:[%s603_s2 + $0x78] sm:$0xff] %v323_v50 }

// kernel: _lambda_.33
= control target key start
LH: loop header
LB: loop body
LE: loop exit
PB: predicated region body
PF: predicated region fallthrough
CT: control target
= control target key end

     0   :  { %v1184_v0 = vmov 0.0   ;;  %v1185_v1 = vmov 1966171168   ;;  %v2115_v3 = vlaneseq  ;;  %vm713_vm0 = vcmask 1043456   ;;  %s2112_s2 = inlined_call_operand.vmem [shape: f32[2,256], index: 2, kind: output, shape index: {}]   ;;  %s2113_s1 = inlined_call_operand.vmem [shape: f32[32,256], index: 1, kind: input, shape index: {}]   ;;  %s2114_s0 = inlined_call_operand.vmem [shape: f32[32,4,256], index: 0, kind: input, shape index: {}]  }
   0x1   :  { %15 = vst [vmem:[%s2112_s2] sm:$0xf] %v1184_v0  ;;  %v67_v2 = vunpack.c.l.s4 %v1185_v1  ;;  %v1172_v6 = vld [vmem:[%s2113_s1] ss:$8 sps:$4 sm:$0xff]   ;;  %v1174_v7 = vld [vmem:[%s2113_s1 + $0x4] ss:$8 sps:$4 sm:$0xff]  }
   0x2   :  { %v70_v5 = vshrl.u32 %v2115_v3, 7  ;;  %v1175_v9 = vld [vmem:[%s2113_s1 + $0x10] ss:$8 sps:$4 sm:$0xff]   ;;  %v1177_v10 = vld [vmem:[%s2113_s1 + $0x14] ss:$8 sps:$4 sm:$0xff]  }
   0x3   :  { %v68_v4 = vunpack.c.0.s8 %v67_v2  ;;  %v1178_v13 = vld [vmem:[%s2113_s1 + $0x20] ss:$8 sps:$4 sm:$0xff]   ;;  %v1180_v16 = vld [vmem:[%s2113_s1 + $0x24] ss:$8 sps:$4 sm:$0xff]   ;;  %v1181_v17 = vld [vmem:[%s2113_s1 + $0x30] ss:$8 sps:$4 sm:$0xff]  }
   0x4   :  { %v1183_v18 = vld [vmem:[%s2113_s1 + $0x34] ss:$8 sps:$4 sm:$0xff]   ;;  %v1241_v27 = vsub.s32 0, %v70_v5  ;;  %v1243_v28 = vsub.s32 1, %v70_v5 }
   0x5   :  { %v1211_v8 = vsub.s32 %v68_v4, %v70_v5 }
   0x6   :  { %2133 = vst [vmem:[#allocation3_spill] sm:$0xff] %v1241_v27  ;;  %2134 = vst [vmem:[#allocation4_spill] sm:$0xff] %v1243_v28 }
   0x7   :  { %2132 = vst [vmem:[#allocation2_spill] sm:$0xff] %v1211_v8  ;;  %v72_v11 = vrot.slane %v1172_v6, %v1211_v8  ;;  %v79_v12 = vrot.slane %v1174_v7, %v1211_v8  ;;  %v122_v14 = vrot.slane %v1175_v9, %v1211_v8  ;;  %v129_v15 = vrot.slane %v1177_v10, %v1211_v8 }
   0x8   :  { %v172_v22 = vrot.slane %v1178_v13, %v1211_v8  ;;  %v179_v25 = vrot.slane %v1180_v16, %v1211_v8  ;;  %v222_v26 = vrot.slane %v1181_v17, %v1211_v8  ;;  %v229_v32 = vrot.slane %v1183_v18, %v1211_v8 }
   0x9   :  { %v80_v19 = vcombine.high %v72_v11, %v72_v11  ;;  %v81_v20 = vcombine.high %v79_v12, %v79_v12  ;;  %v1236_v21 = vrot.slane %v72_v11, %v1211_v8  ;;  %v130_v23 = vcombine.high %v122_v14, %v122_v14 }
   0xa   :  { %v131_v24 = vcombine.high %v129_v15, %v129_v15  ;;  %v1246_v29 = vrot.slane %v79_v12, %v1211_v8  ;;  %v1249_v30 = vrot.slane %v122_v14, %v1211_v8  ;;  %v1252_v31 = vrot.slane %v129_v15, %v1211_v8 }
   0xb   :  { %v1256_v33 = vrot.slane %v80_v19, %v1211_v8  ;;  %v1259_v34 = vrot.slane %v81_v20, %v1211_v8  ;;  %v1263_v35 = vcombine.high %v1236_v21, %v1236_v21  ;;  %v180_v36 = vcombine.high %v172_v22, %v172_v22 }
   0xc   :  { %2135 = vst [vmem:[#allocation5_spill] sm:$0xff] %v1246_v29  ;;  %v1267_v37 = vcombine.high %v1246_v29, %v1246_v29  ;;  %v1270_v38 = vrot.slane %v130_v23, %v1211_v8  ;;  %v1273_v39 = vrot.slane %v131_v24, %v1211_v8  ;;  %v181_v40 = vcombine.high %v179_v25, %v179_v25 }
   0xd   :  { %2136 = vst [vmem:[#allocation6_spill] sm:$0xff] %v1259_v34  ;;  %v1277_v41 = vcombine.high %v1256_v33, %v1256_v33  ;;  %v1281_v42 = vcombine.high %v1249_v30, %v1249_v30  ;;  %v1285_v43 = vcombine.high %v1252_v31, %v1252_v31  ;;  %v230_v44 = vcombine.high %v222_v26, %v222_v26 }
   0xe   :  { %2137 = vst [vmem:[#allocation7_spill] sm:$0xff] %v1267_v37  ;;  %v1289_v45 = vcombine.high %v1259_v34, %v1259_v34  ;;  %v1292_v46 = vrot.slane %v172_v22, %v1211_v8  ;;  %v1295_v47 = vrot.slane %v179_v25, %v1211_v8  ;;  %v231_v48 = vcombine.high %v229_v32, %v229_v32 }
   0xf   :  { %2138 = vst [vmem:[#allocation8_spill] sm:$0xff] %v1277_v41  ;;  %v1299_v49 = vcombine.high %v1270_v38, %v1270_v38  ;;  %v1303_v50 = vcombine.high %v1273_v39, %v1273_v39  ;;  %v1306_v51 = vrot.slane %v180_v36, %v1211_v8  ;;  %v1309_v52 = vrot.slane %v222_v26, %v1211_v8 }
  0x10   :  { %v1312_v53 = vrot.slane %v181_v40, %v1211_v8  ;;  %v1316_v54 = vcombine.high %v1292_v46, %v1292_v46  ;;  %v1320_v55 = vcombine.high %v1295_v47, %v1295_v47  ;;  %v1329_v58 = vrot.slane %v229_v32, %v1211_v8 }
  0x11   :  { %v1326_v57 = vcombine.high %v1306_v51, %v1306_v51  ;;  %v1332_v59 = vrot.slane %v230_v44, %v1211_v8  ;;  %v1336_v60 = vcombine.high %v1309_v52, %v1309_v52  ;;  %v1343_v62 = vrot.slane %v231_v48, %v1211_v8 }
  0x12   :  { %v1340_v61 = vcombine.high %v1312_v53, %v1312_v53  ;;  %v1351_v1 = vcombine.high %v1329_v58, %v1329_v58  ;;  %v319_v16 = vrot.slane %v1267_v37, %v1243_v28  ;;  %v323_v17 = vrot.slane %v1289_v45, %v1241_v27 }
  0x13   :  { %v1355_v2 = vcombine.high %v1332_v59, %v1332_v59  ;;  %v1363_v6 = vcombine.high %v1343_v62, %v1343_v62  ;;  %v327_v18 = vrot.slane %v1289_v45, %v1243_v28  ;;  %v331_v19 = vrot.slane %v1249_v30, %v1241_v27 }
  0x14   :  { %v335_v20 = vrot.slane %v1249_v30, %v1243_v28  ;;  %v339_v22 = vrot.slane %v1270_v38, %v1241_v27  ;;  %v343_v23 = vrot.slane %v1270_v38, %v1243_v28  ;;  %v347_v24 = vrot.slane %v1281_v42, %v1241_v27 }
  0x15   :  { %v351_v25 = vrot.slane %v1281_v42, %v1243_v28  ;;  %v355_v26 = vrot.slane %v1299_v49, %v1241_v27  ;;  %v359_v32 = vrot.slane %v1299_v49, %v1243_v28  ;;  %v363_v30 = vrot.slane %v1252_v31, %v1241_v27 }
  0x16   :  { %v367_v36 = vrot.slane %v1252_v31, %v1243_v28  ;;  %v371_v38 = vrot.slane %v1273_v39, %v1241_v27  ;;  %v375_v40 = vrot.slane %v1273_v39, %v1243_v28  ;;  %v379_v42 = vrot.slane %v1285_v43, %v1241_v27 }
  0x17   :  { %v383_v44 = vrot.slane %v1285_v43, %v1243_v28  ;;  %v387_v45 = vrot.slane %v1303_v50, %v1241_v27  ;;  %v391_v48 = vrot.slane %v1303_v50, %v1243_v28  ;;  %v395_v31 = vrot.slane %v1292_v46, %v1241_v27 }
  0x18   :  { %v399_v49 = vrot.slane %v1292_v46, %v1243_v28  ;;  %v403_v39 = vrot.slane %v1306_v51, %v1241_v27  ;;  %v407_v3 = vrot.slane %v1306_v51, %v1243_v28  ;;  %v411_v43 = vrot.slane %v1316_v54, %v1241_v27 }
  0x19   :  { %v415_v15 = vrot.slane %v1316_v54, %v1243_v28  ;;  %v419_v50 = vrot.slane %v1326_v57, %v1241_v27  ;;  %v423_v13 = vrot.slane %v1326_v57, %v1243_v28  ;;  %v427_v46 = vrot.slane %v1295_v47, %v1241_v27 }
  0x1a   :  { %v431_v14 = vrot.slane %v1295_v47, %v1243_v28  ;;  %v435_v51 = vrot.slane %v1312_v53, %v1241_v27  ;;  %v439_v11 = vrot.slane %v1312_v53, %v1243_v28  ;;  %v443_v54 = vrot.slane %v1320_v55, %v1241_v27 }
  0x1b   :  { %v447_v12 = vrot.slane %v1320_v55, %v1243_v28  ;;  %v451_v57 = vrot.slane %v1340_v61, %v1241_v27  ;;  %v455_v9 = vrot.slane %v1340_v61, %v1243_v28  ;;  %v459_v47 = vrot.slane %v1309_v52, %v1241_v27 }
  0x1c   :  { %v463_v10 = vrot.slane %v1309_v52, %v1243_v28  ;;  %v467_v53 = vrot.slane %v1332_v59, %v1241_v27  ;;  %v471_v5 = vrot.slane %v1332_v59, %v1243_v28  ;;  %v475_v55 = vrot.slane %v1336_v60, %v1241_v27 }
  0x1d   :  { %v479_v7 = vrot.slane %v1336_v60, %v1243_v28  ;;  %v483_v61 = vrot.slane %v1355_v2, %v1241_v27  ;;  %v487_v0 = vrot.slane %v1355_v2, %v1243_v28  ;;  %v491_v52 = vrot.slane %v1329_v58, %v1241_v27 }
  0x1e   :  { %v495_v4 = vrot.slane %v1329_v58, %v1243_v28  ;;  %v499_v59 = vrot.slane %v1343_v62, %v1241_v27  ;;  %v503_v56 = vrot.slane %v1343_v62, %v1243_v28  ;;  %v507_v60 = vrot.slane %v1351_v1, %v1241_v27  ;;  %v16_v62 = vld [vmem:[%s2114_s0] sm:$0xff] }
  0x1f   :  { %v511_v63 = vrot.slane %v1351_v1, %v1243_v28  ;;  %v515_v2 = vrot.slane %v1363_v6, %v1241_v27  ;;  %v2139_v8 = vrot.slane %v1236_v21, %v1243_v28  ;;  %v2140_v58 = vrot.slane %v1236_v21, %v1241_v27 }
  0x20   :  { %v519_v34 = vrot.slane %v1363_v6, %v1243_v28  ;;  %v2141_v1 = vrot.slane %v1256_v33, %v1243_v28  ;;  %v2142_v29 = vrot.slane %v1256_v33, %v1241_v27  ;;  %v2143_v21 = vrot.slane %v1263_v35, %v1243_v28  ;;  %v2145_v6 = vld [vmem:[#allocation8_spill] sm:$0xff] }
  0x21   :  { %v520_v37 = vcombine.low %v2140_v58, %v2139_v8  ;;  %v2144_v8 = vrot.slane %v1263_v35, %v1241_v27  ;;  %v2146_v33 = vrot.slane %v2145_v6, %v1243_v28  ;;  %v17_v35 = vld [vmem:[%s2114_s0 + $0x8] sm:$0xff] }
  0x22   :  { %v521_v41 = vcombine.low %v2142_v29, %v2141_v1  ;;  %v2147_v1 = vrot.slane %v2145_v6, %v1241_v27 }
  0x23   :  { %v522_v58 = vcombine.low %v2144_v8, %v2143_v21  ;;  %v18_v8 = vld [vmem:[%s2114_s0 + $0x10] sm:$0xff]  ;;  %v2148_v21 = vld [vmem:[#allocation5_spill] sm:$0xff] }
  0x24   :  { %v523_v29 = vcombine.low %v2147_v1, %v2146_v33  ;;  %v2149_v6 = vrot.slane %v2148_v21, %v1243_v28  ;;  %v2150_v1 = vrot.slane %v2148_v21, %v1241_v27  ;;  %v2151_v28 = vld [vmem:[#allocation6_spill] sm:$0xff]  ;;  %v2152_v21 = vld [vmem:[#allocation4_spill] sm:$0xff] }
  0x25   :  { %v2153_v27 = vrot.slane %v2151_v28, %v2152_v21 }
  0x26   :  { %v524_v33 = vcombine.low %v2150_v1, %v2149_v6  ;;  %v2154_v1 = vld [vmem:[#allocation3_spill] sm:$0xff] }
  0x27   :  { %v2155_v6 = vrot.slane %v2151_v28, %v2154_v1  ;;  %v2156_v1 = vld [vmem:[#allocation7_spill] sm:$0xff] }
  0x28   :  { %v2157_v28 = vld [vmem:[#allocation3_spill] sm:$0xff] }
  0x29   :  { %v525_v21 = vcombine.low %v2155_v6, %v2153_v27  ;;  %v2158_v6 = vrot.slane %v2156_v1, %v2157_v28  ;;  %v527_v1 = vcombine.low %v323_v17, %v327_v18  ;;  %v528_v28 = vcombine.low %v331_v19, %v335_v20  ;;  %v19_v18 = vld [vmem:[%s2114_s0 + $0x18] sm:$0xff] }
  0x2a   :  { %v531_v17 = vcombine.low %v355_v26, %v359_v32  ;;  %v1534_v19 = vcombine.low %v363_v30, %v367_v36  ;;  %v1536_v20 = vcombine.low %v371_v38, %v375_v40  ;;  %v1546_v26 = vadd.f32 %v521_v41, %v17_v35  ;;  %v20_v30 = vld [vmem:[%s2114_s0 + $0x20] sm:$0xff] }
  0x2b   :  { %v526_v27 = vcombine.low %v2158_v6, %v319_v16  ;;  %v529_v6 = vcombine.low %v339_v22, %v343_v23  ;;  %v530_v16 = vcombine.low %v347_v24, %v351_v25  ;;  %v1538_v22 = vcombine.low %v379_v42, %v383_v44 }
  0x2c   :  { %v1540_v23 = vadd.f32 %v520_v37, %v16_v62  ;;  %v1542_v24 = vcombine.low %v387_v45, %v391_v48  ;;  %v1544_v25 = vcombine.low %v395_v31, %v399_v49  ;;  %v1548_v32 = vadd.f32 %v522_v58, %v18_v8  ;;  %v30_v8 = vld [vmem:[%s2114_s0 + $0x70] sm:$0xff] }
  0x2d   :  { %v1553_v36 = vcombine.low %v403_v39, %v407_v3  ;;  %v1555_v38 = vcombine.low %v411_v43, %v415_v15  ;;  %v1557_v40 = vcombine.low %v419_v50, %v423_v13  ;;  %v1561_v42 = vcombine.low %v427_v46, %v431_v14  ;;  %v21_v3 = vld [vmem:[%s2114_s0 + $0x28] sm:$0xff]  ;;  %v22_v50 = vld [vmem:[%s2114_s0 + $0x30] sm:$0xff]  ;;  %v24_v46 = vld [vmem:[%s2114_s0 + $0x40] sm:$0xff] }
  0x2e   :  { %v714_v37 = vsel %vm713_vm0, %v1540_v23, 0.0  ;;  %v1563_v44 = vadd.f32 %v523_v29, %v19_v18  ;;  %v715_v41 = vsel %vm713_vm0, %v1546_v26, 0.0  ;;  %v717_v45 = vsel %vm713_vm0, %v1548_v32, 0.0 }
  0x2f   :  { %v1572_v15 = vcombine.low %v435_v51, %v439_v11  ;;  %v1574_v13 = vcombine.low %v443_v54, %v447_v12  ;;  %v1576_v48 = vcombine.low %v451_v57, %v455_v9  ;;  %v716_v14 = vadd.f32 %v715_v41, %v714_v37  ;;  %v23_v11 = vld [vmem:[%s2114_s0 + $0x38] sm:$0xff]  ;;  %v25_v51 = vld [vmem:[%s2114_s0 + $0x48] sm:$0xff] }
  0x30   :  { %v1578_v31 = vcombine.low %v459_v47, %v463_v10  ;;  %v1580_v49 = vcombine.low %v467_v53, %v471_v5  ;;  %v1582_v39 = vadd.f32 %v524_v33, %v20_v30  ;;  %v719_v43 = vsel %vm713_vm0, %v1563_v44, 0.0  ;;  %v27_v47 = vld [vmem:[%s2114_s0 + $0x58] sm:$0xff]  ;;  %v33_v37 = vld [vmem:[%s2114_s0 + $0x88] sm:$0xff] }
  0x31   :  { %v1592_v9 = vcombine.low %v475_v55, %v479_v7  ;;  %v1594_v12 = vcombine.low %v483_v61, %v487_v0  ;;  %v1596_v10 = vcombine.low %v491_v52, %v495_v4  ;;  %v718_v5 = vadd.f32 %v717_v45, %v716_v14  ;;  %v26_v4 = vld [vmem:[%s2114_s0 + $0x50] sm:$0xff] }
  0x32   :  { %v1604_v54 = vcombine.low %v499_v59, %v503_v56  ;;  %v1606_v57 = vadd.f32 %v525_v21, %v21_v3  ;;  %v649_v7 = vcombine.high %v1540_v23, %v1540_v23  ;;  %v721_v0 = vsel %vm713_vm0, %v1582_v39, 0.0 }
  0x33   :  { %v1618_v53 = vcombine.low %v507_v60, %v511_v63  ;;  %v650_v56 = vcombine.high %v1546_v26, %v1546_v26  ;;  %v651_v55 = vcombine.high %v1548_v32, %v1548_v32  ;;  %v720_v61 = vadd.f32 %v719_v43, %v718_v5  ;;  %v28_v63 = vld [vmem:[%s2114_s0 + $0x60] sm:$0xff]  ;;  %v29_v60 = vld [vmem:[%s2114_s0 + $0x68] sm:$0xff]  ;;  %v34_v43 = vld [vmem:[%s2114_s0 + $0x90] sm:$0xff] }
  0x34   :  { %v1624_v52 = vcombine.low %v515_v2, %v519_v34  ;;  %v1626_v59 = vadd.f32 %v526_v27, %v22_v50  ;;  %v1628_v62 = vadd.f32 %v527_v1, %v23_v11  ;;  %v723_v58 = vsel %vm713_vm0, %v1606_v57, 0.0  ;;  %v35_v50 = vld [vmem:[%s2114_s0 + $0x98] sm:$0xff] }
  0x35   :  { %v1638_v29 = vadd.f32 %v528_v28, %v24_v46  ;;  %v1640_v35 = vadd.f32 %v529_v6, %v25_v51  ;;  %v652_v34 = vcombine.high %v1563_v44, %v1563_v44  ;;  %v722_v2 = vadd.f32 %v721_v0, %v720_v61  ;;  %v31_v28 = vld [vmem:[%s2114_s0 + $0x78] sm:$0xff]  ;;  %v32_v6 = vld [vmem:[%s2114_s0 + $0x80] sm:$0xff] }
  0x36   :  { %v1647_v33 = vadd.f32 %v530_v16, %v26_v4  ;;  %v1649_v21 = vadd.f32 %v531_v17, %v27_v47  ;;  %v725_v27 = vsel %vm713_vm0, %v1626_v59, 0.0  ;;  %v783_v1 = vsel %vm713_vm0, %v649_v7, 0.0  ;;  %v36_v46 = vld [vmem:[%s2114_s0 + $0xa0] sm:$0xff]  ;;  %v37_v4 = vld [vmem:[%s2114_s0 + $0xa8] sm:$0xff]  ;;  %v38_v47 = vld [vmem:[%s2114_s0 + $0xb0] sm:$0xff] }
  0x37   :  { %v653_v18 = vcombine.high %v1582_v39, %v1582_v39  ;;  %v724_v16 = vadd.f32 %v723_v58, %v722_v2  ;;  %v784_v17 = vsel %vm713_vm0, %v650_v56, 0.0  ;;  %v786_v30 = vsel %vm713_vm0, %v651_v55, 0.0  ;;  %v39_v61 = vld [vmem:[%s2114_s0 + $0xb8] sm:$0xff]  ;;  %v41_v2 = vld [vmem:[%s2114_s0 + $0xc8] sm:$0xff] }
  0x38   :  { %v1668_v41 = vadd.f32 %v1534_v19, %v28_v63  ;;  %v1671_v45 = vadd.f32 %v1536_v20, %v29_v60  ;;  %v727_v3 = vsel %vm713_vm0, %v1628_v62, 0.0  ;;  %v785_v14 = vadd.f32 %v784_v17, %v783_v1  ;;  %v42_v1 = vld [vmem:[%s2114_s0 + $0xd0] sm:$0xff]  ;;  %v44_v17 = vld [vmem:[%s2114_s0 + $0xe0] sm:$0xff] }
  0x39   :  { %v1682_v11 = vadd.f32 %v1538_v22, %v30_v8  ;;  %v654_v19 = vcombine.high %v1606_v57, %v1606_v57  ;;  %v726_v20 = vadd.f32 %v725_v27, %v724_v16  ;;  %v788_v5 = vsel %vm713_vm0, %v652_v34, 0.0  ;;  %v40_v34 = vld [vmem:[%s2114_s0 + $0xc0] sm:$0xff]  ;;  %v43_v16 = vld [vmem:[%s2114_s0 + $0xd8] sm:$0xff] }
  0x3a   :  { %v1691_v51 = vadd.f32 %v1542_v24, %v31_v28  ;;  %v1694_v7 = vadd.f32 %v1544_v25, %v32_v6  ;;  %v729_v22 = vsel %vm713_vm0, %v1638_v29, 0.0  ;;  %v787_v0 = vadd.f32 %v786_v30, %v785_v14 }
  0x3b   :  { %v1705_v56 = vadd.f32 %v1553_v36, %v33_v37  ;;  %v655_v24 = vcombine.high %v1626_v59, %v1626_v59  ;;  %v728_v25 = vadd.f32 %v727_v3, %v726_v20  ;;  %v790_v55 = vsel %vm713_vm0, %v653_v18, 0.0  ;;  %v45_v3 = vld [vmem:[%s2114_s0 + $0xe8] sm:$0xff]  ;;  %v47_v20 = vld [vmem:[%s2114_s0 + $0xf8] sm:$0xff] }
  0x3c   :  { %v1714_v58 = vadd.f32 %v1555_v38, %v34_v43  ;;  %v1717_v63 = vadd.f32 %v1557_v40, %v35_v50  ;;  %v731_v36 = vsel %vm713_vm0, %v1640_v35, 0.0  ;;  %v789_v60 = vadd.f32 %v788_v5, %v787_v0 }
  0x3d   :  { %v1728_v8 = vadd.f32 %v1561_v42, %v36_v46  ;;  %v656_v38 = vcombine.high %v1628_v62, %v1628_v62  ;;  %v730_v40 = vadd.f32 %v729_v22, %v728_v25  ;;  %v792_v27 = vsel %vm713_vm0, %v654_v19, 0.0  ;;  %v46_v19 = vld [vmem:[%s2114_s0 + $0xf0] sm:$0xff] }
  0x3e   :  { %v1737_v28 = vadd.f32 %v1572_v15, %v37_v4  ;;  %v1740_v6 = vadd.f32 %v1574_v13, %v38_v47  ;;  %v733_v42 = vsel %vm713_vm0, %v1647_v33, 0.0  ;;  %v791_v18 = vadd.f32 %v790_v55, %v789_v60 }
  0x3f   :  { %v1751_v30 = vadd.f32 %v1576_v48, %v39_v61  ;;  %v657_v15 = vcombine.high %v1638_v29, %v1638_v29  ;;  %v732_v13 = vadd.f32 %v731_v36, %v730_v40  ;;  %v794_v37 = vsel %vm713_vm0, %v655_v24, 0.0 }
  0x40   :  { %v1760_v14 = vadd.f32 %v1578_v31, %v40_v34  ;;  %v1763_v43 = vadd.f32 %v1580_v49, %v41_v2  ;;  %v735_v48 = vsel %vm713_vm0, %v1649_v21, 0.0  ;;  %v793_v50 = vadd.f32 %v792_v27, %v791_v18 }
  0x41   :  { %2159 = vst [vmem:[#allocation8_spill] sm:$0xff] %v1751_v30  ;;  %v1774_v5 = vadd.f32 %v1592_v9, %v42_v1  ;;  %v658_v31 = vcombine.high %v1640_v35, %v1640_v35  ;;  %v734_v49 = vadd.f32 %v733_v42, %v732_v13  ;;  %v796_v46 = vsel %vm713_vm0, %v656_v38, 0.0 }
  0x42   :  { %2160 = vst [vmem:[#allocation5_spill] sm:$0xff] %v1760_v14  ;;  %2161 = vst [vmem:[#allocation6_spill] sm:$0xff] %v1763_v43  ;;  %v1780_v22 = vadd.f32 %v1594_v12, %v43_v16  ;;  %v1783_v0 = vadd.f32 %v1596_v10, %v44_v17  ;;  %v737_v4 = vsel %vm713_vm0, %v1668_v41, 0.0  ;;  %v795_v47 = vadd.f32 %v794_v37, %v793_v50 }
  0x43   :  { %v1788_v24 = vadd.f32 %v1604_v54, %v45_v3  ;;  %v659_v9 = vcombine.high %v1647_v33, %v1647_v33  ;;  %v736_v25 = vadd.f32 %v735_v48, %v734_v49  ;;  %v798_v55 = vsel %vm713_vm0, %v657_v15, 0.0 }
  0x44   :  { %2162 = vst [vmem:[#allocation4_spill] sm:$0xff] %v1780_v22  ;;  %v1794_v61 = vadd.f32 %v1618_v53, %v46_v19  ;;  %v1797_v12 = vadd.f32 %v1624_v52, %v47_v20  ;;  %v739_v10 = vsel %vm713_vm0, %v1671_v45, 0.0  ;;  %v797_v36 = vadd.f32 %v796_v46, %v795_v47 }
  0x45   :  { %v660_v54 = vcombine.high %v1649_v21, %v1649_v21  ;;  %v661_v60 = vcombine.high %v1668_v41, %v1668_v41  ;;  %v738_v34 = vadd.f32 %v737_v4, %v736_v25  ;;  %v800_v2 = vsel %vm713_vm0, %v658_v31, 0.0 }
  0x46   :  { %v662_v53 = vcombine.high %v1671_v45, %v1671_v45  ;;  %v663_v52 = vcombine.high %v1682_v11, %v1682_v11  ;;  %v741_v38 = vsel %vm713_vm0, %v1682_v11, 0.0  ;;  %v799_v40 = vadd.f32 %v798_v55, %v797_v36 }
  0x47   :  { %v664_v27 = vcombine.high %v1691_v51, %v1691_v51  ;;  %v665_v1 = vcombine.high %v1694_v7, %v1694_v7  ;;  %v740_v42 = vadd.f32 %v739_v10, %v738_v34  ;;  %v802_v18 = vsel %vm713_vm0, %v659_v9, 0.0 }
  0x48   :  { %v666_v16 = vcombine.high %v1705_v56, %v1705_v56  ;;  %v667_v17 = vcombine.high %v1714_v58, %v1714_v58  ;;  %v743_v15 = vsel %vm713_vm0, %v1691_v51, 0.0  ;;  %v801_v13 = vadd.f32 %v800_v2, %v799_v40 }
  0x49   :  { %v668_v37 = vcombine.high %v1717_v63, %v1717_v63  ;;  %v669_v3 = vcombine.high %v1728_v8, %v1728_v8  ;;  %v742_v48 = vadd.f32 %v741_v38, %v740_v42  ;;  %v804_v50 = vsel %vm713_vm0, %v660_v54, 0.0 }
  0x4a   :  { %v670_v19 = vcombine.high %v1737_v28, %v1737_v28  ;;  %v671_v20 = vcombine.high %v1740_v6, %v1740_v6  ;;  %v745_v31 = vsel %vm713_vm0, %v1694_v7, 0.0  ;;  %v803_v49 = vadd.f32 %v802_v18, %v801_v13 }
  0x4b   :  { %v672_v46 = vcombine.high %v1751_v30, %v1751_v30  ;;  %v673_v4 = vcombine.high %v1760_v14, %v1760_v14  ;;  %v744_v47 = vadd.f32 %v743_v15, %v742_v48  ;;  %v806_v9 = vsel %vm713_vm0, %v661_v60, 0.0 }
  0x4c   :  { %v674_v25 = vcombine.high %v1763_v43, %v1763_v43  ;;  %v747_v10 = vsel %vm713_vm0, %v1705_v56, 0.0  ;;  %v805_v36 = vadd.f32 %v804_v50, %v803_v49  ;;  %v676_v54 = vcombine.high %v1780_v22, %v1780_v22 }
  0x4d   :  { %v746_v2 = vadd.f32 %v745_v31, %v744_v47  ;;  %v808_v38 = vsel %vm713_vm0, %v662_v53, 0.0  ;;  %v749_v42 = vsel %vm713_vm0, %v1714_v58, 0.0  ;;  %v751_v48 = vsel %vm713_vm0, %v1717_v63, 0.0 }
  0x4e   :  { %v807_v18 = vadd.f32 %v806_v9, %v805_v36  ;;  %v810_v50 = vsel %vm713_vm0, %v663_v52, 0.0  ;;  %v753_v53 = vsel %vm713_vm0, %v1728_v8, 0.0  ;;  %v755_v31 = vsel %vm713_vm0, %v1737_v28, 0.0 }
  0x4f   :  { %v748_v13 = vadd.f32 %v747_v10, %v746_v2  ;;  %v757_v49 = vsel %vm713_vm0, %v1740_v6, 0.0  ;;  %v759_v36 = vsel %vm713_vm0, %v1751_v30, 0.0  ;;  %v761_v10 = vsel %vm713_vm0, %v1760_v14, 0.0 }
  0x50   :  { %v809_v47 = vadd.f32 %v808_v38, %v807_v18  ;;  %v812_v2 = vsel %vm713_vm0, %v664_v27, 0.0  ;;  %v763_v52 = vsel %vm713_vm0, %v1763_v43, 0.0  ;;  %v765_v15 = vsel %vm713_vm0, %v1774_v5, 0.0 }
  0x51   :  { %v750_v9 = vadd.f32 %v749_v42, %v748_v13  ;;  %v1878_v40 = vsel %vm713_vm0, %v1780_v22, 0.0  ;;  %v1882_v18 = vsel %vm713_vm0, %v1783_v0, 0.0  ;;  %v1886_v13 = vsel %vm713_vm0, %v1788_v24, 0.0 }
  0x52   :  { %v811_v38 = vadd.f32 %v810_v50, %v809_v47  ;;  %v814_v27 = vsel %vm713_vm0, %v665_v1, 0.0  ;;  %v1891_v60 = vsel %vm713_vm0, %v1794_v61, 0.0  ;;  %v1895_v34 = vsel %vm713_vm0, %v1797_v12, 0.0 }
  0x53   :  { %v752_v42 = vadd.f32 %v751_v48, %v750_v9  ;;  %v816_v48 = vsel %vm713_vm0, %v666_v16, 0.0  ;;  %v878_v9 = vmul.f32 %v1540_v23, %v1540_v23  ;;  %v879_v55 = vmul.f32 %v1546_v26, %v1546_v26 }
  0x54   :  { %v813_v50 = vadd.f32 %v812_v2, %v811_v38  ;;  %v880_v1 = vmul.f32 %v1548_v32, %v1548_v32  ;;  %v818_v43 = vsel %vm713_vm0, %v667_v17, 0.0  ;;  %v820_v14 = vsel %vm713_vm0, %v668_v37, 0.0 }
  0x55   :  { %v754_v47 = vadd.f32 %v753_v53, %v752_v42  ;;  %v1908_v2 = vmul.f32 %v1563_v44, %v1563_v44  ;;  %v1006_v53 = vsel %vm713_vm0, %v878_v9, 0.0  ;;  %v1007_v23 = vsel %vm713_vm0, %v879_v55, 0.0 }
  0x56   :  { %v815_v22 = vadd.f32 %v814_v27, %v813_v50  ;;  %v1009_v38 = vsel %vm713_vm0, %v880_v1, 0.0  ;;  %v822_v42 = vsel %vm713_vm0, %v669_v3, 0.0  ;;  %v824_v32 = vsel %vm713_vm0, %v670_v19, 0.0 }
  0x57   :  { %v756_v16 = vadd.f32 %v755_v31, %v754_v47  ;;  %v1008_v27 = vadd.f32 %v1007_v23, %v1006_v53  ;;  %v826_v37 = vsel %vm713_vm0, %v671_v20, 0.0  ;;  %v882_v44 = vmul.f32 %v1582_v39, %v1582_v39 }
  0x58   :  { %v817_v26 = vadd.f32 %v816_v48, %v815_v22  ;;  %v1011_v31 = vsel %vm713_vm0, %v1908_v2, 0.0  ;;  %v828_v47 = vsel %vm713_vm0, %v672_v46, 0.0  ;;  %v830_v30 = vsel %vm713_vm0, %v673_v4, 0.0 }
  0x59   :  { %v758_v17 = vadd.f32 %v757_v49, %v756_v16  ;;  %v1010_v22 = vadd.f32 %v1009_v38, %v1008_v27  ;;  %v832_v3 = vsel %vm713_vm0, %v674_v25, 0.0  ;;  %v883_v19 = vmul.f32 %v1606_v57, %v1606_v57 }
  0x5a   :  { %v819_v50 = vadd.f32 %v818_v43, %v817_v26  ;;  %v1013_v20 = vsel %vm713_vm0, %v882_v44, 0.0  ;;  %v2163_v39 = vcombine.high %v1774_v5, %v1774_v5  ;;  %v836_v43 = vsel %vm713_vm0, %v676_v54, 0.0 }
  0x5b   :  { %v760_v48 = vadd.f32 %v759_v36, %v758_v17  ;;  %v1012_v46 = vadd.f32 %v1011_v31, %v1010_v22  ;;  %v2164_v4 = vcombine.high %v1783_v0, %v1783_v0  ;;  %v884_v57 = vmul.f32 %v1626_v59, %v1626_v59 }
  0x5c   :  { %v821_v49 = vadd.f32 %v820_v14, %v819_v50  ;;  %v834_v16 = vsel %vm713_vm0, %v2163_v39, 0.0  ;;  %v1015_v14 = vsel %vm713_vm0, %v883_v19, 0.0  ;;  %v2165_v23 = vcombine.high %v1788_v24, %v1788_v24 }
  0x5d   :  { %v762_v53 = vadd.f32 %v761_v10, %v760_v48  ;;  %v1935_v25 = vsel %vm713_vm0, %v2164_v4, 0.0  ;;  %v2166_v54 = vcombine.high %v1794_v61, %v1794_v61  ;;  %v1014_v26 = vadd.f32 %v1013_v20, %v1012_v46 }
  0x5e   :  { %v823_v36 = vadd.f32 %v822_v42, %v821_v49  ;;  %v1944_v38 = vsel %vm713_vm0, %v2165_v23, 0.0  ;;  %v1954_v59 = vmul.f32 %v1628_v62, %v1628_v62  ;;  %v942_v17 = vcombine.high %v878_v9, %v878_v9 }
  0x5f   :  { %v1950_v10 = vsel %vm713_vm0, %v2166_v54, 0.0  ;;  %v764_v27 = vadd.f32 %v763_v52, %v762_v53  ;;  %v1017_v42 = vsel %vm713_vm0, %v884_v57, 0.0  ;;  %v943_v50 = vcombine.high %v879_v55, %v879_v55 }
  0x60   :  { %v825_v31 = vadd.f32 %v824_v32, %v823_v36  ;;  %v944_v22 = vcombine.high %v880_v1, %v880_v1  ;;  %v1016_v48 = vadd.f32 %v1015_v14, %v1014_v26  ;;  %v2167_v39 = vcombine.high %v1797_v12, %v1797_v12 }
  0x61   :  { %v766_v49 = vadd.f32 %v765_v15, %v764_v27  ;;  %v886_v52 = vmul.f32 %v1638_v29, %v1638_v29  ;;  %v1019_v62 = vsel %vm713_vm0, %v1954_v59, 0.0  ;;  %v1969_v32 = vmul.f32 %v1640_v35, %v1640_v35 }
  0x62   :  { %v1961_v4 = vsel %vm713_vm0, %v2167_v39, 0.0  ;;  %v827_v9 = vadd.f32 %v826_v37, %v825_v31  ;;  %v945_v55 = vcombine.high %v1908_v2, %v1908_v2  ;;  %v1018_v15 = vadd.f32 %v1017_v42, %v1016_v48 }
  0x63   :  { %v768_v1 = vadd.f32 %v1878_v40, %v766_v49  ;;  %v946_v20 = vcombine.high %v882_v44, %v882_v44  ;;  %v1021_v46 = vsel %vm713_vm0, %v886_v52, 0.0  ;;  %v1075_v53 = vsel %vm713_vm0, %v942_v17, 0.0 }
  0x64   :  { %v829_v29 = vadd.f32 %v828_v47, %v827_v9  ;;  %v1020_v14 = vadd.f32 %v1019_v62, %v1018_v15  ;;  %v1076_v36 = vsel %vm713_vm0, %v943_v50, 0.0  ;;  %v1078_v37 = vsel %vm713_vm0, %v944_v22, 0.0 }
  0x65   :  { %v770_v35 = vadd.f32 %v1882_v18, %v768_v1  ;;  %v888_v23 = vmul.f32 %v1647_v33, %v1647_v33  ;;  %v1023_v2 = vsel %vm713_vm0, %v1969_v32, 0.0  ;;  %v1077_v40 = vadd.f32 %v1076_v36, %v1075_v53 }
  0x66   :  { %v831_v44 = vadd.f32 %v830_v30, %v829_v29  ;;  %v947_v54 = vcombine.high %v883_v19, %v883_v19  ;;  %v1022_v26 = vadd.f32 %v1021_v46, %v1020_v14  ;;  %v1080_v27 = vsel %vm713_vm0, %v945_v55, 0.0 }
  0x67   :  { %v772_v47 = vadd.f32 %v1886_v13, %v770_v35  ;;  %v889_v17 = vmul.f32 %v1649_v21, %v1649_v21  ;;  %v1025_v42 = vsel %vm713_vm0, %v888_v23, 0.0  ;;  %v1079_v18 = vadd.f32 %v1078_v37, %v1077_v40 }
  0x68   :  { %v833_v31 = vadd.f32 %v832_v3, %v831_v44  ;;  %v948_v50 = vcombine.high %v884_v57, %v884_v57  ;;  %v1024_v33 = vadd.f32 %v1023_v2, %v1022_v26  ;;  %v1082_v22 = vsel %vm713_vm0, %v946_v20, 0.0 }
  0x69   :  { %v774_v48 = vadd.f32 %v1891_v60, %v772_v47  ;;  %v890_v30 = vmul.f32 %v1668_v41, %v1668_v41  ;;  %v1027_v19 = vsel %vm713_vm0, %v889_v17, 0.0  ;;  %v1081_v49 = vadd.f32 %v1080_v27, %v1079_v18 }
  0x6a   :  { %v835_v13 = vadd.f32 %v834_v16, %v833_v31  ;;  %v949_v21 = vcombine.high %v1954_v59, %v1954_v59  ;;  %v1026_v39 = vadd.f32 %v1025_v42, %v1024_v33  ;;  %v1084_v62 = vsel %vm713_vm0, %v947_v54, 0.0 }
  0x6b   :  { %v776_v3 = vadd.f32 %v1895_v34, %v774_v48  ;;  %v891_v57 = vmul.f32 %v1671_v45, %v1671_v45  ;;  %v1029_v60 = vsel %vm713_vm0, %v890_v30, 0.0  ;;  %v1083_v9 = vadd.f32 %v1082_v22, %v1081_v49 }
  0x6c   :  { %v837_v55 = vadd.f32 %v836_v43, %v835_v13  ;;  %v950_v41 = vcombine.high %v886_v52, %v886_v52  ;;  %v1028_v15 = vadd.f32 %v1027_v19, %v1026_v39  ;;  %v1086_v1 = vsel %vm713_vm0, %v948_v50, 0.0 }
  0x6d   :  { %v777_v16 = vrot.slane %v776_v3, 4  ;;  %v892_v59 = vmul.f32 %v1682_v11, %v1682_v11  ;;  %v1031_v20 = vsel %vm713_vm0, %v891_v57, 0.0  ;;  %v1085_v46 = vadd.f32 %v1084_v62, %v1083_v9 }
  0x6e   :  { %v839_v34 = vadd.f32 %v1935_v25, %v837_v55  ;;  %v951_v45 = vcombine.high %v1969_v32, %v1969_v32  ;;  %v1030_v53 = vadd.f32 %v1029_v60, %v1028_v15  ;;  %v1088_v29 = vsel %vm713_vm0, %v949_v21, 0.0 }
  0x6f   :  { %v778_v43 = vadd.f32 %v777_v16, %v776_v3  ;;  %v893_v52 = vmul.f32 %v1691_v51, %v1691_v51  ;;  %v1033_v14 = vsel %vm713_vm0, %v892_v59, 0.0  ;;  %v1087_v36 = vadd.f32 %v1086_v1, %v1085_v46 }
  0x70   :  { %v841_v11 = vadd.f32 %v1944_v38, %v839_v34  ;;  %v952_v37 = vcombine.high %v888_v23, %v888_v23  ;;  %v1032_v35 = vadd.f32 %v1031_v20, %v1030_v53  ;;  %v1090_v2 = vsel %vm713_vm0, %v950_v41, 0.0 }
  0x71   :  { %v894_v25 = vmul.f32 %v1694_v7, %v1694_v7  ;;  %v953_v32 = vcombine.high %v889_v17, %v889_v17  ;;  %v1035_v40 = vsel %vm713_vm0, %v893_v52, 0.0  ;;  %v1089_v44 = vadd.f32 %v1088_v29, %v1087_v36  ;;  %v2168_v36 = vld [vmem:[#allocation8_spill] sm:$0xff] }
  0x72   :  { %v779_v54 = vrot.slane %v778_v43, 2  ;;  %v843_v26 = vadd.f32 %v1950_v10, %v841_v11  ;;  %v1034_v51 = vadd.f32 %v1033_v14, %v1032_v35  ;;  %v1092_v27 = vsel %vm713_vm0, %v951_v45, 0.0 }
  0x73   :  { %v895_v38 = vmul.f32 %v1705_v56, %v1705_v56  ;;  %v1037_v23 = vsel %vm713_vm0, %v894_v25, 0.0  ;;  %v1091_v47 = vadd.f32 %v1090_v2, %v1089_v44  ;;  %v954_v18 = vcombine.high %v890_v30, %v890_v30 }
  0x74   :  { %v845_v42 = vadd.f32 %v1961_v4, %v843_v26  ;;  %v1036_v7 = vadd.f32 %v1035_v40, %v1034_v51  ;;  %v1094_v17 = vsel %vm713_vm0, %v952_v37, 0.0  ;;  %v896_v31 = vmul.f32 %v1714_v58, %v1714_v58  ;;  %v2169_v40 = vld [vmem:[#allocation5_spill] sm:$0xff] }
  0x75   :  { %v955_v50 = vcombine.high %v891_v57, %v891_v57  ;;  %v1039_v10 = vsel %vm713_vm0, %v895_v38, 0.0  ;;  %v1093_v33 = vadd.f32 %v1092_v27, %v1091_v47  ;;  %v780_v22 = vadd.f32 %v779_v54, %v778_v43  ;;  %v2170_v47 = vld [vmem:[#allocation6_spill] sm:$0xff] }
  0x76   :  { %v846_v48 = vrot.slane %v845_v42, 4  ;;  %v1038_v19 = vadd.f32 %v1037_v23, %v1036_v7  ;;  %v1096_v56 = vsel %vm713_vm0, %v953_v32, 0.0  ;;  %v897_v49 = vmul.f32 %v1717_v63, %v1717_v63 }
  0x77   :  { %v1041_v4 = vsel %vm713_vm0, %v896_v31, 0.0  ;;  %v1095_v30 = vadd.f32 %v1094_v17, %v1093_v33  ;;  %v956_v21 = vcombine.high %v892_v59, %v892_v59  ;;  %v1098_v58 = vsel %vm713_vm0, %v954_v18, 0.0  ;;  %v2171_v17 = vld [vmem:[#allocation2_spill] sm:$0xff] }
  0x78   :  { %v847_v13 = vadd.f32 %v846_v48, %v845_v42  ;;  %v1040_v39 = vadd.f32 %v1039_v10, %v1038_v19  ;;  %v898_v62 = vmul.f32 %v1728_v8, %v1728_v8  ;;  %v957_v3 = vcombine.high %v893_v52, %v893_v52 }
  0x79   :  { %v1043_v57 = vsel %vm713_vm0, %v897_v49, 0.0  ;;  %v1097_v60 = vadd.f32 %v1096_v56, %v1095_v30  ;;  %v781_v9 = vrot.slane %v780_v22, 1  ;;  %v1100_v63 = vsel %vm713_vm0, %v955_v50, 0.0 }
  0x7a   :  { %v848_v55 = vrot.slane %v847_v13, 2  ;;  %v1042_v41 = vadd.f32 %v1041_v4, %v1040_v39  ;;  %v899_v15 = vmul.f32 %v1737_v28, %v1737_v28  ;;  %v1045_v1 = vsel %vm713_vm0, %v898_v62, 0.0 }
  0x7b   :  { %v1099_v16 = vadd.f32 %v1098_v58, %v1097_v60  ;;  %v958_v20 = vcombine.high %v894_v25, %v894_v25  ;;  %v1102_v8 = vsel %vm713_vm0, %v956_v21, 0.0  ;;  %v900_v34 = vmul.f32 %v1740_v6, %v1740_v6  ;;  %v2175_v58 = vld [vmem:[#allocation4_spill] sm:$0xff] }
  0x7c   :  { %v849_v59 = vadd.f32 %v848_v55, %v847_v13  ;;  %v1044_v46 = vadd.f32 %v1043_v57, %v1042_v41  ;;  %v959_v45 = vcombine.high %v895_v38, %v895_v38  ;;  %v1047_v53 = vsel %vm713_vm0, %v899_v15, 0.0 }
  0x7d   :  { %v1101_v29 = vadd.f32 %v1100_v63, %v1099_v16  ;;  %v782_v43 = vadd.f32 %v781_v9, %v780_v22  ;;  %v1104_v28 = vsel %vm713_vm0, %v957_v3, 0.0  ;;  %v901_v11 = vmul.f32 %v2168_v36, %v2168_v36  ;;  %v616_v22 = vld [vmem:[%s2112_s2] ss:$2 sm:$0x3] }
  0x7e   :  { %v850_v52 = vrot.slane %v849_v59, 1  ;;  %v1046_v14 = vadd.f32 %v1045_v1, %v1044_v46  ;;  %v1049_v37 = vsel %vm713_vm0, %v900_v34, 0.0  ;;  %v960_v25 = vcombine.high %v896_v31, %v896_v31 }
  0x7f   :  { %v1103_v35 = vadd.f32 %v1102_v8, %v1101_v29  ;;  %v1106_v6 = vsel %vm713_vm0, %v958_v20, 0.0  ;;  %v902_v44 = vmul.f32 %v2169_v40, %v2169_v40  ;;  %v1051_v54 = vsel %vm713_vm0, %v901_v11, 0.0 }
  0x80   :  { %v851_v2 = vadd.f32 %v850_v52, %v849_v59  ;;  %v1048_v32 = vadd.f32 %v1047_v53, %v1046_v14  ;;  %v961_v27 = vcombine.high %v897_v49, %v897_v49  ;;  %v1108_v23 = vsel %vm713_vm0, %v959_v45, 0.0 }
  0x81   :  { %v1105_v26 = vadd.f32 %v1104_v28, %v1103_v35  ;;  %v903_v42 = vmul.f32 %v2170_v47, %v2170_v47  ;;  %v1053_v18 = vsel %vm713_vm0, %v902_v44, 0.0  ;;  %v962_v50 = vcombine.high %v898_v62, %v898_v62 }
  0x82   :  { %v854_v51 = vcombine.low %v782_v43, %v851_v2  ;;  %v1050_v38 = vadd.f32 %v1049_v37, %v1048_v32  ;;  %v1110_v33 = vsel %vm713_vm0, %v960_v25, 0.0  ;;  %v904_v48 = vmul.f32 %v1774_v5, %v1774_v5 }
  0x83   :  { %v1107_v7 = vadd.f32 %v1106_v6, %v1105_v26  ;;  %v1055_v19 = vsel %vm713_vm0, %v903_v42, 0.0  ;;  %v963_v4 = vcombine.high %v899_v15, %v899_v15  ;;  %v1112_v13 = vsel %vm713_vm0, %v961_v27, 0.0 }
  0x84   :  { %v861_v31 = vrot.slane %v854_v51, %v2171_v17  ;;  %v1052_v10 = vadd.f32 %v1051_v54, %v1050_v38  ;;  %v2172_v21 = vlaneseq  ;;  %v905_v62 = vmul.f32 %v2175_v58, %v2175_v58 }
  0x85   :  { %v1109_v56 = vadd.f32 %v1108_v23, %v1107_v7  ;;  %v1057_v3 = vsel %vm713_vm0, %v904_v48, 0.0  ;;  %v964_v60 = vcombine.high %v900_v34, %v900_v34  ;;  %v1114_v55 = vsel %vm713_vm0, %v962_v50, 0.0 }
  0x86   :  { %v868_v49 = vrot.slane %v861_v31, %v2171_v17  ;;  %v1054_v30 = vadd.f32 %v1053_v18, %v1052_v10  ;;  %vm2065_vm1 = vcmp.lt.s32.totalorder %v2172_v21, 256  ;;  %v906_v41 = vmul.f32 %v1783_v0, %v1783_v0 }
  0x87   :  { %v1111_v5 = vadd.f32 %v1110_v33, %v1109_v56  ;;  %v1059_v63 = vsel %vm713_vm0, %v905_v62, 0.0  ;;  %v965_v1 = vcombine.high %v901_v11, %v901_v11  ;;  %v1116_v59 = vsel %vm713_vm0, %v963_v4, 0.0 }
  0x88   :  { %v870_v57 = vadd.f32 %v868_v49, %v616_v22  ;;  %v1056_v9 = vadd.f32 %v1055_v19, %v1054_v30  ;;  %v907_v20 = vmul.f32 %v1788_v24, %v1788_v24  ;;  %v1061_v46 = vsel %vm713_vm0, %v906_v41, 0.0 }
  0x89   :  { %v1113_v15 = vadd.f32 %v1112_v13, %v1111_v5  ;;  %v966_v0 = vcombine.high %v902_v44, %v902_v44  ;;  %v1118_v45 = vsel %vm713_vm0, %v964_v60, 0.0  ;;  %v908_v53 = vmul.f32 %v1794_v61, %v1794_v61 }
  0x8a   :  { %875 = vst.msk [vmem:[%s2112_s2] ss:$2 sm:$0x3] %vm2065_vm1, %v870_v57  ;;  %v1058_v16 = vadd.f32 %v1057_v3, %v1056_v9  ;;  %v1063_v29 = vsel %vm713_vm0, %v907_v20, 0.0  ;;  %v967_v52 = vcombine.high %v903_v42, %v903_v42  ;;  %v1120_v28 = vsel %vm713_vm0, %v965_v1, 0.0 }
  0x8b   :  { %v1115_v8 = vadd.f32 %v1114_v55, %v1113_v15  ;;  %v909_v24 = vmul.f32 %v1797_v12, %v1797_v12  ;;  %v1065_v36 = vsel %vm713_vm0, %v908_v53, 0.0  ;;  %v968_v37 = vcombine.high %v904_v48, %v904_v48 }
  0x8c   :  { %v1060_v34 = vadd.f32 %v1059_v63, %v1058_v16  ;;  %v1122_v2 = vsel %vm713_vm0, %v966_v0, 0.0  ;;  %v969_v32 = vcombine.high %v905_v62, %v905_v62  ;;  %v1124_v40 = vsel %vm713_vm0, %v967_v52, 0.0 }
  0x8d   :  { %v1117_v43 = vadd.f32 %v1116_v59, %v1115_v8  ;;  %v1067_v25 = vsel %vm713_vm0, %v909_v24, 0.0  ;;  %v970_v54 = vcombine.high %v906_v41, %v906_v41  ;;  %v1126_v51 = vsel %vm713_vm0, %v968_v37, 0.0  ;;  %v1168_v41 = vld [vmem:[%s2112_s2 + $0x1] ss:$2 sm:$0x3] }
  0x8e   :  { %v1062_v14 = vadd.f32 %v1061_v46, %v1060_v34  ;;  %v971_v27 = vcombine.high %v907_v20, %v907_v20  ;;  %v1128_v38 = vsel %vm713_vm0, %v969_v32, 0.0  ;;  %v972_v42 = vcombine.high %v908_v53, %v908_v53 }
  0x8f   :  { %v1119_v11 = vadd.f32 %v1118_v45, %v1117_v43  ;;  %v1130_v18 = vsel %vm713_vm0, %v970_v54, 0.0  ;;  %v973_v31 = vcombine.high %v909_v24, %v909_v24 }
  0x90   :  { %v1064_v35 = vadd.f32 %v1063_v29, %v1062_v14  ;;  %v1132_v50 = vsel %vm713_vm0, %v971_v27, 0.0  ;;  %v1134_v22 = vsel %vm713_vm0, %v972_v42, 0.0 }
  0x91   :  { %v1121_v61 = vadd.f32 %v1120_v28, %v1119_v11  ;;  %v1136_v19 = vsel %vm713_vm0, %v973_v31, 0.0 }
  0x92   :  { %v1066_v6 = vadd.f32 %v1065_v36, %v1064_v35 }
  0x93   :  { %v1123_v44 = vadd.f32 %v1122_v2, %v1121_v61 }
  0x94   :  { %v1068_v26 = vadd.f32 %v1067_v25, %v1066_v6 }
  0x95   :  { %v1125_v12 = vadd.f32 %v1124_v40, %v1123_v44 }
  0x96   :  { %v1069_v23 = vrot.slane %v1068_v26, 4 }
  0x97   :  { %v1127_v47 = vadd.f32 %v1126_v51, %v1125_v12 }
  0x98   :  { %v1070_v10 = vadd.f32 %v1069_v23, %v1068_v26 }
  0x99   :  { %v1129_v7 = vadd.f32 %v1128_v38, %v1127_v47 }
  0x9a   :  { %v1071_v56 = vrot.slane %v1070_v10, 2 }
  0x9b   :  { %v1131_v33 = vadd.f32 %v1130_v18, %v1129_v7 }
  0x9c   :  { %v1072_v30 = vadd.f32 %v1071_v56, %v1070_v10 }
  0x9d   :  { %v1133_v48 = vadd.f32 %v1132_v50, %v1131_v33 }
  0x9e   :  { %v1073_v58 = vrot.slane %v1072_v30, 1 }
  0x9f   :  { %v1135_v49 = vadd.f32 %v1134_v22, %v1133_v48 }
  0xa0   :  { %v1074_v5 = vadd.f32 %v1073_v58, %v1072_v30 }
  0xa1   :  { %v1137_v4 = vadd.f32 %v1136_v19, %v1135_v49 }
  0xa3   :  { %v1138_v13 = vrot.slane %v1137_v4, 4 }
  0xa5   :  { %v1139_v21 = vadd.f32 %v1138_v13, %v1137_v4 }
  0xa7   :  { %v1140_v62 = vrot.slane %v1139_v21, 2 }
  0xa9   :  { %v1141_v3 = vadd.f32 %v1140_v62, %v1139_v21 }
  0xab   :  { %v1142_v57 = vrot.slane %v1141_v3, 1 }
  0xad   :  { %v1143_v60 = vadd.f32 %v1142_v57, %v1141_v3 }
  0xaf   :  { %v1146_v9 = vcombine.low %v1074_v5, %v1143_v60 }
  0xb1   :  { %v1153_v55 = vrot.slane %v1146_v9, %v2171_v17 }
  0xb3   :  { %v1160_v63 = vrot.slane %v1153_v55, %v2171_v17 }
  0xb5   :  { %v1162_v15 = vadd.f32 %v1168_v41, %v1160_v63 }
  0xb7   :  { %1169 = vst.msk [vmem:[%s2112_s2 + $0x1] ss:$2 sm:$0x3] %vm2065_vm1, %v1162_v15 }

// kernel: _lambda_.34
= control target key start
LH: loop header
LB: loop body
LE: loop exit
PB: predicated region body
PF: predicated region fallthrough
CT: control target
= control target key end

     0   :  { %v1493_v0 = vmov 1966171168   ;;  %v73_v2 = vlaneseq  ;;  %vm881_vm0 = vcmask 1043456   ;;  %vm1394_vm1 = vcmask 1041409   ;;  %s2664_s1 = inlined_call_operand.vmem [shape: f32[32,256], index: 1, kind: input, shape index: {}]   ;;  %s2665_s2 = inlined_call_operand.vmem [shape: f32[2,256], index: 2, kind: input, shape index: {}]   ;;  %s2666_s0 = inlined_call_operand.vmem [shape: f32[32,4,256], index: 0, kind: input, shape index: {}]   ;;  %s2667_s3 = inlined_call_operand.vmem [shape: f32[1,256], index: 3, kind: input, shape index: {}]   ;;  %s2668_s4 = inlined_call_operand.vmem [shape: f32[1,256], index: 4, kind: input, shape index: {}]   ;;  %s2669_s5 = inlined_call_operand.vmem [shape: f32[32,256], index: 5, kind: output, shape index: {}]  }
   0x1   :  { %v71_v1 = vunpack.c.l.s4 %v1493_v0  ;;  %v1479_v5 = vld [vmem:[%s2664_s1] ss:$8 sps:$4 sm:$0xff]   ;;  %v1481_v6 = vld [vmem:[%s2664_s1 + $0x4] ss:$8 sps:$4 sm:$0xff]   ;;  %v1482_v8 = vld [vmem:[%s2664_s1 + $0x10] ss:$8 sps:$4 sm:$0xff]  }
   0x2   :  { %v74_v4 = vshrl.u32 %v73_v2, 7  ;;  %v1484_v9 = vld [vmem:[%s2664_s1 + $0x14] ss:$8 sps:$4 sm:$0xff]   ;;  %v1485_v10 = vld [vmem:[%s2664_s1 + $0x20] ss:$8 sps:$4 sm:$0xff]   ;;  %vm1396_vm2 = vcmask 1042434  }
   0x3   :  { %v72_v3 = vunpack.c.0.s8 %v71_v1  ;;  %v1487_v11 = vld [vmem:[%s2664_s1 + $0x24] ss:$8 sps:$4 sm:$0xff]   ;;  %v1488_v14 = vld [vmem:[%s2664_s1 + $0x30] ss:$8 sps:$4 sm:$0xff]   ;;  %v1490_v15 = vld [vmem:[%s2664_s1 + $0x34] ss:$8 sps:$4 sm:$0xff]  }
   0x4   :  { %v1552_v29 = vsub.s32 0, %v74_v4  ;;  %v1558_v33 = vsub.s32 1, %v74_v4  ;;  %vm1398_vm3 = vcmask 1043459   ;;  %vm1400_vm4 = vcmask 1044484  }
   0x5   :  { %v75_v7 = vsub.s32 %v72_v3, %v74_v4  ;;  %vm1402_vm5 = vcmask 1045509   ;;  %vm1404_vm6 = vcmask 1046534   ;;  %vm1406_vm7 = vcmask 1047559  }
   0x6   :  { %2676 = vst [vmem:[#allocation2_spill] sm:$0xff] %v1558_v33 }
   0x7   :  { %v76_v12 = vrot.slane %v1479_v5, %v75_v7  ;;  %v83_v13 = vrot.slane %v1481_v6, %v75_v7  ;;  %v126_v16 = vrot.slane %v1482_v8, %v75_v7  ;;  %v133_v17 = vrot.slane %v1484_v9, %v75_v7 }
   0x8   :  { %v176_v18 = vrot.slane %v1485_v10, %v75_v7  ;;  %v183_v19 = vrot.slane %v1487_v11, %v75_v7  ;;  %v226_v22 = vrot.slane %v1488_v14, %v75_v7  ;;  %v233_v23 = vrot.slane %v1490_v15, %v75_v7  ;;  %v620_v10 = vld [vmem:[%s2665_s2] ss:$2 sm:$0x3]  ;;  %v1477_v15 = vld [vmem:[%s2665_s2 + $0x1] ss:$2 sm:$0x3] }
   0x9   :  { %v84_v20 = vcombine.high %v76_v12, %v76_v12  ;;  %v85_v21 = vcombine.high %v83_v13, %v83_v13  ;;  %v1548_v24 = vrot.slane %v76_v12, %v75_v7  ;;  %v134_v25 = vcombine.high %v126_v16, %v126_v16 }
   0xa   :  { %v135_v26 = vcombine.high %v133_v17, %v133_v17  ;;  %v1550_v27 = vrot.slane %v83_v13, %v75_v7  ;;  %v184_v28 = vcombine.high %v176_v18, %v176_v18  ;;  %v1554_v30 = vrot.slane %v126_v16, %v75_v7 }
   0xb   :  { %v1556_v31 = vrot.slane %v133_v17, %v75_v7  ;;  %v185_v32 = vcombine.high %v183_v19, %v183_v19  ;;  %v1560_v34 = vrot.slane %v84_v20, %v75_v7  ;;  %v1562_v35 = vrot.slane %v85_v21, %v75_v7 }
   0xc   :  { %v234_v36 = vcombine.high %v226_v22, %v226_v22  ;;  %v235_v37 = vcombine.high %v233_v23, %v233_v23  ;;  %v1566_v38 = vcombine.high %v1548_v24, %v1548_v24  ;;  %v1568_v39 = vrot.slane %v134_v25, %v75_v7 }
   0xd   :  { %v1570_v40 = vrot.slane %v135_v26, %v75_v7  ;;  %v1572_v41 = vrot.slane %v176_v18, %v75_v7  ;;  %v1576_v42 = vcombine.high %v1550_v27, %v1550_v27  ;;  %v1578_v43 = vrot.slane %v183_v19, %v75_v7 }
   0xe   :  { %2677 = vst [vmem:[#allocation3_spill] sm:$0xff] %v1568_v39  ;;  %v1580_v44 = vrot.slane %v184_v28, %v75_v7  ;;  %v1582_v45 = vrot.slane %v226_v22, %v75_v7  ;;  %v1586_v46 = vcombine.high %v1554_v30, %v1554_v30  ;;  %v1590_v47 = vcombine.high %v1556_v31, %v1556_v31 }
   0xf   :  { %v1592_v48 = vrot.slane %v185_v32, %v75_v7  ;;  %v1594_v49 = vrot.slane %v233_v23, %v75_v7  ;;  %v1598_v50 = vcombine.high %v1560_v34, %v1560_v34  ;;  %v1602_v51 = vcombine.high %v1562_v35, %v1562_v35 }
  0x10   :  { %2678 = vst [vmem:[#allocation4_spill] sm:$0xff] %v1586_v46  ;;  %v1604_v52 = vrot.slane %v234_v36, %v75_v7  ;;  %v1606_v53 = vrot.slane %v235_v37, %v75_v7  ;;  %v1610_v54 = vcombine.high %v1568_v39, %v1568_v39  ;;  %v1614_v55 = vcombine.high %v1570_v40, %v1570_v40 }
  0x11   :  { %v1618_v56 = vcombine.high %v1572_v41, %v1572_v41  ;;  %v271_v57 = vrot.slane %v1548_v24, %v1552_v29  ;;  %v1624_v58 = vcombine.high %v1578_v43, %v1578_v43  ;;  %v1628_v59 = vcombine.high %v1580_v44, %v1580_v44 }
  0x12   :  { %v1632_v60 = vcombine.high %v1582_v45, %v1582_v45  ;;  %v275_v61 = vrot.slane %v1548_v24, %v1558_v33  ;;  %v1638_v62 = vcombine.high %v1592_v48, %v1592_v48  ;;  %v1642_v63 = vcombine.high %v1594_v49, %v1594_v49 }
  0x13   :  { %v283_v1 = vrot.slane %v1560_v34, %v1558_v33  ;;  %v1650_v2 = vcombine.high %v1604_v52, %v1604_v52  ;;  %v1654_v3 = vcombine.high %v1606_v53, %v1606_v53  ;;  %v1696_v23 = vmul.f32 0.0078125, %v620_v10 }
  0x14   :  { %v355_v25 = vrot.slane %v1586_v46, %v1558_v33  ;;  %v359_v26 = vrot.slane %v1610_v54, %v1552_v29  ;;  %v363_v28 = vrot.slane %v1610_v54, %v1558_v33  ;;  %v624_v32 = vmul.f32 0.0078125, %v1477_v15 }
  0x15   :  { %2679 = vst [vmem:[#allocation5_spill] sm:$0xff] %v1696_v23  ;;  %v367_v36 = vrot.slane %v1556_v31, %v1552_v29  ;;  %v371_v37 = vrot.slane %v1556_v31, %v1558_v33  ;;  %v375_v10 = vrot.slane %v1570_v40, %v1552_v29  ;;  %v625_v22 = vmul.f32 %v1696_v23, %v1696_v23 }
  0x16   :  { %v379_v20 = vrot.slane %v1570_v40, %v1558_v33  ;;  %v383_v21 = vrot.slane %v1590_v47, %v1552_v29  ;;  %v387_v54 = vrot.slane %v1590_v47, %v1558_v33  ;;  %v391_v15 = vrot.slane %v1614_v55, %v1552_v29 }
  0x17   :  { %v395_v31 = vrot.slane %v1614_v55, %v1558_v33  ;;  %v399_v18 = vrot.slane %v1572_v41, %v1552_v29  ;;  %v403_v19 = vrot.slane %v1572_v41, %v1558_v33  ;;  %v626_v16 = vsub.f32 %v624_v32, %v625_v22 }
  0x18   :  { %v407_v40 = vrot.slane %v1580_v44, %v1552_v29  ;;  %v411_v17 = vrot.slane %v1580_v44, %v1558_v33  ;;  %v415_v47 = vrot.slane %v1618_v56, %v1552_v29  ;;  %v419_v13 = vrot.slane %v1618_v56, %v1558_v33 }
  0x19   :  { %v423_v55 = vrot.slane %v1628_v59, %v1552_v29  ;;  %v427_v14 = vrot.slane %v1628_v59, %v1558_v33  ;;  %v431_v41 = vrot.slane %v1578_v43, %v1552_v29  ;;  %v627_v22 = vmax.f32 %v626_v16, 0.0 }
  0x1a   :  { %v435_v32 = vrot.slane %v1578_v43, %v1558_v33  ;;  %v439_v44 = vrot.slane %v1592_v48, %v1552_v29  ;;  %v443_v11 = vrot.slane %v1592_v48, %v1558_v33  ;;  %v447_v56 = vrot.slane %v1624_v58, %v1552_v29 }
  0x1b   :  { %v451_v12 = vrot.slane %v1624_v58, %v1558_v33  ;;  %v455_v59 = vrot.slane %v1638_v62, %v1552_v29  ;;  %v459_v16 = vrot.slane %v1638_v62, %v1558_v33  ;;  %v629_v8 = vadd.f32 1e-05, %v627_v22 }
  0x1c   :  { %v463_v43 = vrot.slane %v1582_v45, %v1552_v29  ;;  %v467_v9 = vrot.slane %v1582_v45, %v1558_v33  ;;  %v471_v48 = vrot.slane %v1604_v52, %v1552_v29  ;;  %v475_v6 = vrot.slane %v1604_v52, %v1558_v33 }
  0x1d   :  { %v479_v58 = vrot.slane %v1632_v60, %v1552_v29  ;;  %v483_v7 = vrot.slane %v1632_v60, %v1558_v33  ;;  %v487_v62 = vrot.slane %v1650_v2, %v1552_v29  ;;  %1491 = vrsqrt.f32 %v629_v8 }
  0x1e   :  { %v491_v22 = vrot.slane %v1650_v2, %v1558_v33  ;;  %v495_v45 = vrot.slane %v1594_v49, %v1552_v29  ;;  %v499_v4 = vrot.slane %v1594_v49, %v1558_v33  ;;  %v503_v52 = vrot.slane %v1606_v53, %v1552_v29 }
  0x1f   :  { %v507_v5 = vrot.slane %v1606_v53, %v1558_v33  ;;  %v511_v60 = vrot.slane %v1642_v63, %v1552_v29  ;;  %v515_v8 = vrot.slane %v1642_v63, %v1558_v33  ;;  %v519_v2 = vrot.slane %v1654_v3, %v1552_v29 }
  0x20   :  { %v523_v0 = vrot.slane %v1654_v3, %v1558_v33  ;;  %v524_v49 = vcombine.low %v271_v57, %v275_v61  ;;  %v2680_v53 = vrot.slane %v1560_v34, %v1552_v29  ;;  %v2681_v23 = vrot.slane %v1566_v38, %v1558_v33 }
  0x21   :  { %v2682_v3 = vrot.slane %v1566_v38, %v1552_v29  ;;  %v2683_v39 = vrot.slane %v1598_v50, %v1558_v33  ;;  %v2684_v24 = vrot.slane %v1598_v50, %v1552_v29  ;;  %v2685_v61 = vrot.slane %v1550_v27, %v1558_v33 }
  0x22   :  { %v525_v63 = vcombine.low %v2680_v53, %v283_v1  ;;  %v2686_v34 = vrot.slane %v1550_v27, %v1552_v29  ;;  %v2687_v53 = vrot.slane %v1562_v35, %v1558_v33  ;;  %v2688_v38 = vrot.slane %v1562_v35, %v1552_v29 }
  0x23   :  { %v526_v46 = vcombine.low %v2682_v3, %v2681_v23  ;;  %v527_v57 = vcombine.low %v2684_v24, %v2683_v39  ;;  %v2689_v3 = vrot.slane %v1576_v42, %v1558_v33  ;;  %v2690_v39 = vrot.slane %v1576_v42, %v1552_v29 }
  0x24   :  { %v528_v1 = vcombine.low %v2686_v34, %v2685_v61  ;;  %v529_v23 = vcombine.low %v2688_v38, %v2687_v53  ;;  %v2691_v24 = vrot.slane %v1602_v51, %v1558_v33  ;;  %v2692_v27 = vrot.slane %v1602_v51, %v1552_v29  ;;  %v2695_v38 = vld [vmem:[#allocation3_spill] sm:$0xff]  ;;  %v2698_v51 = vld [vmem:[#allocation4_spill] sm:$0xff] }
  0x25   :  { %v530_v50 = vcombine.low %v2690_v39, %v2689_v3  ;;  %v2693_v34 = vrot.slane %v1554_v30, %v1558_v33  ;;  %v2694_v35 = vrot.slane %v1554_v30, %v1552_v29  ;;  %v2696_v42 = vrot.slane %v2695_v38, %v1558_v33  ;;  %v20_v30 = vld [vmem:[%s2666_s0] sm:$0xff] }
  0x26   :  { %v531_v61 = vcombine.low %v2692_v27, %v2691_v24  ;;  %v2697_v3 = vrot.slane %v2695_v38, %v1552_v29  ;;  %v2699_v24 = vrot.slane %v2698_v51, %v1552_v29  ;;  %v1854_v33 = vcombine.low %v375_v10, %v379_v20 }
  0x27   :  { %v532_v53 = vcombine.low %v2694_v35, %v2693_v34  ;;  %v535_v34 = vcombine.low %v359_v26, %v363_v28  ;;  %v1852_v35 = vcombine.low %v367_v36, %v371_v37  ;;  %v1856_v38 = vcombine.low %v383_v21, %v387_v54  ;;  %v24_v21 = vld [vmem:[%s2666_s0 + $0x20] sm:$0xff]  ;;  %v25_v36 = vld [vmem:[%s2666_s0 + $0x28] sm:$0xff] }
  0x28   :  { %v533_v39 = vcombine.low %v2697_v3, %v2696_v42  ;;  %v534_v27 = vcombine.low %v2699_v24, %v355_v25  ;;  %v21_v3 = vld [vmem:[%s2666_s0 + $0x8] sm:$0xff]  ;;  %v22_v42 = vld [vmem:[%s2666_s0 + $0x10] sm:$0xff]  ;;  %v23_v25 = vld [vmem:[%s2666_s0 + $0x18] sm:$0xff]  ;;  %v539_v51 = vcombine.low %v391_v15, %v395_v31  ;;  %v1867_v26 = vcombine.low %v399_v18, %v403_v19 }
  0x29   :  { %v1869_v28 = vcombine.low %v407_v40, %v411_v17  ;;  %v1871_v20 = vcombine.low %v415_v47, %v419_v13  ;;  %v1879_v37 = vcombine.low %v423_v55, %v427_v14  ;;  %v1881_v10 = vcombine.low %v431_v41, %v435_v32  ;;  %v628_v13 = vld [vmem:[%s2667_s3] sm:$0x3]  ;;  %v26_v17 = vld [vmem:[%s2666_s0 + $0x30] sm:$0xff]  ;;  %v27_v19 = vld [vmem:[%s2666_s0 + $0x38] sm:$0xff]  ;;  %v1492_v40 = vpop.eup %1491 }
  0x2a   :  { %v1883_v54 = vcombine.low %v439_v44, %v443_v11  ;;  %v1885_v18 = vcombine.low %v447_v56, %v451_v12  ;;  %v28_v14 = vld [vmem:[%s2666_s0 + $0x40] sm:$0xff]  ;;  %v1899_v11 = vcombine.low %v455_v59, %v459_v16  ;;  %v1901_v12 = vcombine.low %v463_v43, %v467_v9  ;;  %v29_v47 = vld [vmem:[%s2666_s0 + $0x48] sm:$0xff]  ;;  %v30_v55 = vld [vmem:[%s2666_s0 + $0x50] sm:$0xff] }
  0x2b   :  { %v1903_v15 = vcombine.low %v471_v48, %v475_v6  ;;  %v1905_v31 = vcombine.low %v479_v58, %v483_v7  ;;  %v31_v41 = vld [vmem:[%s2666_s0 + $0x58] sm:$0xff]  ;;  %v551_v32 = vcombine.low %v487_v62, %v491_v22  ;;  %v552_v9 = vcombine.low %v495_v45, %v499_v4  ;;  %v32_v7 = vld [vmem:[%s2666_s0 + $0x60] sm:$0xff]  ;;  %v33_v56 = vld [vmem:[%s2666_s0 + $0x68] sm:$0xff] }
  0x2c   :  { %v553_v44 = vcombine.low %v503_v52, %v507_v5  ;;  %v554_v6 = vcombine.low %v511_v60, %v515_v8  ;;  %v34_v59 = vld [vmem:[%s2666_s0 + $0x70] sm:$0xff]  ;;  %v555_v16 = vcombine.low %v519_v2, %v523_v0  ;;  %v588_v43 = vadd.f32 %v524_v49, %v20_v30  ;;  %v35_v4 = vld [vmem:[%s2666_s0 + $0x78] sm:$0xff]  ;;  %v36_v5 = vld [vmem:[%s2666_s0 + $0x80] sm:$0xff] }
  0x2d   :  { %v589_v48 = vadd.f32 %v525_v63, %v21_v3  ;;  %v631_v58 = vmul.f32 %v1492_v40, %v628_v13  ;;  %v37_v62 = vld [vmem:[%s2666_s0 + $0x88] sm:$0xff]  ;;  %v590_v22 = vadd.f32 %v526_v46, %v22_v42  ;;  %v591_v45 = vadd.f32 %v527_v57, %v23_v25  ;;  %v38_v0 = vld [vmem:[%s2666_s0 + $0x90] sm:$0xff]  ;;  %v39_v8 = vld [vmem:[%s2666_s0 + $0x98] sm:$0xff] }
  0x2e   :  { %v592_v52 = vadd.f32 %v528_v1, %v24_v21  ;;  %v593_v60 = vadd.f32 %v529_v23, %v25_v36  ;;  %v40_v2 = vld [vmem:[%s2666_s0 + $0xa0] sm:$0xff]  ;;  %v594_v49 = vadd.f32 %v530_v50, %v26_v17  ;;  %v595_v63 = vadd.f32 %v531_v61, %v27_v19  ;;  %v41_v1 = vld [vmem:[%s2666_s0 + $0xa8] sm:$0xff]  ;;  %v42_v23 = vld [vmem:[%s2666_s0 + $0xb0] sm:$0xff] }
  0x2f   :  { %v639_v24 = vrot.slane %v631_v58, %v1552_v29  ;;  %v2700_v46 = vld [vmem:[#allocation2_spill] sm:$0xff]  ;;  %v43_v30 = vld [vmem:[%s2666_s0 + $0xb8] sm:$0xff]  ;;  %v596_v3 = vadd.f32 %v532_v53, %v28_v14  ;;  %v597_v42 = vadd.f32 %v533_v39, %v29_v47  ;;  %v598_v50 = vadd.f32 %v534_v27, %v30_v55  ;;  %v45_v21 = vld [vmem:[%s2666_s0 + $0xc8] sm:$0xff] }
  0x30   :  { %v643_v57 = vrot.slane %v631_v58, %v2700_v46  ;;  %v599_v61 = vadd.f32 %v535_v34, %v31_v41  ;;  %v44_v25 = vld [vmem:[%s2666_s0 + $0xc0] sm:$0xff]  ;;  %v46_v36 = vld [vmem:[%s2666_s0 + $0xd0] sm:$0xff]  ;;  %v600_v13 = vadd.f32 %v1852_v35, %v32_v7  ;;  %v601_v17 = vadd.f32 %v1854_v33, %v33_v56  ;;  %v47_v27 = vld [vmem:[%s2666_s0 + $0xd8] sm:$0xff] }
  0x31   :  { %v602_v53 = vadd.f32 %v1856_v38, %v34_v59  ;;  %v603_v39 = vadd.f32 %v539_v51, %v35_v4  ;;  %v48_v34 = vld [vmem:[%s2666_s0 + $0xe0] sm:$0xff]  ;;  %v49_v19 = vld [vmem:[%s2666_s0 + $0xe8] sm:$0xff]  ;;  %v604_v14 = vadd.f32 %v1867_v26, %v36_v5  ;;  %v605_v35 = vadd.f32 %v1869_v28, %v37_v62  ;;  %v2701_v33 = vld [vmem:[#allocation5_spill] sm:$0xff] }
  0x32   :  { %v633_v40 = vmul.f32 %v631_v58, %v2701_v33  ;;  %v644_v38 = vcombine.low %v639_v24, %v643_v57  ;;  %v50_v51 = vld [vmem:[%s2666_s0 + $0xf0] sm:$0xff]  ;;  %v51_v47 = vld [vmem:[%s2666_s0 + $0xf8] sm:$0xff]  ;;  %v606_v55 = vadd.f32 %v1871_v20, %v38_v0  ;;  %v607_v41 = vadd.f32 %v1879_v37, %v39_v8  ;;  %v632_v28 = vld [vmem:[%s2668_s4] sm:$0x3] }
  0x33   :  { %v608_v7 = vadd.f32 %v1881_v10, %v40_v2  ;;  %v609_v26 = vadd.f32 %v1883_v54, %v41_v1  ;;  %v610_v56 = vadd.f32 %v1885_v18, %v42_v23  ;;  %v611_v59 = vadd.f32 %v1899_v11, %v43_v30 }
  0x34   :  { %v612_v58 = vadd.f32 %v1901_v12, %v44_v25  ;;  %v613_v4 = vadd.f32 %v1903_v15, %v45_v21  ;;  %v614_v20 = vadd.f32 %v1905_v31, %v46_v36  ;;  %v615_v5 = vadd.f32 %v551_v32, %v47_v27 }
  0x35   :  { %v616_v37 = vadd.f32 %v552_v9, %v48_v34  ;;  %v617_v62 = vadd.f32 %v553_v44, %v49_v19  ;;  %v618_v10 = vadd.f32 %v554_v6, %v50_v51  ;;  %v619_v0 = vadd.f32 %v555_v16, %v51_v47 }
  0x36   :  { %v634_v54 = vsub.f32 %v632_v28, %v633_v40  ;;  %v646_v8 = vmul.f32 %v644_v38, %v588_v43  ;;  %v647_v2 = vmul.f32 %v644_v38, %v589_v48  ;;  %v648_v24 = vmul.f32 %v644_v38, %v590_v22 }
  0x37   :  { %v649_v57 = vmul.f32 %v644_v38, %v591_v45  ;;  %v650_v1 = vmul.f32 %v644_v38, %v592_v52  ;;  %v651_v18 = vmul.f32 %v644_v38, %v593_v60  ;;  %v652_v23 = vmul.f32 %v644_v38, %v594_v49 }
  0x38   :  { %v653_v11 = vmul.f32 %v644_v38, %v595_v63  ;;  %v654_v30 = vmul.f32 %v644_v38, %v596_v3  ;;  %v655_v12 = vmul.f32 %v644_v38, %v597_v42  ;;  %v656_v25 = vmul.f32 %v644_v38, %v598_v50 }
  0x39   :  { %v657_v15 = vmul.f32 %v644_v38, %v599_v61  ;;  %v658_v21 = vmul.f32 %v644_v38, %v600_v13  ;;  %v659_v31 = vmul.f32 %v644_v38, %v601_v17  ;;  %v660_v32 = vmul.f32 %v644_v38, %v602_v53 }
  0x3a   :  { %v661_v9 = vmul.f32 %v644_v38, %v603_v39  ;;  %v662_v44 = vmul.f32 %v644_v38, %v604_v14  ;;  %v663_v6 = vmul.f32 %v644_v38, %v605_v35  ;;  %v664_v16 = vmul.f32 %v644_v38, %v606_v55 }
  0x3b   :  { %v682_v43 = vrot.slane %v634_v54, %v1552_v29  ;;  %v686_v48 = vrot.slane %v634_v54, %v2700_v46  ;;  %v665_v22 = vmul.f32 %v644_v38, %v607_v41  ;;  %v666_v45 = vmul.f32 %v644_v38, %v608_v7 }
  0x3c   :  { %v667_v52 = vmul.f32 %v644_v38, %v609_v26  ;;  %v668_v60 = vmul.f32 %v644_v38, %v610_v56  ;;  %v669_v49 = vmul.f32 %v644_v38, %v611_v59  ;;  %v670_v63 = vmul.f32 %v644_v38, %v612_v58 }
  0x3d   :  { %v671_v3 = vmul.f32 %v644_v38, %v613_v4  ;;  %v687_v42 = vcombine.low %v682_v43, %v686_v48  ;;  %v672_v50 = vmul.f32 %v644_v38, %v614_v20  ;;  %v673_v61 = vmul.f32 %v644_v38, %v615_v5 }
  0x3e   :  { %v674_v36 = vmul.f32 %v644_v38, %v616_v37  ;;  %v675_v13 = vmul.f32 %v644_v38, %v617_v62  ;;  %v676_v17 = vmul.f32 %v644_v38, %v618_v10  ;;  %v677_v53 = vmul.f32 %v644_v38, %v619_v0 }
  0x3f   :  { %v689_v39 = vadd.f32 %v687_v42, %v646_v8  ;;  %v690_v27 = vadd.f32 %v687_v42, %v647_v2  ;;  %v691_v34 = vadd.f32 %v687_v42, %v648_v24  ;;  %v692_v29 = vadd.f32 %v687_v42, %v649_v57 }
  0x40   :  { %v693_v19 = vadd.f32 %v687_v42, %v650_v1  ;;  %v694_v46 = vadd.f32 %v687_v42, %v651_v18  ;;  %v695_v14 = vadd.f32 %v687_v42, %v652_v23  ;;  %v696_v35 = vadd.f32 %v687_v42, %v653_v11 }
  0x41   :  { %v1998_v33 = vadd.f32 %v687_v42, %v654_v30  ;;  %v2000_v40 = vadd.f32 %v687_v42, %v655_v12  ;;  %v2002_v51 = vadd.f32 %v687_v42, %v656_v25  ;;  %v2004_v47 = vadd.f32 %v687_v42, %v657_v15 }
  0x42   :  { %v2006_v55 = vadd.f32 %v687_v42, %v658_v21  ;;  %v2008_v41 = vadd.f32 %v687_v42, %v659_v31  ;;  %v2010_v38 = vadd.f32 %v687_v42, %v660_v32  ;;  %v2012_v7 = vadd.f32 %v687_v42, %v661_v9 }
  0x43   :  { %v2014_v26 = vadd.f32 %v687_v42, %v662_v44  ;;  %v2016_v28 = vadd.f32 %v687_v42, %v663_v6  ;;  %v2018_v56 = vadd.f32 %v687_v42, %v664_v16  ;;  %v2020_v59 = vadd.f32 %v687_v42, %v665_v22 }
  0x44   :  { %v2022_v58 = vadd.f32 %v687_v42, %v666_v45  ;;  %v2024_v4 = vadd.f32 %v687_v42, %v667_v52  ;;  %v2026_v20 = vadd.f32 %v687_v42, %v668_v60  ;;  %v2028_v5 = vadd.f32 %v687_v42, %v669_v49 }
  0x45   :  { %v2030_v37 = vadd.f32 %v687_v42, %v670_v63  ;;  %v2032_v62 = vadd.f32 %v687_v42, %v671_v3  ;;  %v2034_v10 = vadd.f32 %v687_v42, %v672_v50  ;;  %v2036_v0 = vadd.f32 %v687_v42, %v673_v61 }
  0x46   :  { %v2038_v54 = vadd.f32 %v687_v42, %v674_v36  ;;  %v2040_v8 = vadd.f32 %v687_v42, %v675_v13  ;;  %v2042_v2 = vadd.f32 %v687_v42, %v676_v17  ;;  %v721_v24 = vmul.f32 0.2, %v689_v39 }
  0x47   :  { %v722_v57 = vmul.f32 0.2, %v690_v27  ;;  %v723_v1 = vmul.f32 0.2, %v691_v34  ;;  %v720_v18 = vadd.f32 %v687_v42, %v677_v53  ;;  %v724_v23 = vmul.f32 0.2, %v692_v29 }
  0x48   :  { %v725_v11 = vmul.f32 0.2, %v693_v19  ;;  %v726_v30 = vmul.f32 0.2, %v694_v46  ;;  %v727_v12 = vmul.f32 0.2, %v695_v14  ;;  %v2045_v21 = vmax.f32 %v689_v39, %v721_v24 }
  0x49   :  { %v728_v25 = vmul.f32 0.2, %v696_v35  ;;  %v729_v15 = vmul.f32 0.2, %v1998_v33  ;;  %v730_v31 = vmul.f32 0.2, %v2000_v40  ;;  %v2050_v44 = vmax.f32 %v690_v27, %v722_v57 }
  0x4a   :  { %v731_v32 = vmul.f32 0.2, %v2002_v51  ;;  %v732_v9 = vmul.f32 0.2, %v2004_v47  ;;  %v733_v6 = vmul.f32 0.2, %v2006_v55  ;;  %v2055_v48 = vmax.f32 %v691_v34, %v723_v1 }
  0x4b   :  { %v734_v16 = vmul.f32 0.2, %v2008_v41  ;;  %v735_v43 = vmul.f32 0.2, %v2010_v38  ;;  %v736_v22 = vmul.f32 0.2, %v2012_v7  ;;  %v2060_v60 = vmax.f32 %v692_v29, %v724_v23 }
  0x4c   :  { %v737_v45 = vmul.f32 0.2, %v2014_v26  ;;  %v738_v52 = vmul.f32 0.2, %v2016_v28  ;;  %v739_v49 = vmul.f32 0.2, %v2018_v56  ;;  %v2065_v42 = vmax.f32 %v693_v19, %v725_v11 }
  0x4d   :  { %v740_v63 = vmul.f32 0.2, %v2020_v59  ;;  %v741_v3 = vmul.f32 0.2, %v2022_v58  ;;  %v742_v50 = vmul.f32 0.2, %v2024_v4  ;;  %v2070_v13 = vmax.f32 %v694_v46, %v726_v30 }
  0x4e   :  { %v743_v61 = vmul.f32 0.2, %v2026_v20  ;;  %v744_v36 = vmul.f32 0.2, %v2028_v5  ;;  %v745_v17 = vmul.f32 0.2, %v2030_v37  ;;  %v2075_v27 = vmax.f32 %v695_v14, %v727_v12 }
  0x4f   :  { %v746_v53 = vmul.f32 0.2, %v2032_v62  ;;  %v747_v39 = vmul.f32 0.2, %v2034_v10  ;;  %v748_v34 = vmul.f32 0.2, %v2036_v0  ;;  %v2080_v24 = vmax.f32 %v696_v35, %v728_v25 }
  0x50   :  { %v749_v29 = vmul.f32 0.2, %v2038_v54  ;;  %v750_v19 = vmul.f32 0.2, %v2040_v8  ;;  %v751_v57 = vmul.f32 0.2, %v2042_v2  ;;  %v2084_v1 = vmax.f32 %v1998_v33, %v729_v15 }
  0x51   :  { %v752_v46 = vmul.f32 0.2, %v720_v18  ;;  %v2087_v23 = vmax.f32 %v2000_v40, %v730_v31  ;;  %v2090_v14 = vmax.f32 %v2002_v51, %v731_v32  ;;  %v2093_v11 = vmax.f32 %v2004_v47, %v732_v9 }
  0x52   :  { %v2096_v30 = vmax.f32 %v2006_v55, %v733_v6  ;;  %v2099_v35 = vmax.f32 %v2008_v41, %v734_v16  ;;  %v2102_v12 = vmax.f32 %v2010_v38, %v735_v43  ;;  %v2105_v33 = vmax.f32 %v2012_v7, %v736_v22 }
  0x53   :  { %v2108_v40 = vmax.f32 %v2014_v26, %v737_v45  ;;  %v2111_v51 = vmax.f32 %v2016_v28, %v738_v52  ;;  %v2114_v47 = vmax.f32 %v2018_v56, %v739_v49  ;;  %v2117_v55 = vmax.f32 %v2020_v59, %v740_v63 }
  0x54   :  { %v2120_v41 = vmax.f32 %v2022_v58, %v741_v3  ;;  %v2123_v38 = vmax.f32 %v2024_v4, %v742_v50  ;;  %v2126_v7 = vmax.f32 %v2026_v20, %v743_v61  ;;  %v2129_v26 = vmax.f32 %v2028_v5, %v744_v36 }
  0x55   :  { %v2132_v28 = vmax.f32 %v2030_v37, %v745_v17  ;;  %v2135_v56 = vmax.f32 %v2032_v62, %v746_v53  ;;  %v2138_v59 = vmax.f32 %v2034_v10, %v747_v39  ;;  %v2141_v58 = vmax.f32 %v2036_v0, %v748_v34 }
  0x56   :  { %v2144_v4 = vmax.f32 %v2038_v54, %v749_v29  ;;  %v2147_v20 = vmax.f32 %v2040_v8, %v750_v19  ;;  %v2150_v5 = vmax.f32 %v2042_v2, %v751_v57  ;;  %v2152_v37 = vmax.f32 %v720_v18, %v752_v46 }
  0x57   :  { %v817_v62 = vcombine.high %v2045_v21, %v2045_v21  ;;  %v818_v10 = vcombine.high %v2050_v44, %v2050_v44  ;;  %v819_v0 = vcombine.high %v2055_v48, %v2055_v48  ;;  %v820_v54 = vcombine.high %v2060_v60, %v2060_v60 }
  0x58   :  { %v821_v8 = vcombine.high %v2065_v42, %v2065_v42  ;;  %v822_v2 = vcombine.high %v2070_v13, %v2070_v13  ;;  %v823_v18 = vcombine.high %v2075_v27, %v2075_v27  ;;  %v824_v25 = vcombine.high %v2080_v24, %v2080_v24 }
  0x59   :  { %v882_v53 = vsel %vm881_vm0, %v2045_v21, -inf  ;;  %v889_v39 = vsel %vm881_vm0, %v817_v62, -inf  ;;  %v896_v34 = vsel %vm881_vm0, %v2050_v44, -inf  ;;  %v903_v29 = vsel %vm881_vm0, %v818_v10, -inf }
  0x5a   :  { %v883_v17 = vrot.slane %v882_v53, 4  ;;  %v890_v36 = vrot.slane %v889_v39, 4  ;;  %v897_v61 = vrot.slane %v896_v34, 4  ;;  %v904_v19 = vrot.slane %v903_v29, 4 }
  0x5b   :  { %v910_v57 = vsel %vm881_vm0, %v2055_v48, -inf  ;;  %v917_v50 = vsel %vm881_vm0, %v819_v0, -inf  ;;  %v924_v52 = vsel %vm881_vm0, %v2060_v60, -inf  ;;  %v931_v44 = vsel %vm881_vm0, %v820_v54, -inf }
  0x5c   :  { %v884_v46 = vmax.f32 %v882_v53, %v883_v17  ;;  %v891_v3 = vmax.f32 %v889_v39, %v890_v36  ;;  %v911_v63 = vrot.slane %v910_v57, 4  ;;  %v918_v21 = vrot.slane %v917_v50, 4 }
  0x5d   :  { %v898_v49 = vmax.f32 %v896_v34, %v897_v61  ;;  %v905_v62 = vmax.f32 %v903_v29, %v904_v19  ;;  %v925_v48 = vrot.slane %v924_v52, 4  ;;  %v932_v9 = vrot.slane %v931_v44, 4 }
  0x5e   :  { %v885_v45 = vrot.slane %v884_v46, 2  ;;  %v892_v10 = vrot.slane %v891_v3, 2  ;;  %v912_v22 = vmax.f32 %v910_v57, %v911_v63  ;;  %v919_v43 = vmax.f32 %v917_v50, %v918_v21 }
  0x5f   :  { %v899_v16 = vrot.slane %v898_v49, 2  ;;  %v906_v6 = vrot.slane %v905_v62, 2  ;;  %v926_v34 = vmax.f32 %v924_v52, %v925_v48  ;;  %v933_v29 = vmax.f32 %v931_v44, %v932_v9 }
  0x60   :  { %v886_v0 = vmax.f32 %v884_v46, %v885_v45  ;;  %v893_v17 = vmax.f32 %v891_v3, %v892_v10  ;;  %v913_v36 = vrot.slane %v912_v22, 2  ;;  %v920_v53 = vrot.slane %v919_v43, 2 }
  0x61   :  { %v900_v39 = vmax.f32 %v898_v49, %v899_v16  ;;  %v907_v61 = vmax.f32 %v905_v62, %v906_v6  ;;  %v927_v63 = vrot.slane %v926_v34, 2  ;;  %v934_v50 = vrot.slane %v933_v29, 2 }
  0x62   :  { %v887_v19 = vrot.slane %v886_v0, 1  ;;  %v894_v60 = vrot.slane %v893_v17, 1  ;;  %v914_v32 = vmax.f32 %v912_v22, %v913_v36  ;;  %v921_v54 = vmax.f32 %v919_v43, %v920_v53 }
  0x63   :  { %v901_v31 = vrot.slane %v900_v39, 1  ;;  %v908_v15 = vrot.slane %v907_v61, 1  ;;  %v928_v6 = vmax.f32 %v926_v34, %v927_v63  ;;  %v935_v9 = vmax.f32 %v933_v29, %v934_v50 }
  0x64   :  { %v2230_v57 = vmax.f32 %v886_v0, %v887_v19  ;;  %v2232_v21 = vmax.f32 %v893_v17, %v894_v60  ;;  %v915_v45 = vrot.slane %v914_v32, 1  ;;  %v922_v3 = vrot.slane %v921_v54, 1 }
  0x65   :  { %v2234_v46 = vmax.f32 %v900_v39, %v901_v31  ;;  %v2236_v16 = vmax.f32 %v907_v61, %v908_v15  ;;  %v938_v43 = vsel %vm881_vm0, %v2065_v42, -inf  ;;  %v945_v49 = vsel %vm881_vm0, %v821_v8, -inf }
  0x66   :  { %v2238_v52 = vmax.f32 %v914_v32, %v915_v45  ;;  %v2240_v22 = vmax.f32 %v921_v54, %v922_v3  ;;  %v929_v62 = vrot.slane %v928_v6, 1  ;;  %v936_v44 = vrot.slane %v935_v9, 1 }
  0x67   :  { %v939_v31 = vrot.slane %v938_v43, 4  ;;  %v946_v10 = vrot.slane %v945_v49, 4  ;;  %v952_v15 = vsel %vm881_vm0, %v2070_v13, -inf  ;;  %v959_v32 = vsel %vm881_vm0, %v822_v2, -inf }
  0x68   :  { %2702 = vst [vmem:[#allocation3_spill] sm:$0xff] %v2240_v22  ;;  %v966_v48 = vsel %vm881_vm0, %v2075_v27, -inf  ;;  %v973_v42 = vsel %vm881_vm0, %v823_v18, -inf  ;;  %v2260_v8 = vmax.f32 %v928_v6, %v929_v62  ;;  %v2262_v0 = vmax.f32 %v935_v9, %v936_v44 }
  0x69   :  { %v940_v17 = vmax.f32 %v938_v43, %v939_v31  ;;  %v947_v36 = vmax.f32 %v945_v49, %v946_v10  ;;  %v953_v53 = vrot.slane %v952_v15, 4  ;;  %v960_v39 = vrot.slane %v959_v32, 4 }
  0x6a   :  { %2703 = vst [vmem:[#allocation4_spill] sm:$0xff] %v2262_v0  ;;  %v967_v61 = vrot.slane %v966_v48, 4  ;;  %v974_v13 = vrot.slane %v973_v42, 4  ;;  %v980_v29 = vsel %vm881_vm0, %v2080_v24, -inf  ;;  %v987_v27 = vsel %vm881_vm0, %v824_v25, -inf }
  0x6b   :  { %v941_v34 = vrot.slane %v940_v17, 2  ;;  %v948_v2 = vrot.slane %v947_v36, 2  ;;  %v954_v18 = vmax.f32 %v952_v15, %v953_v53  ;;  %v961_v19 = vmax.f32 %v959_v32, %v960_v39 }
  0x6c   :  { %v968_v60 = vmax.f32 %v966_v48, %v967_v61  ;;  %v975_v54 = vmax.f32 %v973_v42, %v974_v13  ;;  %v981_v45 = vrot.slane %v980_v29, 4  ;;  %v988_v3 = vrot.slane %v987_v27, 4 }
  0x6d   :  { %v942_v63 = vmax.f32 %v940_v17, %v941_v34  ;;  %v949_v50 = vmax.f32 %v947_v36, %v948_v2  ;;  %v955_v6 = vrot.slane %v954_v18, 2  ;;  %v962_v9 = vrot.slane %v961_v19, 2 }
  0x6e   :  { %v969_v43 = vrot.slane %v968_v60, 2  ;;  %v976_v49 = vrot.slane %v975_v54, 2  ;;  %v982_v31 = vmax.f32 %v980_v29, %v981_v45  ;;  %v989_v10 = vmax.f32 %v987_v27, %v988_v3 }
  0x6f   :  { %v943_v62 = vrot.slane %v942_v63, 1  ;;  %v950_v44 = vrot.slane %v949_v50, 1  ;;  %v956_v0 = vmax.f32 %v954_v18, %v955_v6  ;;  %v963_v24 = vmax.f32 %v961_v19, %v962_v9 }
  0x70   :  { %v970_v22 = vmax.f32 %v968_v60, %v969_v43  ;;  %v977_v25 = vmax.f32 %v975_v54, %v976_v49  ;;  %v983_v48 = vrot.slane %v982_v31, 2  ;;  %v990_v42 = vrot.slane %v989_v10, 2 }
  0x71   :  { %v2270_v15 = vmax.f32 %v942_v63, %v943_v62  ;;  %v2272_v32 = vmax.f32 %v949_v50, %v950_v44  ;;  %v957_v17 = vrot.slane %v956_v0, 1  ;;  %v964_v36 = vrot.slane %v963_v24, 1 }
  0x72   :  { %v971_v53 = vrot.slane %v970_v22, 1  ;;  %v978_v39 = vrot.slane %v977_v25, 1  ;;  %v984_v61 = vmax.f32 %v982_v31, %v983_v48  ;;  %v991_v13 = vmax.f32 %v989_v10, %v990_v42 }
  0x73   :  { %2704 = vst [vmem:[#allocation2_spill] sm:$0xff] %v2272_v32  ;;  %v994_v34 = vsel %vm881_vm0, %v2084_v1, -inf  ;;  %v2705_v2 = vcombine.high %v2084_v1, %v2084_v1  ;;  %v2280_v27 = vmax.f32 %v956_v0, %v957_v17  ;;  %v2282_v18 = vmax.f32 %v963_v24, %v964_v36 }
  0x74   :  { %v2284_v19 = vmax.f32 %v970_v22, %v971_v53  ;;  %v2286_v60 = vmax.f32 %v977_v25, %v978_v39  ;;  %v985_v54 = vrot.slane %v984_v61, 1  ;;  %v992_v63 = vrot.slane %v991_v13, 1 }
  0x75   :  { %v1001_v29 = vsel %vm881_vm0, %v2705_v2, -inf  ;;  %2706 = vst [vmem:[#allocation5_spill] sm:$0xff] %v2282_v18  ;;  %v995_v50 = vrot.slane %v994_v34, 4  ;;  %v1008_v3 = vsel %vm881_vm0, %v2087_v23, -inf  ;;  %v2709_v1 = vcombine.high %v2087_v23, %v2087_v23 }
  0x76   :  { %2707 = vst [vmem:[#allocation6_spill] sm:$0xff] %v2284_v19  ;;  %2708 = vst [vmem:[#allocation7_spill] sm:$0xff] %v2286_v60  ;;  %v1002_v45 = vrot.slane %v1001_v29, 4  ;;  %v1022_v0 = vsel %vm881_vm0, %v2090_v14, -inf  ;;  %v2710_v22 = vcombine.high %v2090_v14, %v2090_v14  ;;  %v2300_v43 = vmax.f32 %v984_v61, %v985_v54 }
  0x77   :  { %v1015_v6 = vsel %vm881_vm0, %v2709_v1, -inf  ;;  %v2302_v49 = vmax.f32 %v991_v13, %v992_v63  ;;  %v996_v62 = vmax.f32 %v994_v34, %v995_v50  ;;  %v1009_v31 = vrot.slane %v1008_v3, 4 }
  0x78   :  { %v1029_v9 = vsel %vm881_vm0, %v2710_v22, -inf  ;;  %2711 = vst [vmem:[#allocation8_spill] sm:$0xff] %v2300_v43  ;;  %v1003_v44 = vmax.f32 %v1001_v29, %v1002_v45  ;;  %v1016_v10 = vrot.slane %v1015_v6, 4  ;;  %v1023_v24 = vrot.slane %v1022_v0, 4 }
  0x79   :  { %2712 = vst [vmem:[#allocation9_spill] sm:$0xff] %v2302_v49  ;;  %v1030_v23 = vrot.slane %v1029_v9, 4  ;;  %v997_v25 = vrot.slane %v996_v62, 2  ;;  %v1036_v42 = vsel %vm881_vm0, %v2093_v11, -inf  ;;  %v2713_v14 = vcombine.high %v2093_v11, %v2093_v11 }
  0x7a   :  { %v1004_v48 = vrot.slane %v1003_v44, 2  ;;  %v1010_v36 = vmax.f32 %v1008_v3, %v1009_v31  ;;  %v1017_v53 = vmax.f32 %v1015_v6, %v1016_v10  ;;  %v1024_v39 = vmax.f32 %v1022_v0, %v1023_v24 }
  0x7b   :  { %v1043_v17 = vsel %vm881_vm0, %v2713_v14, -inf  ;;  %v1031_v61 = vmax.f32 %v1029_v9, %v1030_v23  ;;  %v998_v13 = vmax.f32 %v996_v62, %v997_v25  ;;  %v1037_v2 = vrot.slane %v1036_v42, 4 }
  0x7c   :  { %v1005_v34 = vmax.f32 %v1003_v44, %v1004_v48  ;;  %v1044_v29 = vrot.slane %v1043_v17, 4  ;;  %v1011_v54 = vrot.slane %v1010_v36, 2  ;;  %v1018_v63 = vrot.slane %v1017_v53, 2 }
  0x7d   :  { %v1025_v50 = vrot.slane %v1024_v39, 2  ;;  %v1032_v45 = vrot.slane %v1031_v61, 2  ;;  %v999_v1 = vrot.slane %v998_v13, 1  ;;  %v1038_v49 = vmax.f32 %v1036_v42, %v1037_v2 }
  0x7e   :  { %v1006_v22 = vrot.slane %v1005_v34, 1  ;;  %v1045_v60 = vmax.f32 %v1043_v17, %v1044_v29  ;;  %v1012_v18 = vmax.f32 %v1010_v36, %v1011_v54  ;;  %v1019_v11 = vmax.f32 %v1017_v53, %v1018_v63 }
  0x7f   :  { %v1026_v32 = vmax.f32 %v1024_v39, %v1025_v50  ;;  %v1033_v14 = vmax.f32 %v1031_v61, %v1032_v45  ;;  %v2310_v3 = vmax.f32 %v998_v13, %v999_v1  ;;  %v1039_v0 = vrot.slane %v1038_v49, 2 }
  0x80   :  { %v2312_v6 = vmax.f32 %v1005_v34, %v1006_v22  ;;  %v1046_v9 = vrot.slane %v1045_v60, 2  ;;  %v1013_v62 = vrot.slane %v1012_v18, 1  ;;  %v1020_v44 = vrot.slane %v1019_v11, 1 }
  0x81   :  { %v1027_v31 = vrot.slane %v1026_v32, 1  ;;  %v1034_v10 = vrot.slane %v1033_v14, 1  ;;  %v1040_v24 = vmax.f32 %v1038_v49, %v1039_v0  ;;  %v1050_v25 = vsel %vm881_vm0, %v2096_v30, -inf }
  0x82   :  { %v1047_v23 = vmax.f32 %v1045_v60, %v1046_v9  ;;  %v2714_v48 = vcombine.high %v2096_v30, %v2096_v30  ;;  %v2320_v17 = vmax.f32 %v1012_v18, %v1013_v62  ;;  %v2322_v36 = vmax.f32 %v1019_v11, %v1020_v44 }
  0x83   :  { %v2324_v53 = vmax.f32 %v1026_v32, %v1027_v31  ;;  %v2326_v39 = vmax.f32 %v1033_v14, %v1034_v10  ;;  %v1041_v61 = vrot.slane %v1040_v24, 1  ;;  %v1051_v49 = vrot.slane %v1050_v25, 4 }
  0x84   :  { %v1057_v42 = vsel %vm881_vm0, %v2714_v48, -inf  ;;  %v1048_v13 = vrot.slane %v1047_v23, 1  ;;  %v1064_v34 = vsel %vm881_vm0, %v2099_v35, -inf  ;;  %v2715_v30 = vcombine.high %v2099_v35, %v2099_v35 }
  0x85   :  { %v1058_v60 = vrot.slane %v1057_v42, 4  ;;  %v1078_v18 = vsel %vm881_vm0, %v2102_v12, -inf  ;;  %v2716_v32 = vcombine.high %v2102_v12, %v2102_v12  ;;  %v2340_v54 = vmax.f32 %v1040_v24, %v1041_v61 }
  0x86   :  { %v1071_v2 = vsel %vm881_vm0, %v2715_v30, -inf  ;;  %v2342_v63 = vmax.f32 %v1047_v23, %v1048_v13  ;;  %v1052_v50 = vmax.f32 %v1050_v25, %v1051_v49  ;;  %v1065_v1 = vrot.slane %v1064_v34, 4 }
  0x87   :  { %v1085_v29 = vsel %vm881_vm0, %v2716_v32, -inf  ;;  %2717 = vst [vmem:[#allocation10_spill] sm:$0xff] %v2340_v54  ;;  %v1059_v45 = vmax.f32 %v1057_v42, %v1058_v60  ;;  %v1072_v22 = vrot.slane %v1071_v2, 4  ;;  %v1079_v11 = vrot.slane %v1078_v18, 4 }
  0x88   :  { %2718 = vst [vmem:[#allocation11_spill] sm:$0xff] %v2342_v63  ;;  %v1086_v35 = vrot.slane %v1085_v29, 4  ;;  %v1053_v14 = vrot.slane %v1052_v50, 2  ;;  %v1092_v9 = vsel %vm881_vm0, %v2105_v33, -inf  ;;  %v2719_v12 = vcombine.high %v2105_v33, %v2105_v33 }
  0x89   :  { %v1060_v0 = vrot.slane %v1059_v45, 2  ;;  %v1066_v44 = vmax.f32 %v1064_v34, %v1065_v1  ;;  %v1073_v31 = vmax.f32 %v1071_v2, %v1072_v22  ;;  %v1080_v10 = vmax.f32 %v1078_v18, %v1079_v11 }
  0x8a   :  { %v1099_v62 = vsel %vm881_vm0, %v2719_v12, -inf  ;;  %v1087_v24 = vmax.f32 %v1085_v29, %v1086_v35  ;;  %v1054_v23 = vmax.f32 %v1052_v50, %v1053_v14  ;;  %v1093_v48 = vrot.slane %v1092_v9, 4 }
  0x8b   :  { %v1061_v25 = vmax.f32 %v1059_v45, %v1060_v0  ;;  %v1100_v42 = vrot.slane %v1099_v62, 4  ;;  %v1067_v61 = vrot.slane %v1066_v44, 2  ;;  %v1074_v13 = vrot.slane %v1073_v31, 2 }
  0x8c   :  { %v1081_v49 = vrot.slane %v1080_v10, 2  ;;  %v1088_v60 = vrot.slane %v1087_v24, 2  ;;  %v1055_v30 = vrot.slane %v1054_v23, 1  ;;  %v1094_v43 = vmax.f32 %v1092_v9, %v1093_v48 }
  0x8d   :  { %v1062_v32 = vrot.slane %v1061_v25, 1  ;;  %v1101_v63 = vmax.f32 %v1099_v62, %v1100_v42  ;;  %v1068_v54 = vmax.f32 %v1066_v44, %v1067_v61  ;;  %v1075_v33 = vmax.f32 %v1073_v31, %v1074_v13 }
  0x8e   :  { %v1082_v19 = vmax.f32 %v1080_v10, %v1081_v49  ;;  %v1089_v12 = vmax.f32 %v1087_v24, %v1088_v60  ;;  %v2350_v34 = vmax.f32 %v1054_v23, %v1055_v30  ;;  %v1095_v18 = vrot.slane %v1094_v43, 2 }
  0x8f   :  { %v2352_v2 = vmax.f32 %v1061_v25, %v1062_v32  ;;  %v1102_v29 = vrot.slane %v1101_v63, 2  ;;  %v1069_v50 = vrot.slane %v1068_v54, 1  ;;  %v1076_v45 = vrot.slane %v1075_v33, 1 }
  0x90   :  { %v1083_v1 = vrot.slane %v1082_v19, 1  ;;  %v1090_v22 = vrot.slane %v1089_v12, 1  ;;  %v1096_v11 = vmax.f32 %v1094_v43, %v1095_v18  ;;  %v1106_v14 = vsel %vm881_vm0, %v2108_v40, -inf }
  0x91   :  { %v1103_v35 = vmax.f32 %v1101_v63, %v1102_v29  ;;  %v2720_v0 = vcombine.high %v2108_v40, %v2108_v40  ;;  %v2360_v62 = vmax.f32 %v1068_v54, %v1069_v50  ;;  %v2362_v44 = vmax.f32 %v1075_v33, %v1076_v45 }
  0x92   :  { %v2364_v31 = vmax.f32 %v1082_v19, %v1083_v1  ;;  %v2366_v10 = vmax.f32 %v1089_v12, %v1090_v22  ;;  %v1097_v24 = vrot.slane %v1096_v11, 1  ;;  %v1107_v43 = vrot.slane %v1106_v14, 4 }
  0x93   :  { %v1113_v9 = vsel %vm881_vm0, %v2720_v0, -inf  ;;  %v1104_v23 = vrot.slane %v1103_v35, 1  ;;  %v1120_v25 = vsel %vm881_vm0, %v2111_v51, -inf  ;;  %v2723_v40 = vcombine.high %v2111_v51, %v2111_v51 }
  0x94   :  { %2721 = vst [vmem:[#allocation12_spill] sm:$0xff] %v2364_v31  ;;  %2722 = vst [vmem:[#allocation13_spill] sm:$0xff] %v2366_v10  ;;  %v1114_v63 = vrot.slane %v1113_v9, 4  ;;  %v1134_v54 = vsel %vm881_vm0, %v2114_v47, -inf  ;;  %v2724_v19 = vcombine.high %v2114_v47, %v2114_v47  ;;  %v2380_v61 = vmax.f32 %v1096_v11, %v1097_v24 }
  0x95   :  { %v1127_v48 = vsel %vm881_vm0, %v2723_v40, -inf  ;;  %v2382_v13 = vmax.f32 %v1103_v35, %v1104_v23  ;;  %v1108_v49 = vmax.f32 %v1106_v14, %v1107_v43  ;;  %v1121_v30 = vrot.slane %v1120_v25, 4 }
  0x96   :  { %v1141_v42 = vsel %vm881_vm0, %v2724_v19, -inf  ;;  %2725 = vst [vmem:[#allocation14_spill] sm:$0xff] %v2380_v61  ;;  %v1115_v60 = vmax.f32 %v1113_v9, %v1114_v63  ;;  %v1128_v32 = vrot.slane %v1127_v48, 4  ;;  %v1135_v33 = vrot.slane %v1134_v54, 4 }
  0x97   :  { %2726 = vst [vmem:[#allocation15_spill] sm:$0xff] %v2382_v13  ;;  %v1142_v51 = vrot.slane %v1141_v42, 4  ;;  %v1109_v12 = vrot.slane %v1108_v49, 2  ;;  %v1148_v29 = vsel %vm881_vm0, %v2117_v55, -inf  ;;  %v2727_v47 = vcombine.high %v2117_v55, %v2117_v55 }
  0x98   :  { %v1116_v18 = vrot.slane %v1115_v60, 2  ;;  %v1122_v45 = vmax.f32 %v1120_v25, %v1121_v30  ;;  %v1129_v1 = vmax.f32 %v1127_v48, %v1128_v32  ;;  %v1136_v22 = vmax.f32 %v1134_v54, %v1135_v33 }
  0x99   :  { %v1155_v50 = vsel %vm881_vm0, %v2727_v47, -inf  ;;  %v1143_v11 = vmax.f32 %v1141_v42, %v1142_v51  ;;  %v1110_v35 = vmax.f32 %v1108_v49, %v1109_v12  ;;  %v1149_v0 = vrot.slane %v1148_v29, 4 }
  0x9a   :  { %v1117_v14 = vmax.f32 %v1115_v60, %v1116_v18  ;;  %v1156_v9 = vrot.slane %v1155_v50, 4  ;;  %v1123_v24 = vrot.slane %v1122_v45, 2  ;;  %v1130_v23 = vrot.slane %v1129_v1, 2 }
  0x9b   :  { %v1137_v43 = vrot.slane %v1136_v22, 2  ;;  %v1144_v63 = vrot.slane %v1143_v11, 2  ;;  %v1111_v40 = vrot.slane %v1110_v35, 1  ;;  %v1150_v13 = vmax.f32 %v1148_v29, %v1149_v0 }
  0x9c   :  { %v1118_v19 = vrot.slane %v1117_v14, 1  ;;  %v1157_v61 = vmax.f32 %v1155_v50, %v1156_v9  ;;  %v1124_v10 = vmax.f32 %v1122_v45, %v1123_v24  ;;  %v1131_v55 = vmax.f32 %v1129_v1, %v1130_v23 }
  0x9d   :  { %v1138_v31 = vmax.f32 %v1136_v22, %v1137_v43  ;;  %v1145_v47 = vmax.f32 %v1143_v11, %v1144_v63  ;;  %v2390_v25 = vmax.f32 %v1110_v35, %v1111_v40  ;;  %v1151_v54 = vrot.slane %v1150_v13, 2 }
  0x9e   :  { %v2392_v48 = vmax.f32 %v1117_v14, %v1118_v19  ;;  %v1158_v42 = vrot.slane %v1157_v61, 2  ;;  %v1125_v49 = vrot.slane %v1124_v10, 1  ;;  %v1132_v60 = vrot.slane %v1131_v55, 1 }
  0x9f   :  { %v1139_v30 = vrot.slane %v1138_v31, 1  ;;  %v1146_v32 = vrot.slane %v1145_v47, 1  ;;  %v1152_v33 = vmax.f32 %v1150_v13, %v1151_v54  ;;  %v1162_v12 = vsel %vm881_vm0, %v2120_v41, -inf }
  0xa0   :  { %2728 = vst [vmem:[#allocation16_spill] sm:$0xff] %v2392_v48  ;;  %v1159_v51 = vmax.f32 %v1157_v61, %v1158_v42  ;;  %v2729_v18 = vcombine.high %v2120_v41, %v2120_v41  ;;  %v2400_v50 = vmax.f32 %v1124_v10, %v1125_v49  ;;  %v2402_v45 = vmax.f32 %v1131_v55, %v1132_v60 }
  0xa1   :  { %v2404_v1 = vmax.f32 %v1138_v31, %v1139_v30  ;;  %v2406_v22 = vmax.f32 %v1145_v47, %v1146_v32  ;;  %v1153_v11 = vrot.slane %v1152_v33, 1  ;;  %v1163_v13 = vrot.slane %v1162_v12, 4 }
  0xa2   :  { %v1169_v29 = vsel %vm881_vm0, %v2729_v18, -inf  ;;  %2730 = vst [vmem:[#allocation17_spill] sm:$0xff] %v2402_v45  ;;  %v1160_v35 = vrot.slane %v1159_v51, 1  ;;  %v1176_v14 = vsel %vm881_vm0, %v2123_v38, -inf  ;;  %v2732_v41 = vcombine.high %v2123_v38, %v2123_v38 }
  0xa3   :  { %2731 = vst [vmem:[#allocation18_spill] sm:$0xff] %v2406_v22  ;;  %v1170_v61 = vrot.slane %v1169_v29, 4  ;;  %v1190_v10 = vsel %vm881_vm0, %v2126_v7, -inf  ;;  %v2733_v31 = vcombine.high %v2126_v7, %v2126_v7  ;;  %v2420_v24 = vmax.f32 %v1152_v33, %v1153_v11 }
  0xa4   :  { %v1183_v0 = vsel %vm881_vm0, %v2732_v41, -inf  ;;  %v2422_v23 = vmax.f32 %v1159_v51, %v1160_v35  ;;  %v1164_v43 = vmax.f32 %v1162_v12, %v1163_v13  ;;  %v1177_v40 = vrot.slane %v1176_v14, 4 }
  0xa5   :  { %v1197_v9 = vsel %vm881_vm0, %v2733_v31, -inf  ;;  %v1171_v63 = vmax.f32 %v1169_v29, %v1170_v61  ;;  %v1184_v19 = vrot.slane %v1183_v0, 4  ;;  %v1191_v55 = vrot.slane %v1190_v10, 4 }
  0xa6   :  { %2734 = vst [vmem:[#allocation19_spill] sm:$0xff] %v2422_v23  ;;  %v1198_v38 = vrot.slane %v1197_v9, 4  ;;  %v1165_v47 = vrot.slane %v1164_v43, 2  ;;  %v1204_v42 = vsel %vm881_vm0, %v2129_v26, -inf  ;;  %v2735_v7 = vcombine.high %v2129_v26, %v2129_v26 }
  0xa7   :  { %v1172_v54 = vrot.slane %v1171_v63, 2  ;;  %v1178_v60 = vmax.f32 %v1176_v14, %v1177_v40  ;;  %v1185_v30 = vmax.f32 %v1183_v0, %v1184_v19  ;;  %v1192_v32 = vmax.f32 %v1190_v10, %v1191_v55 }
  0xa8   :  { %v1211_v49 = vsel %vm881_vm0, %v2735_v7, -inf  ;;  %v1199_v33 = vmax.f32 %v1197_v9, %v1198_v38  ;;  %v1166_v51 = vmax.f32 %v1164_v43, %v1165_v47  ;;  %v1205_v18 = vrot.slane %v1204_v42, 4 }
  0xa9   :  { %v1173_v12 = vmax.f32 %v1171_v63, %v1172_v54  ;;  %v1212_v29 = vrot.slane %v1211_v49, 4  ;;  %v1179_v11 = vrot.slane %v1178_v60, 2  ;;  %v1186_v35 = vrot.slane %v1185_v30, 2 }
  0xaa   :  { %v1193_v13 = vrot.slane %v1192_v32, 2  ;;  %v1200_v61 = vrot.slane %v1199_v33, 2  ;;  %v1167_v41 = vrot.slane %v1166_v51, 1  ;;  %v1206_v23 = vmax.f32 %v1204_v42, %v1205_v18 }
  0xab   :  { %v1174_v31 = vrot.slane %v1173_v12, 1  ;;  %v1213_v22 = vmax.f32 %v1211_v49, %v1212_v29  ;;  %v1180_v45 = vmax.f32 %v1178_v60, %v1179_v11  ;;  %v1187_v26 = vmax.f32 %v1185_v30, %v1186_v35 }
  0xac   :  { %v1194_v48 = vmax.f32 %v1192_v32, %v1193_v13  ;;  %v1201_v7 = vmax.f32 %v1199_v33, %v1200_v61  ;;  %v2430_v14 = vmax.f32 %v1166_v51, %v1167_v41  ;;  %v1207_v10 = vrot.slane %v1206_v23, 2 }
  0xad   :  { %v2432_v0 = vmax.f32 %v1173_v12, %v1174_v31  ;;  %v1214_v9 = vrot.slane %v1213_v22, 2  ;;  %v1181_v43 = vrot.slane %v1180_v45, 1  ;;  %v1188_v63 = vrot.slane %v1187_v26, 1 }
  0xae   :  { %v1195_v40 = vrot.slane %v1194_v48, 1  ;;  %v1202_v19 = vrot.slane %v1201_v7, 1  ;;  %v1208_v55 = vmax.f32 %v1206_v23, %v1207_v10  ;;  %v1218_v47 = vsel %vm881_vm0, %v2132_v28, -inf }
  0xaf   :  { %2736 = vst [vmem:[#allocation20_spill] sm:$0xff] %v2432_v0  ;;  %v1215_v38 = vmax.f32 %v1213_v22, %v1214_v9  ;;  %v2737_v54 = vcombine.high %v2132_v28, %v2132_v28  ;;  %v2440_v49 = vmax.f32 %v1180_v45, %v1181_v43  ;;  %v2442_v60 = vmax.f32 %v1187_v26, %v1188_v63 }
  0xb0   :  { %v2444_v30 = vmax.f32 %v1194_v48, %v1195_v40  ;;  %v2446_v32 = vmax.f32 %v1201_v7, %v1202_v19  ;;  %v1209_v33 = vrot.slane %v1208_v55, 1  ;;  %v1219_v23 = vrot.slane %v1218_v47, 4 }
  0xb1   :  { %v1225_v42 = vsel %vm881_vm0, %v2737_v54, -inf  ;;  %2738 = vst [vmem:[#allocation21_spill] sm:$0xff] %v2442_v60  ;;  %v1216_v51 = vrot.slane %v1215_v38, 1  ;;  %v1232_v12 = vsel %vm881_vm0, %v2135_v56, -inf  ;;  %v2741_v28 = vcombine.high %v2135_v56, %v2135_v56 }
  0xb2   :  { %2739 = vst [vmem:[#allocation22_spill] sm:$0xff] %v2444_v30  ;;  %2740 = vst [vmem:[#allocation23_spill] sm:$0xff] %v2446_v32  ;;  %v1226_v22 = vrot.slane %v1225_v42, 4  ;;  %v1246_v45 = vsel %vm881_vm0, %v2138_v59, -inf  ;;  %v2742_v48 = vcombine.high %v2138_v59, %v2138_v59  ;;  %v2460_v11 = vmax.f32 %v1208_v55, %v1209_v33 }
  0xb3   :  { %v1239_v18 = vsel %vm881_vm0, %v2741_v28, -inf  ;;  %v2462_v35 = vmax.f32 %v1215_v38, %v1216_v51  ;;  %v1220_v13 = vmax.f32 %v1218_v47, %v1219_v23  ;;  %v1233_v41 = vrot.slane %v1232_v12, 4 }
  0xb4   :  { %v1253_v29 = vsel %vm881_vm0, %v2742_v48, -inf  ;;  %2743 = vst [vmem:[#allocation24_spill] sm:$0xff] %v2460_v11  ;;  %v1227_v61 = vmax.f32 %v1225_v42, %v1226_v22  ;;  %v1240_v31 = vrot.slane %v1239_v18, 4  ;;  %v1247_v26 = vrot.slane %v1246_v45, 4 }
  0xb5   :  { %2744 = vst [vmem:[#allocation25_spill] sm:$0xff] %v2462_v35  ;;  %v1254_v56 = vrot.slane %v1253_v29, 4  ;;  %v1221_v7 = vrot.slane %v1220_v13, 2  ;;  %v1260_v9 = vsel %vm881_vm0, %v2141_v58, -inf  ;;  %v2745_v59 = vcombine.high %v2141_v58, %v2141_v58 }
  0xb6   :  { %v1228_v10 = vrot.slane %v1227_v61, 2  ;;  %v1234_v63 = vmax.f32 %v1232_v12, %v1233_v41  ;;  %v1241_v40 = vmax.f32 %v1239_v18, %v1240_v31  ;;  %v1248_v19 = vmax.f32 %v1246_v45, %v1247_v26 }
  0xb7   :  { %v1267_v43 = vsel %vm881_vm0, %v2745_v59, -inf  ;;  %v1255_v55 = vmax.f32 %v1253_v29, %v1254_v56  ;;  %v1222_v38 = vmax.f32 %v1220_v13, %v1221_v7  ;;  %v1261_v54 = vrot.slane %v1260_v9, 4 }
  0xb8   :  { %v1229_v47 = vmax.f32 %v1227_v61, %v1228_v10  ;;  %v1268_v42 = vrot.slane %v1267_v43, 4  ;;  %v1235_v33 = vrot.slane %v1234_v63, 2  ;;  %v1242_v51 = vrot.slane %v1241_v40, 2 }
  0xb9   :  { %v1249_v23 = vrot.slane %v1248_v19, 2  ;;  %v1256_v22 = vrot.slane %v1255_v55, 2  ;;  %v1223_v28 = vrot.slane %v1222_v38, 1  ;;  %v1262_v35 = vmax.f32 %v1260_v9, %v1261_v54 }
  0xba   :  { %v1230_v48 = vrot.slane %v1229_v47, 1  ;;  %v1269_v32 = vmax.f32 %v1267_v43, %v1268_v42  ;;  %v1236_v60 = vmax.f32 %v1234_v63, %v1235_v33  ;;  %v1243_v58 = vmax.f32 %v1241_v40, %v1242_v51 }
  0xbb   :  { %v1250_v0 = vmax.f32 %v1248_v19, %v1249_v23  ;;  %v1257_v59 = vmax.f32 %v1255_v55, %v1256_v22  ;;  %v2470_v12 = vmax.f32 %v1222_v38, %v1223_v28  ;;  %v1263_v45 = vrot.slane %v1262_v35, 2 }
  0xbc   :  { %v2472_v18 = vmax.f32 %v1229_v47, %v1230_v48  ;;  %v1270_v29 = vrot.slane %v1269_v32, 2  ;;  %v1237_v13 = vrot.slane %v1236_v60, 1  ;;  %v1244_v61 = vrot.slane %v1243_v58, 1 }
  0xbd   :  { %v1251_v41 = vrot.slane %v1250_v0, 1  ;;  %v1258_v31 = vrot.slane %v1257_v59, 1  ;;  %v1264_v26 = vmax.f32 %v1262_v35, %v1263_v45  ;;  %v1274_v7 = vsel %vm881_vm0, %v2144_v4, -inf }
  0xbe   :  { %v1271_v56 = vmax.f32 %v1269_v32, %v1270_v29  ;;  %v2746_v10 = vcombine.high %v2144_v4, %v2144_v4  ;;  %v2480_v43 = vmax.f32 %v1236_v60, %v1237_v13  ;;  %v2482_v63 = vmax.f32 %v1243_v58, %v1244_v61 }
  0xbf   :  { %v2484_v40 = vmax.f32 %v1250_v0, %v1251_v41  ;;  %v2486_v19 = vmax.f32 %v1257_v59, %v1258_v31  ;;  %v1265_v55 = vrot.slane %v1264_v26, 1  ;;  %v1275_v35 = vrot.slane %v1274_v7, 4 }
  0xc0   :  { %v1281_v9 = vsel %vm881_vm0, %v2746_v10, -inf  ;;  %v1272_v38 = vrot.slane %v1271_v56, 1  ;;  %v1288_v47 = vsel %vm881_vm0, %v2147_v20, -inf  ;;  %v2747_v4 = vcombine.high %v2147_v20, %v2147_v20 }
  0xc1   :  { %v1282_v32 = vrot.slane %v1281_v9, 4  ;;  %v1302_v60 = vsel %vm881_vm0, %v2150_v5, -inf  ;;  %v2748_v0 = vcombine.high %v2150_v5, %v2150_v5  ;;  %v2500_v33 = vmax.f32 %v1264_v26, %v1265_v55 }
  0xc2   :  { %v1295_v54 = vsel %vm881_vm0, %v2747_v4, -inf  ;;  %v2502_v51 = vmax.f32 %v1271_v56, %v1272_v38  ;;  %v1276_v23 = vmax.f32 %v1274_v7, %v1275_v35  ;;  %v1289_v28 = vrot.slane %v1288_v47, 4 }
  0xc3   :  { %v1309_v42 = vsel %vm881_vm0, %v2748_v0, -inf  ;;  %2749 = vst [vmem:[#allocation26_spill] sm:$0xff] %v2500_v33  ;;  %v1283_v22 = vmax.f32 %v1281_v9, %v1282_v32  ;;  %v1296_v48 = vrot.slane %v1295_v54, 4  ;;  %v1303_v58 = vrot.slane %v1302_v60, 4 }
  0xc4   :  { %2750 = vst [vmem:[#allocation27_spill] sm:$0xff] %v2502_v51  ;;  %v1310_v20 = vrot.slane %v1309_v42, 4  ;;  %v1277_v59 = vrot.slane %v1276_v23, 2  ;;  %v1316_v29 = vsel %vm881_vm0, %v2152_v37, -inf  ;;  %v2751_v5 = vcombine.high %v2152_v37, %v2152_v37 }
  0xc5   :  { %v1284_v45 = vrot.slane %v1283_v22, 2  ;;  %v1290_v61 = vmax.f32 %v1288_v47, %v1289_v28  ;;  %v1297_v41 = vmax.f32 %v1295_v54, %v1296_v48  ;;  %v1304_v31 = vmax.f32 %v1302_v60, %v1303_v58 }
  0xc6   :  { %v1323_v13 = vsel %vm881_vm0, %v2751_v5, -inf  ;;  %v1311_v26 = vmax.f32 %v1309_v42, %v1310_v20  ;;  %v1278_v56 = vmax.f32 %v1276_v23, %v1277_v59  ;;  %v1317_v10 = vrot.slane %v1316_v29, 4 }
  0xc7   :  { %v1285_v7 = vmax.f32 %v1283_v22, %v1284_v45  ;;  %v1324_v9 = vrot.slane %v1323_v13, 4  ;;  %v1291_v55 = vrot.slane %v1290_v61, 2  ;;  %v1298_v38 = vrot.slane %v1297_v41, 2 }
  0xc8   :  { %v1305_v35 = vrot.slane %v1304_v31, 2  ;;  %v1312_v32 = vrot.slane %v1311_v26, 2  ;;  %v1279_v4 = vrot.slane %v1278_v56, 1  ;;  %v1318_v11 = vmax.f32 %v1316_v29, %v1317_v10 }
  0xc9   :  { %v1286_v0 = vrot.slane %v1285_v7, 1  ;;  %v1325_v51 = vmax.f32 %v1323_v13, %v1324_v9  ;;  %v1292_v33 = vmax.f32 %v1290_v61, %v1291_v55  ;;  %v1299_v37 = vmax.f32 %v1297_v41, %v1298_v38  ;;  %v2755_v9 = vld [vmem:[#allocation10_spill] sm:$0xff]  ;;  %v2757_v55 = vld [vmem:[#allocation8_spill] sm:$0xff] }
  0xca   :  { %v1306_v30 = vmax.f32 %v1304_v31, %v1305_v35  ;;  %v1313_v5 = vmax.f32 %v1311_v26, %v1312_v32  ;;  %v2510_v47 = vmax.f32 %v1278_v56, %v1279_v4  ;;  %v1319_v60 = vrot.slane %v1318_v11, 2  ;;  %v2758_v35 = vld [vmem:[#allocation2_spill] sm:$0xff]  ;;  %v2759_v4 = vld [vmem:[#allocation5_spill] sm:$0xff] }
  0xcb   :  { %v2512_v54 = vmax.f32 %v1285_v7, %v1286_v0  ;;  %v1326_v42 = vrot.slane %v1325_v51, 2  ;;  %v1293_v23 = vrot.slane %v1292_v33, 1  ;;  %v1300_v22 = vrot.slane %v1299_v37, 1 }
  0xcc   :  { %v1307_v28 = vrot.slane %v1306_v30, 1  ;;  %v1314_v48 = vrot.slane %v1313_v5, 1  ;;  %v1320_v58 = vmax.f32 %v1318_v11, %v1319_v60  ;;  %v1395_v31 = vsel %vm1394_vm1, %v2234_v46, %v2230_v57 }
  0xcd   :  { %v1327_v20 = vmax.f32 %v1325_v51, %v1326_v42  ;;  %v2514_v59 = vmax.f32 %v1292_v33, %v1293_v23  ;;  %v2516_v45 = vmax.f32 %v1299_v37, %v1300_v22  ;;  %v1397_v11 = vsel %vm1396_vm2, %v2238_v52, %v1395_v31  ;;  %v2761_v42 = vld [vmem:[#allocation12_spill] sm:$0xff]  ;;  %v2762_v22 = vld [vmem:[#allocation13_spill] sm:$0xff] }
  0xce   :  { %v2518_v29 = vmax.f32 %v1306_v30, %v1307_v28  ;;  %v2520_v13 = vmax.f32 %v1313_v5, %v1314_v48  ;;  %v1321_v61 = vrot.slane %v1320_v58, 1  ;;  %v1399_v30 = vsel %vm1398_vm3, %v2260_v8, %v1397_v11  ;;  %v2752_v8 = vld [vmem:[#allocation3_spill] sm:$0xff]  ;;  %v2763_v28 = vld [vmem:[#allocation9_spill] sm:$0xff]  ;;  %v2766_v31 = vld [vmem:[#allocation16_spill] sm:$0xff] }
  0xcf   :  { %v1328_v41 = vrot.slane %v1327_v20, 1  ;;  %v1401_v26 = vsel %vm1400_vm4, %v2270_v15, %v1399_v30  ;;  %v1408_v57 = vsel %vm1394_vm1, %v2236_v16, %v2232_v21  ;;  %v1415_v46 = vsel %vm1394_vm1, %v2320_v17, %v2310_v3  ;;  %v2753_v16 = vld [vmem:[#allocation6_spill] sm:$0xff]  ;;  %v2754_v3 = vld [vmem:[#allocation4_spill] sm:$0xff]  ;;  %v2767_v11 = vld [vmem:[#allocation17_spill] sm:$0xff] }
  0xd0   :  { %v1322_v33 = vmax.f32 %v1320_v58, %v1321_v61  ;;  %v1422_v52 = vsel %vm1394_vm1, %v2322_v36, %v2312_v6  ;;  %v1403_v56 = vsel %vm1402_vm5, %v2280_v27, %v1401_v26  ;;  %v1409_v7 = vsel %vm1396_vm2, %v2752_v8, %v1408_v57  ;;  %v2756_v36 = vld [vmem:[#allocation11_spill] sm:$0xff] }
  0xd1   :  { %v1329_v51 = vmax.f32 %v1327_v20, %v1328_v41  ;;  %v1416_v15 = vsel %vm1396_vm2, %v2324_v53, %v1415_v46  ;;  %v1423_v21 = vsel %vm1396_vm2, %v2326_v39, %v1422_v52  ;;  %v1405_v10 = vsel %vm1404_vm6, %v2753_v16, %v1403_v56  ;;  %v2765_v58 = vld [vmem:[#allocation15_spill] sm:$0xff]  ;;  %v2771_v56 = vld [vmem:[#allocation26_spill] sm:$0xff]  ;;  %v2774_v16 = vld [vmem:[#allocation20_spill] sm:$0xff] }
  0xd2   :  { %v1410_v17 = vsel %vm1398_vm3, %v2754_v3, %v1409_v7  ;;  %v1417_v6 = vsel %vm1398_vm3, %v2755_v9, %v1416_v15  ;;  %v1424_v27 = vsel %vm1398_vm3, %v2756_v36, %v1423_v21  ;;  %v1407_v38 = vsel %vm1406_vm7, %v2757_v55, %v1405_v10  ;;  %v2770_v46 = vld [vmem:[#allocation19_spill] sm:$0xff]  ;;  %v2773_v15 = vld [vmem:[#allocation24_spill] sm:$0xff]  ;;  %v2775_v3 = vld [vmem:[#allocation21_spill] sm:$0xff] }
  0xd3   :  { %v1411_v53 = vsel %vm1400_vm4, %v2758_v35, %v1410_v17  ;;  %v1418_v39 = vsel %vm1400_vm4, %v2350_v34, %v1417_v6  ;;  %v1425_v32 = vsel %vm1400_vm4, %v2352_v2, %v1424_v27  ;;  %v1429_v60 = vsel %vm1394_vm1, %v2400_v50, %v2390_v25  ;;  %1465 = vst [vmem:[%s2669_s5] sm:$0xff] %v1407_v38  ;;  %v2760_v34 = vld [vmem:[#allocation7_spill] sm:$0xff]  ;;  %v2764_v25 = vld [vmem:[#allocation14_spill] sm:$0xff]  ;;  %v2777_v55 = vld [vmem:[#allocation25_spill] sm:$0xff] }
  0xd4   :  { %v1412_v0 = vsel %vm1402_vm5, %v2759_v4, %v1411_v53  ;;  %v1419_v37 = vsel %vm1402_vm5, %v2360_v62, %v1418_v39  ;;  %v1426_v5 = vsel %vm1402_vm5, %v2362_v44, %v1425_v32  ;;  %v1430_v44 = vsel %vm1396_vm2, %v2404_v1, %v1429_v60  ;;  %v2772_v7 = vld [vmem:[#allocation27_spill] sm:$0xff] }
  0xd5   :  { %v1413_v2 = vsel %vm1404_vm6, %v2760_v34, %v1412_v0  ;;  %v1420_v23 = vsel %vm1404_vm6, %v2761_v42, %v1419_v37  ;;  %v1427_v62 = vsel %vm1404_vm6, %v2762_v22, %v1426_v5  ;;  %v1431_v61 = vsel %vm1398_vm3, %v2420_v24, %v1430_v44  ;;  %v2776_v36 = vld [vmem:[#allocation23_spill] sm:$0xff] }
  0xd6   :  { %v1414_v48 = vsel %vm1406_vm7, %v2763_v28, %v1413_v2  ;;  %v1421_v50 = vsel %vm1406_vm7, %v2764_v25, %v1420_v23  ;;  %v1428_v20 = vsel %vm1406_vm7, %v2765_v58, %v1427_v62  ;;  %v1432_v41 = vsel %vm1400_vm4, %v2430_v14, %v1431_v61  ;;  %v2768_v14 = vld [vmem:[#allocation18_spill] sm:$0xff] }
  0xd7   :  { %v1436_v30 = vsel %vm1394_vm1, %v2767_v11, %v2766_v31  ;;  %v1443_v1 = vsel %vm1394_vm1, %v2480_v43, %v2470_v12  ;;  %v1450_v26 = vsel %vm1394_vm1, %v2482_v63, %v2472_v18  ;;  %1466 = vst [vmem:[%s2669_s5 + $0x8] sm:$0xff] %v1414_v48  ;;  %1467 = vst [vmem:[%s2669_s5 + $0x10] sm:$0xff] %v1421_v50  ;;  %v2769_v63 = vld [vmem:[#allocation22_spill] sm:$0xff] }
  0xd8   :  { %1468 = vst [vmem:[%s2669_s5 + $0x18] sm:$0xff] %v1428_v20  ;;  %v1433_v24 = vsel %vm1402_vm5, %v2440_v49, %v1432_v41  ;;  %v1437_v12 = vsel %vm1396_vm2, %v2768_v14, %v1436_v30  ;;  %v1444_v18 = vsel %vm1396_vm2, %v2484_v40, %v1443_v1  ;;  %v1451_v43 = vsel %vm1396_vm2, %v2486_v19, %v1450_v26 }
  0xd9   :  { %v1434_v57 = vsel %vm1404_vm6, %v2769_v63, %v1433_v24  ;;  %v1438_v52 = vsel %vm1398_vm3, %v2770_v46, %v1437_v12  ;;  %v1445_v8 = vsel %vm1398_vm3, %v2771_v56, %v1444_v18  ;;  %v1452_v49 = vsel %vm1398_vm3, %v2772_v7, %v1451_v43 }
  0xda   :  { %v1435_v21 = vsel %vm1406_vm7, %v2773_v15, %v1434_v57  ;;  %v1439_v40 = vsel %vm1400_vm4, %v2774_v16, %v1438_v52  ;;  %v1446_v19 = vsel %vm1400_vm4, %v2510_v47, %v1445_v8  ;;  %v1453_v10 = vsel %vm1400_vm4, %v2512_v54, %v1452_v49 }
  0xdb   :  { %v1440_v17 = vsel %vm1402_vm5, %v2775_v3, %v1439_v40  ;;  %v1447_v9 = vsel %vm1402_vm5, %v2514_v59, %v1446_v19  ;;  %v1454_v6 = vsel %vm1402_vm5, %v2516_v45, %v1453_v10  ;;  %1469 = vst [vmem:[%s2669_s5 + $0x20] sm:$0xff] %v1435_v21 }
  0xdc   :  { %v1441_v27 = vsel %vm1404_vm6, %v2776_v36, %v1440_v17  ;;  %v1448_v47 = vsel %vm1404_vm6, %v2518_v29, %v1447_v9  ;;  %v1455_v54 = vsel %vm1404_vm6, %v2520_v13, %v1454_v6 }
  0xdd   :  { %v1442_v38 = vsel %vm1406_vm7, %v2777_v55, %v1441_v27  ;;  %v1449_v59 = vsel %vm1406_vm7, %v1322_v33, %v1448_v47  ;;  %v1456_v45 = vsel %vm1406_vm7, %v1329_v51, %v1455_v54 }
  0xde   :  { %1470 = vst [vmem:[%s2669_s5 + $0x28] sm:$0xff] %v1442_v38  ;;  %1471 = vst [vmem:[%s2669_s5 + $0x30] sm:$0xff] %v1449_v59 }
  0xdf   :  { %1472 = vst [vmem:[%s2669_s5 + $0x38] sm:$0xff] %v1456_v45 }

// kernel: _lambda_.35
= control target key start
LH: loop header
LB: loop body
LE: loop exit
PB: predicated region body
PF: predicated region fallthrough
CT: control target
= control target key end

     0   :  { %vm18_vm0 = vcmask 517120   ;;  %v613_v40 = vmov 0.0   ;;  %vm422_vm1 = vcmask 523264   ;;  %vm442_vm2 = vcmask 516096   ;;  %s793_s1 = inlined_call_operand.vmem [shape: bf16[512,64], index: 1, kind: input, shape index: {}]   ;;  %s794_s0 = inlined_call_operand.vmem [shape: bf16[32,512], index: 0, kind: input, shape index: {}]   ;;  %s795_s3 = inlined_call_operand.vmem [shape: f32[2,64], index: 3, kind: output, shape index: {1}]   ;;  %s796_s2 = inlined_call_operand.vmem [shape: f32[32,64], index: 2, kind: output, shape index: {0}]  }
   0x1   :  { %v569_v0 = vld [vmem:[%s793_s1 + $0x40] sm:$0xff]   ;;  %v573_v4 = vld [vmem:[%s793_s1 + $0x48] sm:$0xff]   ;;  %v577_v8 = vld [vmem:[%s793_s1 + $0x50] sm:$0xff]   ;;  %19 = vst.msk [vmem:[%s795_s3] sm:$0x3] %vm18_vm0, %v613_v40 }
   0x2   :  { %v570_v1 = vld [vmem:[%s793_s1 + $0xc0] sm:$0xff]   ;;  %512 = vmatprep.subr.bf16.mxu0 %v569_v0  ;;  %v574_v5 = vld [vmem:[%s793_s1 + $0xc8] sm:$0xff]   ;;  %v578_v9 = vld [vmem:[%s793_s1 + $0xd0] sm:$0xff]  }
   0x3   :  { %v571_v2 = vld [vmem:[%s793_s1] sm:$0xff]   ;;  %540 = vmatprep.subr.bf16.mxu1 %v570_v1  ;;  %v575_v6 = vld [vmem:[%s793_s1 + $0x8] sm:$0xff]   ;;  %v579_v10 = vld [vmem:[%s793_s1 + $0x10] sm:$0xff]  }
   0x4   :  { %v572_v3 = vld [vmem:[%s793_s1 + $0x80] sm:$0xff]   ;;  %513 = vmatpush3.bf16.msra.mxu0 %v571_v2  ;;  %v576_v7 = vld [vmem:[%s793_s1 + $0x88] sm:$0xff]   ;;  %v580_v11 = vld [vmem:[%s793_s1 + $0x90] sm:$0xff]  }
   0x5   :  { %541 = vmatpush3.bf16.msra.mxu1 %v572_v3  ;;  %514 = vmatprep.subr.bf16.mxu0 %v573_v4  ;;  %v581_v12 = vld [vmem:[%s793_s1 + $0x58] sm:$0xff]   ;;  %v585_v16 = vld [vmem:[%s793_s1 + $0x60] sm:$0xff]   ;;  %v589_v20 = vld [vmem:[%s793_s1 + $0x68] sm:$0xff]  }
   0x6   :  { %542 = vmatprep.subr.bf16.mxu1 %v574_v5  ;;  %v582_v13 = vld [vmem:[%s793_s1 + $0xd8] sm:$0xff]   ;;  %v586_v17 = vld [vmem:[%s793_s1 + $0xe0] sm:$0xff]   ;;  %v590_v21 = vld [vmem:[%s793_s1 + $0xe8] sm:$0xff]  }
   0x7   :  { %v583_v14 = vld [vmem:[%s793_s1 + $0x18] sm:$0xff]   ;;  %v587_v18 = vld [vmem:[%s793_s1 + $0x20] sm:$0xff]   ;;  %v591_v22 = vld [vmem:[%s793_s1 + $0x28] sm:$0xff]  }
   0x8   :  { %515 = vmatpush3.bf16.msra.mxu0 %v575_v6  ;;  %v584_v15 = vld [vmem:[%s793_s1 + $0x98] sm:$0xff]   ;;  %v588_v19 = vld [vmem:[%s793_s1 + $0xa0] sm:$0xff]   ;;  %v592_v23 = vld [vmem:[%s793_s1 + $0xa8] sm:$0xff]  }
   0x9   :  { %543 = vmatpush3.bf16.msra.mxu1 %v576_v7  ;;  %516 = vmatprep.subr.bf16.mxu0 %v577_v8  ;;  %v593_v24 = vld [vmem:[%s793_s1 + $0x70] sm:$0xff]   ;;  %v597_v28 = vld [vmem:[%s793_s1 + $0x78] sm:$0xff]  }
   0xa   :  { %544 = vmatprep.subr.bf16.mxu1 %v578_v9  ;;  %v594_v25 = vld [vmem:[%s793_s1 + $0xf0] sm:$0xff]   ;;  %v598_v29 = vld [vmem:[%s793_s1 + $0xf8] sm:$0xff]  }
   0xb   :  { %v595_v26 = vld [vmem:[%s793_s1 + $0x30] sm:$0xff]   ;;  %v599_v30 = vld [vmem:[%s793_s1 + $0x38] sm:$0xff]  }
   0xc   :  { %517 = vmatpush3.bf16.msra.mxu0 %v579_v10  ;;  %v596_v27 = vld [vmem:[%s793_s1 + $0xb0] sm:$0xff]   ;;  %v600_v31 = vld [vmem:[%s793_s1 + $0xb8] sm:$0xff]  }
   0xd   :  { %545 = vmatpush3.bf16.msra.mxu1 %v580_v11  ;;  %518 = vmatprep.subr.bf16.mxu0 %v581_v12  ;;  %v601_v32 = vld [vmem:[%s794_s0] ss:$16 sps:$4 sm:$0xff]   ;;  %v603_v33 = vld [vmem:[%s794_s0 + $0x4] ss:$16 sps:$4 sm:$0xff]   ;;  %v604_v34 = vld [vmem:[%s794_s0 + $0x8] ss:$16 sps:$4 sm:$0xff]  }
   0xe   :  { %546 = vmatprep.subr.bf16.mxu1 %v582_v13  ;;  %v606_v35 = vld [vmem:[%s794_s0 + $0xc] ss:$16 sps:$4 sm:$0xff]   ;;  %356 = vmatprep.mubr.bf16.mxu0 %v603_v33  ;;  %v607_v36 = vld [vmem:[%s794_s0 + $0x24] ss:$16 sps:$4 sm:$0xff]   ;;  %v611_v38 = vld [vmem:[%s794_s0 + $0x20] ss:$16 sps:$4 sm:$0xff]  }
   0xf   :  { %405 = vmatprep.mubr.bf16.mxu1 %v606_v35  ;;  %v609_v37 = vld [vmem:[%s794_s0 + $0x2c] ss:$16 sps:$4 sm:$0xff]   ;;  %v612_v39 = vld [vmem:[%s794_s0 + $0x28] ss:$16 sps:$4 sm:$0xff]   ;;  %v444_v35 = vld [vmem:[%s795_s3 + $0x1] sm:$0x1] }
  0x10   :  { %519 = vmatpush3.bf16.msra.mxu0 %v583_v14 }
  0x11   :  { %547 = vmatpush3.bf16.msra.mxu1 %v584_v15  ;;  %520 = vmatprep.subr.bf16.mxu0 %v585_v16 }
  0x12   :  { %548 = vmatprep.subr.bf16.mxu1 %v586_v17 }
  0x14   :  { %521 = vmatpush3.bf16.msra.mxu0 %v587_v18 }
  0x15   :  { %549 = vmatpush3.bf16.msra.mxu1 %v588_v19  ;;  %522 = vmatprep.subr.bf16.mxu0 %v589_v20 }
  0x16   :  { %550 = vmatprep.subr.bf16.mxu1 %v590_v21 }
  0x18   :  { %523 = vmatpush3.bf16.msra.mxu0 %v591_v22 }
  0x19   :  { %551 = vmatpush3.bf16.msra.mxu1 %v592_v23  ;;  %524 = vmatprep.subr.bf16.mxu0 %v593_v24 }
  0x1a   :  { %552 = vmatprep.subr.bf16.mxu1 %v594_v25 }
  0x1c   :  { %525 = vmatpush3.bf16.msra.mxu0 %v595_v26 }
  0x1d   :  { %553 = vmatpush3.bf16.msra.mxu1 %v596_v27  ;;  %526 = vmatprep.subr.bf16.mxu0 %v597_v28 }
  0x1e   :  { %554 = vmatprep.subr.bf16.mxu1 %v598_v29 }
  0x20   :  { %527 = vmatpush3.bf16.msra.mxu0 %v599_v30 }
  0x21   :  { %555 = vmatpush3.bf16.msra.mxu1 %v600_v31 }
  0x23   :  { %357 = vmatmul.mubr.bf16.vlgmr.msra.gmra.mrb[0].mxu0 %v601_v32  ;;  %v427_v32 = vld [vmem:[%s795_s3] sm:$0x1] }
  0x24   :  { %406 = vmatmul.mubr.bf16.vlgmr.msra.gmra.mrb[0].mxu1 %v604_v34  ;;  %364 = vmatprep.mubr.bf16.mxu0 %v607_v36 }
  0x25   :  { %413 = vmatprep.mubr.bf16.mxu1 %v609_v37 }
  0x2b   :  { %365 = vmatmul.mubr.bf16.gmra.mrb[4].mxu0 %v611_v38 }
  0x2c   :  { %414 = vmatmul.mubr.bf16.gmra.mrb[4].mxu1 %v612_v39 }
  0xf6   :  { %v528_v41 = vpop.f32.mrb[0].mxu0 }
  0xf7   :  { %v556_v42 = vpop.f32.mrb[0].mxu1  ;;  %v529_v43 = vpop.f32.mrb[1].mxu0 }
  0xf8   :  { %v530_v44 = vadd.f32 %v529_v43, %v528_v41  ;;  %v557_v45 = vpop.f32.mrb[1].mxu1  ;;  %v531_v46 = vpop.f32.mrb[2].mxu0 }
  0xf9   :  { %v558_v47 = vadd.f32 %v557_v45, %v556_v42  ;;  %v559_v48 = vpop.f32.mrb[2].mxu1  ;;  %v532_v49 = vpop.f32.mrb[3].mxu0 }
  0xfa   :  { %v533_v50 = vadd.f32 %v532_v49, %v531_v46  ;;  %v560_v51 = vpop.f32.mrb[3].mxu1 }
  0xfb   :  { %v408_v52 = vadd.f32 %v558_v47, %v530_v44  ;;  %v561_v53 = vadd.f32 %v560_v51, %v559_v48 }
  0xfd   :  { %423 = vst.msk [vmem:[%s796_s2] sm:$0xff] %vm422_vm1, %v408_v52  ;;  %v445_v54 = vmul.f32 %v408_v52, %v408_v52  ;;  %v411_v55 = vadd.f32 %v561_v53, %v533_v50  ;;  %v428_v57 = vsel %vm422_vm1, %v408_v52, 0.0 }
  0xfe   :  { %v534_v56 = vpop.f32.mrb[4].mxu0 }
  0xff   :  { %424 = vst.msk [vmem:[%s796_s2 + $0x8] sm:$0xff] %vm422_vm1, %v411_v55  ;;  %v429_v58 = vsel %vm422_vm1, %v411_v55, 0.0  ;;  %v446_v59 = vmul.f32 %v411_v55, %v411_v55  ;;  %v562_v60 = vpop.f32.mrb[4].mxu1  ;;  %v535_v61 = vpop.f32.mrb[5].mxu0  ;;  %v449_v2 = vsel %vm422_vm1, %v445_v54, 0.0 }
 0x100   :  { %v430_v62 = vadd.f32 %v429_v58, %v428_v57  ;;  %v536_v63 = vadd.f32 %v535_v61, %v534_v56  ;;  %v563_v0 = vpop.f32.mrb[5].mxu1  ;;  %v537_v1 = vpop.f32.mrb[6].mxu0 }
 0x101   :  { %v450_v3 = vsel %vm422_vm1, %v446_v59, 0.0  ;;  %v564_v4 = vadd.f32 %v563_v0, %v562_v60  ;;  %v565_v5 = vpop.f32.mrb[6].mxu1  ;;  %v538_v6 = vpop.f32.mrb[7].mxu0 }
 0x102   :  { %v451_v7 = vadd.f32 %v450_v3, %v449_v2  ;;  %v539_v8 = vadd.f32 %v538_v6, %v537_v1  ;;  %v566_v9 = vpop.f32.mrb[7].mxu1 }
 0x103   :  { %v416_v10 = vadd.f32 %v564_v4, %v536_v63  ;;  %v567_v11 = vadd.f32 %v566_v9, %v565_v5 }
 0x105   :  { %425 = vst.msk [vmem:[%s796_s2 + $0x10] sm:$0xff] %vm422_vm1, %v416_v10  ;;  %v431_v12 = vsel %vm422_vm1, %v416_v10, 0.0  ;;  %v447_v13 = vmul.f32 %v416_v10, %v416_v10  ;;  %v419_v14 = vadd.f32 %v567_v11, %v539_v8 }
 0x106   :  { %v432_v15 = vadd.f32 %v431_v12, %v430_v62 }
 0x107   :  { %v452_v16 = vsel %vm422_vm1, %v447_v13, 0.0  ;;  %426 = vst.msk [vmem:[%s796_s2 + $0x18] sm:$0xff] %vm422_vm1, %v419_v14  ;;  %v433_v17 = vsel %vm422_vm1, %v419_v14, 0.0  ;;  %v448_v18 = vmul.f32 %v419_v14, %v419_v14 }
 0x108   :  { %v453_v19 = vadd.f32 %v452_v16, %v451_v7  ;;  %v434_v20 = vadd.f32 %v433_v17, %v432_v15 }
 0x109   :  { %v454_v21 = vsel %vm422_vm1, %v448_v18, 0.0 }
 0x10a   :  { %v435_v22 = vrot.slane %v434_v20, 4  ;;  %v455_v23 = vadd.f32 %v454_v21, %v453_v19 }
 0x10c   :  { %v436_v24 = vadd.f32 %v435_v22, %v434_v20  ;;  %v456_v25 = vrot.slane %v455_v23, 4 }
 0x10e   :  { %v437_v26 = vrot.slane %v436_v24, 2  ;;  %v457_v27 = vadd.f32 %v456_v25, %v455_v23 }
 0x110   :  { %v438_v28 = vadd.f32 %v437_v26, %v436_v24  ;;  %v458_v29 = vrot.slane %v457_v27, 2 }
 0x112   :  { %v439_v30 = vrot.slane %v438_v28, 1  ;;  %v459_v31 = vadd.f32 %v458_v29, %v457_v27 }
 0x114   :  { %v440_v33 = vadd.f32 %v439_v30, %v438_v28  ;;  %v460_v34 = vrot.slane %v459_v31, 1 }
 0x116   :  { %v441_v36 = vadd.f32 %v440_v33, %v427_v32  ;;  %v461_v37 = vadd.f32 %v460_v34, %v459_v31 }
 0x118   :  { %443 = vst.msk [vmem:[%s795_s3] sm:$0x1] %vm442_vm2, %v441_v36  ;;  %v462_v38 = vadd.f32 %v461_v37, %v444_v35 }
 0x11a   :  { %463 = vst.msk [vmem:[%s795_s3 + $0x1] sm:$0x1] %vm442_vm2, %v462_v38 }

// kernel: _lambda_.36
= control target key start
LH: loop header
LB: loop body
LE: loop exit
PB: predicated region body
PF: predicated region fallthrough
CT: control target
= control target key end

     0   :  { %s419_s18 = smov 0   ;;  %s456_s0 = inlined_call_operand.vmem [shape: f32[2,16,64], index: 0, kind: input, shape index: {}]   ;;  %s457_s1 = inlined_call_operand.vmem [shape: f32[2,64], index: 1, kind: input, shape index: {}]   ;;  %s458_s2 = inlined_call_operand.vmem [shape: f32[1,64], index: 2, kind: input, shape index: {}]   ;;  %s459_s3 = inlined_call_operand.vmem [shape: f32[1,64], index: 3, kind: input, shape index: {}]   ;;  %s460_s4 = inlined_call_operand.vmem [shape: f32[2,1,64], index: 4, kind: output, shape index: {0}]   ;;  %s461_s5 = inlined_call_operand.vmem [shape: f32[2,1,64], index: 5, kind: output, shape index: {1}]  }
   0x1 LB: > { %s361_s19 = sadd.s32 4294967295, %s387_s18   ;;  %p365_p0 = scmp.ge.s32.totalorder %s387_s18, 1  ;;  %s387_s18 = sphi %s419_s18, %s16_s18  }
   0x2   : > { %p190_p1 = scmp.lt.s32.totalorder %s387_s18, 3 }
   0x4   : > { %p191_p2 = pnand %p365_p0, %p190_p1 }
   0x5   : > { %v232_v0 = vld [vmem:[%s457_s1] sm:$0x1] (!%p191_p2)  ;;  %v234_v1 = vld [vmem:[%s457_s1 + $0x1] sm:$0x1] (!%p191_p2)  ;;  %p219_p3 = scmp.lt.s32.totalorder (!%p191_p2), %s361_s19, 1  ;;  %v247_v8 = vlaneseq (!%p191_p2)  ;;  %vm266_vm0 = vcmask (!%p191_p2), 523264  }
   0x6   : > { %194 = sbr.rel (%p191_p2) target bundleno = 59 (0x3b), region = 36  ;;  %v233_v2 = vmul.f32 (!%p191_p2), 0.03125, %v232_v0  ;;  %v235_v3 = vmul.f32 (!%p191_p2), 0.03125, %v234_v1  ;;  %v239_v10 = vld [vmem:[%s458_s2] sm:$0x1] (!%p191_p2)  ;;  %vm276_vm1 = vcmask (!%p191_p2), 516096  }
   0x7   : > { %v248_v9 = vshrl.u32 (!%p191_p2), %v247_v8, 7  ;;  %v243_v16 = vld [vmem:[%s459_s3] sm:$0x1] (!%p191_p2) }
   0x8   : > { %v236_v4 = vmul.f32 (!%p191_p2), %v233_v2, %v233_v2 }
   0x9   : > { %v249_v11 = vsub.s32 (!%p191_p2), 0, %v248_v9 }
   0xa   : > { %v237_v5 = vsub.f32 (!%p191_p2), %v235_v3, %v236_v4 }
   0xc   : > { %v238_v6 = vmax.f32 (!%p191_p2), %v237_v5, 0.0 }
   0xd   : > { %s463_s19 = smov (!%p219_p3, %s361_s19), 1 }
   0xe   : > { %v240_v7 = vadd.f32 1e-05, %v238_v6  ;;  %s370_s24 = sshll.u32 %s463_s19, 4  ;;  %s226_s9 = scalar_lea.vmem %s460_s4, %s463_s19 }
   0xf   : > { %s223_s29 = scalar_lea.vmem %s456_s0, %s370_s24  ;;  %s229_s12 = scalar_lea.vmem %s461_s5, %s463_s19 }
  0x10   : > { %379 = vrsqrt.f32 %v240_v7  ;;  %v230_v14 = vld [vmem:[%s223_s29] sm:$0xff]  ;;  %v231_v15 = vld [vmem:[%s223_s29 + $0x8] sm:$0xff] }
  0x1a   : > { %v380_v12 = vpop.eup %379 }
  0x1b   : > { %v242_v13 = vmul.f32 %v380_v12, %v239_v10 }
  0x1d   : > { %v244_v17 = vmul.f32 %v242_v13, %v233_v2  ;;  %v250_v18 = vrot.slane %v242_v13, %v249_v11 }
  0x1f   : > { %v245_v19 = vsub.f32 %v243_v16, %v244_v17  ;;  %v252_v20 = vmul.f32 %v250_v18, %v230_v14  ;;  %v253_v21 = vmul.f32 %v250_v18, %v231_v15 }
  0x21   : > { %v258_v22 = vrot.slane %v245_v19, %v249_v11 }
  0x23   : > { %v260_v23 = vadd.f32 %v258_v22, %v252_v20  ;;  %v261_v24 = vadd.f32 %v258_v22, %v253_v21 }
  0x25   : > { %v262_v25 = vmul.f32 0.2, %v260_v23  ;;  %v263_v26 = vmul.f32 0.2, %v261_v24 }
  0x27   : > { %v264_v27 = vmax.f32 %v260_v23, %v262_v25  ;;  %v265_v28 = vmax.f32 %v261_v24, %v263_v26 }
  0x29   : > { %v267_v29 = vsel %vm266_vm0, %v264_v27, -inf  ;;  %v268_v30 = vsel %vm266_vm0, %v265_v28, -inf  ;;  %v278_v31 = vsel %vm266_vm0, %v264_v27, 0.0  ;;  %v279_v32 = vsel %vm266_vm0, %v265_v28, 0.0 }
  0x2a   : > { %v269_v33 = vmax.f32 %v267_v29, %v268_v30  ;;  %v280_v34 = vadd.f32 %v279_v32, %v278_v31 }
  0x2c   : > { %v270_v35 = vrot.slane %v269_v33, 4  ;;  %v281_v36 = vrot.slane %v280_v34, 4 }
  0x2e   : > { %v271_v37 = vmax.f32 %v269_v33, %v270_v35  ;;  %v282_v38 = vadd.f32 %v281_v36, %v280_v34 }
  0x30   : > { %v272_v39 = vrot.slane %v271_v37, 2  ;;  %v283_v40 = vrot.slane %v282_v38, 2 }
  0x32   : > { %v273_v41 = vmax.f32 %v271_v37, %v272_v39  ;;  %v284_v42 = vadd.f32 %v283_v40, %v282_v38 }
  0x34   : > { %v274_v43 = vrot.slane %v273_v41, 1  ;;  %v285_v44 = vrot.slane %v284_v42, 1 }
  0x36   : > { %v275_v45 = vmax.f32 %v273_v41, %v274_v43  ;;  %v286_v46 = vadd.f32 %v285_v44, %v284_v42 }
  0x38   : > { %277 = vst.msk [vmem:[%s226_s9] sm:$0x1] %vm276_vm1, %v275_v45  ;;  %v287_v47 = vmul.f32 0.0625, %v286_v46 }
  0x3a   : > { %288 = vst.msk [vmem:[%s229_s12] sm:$0x1] %vm276_vm1, %v287_v47 }
  0x3b PF: > { %s16_s18 = sadd.s32 1, %s387_s18  }
  0x3c   : > { %p13_p4 = scmp.ge.s32.totalorder %s16_s18, 4  }
  0x3e   :  { %15 = sbr.rel (!%p13_p4) target bundleno = 1 (0x1), region = 78 }

// kernel: _lambda_.37
= control target key start
LH: loop header
LB: loop body
LE: loop exit
PB: predicated region body
PF: predicated region fallthrough
CT: control target
= control target key end

     0   :  { %v1216_v7 = vmov 0.0   ;;  %s2048_s0 = inlined_call_operand.vmem [shape: f32[2,128], index: 0, kind: input, shape index: {}]   ;;  %s2049_s1 = inlined_call_operand.vmem [shape: f32[128,512], index: 1, kind: input, shape index: {}]   ;;  %s2050_s2 = inlined_call_operand.vmem [shape: f32[1,512], index: 2, kind: input, shape index: {}]   ;;  %s2051_s3 = inlined_call_operand.vmem [shape: f32[1,512], index: 3, kind: input, shape index: {}]   ;;  %s2052_s4 = inlined_call_operand.vmem [shape: f32[512,256], index: 4, kind: input, shape index: {}]   ;;  %s2053_s5 = inlined_call_operand.vmem [shape: f32[1,256], index: 5, kind: input, shape index: {}]   ;;  %s2054_s6 = inlined_call_operand.vmem [shape: f32[1,256], index: 6, kind: input, shape index: {}]   ;;  %s2055_s7 = inlined_call_operand.vmem [shape: f32[1,256], index: 7, kind: input, shape index: {}]   ;;  %s2056_s8 = inlined_call_operand.vmem [shape: f32[256,40], index: 8, kind: input, shape index: {}]   ;;  %s2057_s9 = inlined_call_operand.vmem [shape: f32[1,40], index: 9, kind: input, shape index: {}]   ;;  %s2058_s10 = inlined_call_operand.hbm [shape: f32[2,40], index: 10, kind: output, shape index: {}]  }
   0x1   :  { %v38_v0 = vld [vmem:[%s2049_s1 + $0x8] sm:$0xff]  ;;  %v37_v2 = vld [vmem:[%s2049_s1] sm:$0xff]  ;;  %165 = vmatprep.mubr.f32.mxu1 %v1216_v7 }
   0x2   :  { %v42_v1 = vld [vmem:[%s2049_s1 + $0x28] sm:$0xff]  ;;  %v41_v4 = vld [vmem:[%s2049_s1 + $0x20] sm:$0xff] }
   0x3   :  { %v949_v3 = vpack.c.bf16 %v42_v1, %v38_v0  ;;  %v46_v5 = vld [vmem:[%s2049_s1 + $0x48] sm:$0xff]  ;;  %v951_v8 = vpack.c.bf16 %v41_v4, %v37_v2  ;;  %v45_v10 = vld [vmem:[%s2049_s1 + $0x40] sm:$0xff] }
   0x4   :  { %v50_v6 = vld [vmem:[%s2049_s1 + $0x68] sm:$0xff]  ;;  %v49_v11 = vld [vmem:[%s2049_s1 + $0x60] sm:$0xff] }
   0x5   :  { %v953_v9 = vpack.c.bf16 %v50_v6, %v46_v5  ;;  %v54_v12 = vld [vmem:[%s2049_s1 + $0x88] sm:$0xff]  ;;  %950 = vmatprep.subr.bf16.mxu1 %v949_v3  ;;  %v955_v14 = vpack.c.bf16 %v49_v11, %v45_v10  ;;  %v53_v16 = vld [vmem:[%s2049_s1 + $0x80] sm:$0xff] }
   0x6   :  { %v58_v13 = vld [vmem:[%s2049_s1 + $0xa8] sm:$0xff]  ;;  %952 = vmatpush1.bf16.msra.mxu1 %v951_v8  ;;  %v57_v17 = vld [vmem:[%s2049_s1 + $0xa0] sm:$0xff] }
   0x7   :  { %954 = vmatprep.subr.bf16.mxu1 %v953_v9  ;;  %v957_v15 = vpack.c.bf16 %v58_v13, %v54_v12  ;;  %v62_v18 = vld [vmem:[%s2049_s1 + $0xc8] sm:$0xff]  ;;  %v959_v20 = vpack.c.bf16 %v57_v17, %v53_v16  ;;  %v61_v22 = vld [vmem:[%s2049_s1 + $0xc0] sm:$0xff] }
   0x8   :  { %v66_v19 = vld [vmem:[%s2049_s1 + $0xe8] sm:$0xff]  ;;  %v65_v23 = vld [vmem:[%s2049_s1 + $0xe0] sm:$0xff] }
   0x9   :  { %v961_v21 = vpack.c.bf16 %v66_v19, %v62_v18  ;;  %v70_v24 = vld [vmem:[%s2049_s1 + $0x108] sm:$0xff]  ;;  %v963_v26 = vpack.c.bf16 %v65_v23, %v61_v22  ;;  %v69_v28 = vld [vmem:[%s2049_s1 + $0x100] sm:$0xff] }
   0xa   :  { %956 = vmatpush1.bf16.msra.mxu1 %v955_v14  ;;  %v74_v25 = vld [vmem:[%s2049_s1 + $0x128] sm:$0xff]  ;;  %v73_v29 = vld [vmem:[%s2049_s1 + $0x120] sm:$0xff] }
   0xb   :  { %958 = vmatprep.subr.bf16.mxu1 %v957_v15  ;;  %v965_v27 = vpack.c.bf16 %v74_v25, %v70_v24  ;;  %v78_v30 = vld [vmem:[%s2049_s1 + $0x148] sm:$0xff]  ;;  %v967_v32 = vpack.c.bf16 %v73_v29, %v69_v28  ;;  %v77_v34 = vld [vmem:[%s2049_s1 + $0x140] sm:$0xff] }
   0xc   :  { %v82_v31 = vld [vmem:[%s2049_s1 + $0x168] sm:$0xff]  ;;  %v81_v35 = vld [vmem:[%s2049_s1 + $0x160] sm:$0xff] }
   0xd   :  { %v969_v33 = vpack.c.bf16 %v82_v31, %v78_v30  ;;  %v86_v36 = vld [vmem:[%s2049_s1 + $0x188] sm:$0xff]  ;;  %v971_v38 = vpack.c.bf16 %v81_v35, %v77_v34  ;;  %v85_v40 = vld [vmem:[%s2049_s1 + $0x180] sm:$0xff] }
   0xe   :  { %960 = vmatpush1.bf16.msra.mxu1 %v959_v20  ;;  %v90_v37 = vld [vmem:[%s2049_s1 + $0x1a8] sm:$0xff]  ;;  %v89_v41 = vld [vmem:[%s2049_s1 + $0x1a0] sm:$0xff] }
   0xf   :  { %962 = vmatprep.subr.bf16.mxu1 %v961_v21  ;;  %v973_v39 = vpack.c.bf16 %v90_v37, %v86_v36 }
  0x12   :  { %964 = vmatpush1.bf16.msra.mxu1 %v963_v26 }
  0x13   :  { %966 = vmatprep.subr.bf16.mxu1 %v965_v27 }
  0x16   :  { %968 = vmatpush1.bf16.msra.mxu1 %v967_v32 }
  0x17   :  { %970 = vmatprep.subr.bf16.mxu1 %v969_v33 }
  0x18   :  { %15 = vsyncpa [#allocation3], 0  ;;  %v94_v42 = vld [vmem:[%s2049_s1 + $0x1c8] sm:$0xff]  ;;  %v975_v44 = vpack.c.bf16 %v89_v41, %v85_v40  ;;  %v93_v46 = vld [vmem:[%s2049_s1 + $0x1c0] sm:$0xff]  ;;  %vm245_vm0 = vcmask 1041408   ;;  %s1218_s20 = smov [#allocation2]  }
  0x19   :  { %v98_v43 = vld [vmem:[%s2049_s1 + $0x1e8] sm:$0xff]  ;;  %v97_v47 = vld [vmem:[%s2049_s1 + $0x1e0] sm:$0xff]  ;;  %v40_v48 = vld [vmem:[%s2049_s1 + $0x18] sm:$0xff]  ;;  %s905_s21 = sshll.u32 %s1218_s20, 4  ;;  %vm897_vm1 = vcmask 320512   ;;  %s906_s21 = int_to_ptr.vmem [resolvable:$true] %s905_s21 }
  0x1a   :  { %972 = vmatpush1.bf16.msra.mxu1 %v971_v38  ;;  %v977_v45 = vpack.c.bf16 %v98_v43, %v94_v42  ;;  %v44_v49 = vld [vmem:[%s2049_s1 + $0x38] sm:$0xff]  ;;  %v979_v50 = vpack.c.bf16 %v97_v47, %v93_v46  ;;  %v39_v52 = vld [vmem:[%s2049_s1 + $0x10] sm:$0xff]  ;;  %v36_v56 = vld [vmem:[%s2048_s0] sm:$0x3]  ;;  %s1192_s22 = scalar_lea.vmem %s906_s21, 32  ;;  %p1197_p1 = scmp.lt.s32.totalorder %s906_s21, %s906_s21 }
  0x1b   :  { %974 = vmatprep.subr.bf16.mxu1 %v973_v39  ;;  %v981_v51 = vpack.c.bf16 %v44_v49, %v40_v48  ;;  %v43_v53 = vld [vmem:[%s2049_s1 + $0x30] sm:$0xff]  ;;  %v48_v54 = vld [vmem:[%s2049_s1 + $0x58] sm:$0xff]  ;;  %v416_v34 = vld [vmem:[%s2052_s4 + $0x8] sm:$0xff]  ;;  %p1193_p0 = scmp.ne.s32.totalorder %s906_s21, %s1192_s22  ;;  %p1198_p2 = scmp.lt.s32.totalorder %s1192_s22, %s1192_s22 }
  0x1c   :  { %v52_v55 = vld [vmem:[%s2049_s1 + $0x78] sm:$0xff]  ;;  %v983_v57 = vpack.c.bf16 %v43_v53, %v39_v52  ;;  %v47_v59 = vld [vmem:[%s2049_s1 + $0x50] sm:$0xff]  ;;  %v415_v37 = vld [vmem:[%s2052_s4] sm:$0xff] }
  0x1d   :  { %v985_v58 = vpack.c.bf16 %v52_v55, %v48_v54  ;;  %v51_v60 = vld [vmem:[%s2049_s1 + $0x70] sm:$0xff]  ;;  %v56_v61 = vld [vmem:[%s2049_s1 + $0x98] sm:$0xff]  ;;  %v420_v40 = vld [vmem:[%s2052_s4 + $0x28] sm:$0xff]  ;;  %p1199_p3 = por %p1198_p2, %p1197_p1 }
  0x1e   :  { %976 = vmatpush1.bf16.msra.mxu1 %v975_v44  ;;  %v60_v62 = vld [vmem:[%s2049_s1 + $0xb8] sm:$0xff]  ;;  %v987_v63 = vpack.c.bf16 %v51_v60, %v47_v59  ;;  %v55_v1 = vld [vmem:[%s2049_s1 + $0x90] sm:$0xff]  ;;  %v419_v43 = vld [vmem:[%s2052_s4 + $0x20] sm:$0xff] }
  0x1f   :  { %978 = vmatprep.subr.bf16.mxu1 %v977_v45  ;;  %v989_v0 = vpack.c.bf16 %v60_v62, %v56_v61  ;;  %v59_v2 = vld [vmem:[%s2049_s1 + $0xb0] sm:$0xff]  ;;  %v64_v3 = vld [vmem:[%s2049_s1 + $0xd8] sm:$0xff]  ;;  %v424_v46 = vld [vmem:[%s2052_s4 + $0x48] sm:$0xff]  ;;  %p1200_p4 = pnand %p1199_p3, %p1193_p0 }
  0x20   :  { %v68_v4 = vld [vmem:[%s2049_s1 + $0xf8] sm:$0xff]  ;;  %v991_v5 = vpack.c.bf16 %v59_v2, %v55_v1  ;;  %v67_v8 = vld [vmem:[%s2049_s1 + $0xf0] sm:$0xff]  ;;  %v423_v49 = vld [vmem:[%s2052_s4 + $0x40] sm:$0xff] }
  0x21   :  { %v993_v6 = vpack.c.bf16 %v68_v4, %v64_v3  ;;  %v72_v9 = vld [vmem:[%s2049_s1 + $0x118] sm:$0xff]  ;;  %v71_v13 = vld [vmem:[%s2049_s1 + $0x110] sm:$0xff]  ;;  %v428_v52 = vld [vmem:[%s2052_s4 + $0x68] sm:$0xff] }
  0x22   :  { %980 = vmatpush1.bf16.msra.mxu1 %v979_v50  ;;  %v76_v10 = vld [vmem:[%s2049_s1 + $0x138] sm:$0xff]  ;;  %v75_v14 = vld [vmem:[%s2049_s1 + $0x130] sm:$0xff]  ;;  %v427_v55 = vld [vmem:[%s2052_s4 + $0x60] sm:$0xff] }
  0x23   :  { %982 = vmatprep.subr.bf16.mxu1 %v981_v51  ;;  %v997_v12 = vpack.c.bf16 %v76_v10, %v72_v9  ;;  %v80_v15 = vld [vmem:[%s2049_s1 + $0x158] sm:$0xff]  ;;  %v999_v17 = vpack.c.bf16 %v75_v14, %v71_v13  ;;  %v79_v19 = vld [vmem:[%s2049_s1 + $0x150] sm:$0xff]  ;;  %v431_v61 = vld [vmem:[%s2052_s4 + $0x80] sm:$0xff] }
  0x24   :  { %v84_v16 = vld [vmem:[%s2049_s1 + $0x178] sm:$0xff]  ;;  %v83_v20 = vld [vmem:[%s2049_s1 + $0x170] sm:$0xff]  ;;  %v435_v3 = vld [vmem:[%s2052_s4 + $0xa0] sm:$0xff] }
  0x25   :  { %166 = vmatmul.mubr.f32.vlgmr.msra.gmra.mrb[0].mxu1 %v36_v56  ;;  %v1001_v18 = vpack.c.bf16 %v84_v16, %v80_v15  ;;  %v88_v21 = vld [vmem:[%s2049_s1 + $0x198] sm:$0xff]  ;;  %v1003_v23 = vpack.c.bf16 %v83_v20, %v79_v19  ;;  %v87_v25 = vld [vmem:[%s2049_s1 + $0x190] sm:$0xff]  ;;  %v439_v9 = vld [vmem:[%s2052_s4 + $0xc0] sm:$0xff] }
  0x26   :  { %984 = vmatpush1.bf16.msra.mxu1 %v983_v57  ;;  %236 = vmatprep.mubr.f32.mxu1 %v1216_v7  ;;  %v63_v7 = vld [vmem:[%s2049_s1 + $0xd0] sm:$0xff]  ;;  %v92_v22 = vld [vmem:[%s2049_s1 + $0x1b8] sm:$0xff]  ;;  %v443_v15 = vld [vmem:[%s2052_s4 + $0xe0] sm:$0xff] }
  0x27   :  { %986 = vmatprep.subr.bf16.mxu1 %v985_v58  ;;  %v995_v11 = vpack.c.bf16 %v67_v8, %v63_v7  ;;  %v1005_v24 = vpack.c.bf16 %v92_v22, %v88_v21  ;;  %v91_v26 = vld [vmem:[%s2049_s1 + $0x1b0] sm:$0xff]  ;;  %v96_v27 = vld [vmem:[%s2049_s1 + $0x1d8] sm:$0xff]  ;;  %v432_v58 = vld [vmem:[%s2052_s4 + $0x88] sm:$0xff] }
  0x28   :  { %v100_v28 = vld [vmem:[%s2049_s1 + $0x1f8] sm:$0xff]  ;;  %v1007_v29 = vpack.c.bf16 %v91_v26, %v87_v25  ;;  %v95_v31 = vld [vmem:[%s2049_s1 + $0x1d0] sm:$0xff]  ;;  %v447_v21 = vld [vmem:[%s2052_s4 + $0x100] sm:$0xff] }
  0x29   :  { %v1009_v30 = vpack.c.bf16 %v100_v28, %v96_v27  ;;  %v99_v32 = vld [vmem:[%s2049_s1 + $0x1f0] sm:$0xff]  ;;  %v418_v35 = vld [vmem:[%s2052_s4 + $0x18] sm:$0xff]  ;;  %v451_v27 = vld [vmem:[%s2052_s4 + $0x120] sm:$0xff] }
  0x2a   :  { %988 = vmatpush1.bf16.msra.mxu1 %v987_v63  ;;  %v1011_v33 = vpack.c.bf16 %v99_v32, %v95_v31  ;;  %v1013_v36 = vpack.c.bf16 %v418_v35, %v416_v34  ;;  %v417_v38 = vld [vmem:[%s2052_s4 + $0x10] sm:$0xff]  ;;  %v422_v41 = vld [vmem:[%s2052_s4 + $0x38] sm:$0xff] }
  0x2b   :  { %990 = vmatprep.subr.bf16.mxu1 %v989_v0  ;;  %v1015_v39 = vpack.c.bf16 %v417_v38, %v415_v37  ;;  %v1017_v42 = vpack.c.bf16 %v422_v41, %v420_v40  ;;  %v421_v44 = vld [vmem:[%s2052_s4 + $0x30] sm:$0xff]  ;;  %v426_v47 = vld [vmem:[%s2052_s4 + $0x58] sm:$0xff]  ;;  %v436_v0 = vld [vmem:[%s2052_s4 + $0xa8] sm:$0xff] }
  0x2c   :  { %1014 = vmatprep.subr.bf16.mxu0 %v1013_v36  ;;  %v1019_v45 = vpack.c.bf16 %v421_v44, %v419_v43  ;;  %v1021_v48 = vpack.c.bf16 %v426_v47, %v424_v46  ;;  %v425_v50 = vld [vmem:[%s2052_s4 + $0x50] sm:$0xff]  ;;  %v430_v53 = vld [vmem:[%s2052_s4 + $0x78] sm:$0xff]  ;;  %v460_v36 = vld [vmem:[%s2052_s4 + $0x168] sm:$0xff] }
  0x2d   :  { %1016 = vmatpush1.bf16.msra.mxu0 %v1015_v39  ;;  %v1023_v51 = vpack.c.bf16 %v425_v50, %v423_v49  ;;  %v1025_v54 = vpack.c.bf16 %v430_v53, %v428_v52  ;;  %v434_v59 = vld [vmem:[%s2052_s4 + $0x98] sm:$0xff]  ;;  %v433_v62 = vld [vmem:[%s2052_s4 + $0x90] sm:$0xff]  ;;  %v459_v39 = vld [vmem:[%s2052_s4 + $0x160] sm:$0xff] }
  0x2e   :  { %992 = vmatpush1.bf16.msra.mxu1 %v991_v5  ;;  %1018 = vmatprep.subr.bf16.mxu0 %v1017_v42  ;;  %v1029_v60 = vpack.c.bf16 %v434_v59, %v432_v58  ;;  %v1031_v63 = vpack.c.bf16 %v433_v62, %v431_v61  ;;  %v438_v1 = vld [vmem:[%s2052_s4 + $0xb8] sm:$0xff]  ;;  %v437_v4 = vld [vmem:[%s2052_s4 + $0xb0] sm:$0xff]  ;;  %v464_v42 = vld [vmem:[%s2052_s4 + $0x188] sm:$0xff] }
  0x2f   :  { %994 = vmatprep.subr.bf16.mxu1 %v993_v6  ;;  %v1033_v2 = vpack.c.bf16 %v438_v1, %v436_v0  ;;  %v1035_v5 = vpack.c.bf16 %v437_v4, %v435_v3  ;;  %v440_v6 = vld [vmem:[%s2052_s4 + $0xc8] sm:$0xff]  ;;  %v442_v7 = vld [vmem:[%s2052_s4 + $0xd8] sm:$0xff]  ;;  %v441_v10 = vld [vmem:[%s2052_s4 + $0xd0] sm:$0xff] }
  0x30   :  { %v1037_v8 = vpack.c.bf16 %v442_v7, %v440_v6  ;;  %v446_v13 = vld [vmem:[%s2052_s4 + $0xf8] sm:$0xff]  ;;  %v445_v16 = vld [vmem:[%s2052_s4 + $0xf0] sm:$0xff]  ;;  %v468_v49 = vld [vmem:[%s2052_s4 + $0x1a8] sm:$0xff] }
  0x31   :  { %1020 = vmatpush1.bf16.msra.mxu0 %v1019_v45  ;;  %v450_v19 = vld [vmem:[%s2052_s4 + $0x118] sm:$0xff]  ;;  %v449_v22 = vld [vmem:[%s2052_s4 + $0x110] sm:$0xff]  ;;  %v463_v45 = vld [vmem:[%s2052_s4 + $0x180] sm:$0xff] }
  0x32   :  { %996 = vmatpush1.bf16.msra.mxu1 %v995_v11  ;;  %1022 = vmatprep.subr.bf16.mxu0 %v1021_v48  ;;  %v1039_v11 = vpack.c.bf16 %v441_v10, %v439_v9  ;;  %v454_v25 = vld [vmem:[%s2052_s4 + $0x138] sm:$0xff]  ;;  %v453_v28 = vld [vmem:[%s2052_s4 + $0x130] sm:$0xff]  ;;  %v336_v48 = vlaneseq  ;;  %v467_v52 = vld [vmem:[%s2052_s4 + $0x1a0] sm:$0xff] }
  0x33   :  { %998 = vmatprep.subr.bf16.mxu1 %v997_v12  ;;  %v444_v12 = vld [vmem:[%s2052_s4 + $0xe8] sm:$0xff]  ;;  %v458_v31 = vld [vmem:[%s2052_s4 + $0x158] sm:$0xff]  ;;  %v457_v34 = vld [vmem:[%s2052_s4 + $0x150] sm:$0xff] }
  0x34   :  { %v1041_v14 = vpack.c.bf16 %v446_v13, %v444_v12  ;;  %v462_v37 = vld [vmem:[%s2052_s4 + $0x178] sm:$0xff]  ;;  %v461_v40 = vld [vmem:[%s2052_s4 + $0x170] sm:$0xff]  ;;  %v1650_v58 = vld [vmem:[%s2051_s3] sm:$0xf] }
  0x35   :  { %1024 = vmatpush1.bf16.msra.mxu0 %v1023_v51  ;;  %v1057_v38 = vpack.c.bf16 %v462_v37, %v460_v36  ;;  %v1059_v41 = vpack.c.bf16 %v461_v40, %v459_v39  ;;  %v466_v43 = vld [vmem:[%s2052_s4 + $0x198] sm:$0xff]  ;;  %v465_v46 = vld [vmem:[%s2052_s4 + $0x190] sm:$0xff]  ;;  %v476_v0 = vld [vmem:[%s2052_s4 + $0x1e8] sm:$0xff] }
  0x36   :  { %1000 = vmatpush1.bf16.msra.mxu1 %v999_v17  ;;  %1026 = vmatprep.subr.bf16.mxu0 %v1025_v54  ;;  %v1043_v17 = vpack.c.bf16 %v445_v16, %v443_v15  ;;  %v1061_v44 = vpack.c.bf16 %v466_v43, %v464_v42  ;;  %v1063_v47 = vpack.c.bf16 %v465_v46, %v463_v45  ;;  %v470_v50 = vld [vmem:[%s2052_s4 + $0x1b8] sm:$0xff]  ;;  %v469_v53 = vld [vmem:[%s2052_s4 + $0x1b0] sm:$0xff]  ;;  %v475_v4 = vld [vmem:[%s2052_s4 + $0x1e0] sm:$0xff] }
  0x37   :  { %1002 = vmatprep.subr.bf16.mxu1 %v1001_v18  ;;  %v448_v18 = vld [vmem:[%s2052_s4 + $0x108] sm:$0xff]  ;;  %v1065_v51 = vpack.c.bf16 %v470_v50, %v468_v49  ;;  %v1067_v54 = vpack.c.bf16 %v469_v53, %v467_v52  ;;  %v473_v61 = vld [vmem:[%s2052_s4 + $0x1d0] sm:$0xff]  ;;  %v478_v1 = vld [vmem:[%s2052_s4 + $0x1f8] sm:$0xff] }
  0x38   :  { %v1045_v20 = vpack.c.bf16 %v450_v19, %v448_v18  ;;  %v1073_v3 = vpack.c.bf16 %v478_v1, %v476_v0  ;;  %v480_v7 = vld [vmem:[%s2052_s4 + $0x208] sm:$0xff] }
  0x3a   :  { %1004 = vmatpush1.bf16.msra.mxu1 %v1003_v23  ;;  %v1047_v23 = vpack.c.bf16 %v449_v22, %v447_v21 }
  0x3b   :  { %1006 = vmatprep.subr.bf16.mxu1 %v1005_v24  ;;  %v452_v24 = vld [vmem:[%s2052_s4 + $0x128] sm:$0xff] }
  0x3c   :  { %v1049_v26 = vpack.c.bf16 %v454_v25, %v452_v24 }
  0x3e   :  { %1008 = vmatpush1.bf16.msra.mxu1 %v1007_v29  ;;  %v1051_v29 = vpack.c.bf16 %v453_v28, %v451_v27 }
  0x3f   :  { %1010 = vmatprep.subr.bf16.mxu1 %v1009_v30  ;;  %v456_v30 = vld [vmem:[%s2052_s4 + $0x148] sm:$0xff] }
  0x40   :  { %v1053_v32 = vpack.c.bf16 %v458_v31, %v456_v30 }
  0x42   :  { %1012 = vmatpush1.bf16.msra.mxu1 %v1011_v33  ;;  %v455_v33 = vld [vmem:[%s2052_s4 + $0x140] sm:$0xff] }
  0x43   :  { %v1055_v35 = vpack.c.bf16 %v457_v34, %v455_v33 }
  0x45   :  { %237 = vmatmul.mubr.f32.vlgmr.msra.gmra.mrb[2].mxu1 %v36_v56  ;;  %v429_v56 = vld [vmem:[%s2052_s4 + $0x70] sm:$0xff] }
  0x46   :  { %v1027_v57 = vpack.c.bf16 %v429_v56, %v427_v55  ;;  %v1639_v55 = vshrl.u32 %v336_v48, 7  ;;  %v472_v56 = vld [vmem:[%s2052_s4 + $0x1c8] sm:$0xff] }
  0x48   :  { %1028 = vmatpush1.bf16.msra.mxu0 %v1027_v57  ;;  %v474_v57 = vld [vmem:[%s2052_s4 + $0x1d8] sm:$0xff] }
  0x49   :  { %1030 = vmatprep.subr.bf16.mxu0 %v1029_v60  ;;  %v1069_v59 = vpack.c.bf16 %v474_v57, %v472_v56  ;;  %v471_v60 = vld [vmem:[%s2052_s4 + $0x1c0] sm:$0xff] }
  0x4a   :  { %v1071_v62 = vpack.c.bf16 %v473_v61, %v471_v60 }
  0x4c   :  { %1032 = vmatpush1.bf16.msra.mxu0 %v1031_v63  ;;  %v368_v63 = vsub.s32 2, %v1639_v55 }
  0x4d   :  { %1034 = vmatprep.subr.bf16.mxu0 %v1033_v2 }
  0x4e   :  { %v1668_v2 = vrot.slane %v1650_v58, %v368_v63 }
  0x50   :  { %1036 = vmatpush1.bf16.msra.mxu0 %v1035_v5  ;;  %v477_v5 = vld [vmem:[%s2052_s4 + $0x1f0] sm:$0xff] }
  0x51   :  { %1038 = vmatprep.subr.bf16.mxu0 %v1037_v8  ;;  %v1075_v6 = vpack.c.bf16 %v477_v5, %v475_v4  ;;  %v482_v8 = vld [vmem:[%s2052_s4 + $0x218] sm:$0xff] }
  0x52   :  { %v1077_v9 = vpack.c.bf16 %v482_v8, %v480_v7 }
  0x54   :  { %1040 = vmatpush1.bf16.msra.mxu0 %v1039_v11 }
  0x55   :  { %1042 = vmatprep.subr.bf16.mxu0 %v1041_v14 }
  0x58   :  { %1044 = vmatpush1.bf16.msra.mxu0 %v1043_v17 }
  0x59   :  { %1046 = vmatprep.subr.bf16.mxu0 %v1045_v20 }
  0x5c   :  { %1048 = vmatpush1.bf16.msra.mxu0 %v1047_v23 }
  0x5d   :  { %1050 = vmatprep.subr.bf16.mxu0 %v1049_v26 }
  0x60   :  { %1052 = vmatpush1.bf16.msra.mxu0 %v1051_v29 }
  0x61   :  { %1054 = vmatprep.subr.bf16.mxu0 %v1053_v32 }
  0x64   :  { %1056 = vmatpush1.bf16.msra.mxu0 %v1055_v35 }
  0x65   :  { %1058 = vmatprep.subr.bf16.mxu0 %v1057_v38 }
  0x68   :  { %1060 = vmatpush1.bf16.msra.mxu0 %v1059_v41 }
  0x69   :  { %1062 = vmatprep.subr.bf16.mxu0 %v1061_v44 }
  0x6c   :  { %1064 = vmatpush1.bf16.msra.mxu0 %v1063_v47 }
  0x6d   :  { %1066 = vmatprep.subr.bf16.mxu0 %v1065_v51 }
  0x70   :  { %1068 = vmatpush1.bf16.msra.mxu0 %v1067_v54 }
  0x71   :  { %1070 = vmatprep.subr.bf16.mxu0 %v1069_v59 }
  0x74   :  { %1072 = vmatpush1.bf16.msra.mxu0 %v1071_v62 }
  0x75   :  { %1074 = vmatprep.subr.bf16.mxu0 %v1073_v3 }
  0x78   :  { %1076 = vmatpush1.bf16.msra.mxu0 %v1075_v6 }
  0x79   :  { %1078 = vmatprep.subr.bf16.mxu0 %v1077_v9 }
  0xf8   :  { %v167_v10 = vpop.f32.mrb[0].mxu1 }
  0xf9   :  { %v246_v11 = vsel %vm245_vm0, %v167_v10, 0.0  ;;  %v169_v12 = vpop.f32.mrb[1].mxu1 }
  0xfa   :  { %v247_v13 = vrot.slane %v246_v11, 4  ;;  %v253_v14 = vsel %vm245_vm0, %v169_v12, 0.0 }
  0xfb   :  { %v254_v15 = vrot.slane %v253_v14, 4 }
  0xfc   :  { %v248_v16 = vadd.f32 %v247_v13, %v246_v11 }
  0xfd   :  { %v255_v17 = vadd.f32 %v254_v15, %v253_v14 }
  0xfe   :  { %v249_v18 = vrot.slane %v248_v16, 2 }
  0xff   :  { %v256_v19 = vrot.slane %v255_v17, 2 }
 0x100   :  { %v250_v20 = vadd.f32 %v249_v18, %v248_v16 }
 0x101   :  { %v257_v21 = vadd.f32 %v256_v19, %v255_v17 }
 0x102   :  { %v251_v22 = vrot.slane %v250_v20, 1 }
 0x103   :  { %v258_v23 = vrot.slane %v257_v21, 1 }
 0x104   :  { %v252_v24 = vadd.f32 %v251_v22, %v250_v20 }
 0x105   :  { %v259_v25 = vadd.f32 %v258_v23, %v257_v21 }
 0x106   :  { %v275_v26 = vmul.f32 0.5, %v252_v24 }
 0x107   :  { %v276_v27 = vmul.f32 0.5, %v259_v25 }
 0x108   :  { %v1684_v28 = vsub.f32 %v167_v10, %v275_v26 }
 0x109   :  { %v1686_v29 = vsub.f32 %v169_v12, %v276_v27 }
 0x10a   :  { %v283_v30 = vmul.f32 %v1684_v28, %v1684_v28 }
 0x10b   :  { %v284_v31 = vmul.f32 %v1686_v29, %v1686_v29 }
 0x10c   :  { %v287_v32 = vsel %vm245_vm0, %v283_v30, 0.0 }
 0x10d   :  { %v288_v33 = vrot.slane %v287_v32, 4  ;;  %v294_v34 = vsel %vm245_vm0, %v284_v31, 0.0 }
 0x10e   :  { %v295_v35 = vrot.slane %v294_v34, 4 }
 0x10f   :  { %v289_v36 = vadd.f32 %v288_v33, %v287_v32 }
 0x110   :  { %v296_v37 = vadd.f32 %v295_v35, %v294_v34  ;;  %v1217_v35 = vmov 1966171168  }
 0x111   :  { %v290_v38 = vrot.slane %v289_v36, 2 }
 0x112   :  { %v297_v39 = vrot.slane %v296_v37, 2 }
 0x113   :  { %v291_v40 = vadd.f32 %v290_v38, %v289_v36  ;;  %v334_v36 = vunpack.c.l.s4 %v1217_v35  ;;  %v502_v35 = vld [vmem:[%s2052_s4 + $0x2b8] sm:$0xff] }
 0x114   :  { %v298_v41 = vadd.f32 %v297_v39, %v296_v37 }
 0x115   :  { %v292_v42 = vrot.slane %v291_v40, 1  ;;  %v335_v37 = vunpack.c.0.s8 %v334_v36 }
 0x116   :  { %v299_v43 = vrot.slane %v298_v41, 1 }
 0x117   :  { %v293_v44 = vadd.f32 %v292_v42, %v291_v40  ;;  %v1699_v39 = vsub.s32 %v335_v37, %v1639_v55 }
 0x118   :  { %v300_v45 = vadd.f32 %v299_v43, %v298_v41  ;;  %v238_v46 = vpop.f32.mrb[2].mxu1 }
 0x119   :  { %v315_v47 = vmul.f32 0.5, %v293_v44  ;;  %v260_v48 = vsel %vm245_vm0, %v238_v46, 0.0  ;;  %v240_v49 = vpop.f32.mrb[3].mxu1 }
 0x11a   :  { %v316_v50 = vmul.f32 0.5, %v300_v45  ;;  %v261_v51 = vrot.slane %v260_v48, 4  ;;  %v267_v52 = vsel %vm245_vm0, %v240_v49, 0.0  ;;  %v243_v45 = vld [vmem:[%s2050_s2] sm:$0xf] }
 0x11b   :  { %v319_v53 = vadd.f32 1e-05, %v315_v47  ;;  %v268_v54 = vrot.slane %v267_v52, 4  ;;  %v372_v47 = vsub.s32 3, %v1639_v55 }
 0x11c   :  { %v320_v56 = vadd.f32 1e-05, %v316_v50  ;;  %v262_v57 = vadd.f32 %v261_v51, %v260_v48  ;;  %v1709_v48 = vsub.s32 1, %v1639_v55 }
 0x11d   :  { %1180 = vrsqrt.f32 %v319_v53  ;;  %v269_v59 = vadd.f32 %v268_v54, %v267_v52  ;;  %v398_v51 = vrot.slane %v1650_v58, %v372_v47 }
 0x11e   :  { %1182 = vrsqrt.f32 %v320_v56  ;;  %v263_v60 = vrot.slane %v262_v57, 2  ;;  %v390_v52 = vrot.slane %v1650_v58, %v1709_v48 }
 0x11f   :  { %v270_v61 = vrot.slane %v269_v59, 2 }
 0x120   :  { %v264_v62 = vadd.f32 %v263_v60, %v262_v57 }
 0x121   :  { %v271_v0 = vadd.f32 %v270_v61, %v269_v59 }
 0x122   :  { %v265_v1 = vrot.slane %v264_v62, 1 }
 0x123   :  { %v272_v3 = vrot.slane %v271_v0, 1 }
 0x124   :  { %v266_v4 = vadd.f32 %v265_v1, %v264_v62 }
 0x125   :  { %v273_v5 = vadd.f32 %v272_v3, %v271_v0 }
 0x126   :  { %v277_v6 = vmul.f32 0.5, %v266_v4 }
 0x127   :  { %v1181_v7 = vpop.eup %1180  ;;  %v278_v8 = vmul.f32 0.5, %v273_v5 }
 0x128   :  { %v1183_v9 = vpop.eup %1182  ;;  %v281_v10 = vsub.f32 %v238_v46, %v277_v6 }
 0x129   :  { %v282_v11 = vsub.f32 %v240_v49, %v278_v8  ;;  %v331_v12 = vcombine.low %v1181_v7, %v1183_v9  ;;  %v1712_v49 = vsub.s32 0, %v1639_v55  ;;  %v481_v55 = vld [vmem:[%s2052_s4 + $0x210] sm:$0xff] }
 0x12a   :  { %v285_v13 = vmul.f32 %v281_v10, %v281_v10 }
 0x12b   :  { %v286_v14 = vmul.f32 %v282_v11, %v282_v11  ;;  %v339_v42 = vrot.slane %v331_v12, %v1699_v39  ;;  %v386_v53 = vrot.slane %v1650_v58, %v1712_v49  ;;  %v479_v58 = vld [vmem:[%s2052_s4 + $0x200] sm:$0xff]  ;;  %v485_v12 = vld [vmem:[%s2052_s4 + $0x230] sm:$0xff] }
 0x12c   :  { %v301_v15 = vsel %vm245_vm0, %v285_v13, 0.0 }
 0x12d   :  { %v302_v16 = vrot.slane %v301_v15, 4  ;;  %v308_v17 = vsel %vm245_vm0, %v286_v14, 0.0  ;;  %v488_v14 = vld [vmem:[%s2052_s4 + $0x248] sm:$0xff] }
 0x12e   :  { %v309_v18 = vrot.slane %v308_v17, 4 }
 0x12f   :  { %v303_v19 = vadd.f32 %v302_v16, %v301_v15  ;;  %v490_v15 = vld [vmem:[%s2052_s4 + $0x258] sm:$0xff] }
 0x130   :  { %v310_v20 = vadd.f32 %v309_v18, %v308_v17  ;;  %v1085_v17 = vpack.c.bf16 %v490_v15, %v488_v14  ;;  %v487_v18 = vld [vmem:[%s2052_s4 + $0x240] sm:$0xff]  ;;  %v528_v14 = vld [vmem:[%s2052_s4 + $0x388] sm:$0xff]  ;;  %v530_v15 = vld [vmem:[%s2052_s4 + $0x398] sm:$0xff] }
 0x131   :  { %v304_v21 = vrot.slane %v303_v19, 2 }
 0x132   :  { %v311_v22 = vrot.slane %v310_v20, 2 }
 0x133   :  { %v305_v23 = vadd.f32 %v304_v21, %v303_v19  ;;  %v489_v19 = vld [vmem:[%s2052_s4 + $0x250] sm:$0xff]  ;;  %v494_v21 = vld [vmem:[%s2052_s4 + $0x278] sm:$0xff] }
 0x134   :  { %v312_v24 = vadd.f32 %v311_v22, %v310_v20  ;;  %v492_v20 = vld [vmem:[%s2052_s4 + $0x268] sm:$0xff]  ;;  %v1087_v22 = vpack.c.bf16 %v489_v19, %v487_v18  ;;  %v527_v18 = vld [vmem:[%s2052_s4 + $0x380] sm:$0xff]  ;;  %v529_v19 = vld [vmem:[%s2052_s4 + $0x390] sm:$0xff] }
 0x135   :  { %v306_v25 = vrot.slane %v305_v23, 1 }
 0x136   :  { %v313_v26 = vrot.slane %v312_v24, 1 }
 0x137   :  { %v307_v27 = vadd.f32 %v306_v25, %v305_v23  ;;  %v1089_v23 = vpack.c.bf16 %v494_v21, %v492_v20  ;;  %v493_v25 = vld [vmem:[%s2052_s4 + $0x270] sm:$0xff]  ;;  %v532_v20 = vld [vmem:[%s2052_s4 + $0x3a8] sm:$0xff]  ;;  %v534_v21 = vld [vmem:[%s2052_s4 + $0x3b8] sm:$0xff] }
 0x138   :  { %v314_v30 = vadd.f32 %v313_v26, %v312_v24  ;;  %v491_v24 = vld [vmem:[%s2052_s4 + $0x260] sm:$0xff]  ;;  %v496_v26 = vld [vmem:[%s2052_s4 + $0x288] sm:$0xff] }
 0x139   :  { %v317_v31 = vmul.f32 0.5, %v307_v27  ;;  %v498_v27 = vld [vmem:[%s2052_s4 + $0x298] sm:$0xff] }
 0x13a   :  { %v318_v32 = vmul.f32 0.5, %v314_v30  ;;  %v1091_v30 = vpack.c.bf16 %v493_v25, %v491_v24  ;;  %v531_v24 = vld [vmem:[%s2052_s4 + $0x3a0] sm:$0xff]  ;;  %v533_v25 = vld [vmem:[%s2052_s4 + $0x3b0] sm:$0xff] }
 0x13b   :  { %v321_v33 = vadd.f32 1e-05, %v317_v31  ;;  %v1093_v31 = vpack.c.bf16 %v498_v27, %v496_v26  ;;  %v536_v26 = vld [vmem:[%s2052_s4 + $0x3c8] sm:$0xff]  ;;  %v538_v27 = vld [vmem:[%s2052_s4 + $0x3d8] sm:$0xff] }
 0x13c   :  { %v322_v34 = vadd.f32 1e-05, %v318_v32  ;;  %v495_v32 = vld [vmem:[%s2052_s4 + $0x280] sm:$0xff] }
 0x13d   :  { %1184 = vrsqrt.f32 %v321_v33  ;;  %v497_v33 = vld [vmem:[%s2052_s4 + $0x290] sm:$0xff] }
 0x13e   :  { %1186 = vrsqrt.f32 %v322_v34  ;;  %v500_v34 = vld [vmem:[%s2052_s4 + $0x2a8] sm:$0xff]  ;;  %v1095_v36 = vpack.c.bf16 %v497_v33, %v495_v32  ;;  %v535_v32 = vld [vmem:[%s2052_s4 + $0x3c0] sm:$0xff]  ;;  %v537_v33 = vld [vmem:[%s2052_s4 + $0x3d0] sm:$0xff] }
 0x13f   :  { %v1097_v37 = vpack.c.bf16 %v502_v35, %v500_v34  ;;  %v540_v34 = vld [vmem:[%s2052_s4 + $0x3e8] sm:$0xff]  ;;  %v542_v35 = vld [vmem:[%s2052_s4 + $0x3f8] sm:$0xff] }
 0x147   :  { %v1185_v38 = vpop.eup %1184 }
 0x148   :  { %v1187_v40 = vpop.eup %1186 }
 0x149   :  { %v332_v41 = vcombine.low %v1185_v38, %v1187_v40  ;;  %v499_v38 = vld [vmem:[%s2052_s4 + $0x2a0] sm:$0xff]  ;;  %v501_v40 = vld [vmem:[%s2052_s4 + $0x2b0] sm:$0xff] }
 0x14b   :  { %v346_v43 = vrot.slane %v332_v41, %v1699_v39  ;;  %v504_v41 = vld [vmem:[%s2052_s4 + $0x2c8] sm:$0xff] }
 0x14d   :  { %v347_v44 = vcombine.low %v339_v42, %v346_v43  ;;  %v506_v42 = vld [vmem:[%s2052_s4 + $0x2d8] sm:$0xff]  ;;  %v1099_v43 = vpack.c.bf16 %v501_v40, %v499_v38  ;;  %v539_v38 = vld [vmem:[%s2052_s4 + $0x3e0] sm:$0xff]  ;;  %v541_v40 = vld [vmem:[%s2052_s4 + $0x3f0] sm:$0xff] }
 0x14f   :  { %v354_v46 = vrot.slane %v347_v44, %v1699_v39  ;;  %v1101_v44 = vpack.c.bf16 %v506_v42, %v504_v41  ;;  %v1139_v41 = vpack.c.bf16 %v541_v40, %v539_v38 }
 0x151   :  { %v356_v50 = vmul.f32 %v354_v46, %v243_v45  ;;  %v503_v45 = vld [vmem:[%s2052_s4 + $0x2c0] sm:$0xff]  ;;  %v505_v46 = vld [vmem:[%s2052_s4 + $0x2d0] sm:$0xff] }
 0x153   :  { %v373_v54 = vrot.slane %v356_v50, %v372_v47  ;;  %v365_v56 = vrot.slane %v356_v50, %v1709_v48  ;;  %v361_v57 = vrot.slane %v356_v50, %v1712_v49  ;;  %v369_v59 = vrot.slane %v356_v50, %v368_v63  ;;  %v484_v63 = vld [vmem:[%s2052_s4 + $0x228] sm:$0xff]  ;;  %v510_v50 = vld [vmem:[%s2052_s4 + $0x2f8] sm:$0xff] }
 0x154   :  { %v508_v47 = vld [vmem:[%s2052_s4 + $0x2e8] sm:$0xff] }
 0x155   :  { %v381_v60 = vmul.f32 %v373_v54, %v282_v11  ;;  %v379_v61 = vmul.f32 %v365_v56, %v1686_v29  ;;  %v378_v62 = vmul.f32 %v361_v57, %v1684_v28  ;;  %v380_v0 = vmul.f32 %v369_v59, %v281_v10  ;;  %v486_v28 = vld [vmem:[%s2052_s4 + $0x238] sm:$0xff]  ;;  %v483_v11 = vld [vmem:[%s2052_s4 + $0x220] sm:$0xff]  ;;  %v509_v54 = vld [vmem:[%s2052_s4 + $0x2f0] sm:$0xff] }
 0x156   :  { %v1079_v10 = vpack.c.bf16 %v481_v55, %v479_v58  ;;  %v1083_v16 = vpack.c.bf16 %v485_v12, %v483_v11  ;;  %v512_v56 = vld [vmem:[%s2052_s4 + $0x308] sm:$0xff]  ;;  %v514_v57 = vld [vmem:[%s2052_s4 + $0x318] sm:$0xff]  ;;  %v515_v58 = vld [vmem:[%s2052_s4 + $0x320] sm:$0xff] }
 0x157   :  { %v406_v1 = vadd.f32 %v398_v51, %v381_v60  ;;  %v404_v3 = vadd.f32 %v390_v52, %v379_v61  ;;  %v403_v4 = vadd.f32 %v386_v53, %v378_v62  ;;  %v1729_v5 = vadd.f32 %v1668_v2, %v380_v0  ;;  %v507_v53 = vld [vmem:[%s2052_s4 + $0x2e0] sm:$0xff]  ;;  %v513_v62 = vld [vmem:[%s2052_s4 + $0x310] sm:$0xff]  ;;  %v516_v0 = vld [vmem:[%s2052_s4 + $0x328] sm:$0xff] }
 0x158   :  { %v1081_v2 = vpack.c.bf16 %v486_v28, %v484_v63  ;;  %v1103_v51 = vpack.c.bf16 %v505_v46, %v503_v45  ;;  %v1105_v52 = vpack.c.bf16 %v510_v50, %v508_v47  ;;  %v1107_v59 = vpack.c.bf16 %v509_v54, %v507_v53  ;;  %v511_v61 = vld [vmem:[%s2052_s4 + $0x300] sm:$0xff]  ;;  %v517_v55 = vld [vmem:[%s2052_s4 + $0x330] sm:$0xff]  ;;  %v520_v63 = vld [vmem:[%s2052_s4 + $0x348] sm:$0xff] }
 0x159   :  { %v408_v29 = vmul.f32 0.2, %v404_v3  ;;  %v407_v6 = vmul.f32 0.2, %v403_v4  ;;  %v410_v7 = vmul.f32 0.2, %v406_v1  ;;  %v1109_v60 = vpack.c.bf16 %v514_v57, %v512_v56 }
 0x15a   :  { %v522_v28 = vld [vmem:[%s2052_s4 + $0x358] sm:$0xff]  ;;  %v523_v12 = vld [vmem:[%s2052_s4 + $0x360] sm:$0xff]  ;;  %v409_v42 = vmul.f32 0.2, %v1729_v5  ;;  %v805_v45 = vld [vmem:[%s2056_s8 + $0x88] sm:$0xff] }
 0x15b   :  { %v412_v8 = vmax.f32 %v404_v3, %v408_v29  ;;  %v411_v9 = vmax.f32 %v403_v4, %v407_v6  ;;  %v414_v13 = vmax.f32 %v406_v1, %v410_v7  ;;  %v518_v1 = vld [vmem:[%s2052_s4 + $0x338] sm:$0xff]  ;;  %v1111_v3 = vpack.c.bf16 %v513_v62, %v511_v61  ;;  %v519_v7 = vld [vmem:[%s2052_s4 + $0x340] sm:$0xff]  ;;  %v789_v50 = vld [vmem:[%s2056_s8 + $0x8] sm:$0xff] }
 0x15c   :  { %v1113_v4 = vpack.c.bf16 %v518_v1, %v516_v0  ;;  %v1115_v29 = vpack.c.bf16 %v517_v55, %v515_v58  ;;  %v1117_v6 = vpack.c.bf16 %v522_v28, %v520_v63  ;;  %v788_v47 = vld [vmem:[%s2056_s8] sm:$0xff]  ;;  %v790_v54 = vld [vmem:[%s2056_s8 + $0x10] sm:$0xff]  ;;  %v791_v56 = vld [vmem:[%s2056_s8 + $0x18] sm:$0xff] }
 0x15d   :  { %619 = vmatprep.mubr.f32.mxu0 %v412_v8  ;;  %v521_v8 = vld [vmem:[%s2052_s4 + $0x350] sm:$0xff]  ;;  %v1147_v57 = vpack.c.bf16 %v791_v56, %v790_v54  ;;  %v792_v62 = vld [vmem:[%s2056_s8 + $0x20] sm:$0xff]  ;;  %v793_v0 = vld [vmem:[%s2056_s8 + $0x28] sm:$0xff] }
 0x15e   :  { %620 = vmatmul.mubr.f32.vlgmr.msra.gmra.mrb[0].mxu0 %v411_v9  ;;  %v524_v9 = vld [vmem:[%s2052_s4 + $0x368] sm:$0xff]  ;;  %v1151_v1 = vpack.c.bf16 %v793_v0, %v792_v62  ;;  %v794_v55 = vld [vmem:[%s2056_s8 + $0x30] sm:$0xff]  ;;  %v795_v63 = vld [vmem:[%s2056_s8 + $0x38] sm:$0xff] }
 0x15f   :  { %1080 = vmatpush1.bf16.msra.mxu0 %v1079_v10  ;;  %690 = vmatprep.mubr.f32.mxu0 %v414_v13  ;;  %v526_v10 = vld [vmem:[%s2052_s4 + $0x378] sm:$0xff]  ;;  %v525_v13 = vld [vmem:[%s2052_s4 + $0x370] sm:$0xff]  ;;  %v1155_v28 = vpack.c.bf16 %v795_v63, %v794_v55 }
 0x160   :  { %1082 = vmatprep.subr.bf16.mxu0 %v1081_v2  ;;  %v1119_v2 = vpack.c.bf16 %v521_v8, %v519_v7  ;;  %v1121_v11 = vpack.c.bf16 %v526_v10, %v524_v9  ;;  %v796_v8 = vld [vmem:[%s2056_s8 + $0x40] sm:$0xff]  ;;  %v797_v9 = vld [vmem:[%s2056_s8 + $0x48] sm:$0xff] }
 0x161   :  { %v1159_v10 = vpack.c.bf16 %v797_v9, %v796_v8 }
 0x163   :  { %1084 = vmatpush1.bf16.msra.mxu0 %v1083_v16  ;;  %v1123_v16 = vpack.c.bf16 %v525_v13, %v523_v12  ;;  %v798_v13 = vld [vmem:[%s2056_s8 + $0x50] sm:$0xff] }
 0x164   :  { %1086 = vmatprep.subr.bf16.mxu0 %v1085_v17  ;;  %v1125_v17 = vpack.c.bf16 %v530_v15, %v528_v14  ;;  %v799_v14 = vld [vmem:[%s2056_s8 + $0x58] sm:$0xff] }
 0x165   :  { %v1163_v15 = vpack.c.bf16 %v799_v14, %v798_v13 }
 0x167   :  { %1088 = vmatpush1.bf16.msra.mxu0 %v1087_v22  ;;  %v1127_v22 = vpack.c.bf16 %v529_v19, %v527_v18  ;;  %v800_v19 = vld [vmem:[%s2056_s8 + $0x60] sm:$0xff] }
 0x168   :  { %1090 = vmatprep.subr.bf16.mxu0 %v1089_v23  ;;  %v1129_v23 = vpack.c.bf16 %v534_v21, %v532_v20  ;;  %v801_v20 = vld [vmem:[%s2056_s8 + $0x68] sm:$0xff] }
 0x169   :  { %v1167_v21 = vpack.c.bf16 %v801_v20, %v800_v19 }
 0x16b   :  { %1092 = vmatpush1.bf16.msra.mxu0 %v1091_v30  ;;  %v1131_v30 = vpack.c.bf16 %v533_v25, %v531_v24  ;;  %v802_v24 = vld [vmem:[%s2056_s8 + $0x70] sm:$0xff] }
 0x16c   :  { %1094 = vmatprep.subr.bf16.mxu0 %v1093_v31  ;;  %v1133_v31 = vpack.c.bf16 %v538_v27, %v536_v26  ;;  %v803_v26 = vld [vmem:[%s2056_s8 + $0x78] sm:$0xff] }
 0x16d   :  { %v1171_v27 = vpack.c.bf16 %v803_v26, %v802_v24 }
 0x16f   :  { %1096 = vmatpush1.bf16.msra.mxu0 %v1095_v36  ;;  %v1135_v36 = vpack.c.bf16 %v537_v33, %v535_v32 }
 0x170   :  { %1098 = vmatprep.subr.bf16.mxu0 %v1097_v37  ;;  %v1137_v37 = vpack.c.bf16 %v542_v35, %v540_v34 }
 0x173   :  { %1100 = vmatpush1.bf16.msra.mxu0 %v1099_v43  ;;  %v413_v43 = vmax.f32 %v1729_v5, %v409_v42  ;;  %v806_v5 = vld [vmem:[%s2056_s8 + $0x90] sm:$0xff] }
 0x174   :  { %1102 = vmatprep.subr.bf16.mxu0 %v1101_v44  ;;  %v804_v44 = vld [vmem:[%s2056_s8 + $0x80] sm:$0xff] }
 0x175   :  { %v1141_v46 = vpack.c.bf16 %v805_v45, %v804_v44 }
 0x177   :  { %1104 = vmatpush1.bf16.msra.mxu0 %v1103_v51  ;;  %v1143_v51 = vpack.c.bf16 %v789_v50, %v788_v47  ;;  %1142 = vmatprep.subr.bf16.mxu1 %v1141_v46 }
 0x178   :  { %1106 = vmatprep.subr.bf16.mxu0 %v1105_v52  ;;  %v807_v52 = vld [vmem:[%s2056_s8 + $0x98] sm:$0xff] }
 0x179   :  { %1144 = vmatpush3.bf16.msra.mxu1 %v1143_v51  ;;  %v1145_v53 = vpack.c.bf16 %v807_v52, %v806_v5 }
 0x17b   :  { %1108 = vmatpush1.bf16.msra.mxu0 %v1107_v59  ;;  %1146 = vmatprep.subr.bf16.mxu1 %v1145_v53  ;;  %v808_v59 = vld [vmem:[%s2056_s8 + $0xa0] sm:$0xff] }
 0x17c   :  { %1110 = vmatprep.subr.bf16.mxu0 %v1109_v60  ;;  %v809_v60 = vld [vmem:[%s2056_s8 + $0xa8] sm:$0xff] }
 0x17d   :  { %1148 = vmatpush3.bf16.msra.mxu1 %v1147_v57  ;;  %v1149_v61 = vpack.c.bf16 %v809_v60, %v808_v59 }
 0x17f   :  { %1112 = vmatpush1.bf16.msra.mxu0 %v1111_v3  ;;  %1150 = vmatprep.subr.bf16.mxu1 %v1149_v61  ;;  %v810_v3 = vld [vmem:[%s2056_s8 + $0xb0] sm:$0xff] }
 0x180   :  { %1114 = vmatprep.subr.bf16.mxu0 %v1113_v4  ;;  %v811_v4 = vld [vmem:[%s2056_s8 + $0xb8] sm:$0xff] }
 0x181   :  { %1152 = vmatpush3.bf16.msra.mxu1 %v1151_v1  ;;  %v1153_v58 = vpack.c.bf16 %v811_v4, %v810_v3 }
 0x183   :  { %1116 = vmatpush1.bf16.msra.mxu0 %v1115_v29  ;;  %1154 = vmatprep.subr.bf16.mxu1 %v1153_v58  ;;  %v812_v29 = vld [vmem:[%s2056_s8 + $0xc0] sm:$0xff] }
 0x184   :  { %1118 = vmatprep.subr.bf16.mxu0 %v1117_v6  ;;  %v813_v6 = vld [vmem:[%s2056_s8 + $0xc8] sm:$0xff] }
 0x185   :  { %1156 = vmatpush3.bf16.msra.mxu1 %v1155_v28  ;;  %v1157_v7 = vpack.c.bf16 %v813_v6, %v812_v29 }
 0x187   :  { %1120 = vmatpush1.bf16.msra.mxu0 %v1119_v2  ;;  %1158 = vmatprep.subr.bf16.mxu1 %v1157_v7  ;;  %v814_v2 = vld [vmem:[%s2056_s8 + $0xd0] sm:$0xff] }
 0x188   :  { %1122 = vmatprep.subr.bf16.mxu0 %v1121_v11  ;;  %v815_v11 = vld [vmem:[%s2056_s8 + $0xd8] sm:$0xff] }
 0x189   :  { %1160 = vmatpush3.bf16.msra.mxu1 %v1159_v10  ;;  %v1161_v12 = vpack.c.bf16 %v815_v11, %v814_v2 }
 0x18b   :  { %1124 = vmatpush1.bf16.msra.mxu0 %v1123_v16  ;;  %1162 = vmatprep.subr.bf16.mxu1 %v1161_v12  ;;  %v816_v16 = vld [vmem:[%s2056_s8 + $0xe0] sm:$0xff] }
 0x18c   :  { %1126 = vmatprep.subr.bf16.mxu0 %v1125_v17  ;;  %v817_v17 = vld [vmem:[%s2056_s8 + $0xe8] sm:$0xff] }
 0x18d   :  { %1164 = vmatpush3.bf16.msra.mxu1 %v1163_v15  ;;  %v1165_v18 = vpack.c.bf16 %v817_v17, %v816_v16  ;;  %v697_v16 = vld [vmem:[%s2054_s6] sm:$0x3] }
 0x18f   :  { %1128 = vmatpush1.bf16.msra.mxu0 %v1127_v22  ;;  %v818_v22 = vld [vmem:[%s2056_s8 + $0xf0] sm:$0xff]  ;;  %1166 = vmatprep.subr.bf16.mxu1 %v1165_v18  ;;  %v698_v18 = vld [vmem:[%s2055_s7] sm:$0x3] }
 0x190   :  { %1130 = vmatprep.subr.bf16.mxu0 %v1129_v23  ;;  %v819_v23 = vld [vmem:[%s2056_s8 + $0xf8] sm:$0xff] }
 0x191   :  { %v1169_v25 = vpack.c.bf16 %v819_v23, %v818_v22  ;;  %1168 = vmatpush3.bf16.msra.mxu1 %v1167_v21  ;;  %v775_v22 = vrot.slane %v698_v18, %v1712_v49  ;;  %v779_v23 = vrot.slane %v698_v18, %v1709_v48 }
 0x193   :  { %1132 = vmatpush1.bf16.msra.mxu0 %v1131_v30  ;;  %1170 = vmatprep.subr.bf16.mxu1 %v1169_v25  ;;  %v543_v30 = vld [vmem:[%s2053_s5] sm:$0x3] }
 0x194   :  { %1134 = vmatprep.subr.bf16.mxu0 %v1133_v31  ;;  %v548_v31 = vrot.slane %v543_v30, %v1712_v49  ;;  %v552_v32 = vrot.slane %v543_v30, %v1709_v48 }
 0x195   :  { %1172 = vmatpush3.bf16.msra.mxu1 %v1171_v27 }
 0x197   :  { %1136 = vmatpush1.bf16.msra.mxu0 %v1135_v36 }
 0x198   :  { %1138 = vmatprep.subr.bf16.mxu0 %v1137_v37 }
 0x19b   :  { %1140 = vmatpush1.bf16.msra.mxu0 %v1139_v41 }
 0x19e   :  { %691 = vmatmul.mubr.f32.vlgmr.msra.gmra.mrb[0].mxu0 %v413_v43 }
 0x271   :  { %v692_v33 = vpop.f32.mrb[0].mxu0 }
 0x272   :  { %v1173_v34 = vadd.f32 %v692_v33, %v548_v31  ;;  %v694_v35 = vpop.f32.mrb[1].mxu0 }
 0x273   :  { %v1174_v36 = vadd.f32 %v694_v35, %v552_v32 }
 0x274   :  { %v699_v37 = vsel %vm245_vm0, %v1173_v34, 0.0 }
 0x275   :  { %v700_v38 = vrot.slane %v699_v37, 4  ;;  %v706_v40 = vsel %vm245_vm0, %v1174_v36, 0.0 }
 0x276   :  { %v707_v41 = vrot.slane %v706_v40, 4 }
 0x277   :  { %v701_v42 = vadd.f32 %v700_v38, %v699_v37 }
 0x278   :  { %v708_v43 = vadd.f32 %v707_v41, %v706_v40 }
 0x279   :  { %v702_v44 = vrot.slane %v701_v42, 2 }
 0x27a   :  { %v709_v45 = vrot.slane %v708_v43, 2 }
 0x27b   :  { %v703_v46 = vadd.f32 %v702_v44, %v701_v42 }
 0x27c   :  { %v710_v47 = vadd.f32 %v709_v45, %v708_v43 }
 0x27d   :  { %v704_v50 = vrot.slane %v703_v46, 1 }
 0x27e   :  { %v711_v51 = vrot.slane %v710_v47, 1 }
 0x27f   :  { %v705_v5 = vadd.f32 %v704_v50, %v703_v46 }
 0x280   :  { %v712_v52 = vadd.f32 %v711_v51, %v710_v47 }
 0x281   :  { %v713_v53 = vmul.f32 0.5, %v705_v5 }
 0x282   :  { %v714_v54 = vmul.f32 0.5, %v712_v52 }
 0x283   :  { %v715_v56 = vsub.f32 %v1173_v34, %v713_v53  ;;  %v913_v34 = vld [vmem:[%s2057_s9] ss:$0 sm:$0xff] }
 0x284   :  { %v716_v57 = vsub.f32 %v1174_v36, %v714_v54 }
 0x285   :  { %v717_v59 = vmul.f32 %v715_v56, %v715_v56 }
 0x286   :  { %v718_v60 = vmul.f32 %v716_v57, %v716_v57 }
 0x287   :  { %v719_v61 = vsel %vm245_vm0, %v717_v59, 0.0 }
 0x288   :  { %v720_v62 = vrot.slane %v719_v61, 4  ;;  %v726_v0 = vsel %vm245_vm0, %v718_v60, 0.0 }
 0x289   :  { %v727_v1 = vrot.slane %v726_v0, 4 }
 0x28a   :  { %v721_v3 = vadd.f32 %v720_v62, %v719_v61 }
 0x28b   :  { %v728_v4 = vadd.f32 %v727_v1, %v726_v0 }
 0x28c   :  { %v722_v58 = vrot.slane %v721_v3, 2 }
 0x28d   :  { %v729_v55 = vrot.slane %v728_v4, 2 }
 0x28e   :  { %v723_v63 = vadd.f32 %v722_v58, %v721_v3 }
 0x28f   :  { %v730_v28 = vadd.f32 %v729_v55, %v728_v4 }
 0x290   :  { %v724_v29 = vrot.slane %v723_v63, 1 }
 0x291   :  { %v731_v6 = vrot.slane %v730_v28, 1 }
 0x292   :  { %v725_v7 = vadd.f32 %v724_v29, %v723_v63 }
 0x293   :  { %v732_v8 = vadd.f32 %v731_v6, %v730_v28 }
 0x294   :  { %v733_v9 = vmul.f32 0.5, %v725_v7 }
 0x295   :  { %v734_v10 = vmul.f32 0.5, %v732_v8 }
 0x296   :  { %v735_v2 = vadd.f32 1e-05, %v733_v9 }
 0x297   :  { %v736_v11 = vadd.f32 1e-05, %v734_v10 }
 0x298   :  { %1188 = vrsqrt.f32 %v735_v2 }
 0x299   :  { %1190 = vrsqrt.f32 %v736_v11 }
 0x2a2   :  { %v1189_v12 = vpop.eup %1188 }
 0x2a3   :  { %v1191_v13 = vpop.eup %1190 }
 0x2a4   :  { %v741_v14 = vcombine.low %v1189_v12, %v1191_v13 }
 0x2a6   :  { %v748_v15 = vrot.slane %v741_v14, %v1699_v39 }
 0x2a8   :  { %v755_v17 = vrot.slane %v748_v15, %v1699_v39 }
 0x2aa   :  { %v757_v19 = vmul.f32 %v755_v17, %v697_v16 }
 0x2ac   :  { %v762_v20 = vrot.slane %v757_v19, %v1712_v49  ;;  %v766_v21 = vrot.slane %v757_v19, %v1709_v48 }
 0x2ae   :  { %v770_v24 = vmul.f32 %v766_v21, %v716_v57  ;;  %v769_v25 = vmul.f32 %v762_v20, %v715_v56 }
 0x2b0   :  { %v783_v26 = vadd.f32 %v779_v23, %v770_v24  ;;  %v782_v27 = vadd.f32 %v775_v22, %v769_v25 }
 0x2b2   :  { %v785_v30 = vmul.f32 0.2, %v783_v26  ;;  %v784_v31 = vmul.f32 0.2, %v782_v27 }
 0x2b4   :  { %v787_v39 = vmax.f32 %v783_v26, %v785_v30  ;;  %v786_v32 = vmax.f32 %v782_v27, %v784_v31 }
 0x2b6   :  { %891 = vmatprep.mubr.f32.mxu1 %v787_v39 }
 0x2b7   :  { %892 = vmatmul.mubr.f32.vlgmr.msra.gmra.mrb[4].mxu1 %v786_v32 }
 0x38a   :  { %v946_v33 = vpop.f32.mrb[4].mxu1 }
 0x38b   :  { %v947_v35 = vpop.f32.mrb[5].mxu1 }
 0x38c   :  { %v948_v49 = vadd.f32 %v947_v35, %v946_v33 }
 0x38e   :  { %v894_v48 = vadd.f32 %v948_v49, %v913_v34 }
 0x390   :  { %898 = vst.msk [vmem:[#allocation2] sm:$0x3] %vm897_vm1, %v894_v48 }
 0x391   :  { %1203 = shalt.err (!%p1200_p4)
}
 0x392   :  { %s1204_s24 = scalar_lea.hbm %s2058_s10, 32 }
 0x393   :  { %p1205_p5 = scmp.ne.s32.totalorder %s2058_s10, %s1204_s24  ;;  %p1208_p6 = scmp.lt.u32.totalorder %s1204_s24, %s2058_s10 }
 0x395   :  { %p1210_p7 = pnand %p1208_p6, %p1205_p5 }
 0x397   :  { %1213 = shalt.err (!%p1210_p7)
}
 0x398   :  { %908 = dma.vmem_to_hbm [thread:$0]  %s906_s21, 32, %s2058_s10, [#allocation3]  }
 0x399   :  { %1214 = dma.done.wait [#allocation3], 32  }
 0x39a   :  { %1215 = vsyncadd [#allocation3], 4294967264 }
 0x39b   :  { %912 = vsyncpa [#allocation3], 1 }

</bundles_post_ra>
